<compile_context>
chip_gen: v7x
topology: tpu7x:2x2x1
jax: 0.10.0
libtpu: 0.0.40
codegen_flags: <defaults>
</compile_context>

<pallas_src>
import functools
import math

import jax
import jax.numpy as jnp
import numpy as np
from jax.experimental import pallas as pl
from jax.experimental.pallas import tpu as pltpu


def _round_up(x, m):
    return (x + m - 1) // m * m


def _pad_to(a, shape):
    return jnp.pad(a, [(0, t - s) for s, t in zip(a.shape, shape)])


# ---------------------------------------------------------------------------
# Pallas kernel: one batch item's full token slab of the MLABlock.
# ---------------------------------------------------------------------------
def mla_block_kernel(x_ref, valid_ref, amask_ref, w_qkv_ref, b_qkv_ref,
                     w_proj_ref, b_proj_ref, w_fc1_ref, b_fc1_ref,
                     w_fc2_ref, b_fc2_ref, o_ref,
                     *, num_heads, hdp, d_real, eps=1e-5):
    x = x_ref[0].astype(jnp.float32)          # (N, Dp), padded lanes are zero
    n = x.shape[0]
    cp = num_heads * hdp
    inv_d = 1.0 / d_real                      # LN stats over the REAL dim
    valid = valid_ref[...]                    # (1, Dp) 1.0 on real lanes else 0.0

    def ln_hat(v):
        # gamma/beta are folded into the following matmul weights host-side;
        # only the normalization remains.  Two-pass variance (robust against
        # cancellation); `valid` keeps zero-padded lanes out of the stats.
        mu = jnp.sum(v, axis=-1, keepdims=True) * inv_d
        xc = (v - mu) * valid
        var = jnp.sum(xc * xc, axis=-1, keepdims=True) * inv_d
        return xc * jax.lax.rsqrt(var + eps)

    # ----- attention branch: x + proj(attn(qkv(reduce(norm1(x))))) -----
    # reduce∘qkv pre-composed into a single fused weight; LN1 affine and the
    # softmax scale are also folded host-side.
    xn = ln_hat(x).astype(jnp.bfloat16)
    qkv = jnp.dot(xn, w_qkv_ref[...],
                  preferred_element_type=jnp.float32) + b_qkv_ref[0]  # (N, 3*Cp)
    q3 = qkv[:, 0 * cp:1 * cp].reshape(n, num_heads, hdp).astype(jnp.bfloat16)
    k3 = qkv[:, 1 * cp:2 * cp].reshape(n, num_heads, hdp).astype(jnp.bfloat16)
    v3 = qkv[:, 2 * cp:3 * cp].reshape(n, num_heads, hdp).astype(jnp.bfloat16)

    # All heads batched in one einsum over the full sequence; the 4-way
    # block-diagonal (chunk-local) attention is enforced with a 0/1 mask on
    # the probabilities (exact: softmax is invariant to the row-max shift).
    att = jnp.einsum('qhd,khd->hqk', q3, k3,
                     preferred_element_type=jnp.float32)              # (H, N, N)
    att = att - jnp.max(att, axis=-1, keepdims=True)
    p = jnp.exp(att) * amask_ref[...]                                 # zero cross-chunk
    p = p * pl.reciprocal(jnp.sum(p, axis=-1, keepdims=True), approx=True)
    oh = jnp.einsum('hqk,khd->qhd', p.astype(jnp.bfloat16), v3,
                    preferred_element_type=jnp.float32)               # (N, H, hdp)
    attn_out = oh.reshape(n, cp).astype(jnp.bfloat16)
    proj = jnp.dot(attn_out, w_proj_ref[...],
                   preferred_element_type=jnp.float32) + b_proj_ref[0]
    x = x + proj

    # ----- MLP branch: x + fc2(relu(fc1(norm2(x)))) -----
    # LN2 affine folded into w_fc1 / b_fc1 host-side.
    xn2 = ln_hat(x).astype(jnp.bfloat16)
    h1 = jnp.dot(xn2, w_fc1_ref[...],
                 preferred_element_type=jnp.float32) + b_fc1_ref[0]
    h1 = jnp.maximum(h1, 0.0).astype(jnp.bfloat16)
    h2 = jnp.dot(h1, w_fc2_ref[...],
                 preferred_element_type=jnp.float32) + b_fc2_ref[0]
    o_ref[0] = (x + h2).astype(o_ref.dtype)


# ---------------------------------------------------------------------------
# Wrapper: host-side weight prep (compose / fuse / fold / zero-pad / bf16)
# and pallas_call with a per-batch grid.
# ---------------------------------------------------------------------------
def mla_block(tokens, params, num_heads=8):
    B, N, D = tokens.shape
    assert N % 4 == 0, "kernel assumes N divisible by 4 (no ragged attention chunk)"
    C = D // 2
    assert C % num_heads == 0, "reduced dim must divide evenly into heads"
    hd = C // num_heads
    nc = 4
    cs = N // nc

    # Padded, MXU/lane-friendly sizes.
    Dp = _round_up(D, 128)            # token dim (lane-dense I/O + residual)
    hdp = _round_up(hd, 16)           # per-head dim
    Cp = num_heads * hdp              # padded qkv width per q/k/v (128 for 8 heads)
    Hh = params["w_fc1"].shape[1]
    Hp = _round_up(Hh, 128)           # padded MLP hidden

    # NOTE: PyTorch EffAttention derives head_dim (and scale) from the FULL
    # dim, not dim//2 — replicate that quirk exactly.
    scale = float((D // num_heads) ** -0.5)

    f32, bf16 = jnp.float32, jnp.bfloat16

    g1 = params["g1"].reshape(D).astype(f32)
    b1 = params["b1"].reshape(D).astype(f32)
    g2 = params["g2"].reshape(D).astype(f32)
    b2 = params["b2"].reshape(D).astype(f32)

    # Pre-compose reduce @ qkv (f32), fold softmax scale into q, pad per-head,
    # fuse q|k|v columns, then fold LN1 affine (gamma into rows, beta into bias).
    w_comp = params["w_red"].astype(f32) @ params["w_qkv"].astype(f32)   # (D, 3C)

    def head_pad_w(w):                                # (D, C) -> (D, Cp)
        w = w.reshape(D, num_heads, hd)
        w = _pad_to(w, (D, num_heads, hdp))
        return w.reshape(D, Cp)

    w_q = head_pad_w(w_comp[:, 0 * C:1 * C] * scale)  # fold softmax scale into q
    w_k = head_pad_w(w_comp[:, 1 * C:2 * C])
    w_v = head_pad_w(w_comp[:, 2 * C:3 * C])
    w_qkv = jnp.concatenate([w_q, w_k, w_v], axis=1)  # (D, 3*Cp)
    b_qkv = (b1[None, :] @ w_qkv).astype(f32)         # LN1 beta folded (qkv_bias=False)
    w_qkv = g1[:, None] * w_qkv                       # LN1 gamma folded
    w_qkv = _pad_to(w_qkv, (Dp, 3 * Cp)).astype(bf16)

    w_proj = params["w_proj"].astype(f32).reshape(num_heads, hd, D)      # rows h*hd+d
    w_proj = _pad_to(w_proj, (num_heads, hdp, D)).reshape(Cp, D)
    w_proj = _pad_to(w_proj, (Cp, Dp)).astype(bf16)
    b_proj = _pad_to(params["b_proj"].astype(f32), (1, Dp))

    # Fold LN2 affine into fc1.
    w_fc1 = params["w_fc1"].astype(f32)                                  # (D, Hh)
    b_fc1 = params["b_fc1"].astype(f32).reshape(1, Hh) + b2[None, :] @ w_fc1
    w_fc1 = g2[:, None] * w_fc1
    w_fc1 = _pad_to(w_fc1, (Dp, Hp)).astype(bf16)
    b_fc1 = _pad_to(b_fc1, (1, Hp))

    w_fc2 = _pad_to(params["w_fc2"].astype(f32), (Hp, Dp)).astype(bf16)
    b_fc2 = _pad_to(params["b_fc2"].astype(f32), (1, Dp))

    # Constant masks: lane-validity for LN stats, block-diagonal 0/1 attention
    # mask (4 contiguous chunks of cs tokens).
    valid = jnp.asarray((np.arange(Dp) < D).astype(np.float32))[None, :]      # (1, Dp)
    chunk_id = np.arange(N) // cs
    amask = jnp.asarray(
        (chunk_id[:, None] == chunk_id[None, :]).astype(np.float32))[None]    # (1, N, N)

    consts = (valid, amask, w_qkv, b_qkv, w_proj, b_proj,
              w_fc1, b_fc1, w_fc2, b_fc2)

    def _const_spec(w):
        return pl.BlockSpec(w.shape, lambda *_, nd=w.ndim: (0,) * nd)

    # bf16 HBM I/O; all sensitive math stays f32 inside the kernel.
    tokens_pad = _pad_to(tokens.astype(f32), (B, N, Dp)).astype(bf16)

    # Explicit VMEM budget: double-buffered in/out tiles + resident (double-
    # buffered) weights + f32 attention logits/probs + dense temps + slack.
    # Capped at 48 MiB so it stays v7x-safe (64 MiB physical VMEM).
    in_blk = N * Dp * 2
    out_blk = N * Dp * 2
    w_bytes = sum(int(np.prod(w.shape)) * w.dtype.itemsize for w in consts)
    att_bytes = 2 * num_heads * N * N * 4
    interm_bytes = att_bytes + 8 * N * Dp * 4
    vmem_limit = int(min(48 * 1024 * 1024,
                         2 * (in_blk + out_blk) + 2 * w_bytes
                         + interm_bytes + 8 * 1024 * 1024))

    kernel = functools.partial(mla_block_kernel, num_heads=num_heads,
                               hdp=hdp, d_real=D)
    out_pad = pl.pallas_call(
        kernel,
        out_shape=jax.ShapeDtypeStruct((B, N, Dp), jnp.bfloat16),
        grid=(B,),
        in_specs=[pl.BlockSpec((1, N, Dp), lambda b: (b, 0, 0))]
                 + [_const_spec(w) for w in consts],
        out_specs=pl.BlockSpec((1, N, Dp), lambda b: (b, 0, 0)),
        compiler_params=pltpu.CompilerParams(
            dimension_semantics=("parallel",),      # >=2 parallel steps -> both v7x TCs
            vmem_limit_bytes=vmem_limit),
    )(tokens_pad, *consts)
    return out_pad[..., :D].astype(jnp.float32)


# ---------------------------------------------------------------------------
# Glue: extract_image_patches (3x3, stride 1, rate 1, 'same') == pad(1)+unfold.
# Pure data movement -> plain JAX.
# ---------------------------------------------------------------------------
def extract_image_patches_same(x):
    # x: (B, C, H, W) -> (B, C*9, H*W), torch.nn.Unfold channel ordering.
    B, C, H, W = x.shape
    xp = jnp.pad(x, ((0, 0), (0, 0), (1, 1), (1, 1)))
    patches = [xp[:, :, i:i + H, j:j + W] for i in range(3) for j in range(3)]
    p = jnp.stack(patches, axis=2)                 # (B, C, 9, H, W)
    return p.reshape(B, C * 9, H * W)


# ---------------------------------------------------------------------------
# Pure-JAX reference mirroring the PyTorch forward exactly (for checking).
# ---------------------------------------------------------------------------
def mla_block_ref(tokens, params, num_heads=8):
    B, N, D = tokens.shape
    C = D // 2
    hd = C // num_heads
    scale = (D // num_heads) ** -0.5

    def ln(v, g, b):
        mu = v.mean(-1, keepdims=True)
        var = ((v - mu) ** 2).mean(-1, keepdims=True)
        return (v - mu) / jnp.sqrt(var + 1e-5) * g + b

    x = tokens
    xn = ln(x, params["g1"][0], params["b1"][0])
    xr = xn @ params["w_red"]
    qkv = (xr @ params["w_qkv"]).reshape(B, N, 3, num_heads, hd)
    qkv = qkv.transpose(2, 0, 3, 1, 4)             # (3, B, H, N, hd)
    q, k, v = qkv[0], qkv[1], qkv[2]
    cs = math.ceil(N // 4)
    outs = []
    for c in range(N // cs):
        qc, kc, vc = (t[:, :, c * cs:(c + 1) * cs] for t in (q, k, v))
        att = jnp.einsum('bhqd,bhkd->bhqk', qc, kc) * scale
        att = jax.nn.softmax(att, axis=-1)
        oc = jnp.einsum('bhqk,bhkd->bhqd', att, vc).transpose(0, 2, 1, 3)
        outs.append(oc)
    a = jnp.concatenate(outs, axis=1).reshape(B, N, C)
    x = x + (a @ params["w_proj"] + params["b_proj"][0])
    xn2 = ln(x, params["g2"][0], params["b2"][0])
    h1 = jnp.maximum(xn2 @ params["w_fc1"] + params["b_fc1"][0], 0.0)
    x = x + (h1 @ params["w_fc2"] + params["b_fc2"][0])
    return x


# ---------------------------------------------------------------------------
if __name__ == "__main__":
    # Small but consistent shapes: dim = C*9 must be even and dim//2 divisible
    # by num_heads=8  ->  C = 16, dim = 144, N = H*W = 64.
    B, C, H, W = 2, 16, 8, 8
    num_heads = 8
    D = C * 9

    key = jax.random.PRNGKey(0)
    keys = jax.random.split(key, 10)
    x = jax.random.normal(keys[0], (B, C, H, W), jnp.float32)

    def init(k, shape, scl=0.05):
        return jax.random.normal(k, shape, jnp.float32) * scl

    # Weights stored as (in, out); qkv_bias=False -> reduce/qkv have no bias.
    params = dict(
        g1=jnp.ones((1, D), jnp.float32),
        b1=jnp.zeros((1, D), jnp.float32),
        w_red=init(keys[1], (D, D // 2)),
        w_qkv=init(keys[2], (D // 2, 3 * (D // 2))),
        w_proj=init(keys[3], (D // 2, D)),
        b_proj=init(keys[4], (1, D)),
        g2=jnp.ones((1, D), jnp.float32),
        b2=jnp.zeros((1, D), jnp.float32),
        w_fc1=init(keys[5], (D, D // 4)),
        b_fc1=init(keys[6], (1, D // 4)),
        w_fc2=init(keys[7], (D // 4, D)),
        b_fc2=init(keys[8], (1, D)),
    )

    # Glue: im2col + permute(0, 2, 1) -> (B, N, D) tokens.
    tokens = jnp.transpose(extract_image_patches_same(x), (0, 2, 1))

    out = mla_block(tokens, params, num_heads=num_heads)
    out = jax.block_until_ready(out)

    ref = mla_block_ref(tokens, params, num_heads=num_heads)
    assert out.shape == (B, H * W, D)
    err = float(np.max(np.abs(np.asarray(out) - np.asarray(ref))))
    assert np.allclose(np.asarray(out), np.asarray(ref), rtol=2e-2, atol=2e-2), err
    print("KERNEL_OK")
</pallas_src>

<mosaic_0001>
module attributes {stable_mosaic.version = 11 : i64} {
  func.func @mla_block_kernel(%arg0: i32, %arg1: memref<1x64x256xbf16, #tpu.memory_space<vmem>>, %arg2: memref<1x256xf32, #tpu.memory_space<vmem>>, %arg3: memref<1x64x64xf32, #tpu.memory_space<vmem>>, %arg4: memref<256x384xbf16, #tpu.memory_space<vmem>>, %arg5: memref<1x384xf32, #tpu.memory_space<vmem>>, %arg6: memref<128x256xbf16, #tpu.memory_space<vmem>>, %arg7: memref<1x256xf32, #tpu.memory_space<vmem>>, %arg8: memref<256x128xbf16, #tpu.memory_space<vmem>>, %arg9: memref<1x128xf32, #tpu.memory_space<vmem>>, %arg10: memref<128x256xbf16, #tpu.memory_space<vmem>>, %arg11: memref<1x256xf32, #tpu.memory_space<vmem>>, %arg12: memref<1x64x256xbf16, #tpu.memory_space<vmem>>) attributes {dimension_semantics = [#tpu.dimension_semantics<parallel>], iteration_bounds = array<i64: 2>, scalar_prefetch = 0 : i64, scratch_operands = 0 : i64, tpu.core_type = #tpu.core_type<tc>, window_params = [{transform_indices = @transform_0, window_bounds = array<i64: 1, 64, 256>}, {pipeline_mode = #tpu.pipeline_mode<synchronous>, transform_indices = @transform_1, window_bounds = array<i64: 1, 256>}, {pipeline_mode = #tpu.pipeline_mode<synchronous>, transform_indices = @transform_2, window_bounds = array<i64: 1, 64, 64>}, {pipeline_mode = #tpu.pipeline_mode<synchronous>, transform_indices = @transform_3, window_bounds = array<i64: 256, 384>}, {pipeline_mode = #tpu.pipeline_mode<synchronous>, transform_indices = @transform_4, window_bounds = array<i64: 1, 384>}, {pipeline_mode = #tpu.pipeline_mode<synchronous>, transform_indices = @transform_5, window_bounds = array<i64: 128, 256>}, {pipeline_mode = #tpu.pipeline_mode<synchronous>, transform_indices = @transform_6, window_bounds = array<i64: 1, 256>}, {pipeline_mode = #tpu.pipeline_mode<synchronous>, transform_indices = @transform_7, window_bounds = array<i64: 256, 128>}, {pipeline_mode = #tpu.pipeline_mode<synchronous>, transform_indices = @transform_8, window_bounds = array<i64: 1, 128>}, {pipeline_mode = #tpu.pipeline_mode<synchronous>, transform_indices = @transform_9, window_bounds = array<i64: 128, 256>}, {pipeline_mode = #tpu.pipeline_mode<synchronous>, transform_indices = @transform_10, window_bounds = array<i64: 1, 256>}, {transform_indices = @transform_11, window_bounds = array<i64: 1, 64, 256>}]} {
    %c0 = arith.constant 0 : index
    %c0_0 = arith.constant 0 : index
    %c0_1 = arith.constant 0 : index
    %0 = vector.load %arg1[%c0, %c0_0, %c0_1] : memref<1x64x256xbf16, #tpu.memory_space<vmem>>, vector<1x64x256xbf16>
    %1 = vector.shape_cast %0 : vector<1x64x256xbf16> to vector<64x256xbf16>
    %2 = arith.extf %1 : vector<64x256xbf16> to vector<64x256xf32>
    %c0_2 = arith.constant 0 : index
    %c0_3 = arith.constant 0 : index
    %3 = vector.load %arg2[%c0_2, %c0_3] : memref<1x256xf32, #tpu.memory_space<vmem>>, vector<1x256xf32>
    %cst = arith.constant dense<0.000000e+00> : vector<64xf32>
    %4 = vector.multi_reduction <add>, %2, %cst [1] : vector<64x256xf32> to vector<64xf32>
    %5 = vector.shape_cast %4 : vector<64xf32> to vector<64x1xf32>
    %cst_4 = arith.constant 0.0069444445 : f32
    %6 = vector.broadcast %cst_4 : f32 to vector<64x1xf32>
    %7 = arith.mulf %5, %6 : vector<64x1xf32>
    %8 = vector.broadcast %7 : vector<64x1xf32> to vector<64x256xf32>
    %9 = arith.subf %2, %8 : vector<64x256xf32>
    %10 = vector.broadcast %3 : vector<1x256xf32> to vector<64x256xf32>
    %11 = arith.mulf %9, %10 : vector<64x256xf32>
    %12 = arith.mulf %11, %11 : vector<64x256xf32>
    %cst_5 = arith.constant dense<0.000000e+00> : vector<64xf32>
    %13 = vector.multi_reduction <add>, %12, %cst_5 [1] : vector<64x256xf32> to vector<64xf32>
    %14 = vector.shape_cast %13 : vector<64xf32> to vector<64x1xf32>
    %cst_6 = arith.constant 0.0069444445 : f32
    %15 = vector.broadcast %cst_6 : f32 to vector<64x1xf32>
    %16 = arith.mulf %14, %15 : vector<64x1xf32>
    %cst_7 = arith.constant 9.99999974E-6 : f32
    %17 = vector.broadcast %cst_7 : f32 to vector<64x1xf32>
    %18 = arith.addf %16, %17 : vector<64x1xf32>
    %19 = math.rsqrt %18 : vector<64x1xf32>
    %20 = vector.broadcast %19 : vector<64x1xf32> to vector<64x256xf32>
    %21 = arith.mulf %11, %20 : vector<64x256xf32>
    %22 = arith.truncf %21 : vector<64x256xf32> to vector<64x256xbf16>
    %c0_8 = arith.constant 0 : index
    %c0_9 = arith.constant 0 : index
    %23 = vector.load %arg4[%c0_8, %c0_9] : memref<256x384xbf16, #tpu.memory_space<vmem>>, vector<256x384xbf16>
    %cst_10 = arith.constant dense<0.000000e+00> : vector<64x384xf32>
    %24 = tpu.matmul %22, %23, %cst_10 {dimension_numbers = #tpu.dot_dimension_numbers<[1], [0], [0], [1], [0, 0, 1, 1], [], []>} : vector<64x256xbf16>, vector<256x384xbf16>, vector<64x384xf32> -> vector<64x384xf32>
    %c0_11 = arith.constant 0 : index
    %c0_12 = arith.constant 0 : index
    %25 = vector.load %arg5[%c0_11, %c0_12] : memref<1x384xf32, #tpu.memory_space<vmem>>, vector<1x384xf32>
    %26 = vector.shape_cast %25 : vector<1x384xf32> to vector<384xf32>
    %27 = vector.shape_cast %26 : vector<384xf32> to vector<1x384xf32>
    %28 = vector.broadcast %27 : vector<1x384xf32> to vector<64x384xf32>
    %29 = arith.addf %24, %28 : vector<64x384xf32>
    %30 = vector.extract_strided_slice %29 {offsets = [0, 0], sizes = [64, 128], strides = [1, 1]} : vector<64x384xf32> to vector<64x128xf32>
    %31 = vector.shape_cast %30 : vector<64x128xf32> to vector<64x8x16xf32>
    %32 = arith.truncf %31 : vector<64x8x16xf32> to vector<64x8x16xbf16>
    %33 = vector.extract_strided_slice %29 {offsets = [0, 128], sizes = [64, 128], strides = [1, 1]} : vector<64x384xf32> to vector<64x128xf32>
    %34 = vector.shape_cast %33 : vector<64x128xf32> to vector<64x8x16xf32>
    %35 = arith.truncf %34 : vector<64x8x16xf32> to vector<64x8x16xbf16>
    %36 = vector.extract_strided_slice %29 {offsets = [0, 256], sizes = [64, 128], strides = [1, 1]} : vector<64x384xf32> to vector<64x128xf32>
    %37 = vector.shape_cast %36 : vector<64x128xf32> to vector<64x8x16xf32>
    %38 = arith.truncf %37 : vector<64x8x16xf32> to vector<64x8x16xbf16>
    "tpu.trace_start"() <{level = 10 : i32, message = "qhd,khd->hqk"}> : () -> ()
    %cst_13 = arith.constant dense<0.000000e+00> : vector<8x64x64xf32>
    %39 = tpu.matmul %32, %35, %cst_13 {dimension_numbers = #tpu.dot_dimension_numbers<[2], [2], [0], [0], [0, 1, 0, 0, 1, 0], [1], [1]>} : vector<64x8x16xbf16>, vector<64x8x16xbf16>, vector<8x64x64xf32> -> vector<8x64x64xf32>
    "tpu.trace_stop"() : () -> ()
    %cst_14 = arith.constant dense<0xFF800000> : vector<8x64xf32>
    %40 = vector.multi_reduction <maximumf>, %39, %cst_14 [2] : vector<8x64x64xf32> to vector<8x64xf32>
    %41 = vector.shape_cast %40 : vector<8x64xf32> to vector<8x64x1xf32>
    %42 = vector.broadcast %41 : vector<8x64x1xf32> to vector<8x64x64xf32>
    %43 = arith.subf %39, %42 : vector<8x64x64xf32>
    %44 = math.exp %43 : vector<8x64x64xf32>
    %c0_15 = arith.constant 0 : index
    %c0_16 = arith.constant 0 : index
    %c0_17 = arith.constant 0 : index
    %45 = vector.load %arg3[%c0_15, %c0_16, %c0_17] : memref<1x64x64xf32, #tpu.memory_space<vmem>>, vector<1x64x64xf32>
    %46 = vector.broadcast %45 : vector<1x64x64xf32> to vector<8x64x64xf32>
    %47 = arith.mulf %44, %46 : vector<8x64x64xf32>
    %cst_18 = arith.constant dense<0.000000e+00> : vector<8x64xf32>
    %48 = vector.multi_reduction <add>, %47, %cst_18 [2] : vector<8x64x64xf32> to vector<8x64xf32>
    %49 = vector.shape_cast %48 : vector<8x64xf32> to vector<8x64x1xf32>
    %50 = tpu.reciprocal %49 {approx = true} : vector<8x64x1xf32> -> vector<8x64x1xf32>
    %51 = vector.broadcast %50 : vector<8x64x1xf32> to vector<8x64x64xf32>
    %52 = arith.mulf %47, %51 : vector<8x64x64xf32>
    %53 = arith.truncf %52 : vector<8x64x64xf32> to vector<8x64x64xbf16>
    "tpu.trace_start"() <{level = 10 : i32, message = "hqk,khd->qhd"}> : () -> ()
    %cst_19 = arith.constant dense<0.000000e+00> : vector<8x16x64xf32>
    %54 = tpu.matmul %38, %53, %cst_19 {dimension_numbers = #tpu.dot_dimension_numbers<[0], [2], [2], [1], [0, 1, 0, 2, 1, 1], [1], [0]>} : vector<64x8x16xbf16>, vector<8x64x64xbf16>, vector<8x16x64xf32> -> vector<8x16x64xf32>
    %55 = tpu.transpose %54, [2, 0, 1] : vector<8x16x64xf32> -> vector<64x8x16xf32>
    "tpu.trace_stop"() : () -> ()
    %56 = vector.shape_cast %55 : vector<64x8x16xf32> to vector<64x128xf32>
    %57 = arith.truncf %56 : vector<64x128xf32> to vector<64x128xbf16>
    %c0_20 = arith.constant 0 : index
    %c0_21 = arith.constant 0 : index
    %58 = vector.load %arg6[%c0_20, %c0_21] : memref<128x256xbf16, #tpu.memory_space<vmem>>, vector<128x256xbf16>
    %cst_22 = arith.constant dense<0.000000e+00> : vector<64x256xf32>
    %59 = tpu.matmul %57, %58, %cst_22 {dimension_numbers = #tpu.dot_dimension_numbers<[1], [0], [0], [1], [0, 0, 1, 1], [], []>} : vector<64x128xbf16>, vector<128x256xbf16>, vector<64x256xf32> -> vector<64x256xf32>
    %c0_23 = arith.constant 0 : index
    %c0_24 = arith.constant 0 : index
    %60 = vector.load %arg7[%c0_23, %c0_24] : memref<1x256xf32, #tpu.memory_space<vmem>>, vector<1x256xf32>
    %61 = vector.shape_cast %60 : vector<1x256xf32> to vector<256xf32>
    %62 = vector.shape_cast %61 : vector<256xf32> to vector<1x256xf32>
    %63 = vector.broadcast %62 : vector<1x256xf32> to vector<64x256xf32>
    %64 = arith.addf %59, %63 : vector<64x256xf32>
    %65 = arith.addf %2, %64 : vector<64x256xf32>
    %cst_25 = arith.constant dense<0.000000e+00> : vector<64xf32>
    %66 = vector.multi_reduction <add>, %65, %cst_25 [1] : vector<64x256xf32> to vector<64xf32>
    %67 = vector.shape_cast %66 : vector<64xf32> to vector<64x1xf32>
    %cst_26 = arith.constant 0.0069444445 : f32
    %68 = vector.broadcast %cst_26 : f32 to vector<64x1xf32>
    %69 = arith.mulf %67, %68 : vector<64x1xf32>
    %70 = vector.broadcast %69 : vector<64x1xf32> to vector<64x256xf32>
    %71 = arith.subf %65, %70 : vector<64x256xf32>
    %72 = vector.broadcast %3 : vector<1x256xf32> to vector<64x256xf32>
    %73 = arith.mulf %71, %72 : vector<64x256xf32>
    %74 = arith.mulf %73, %73 : vector<64x256xf32>
    %cst_27 = arith.constant dense<0.000000e+00> : vector<64xf32>
    %75 = vector.multi_reduction <add>, %74, %cst_27 [1] : vector<64x256xf32> to vector<64xf32>
    %76 = vector.shape_cast %75 : vector<64xf32> to vector<64x1xf32>
    %cst_28 = arith.constant 0.0069444445 : f32
    %77 = vector.broadcast %cst_28 : f32 to vector<64x1xf32>
    %78 = arith.mulf %76, %77 : vector<64x1xf32>
    %cst_29 = arith.constant 9.99999974E-6 : f32
    %79 = vector.broadcast %cst_29 : f32 to vector<64x1xf32>
    %80 = arith.addf %78, %79 : vector<64x1xf32>
    %81 = math.rsqrt %80 : vector<64x1xf32>
    %82 = vector.broadcast %81 : vector<64x1xf32> to vector<64x256xf32>
    %83 = arith.mulf %73, %82 : vector<64x256xf32>
    %84 = arith.truncf %83 : vector<64x256xf32> to vector<64x256xbf16>
    %c0_30 = arith.constant 0 : index
    %c0_31 = arith.constant 0 : index
    %85 = vector.load %arg8[%c0_30, %c0_31] : memref<256x128xbf16, #tpu.memory_space<vmem>>, vector<256x128xbf16>
    %cst_32 = arith.constant dense<0.000000e+00> : vector<64x128xf32>
    %86 = tpu.matmul %84, %85, %cst_32 {dimension_numbers = #tpu.dot_dimension_numbers<[1], [0], [0], [1], [0, 0, 1, 1], [], []>} : vector<64x256xbf16>, vector<256x128xbf16>, vector<64x128xf32> -> vector<64x128xf32>
    %c0_33 = arith.constant 0 : index
    %c0_34 = arith.constant 0 : index
    %87 = vector.load %arg9[%c0_33, %c0_34] : memref<1x128xf32, #tpu.memory_space<vmem>>, vector<1x128xf32>
    %88 = vector.shape_cast %87 : vector<1x128xf32> to vector<128xf32>
    %89 = vector.shape_cast %88 : vector<128xf32> to vector<1x128xf32>
    %90 = vector.broadcast %89 : vector<1x128xf32> to vector<64x128xf32>
    %91 = arith.addf %86, %90 : vector<64x128xf32>
    %cst_35 = arith.constant 0.000000e+00 : f32
    %92 = vector.broadcast %cst_35 : f32 to vector<64x128xf32>
    %93 = arith.maximumf %91, %92 : vector<64x128xf32>
    %94 = arith.truncf %93 : vector<64x128xf32> to vector<64x128xbf16>
    %c0_36 = arith.constant 0 : index
    %c0_37 = arith.constant 0 : index
    %95 = vector.load %arg10[%c0_36, %c0_37] : memref<128x256xbf16, #tpu.memory_space<vmem>>, vector<128x256xbf16>
    %cst_38 = arith.constant dense<0.000000e+00> : vector<64x256xf32>
    %96 = tpu.matmul %94, %95, %cst_38 {dimension_numbers = #tpu.dot_dimension_numbers<[1], [0], [0], [1], [0, 0, 1, 1], [], []>} : vector<64x128xbf16>, vector<128x256xbf16>, vector<64x256xf32> -> vector<64x256xf32>
    %c0_39 = arith.constant 0 : index
    %c0_40 = arith.constant 0 : index
    %97 = vector.load %arg11[%c0_39, %c0_40] : memref<1x256xf32, #tpu.memory_space<vmem>>, vector<1x256xf32>
    %98 = vector.shape_cast %97 : vector<1x256xf32> to vector<256xf32>
    %99 = vector.shape_cast %98 : vector<256xf32> to vector<1x256xf32>
    %100 = vector.broadcast %99 : vector<1x256xf32> to vector<64x256xf32>
    %101 = arith.addf %96, %100 : vector<64x256xf32>
    %102 = arith.addf %65, %101 : vector<64x256xf32>
    %103 = arith.truncf %102 : vector<64x256xf32> to vector<64x256xbf16>
    %c0_41 = arith.constant 0 : index
    %c0_42 = arith.constant 0 : index
    %c0_43 = arith.constant 0 : index
    %104 = vector.load %arg12[%c0_41, %c0_42, %c0_43] : memref<1x64x256xbf16, #tpu.memory_space<vmem>>, vector<1x64x256xbf16>
    %105 = vector.shape_cast %104 : vector<1x64x256xbf16> to vector<64x256xbf16>
    %106 = vector.shape_cast %103 : vector<64x256xbf16> to vector<1x64x256xbf16>
    tpu.vector_store %arg12[%c0_41, %c0_42, %c0_43], %106 {strides = array<i32>} : memref<1x64x256xbf16, #tpu.memory_space<vmem>>, vector<1x64x256xbf16>,
    return
  }
  func.func @transform_0(%arg0: i32) -> (i32, i32, i32) {
    %c0_i32 = arith.constant 0 : i32
    %c0_i32_0 = arith.constant 0 : i32
    %c0_i32_1 = arith.constant 0 : i32
    return %arg0, %c0_i32, %c0_i32_0 : i32, i32, i32
  }
  func.func @transform_1(%arg0: i32) -> (i32, i32) {
    %c0_i32 = arith.constant 0 : i32
    %c0_i32_0 = arith.constant 0 : i32
    %c0_i32_1 = arith.constant 0 : i32
    return %c0_i32, %c0_i32_0 : i32, i32
  }
  func.func @transform_2(%arg0: i32) -> (i32, i32, i32) {
    %c0_i32 = arith.constant 0 : i32
    %c0_i32_0 = arith.constant 0 : i32
    %c0_i32_1 = arith.constant 0 : i32
    %c0_i32_2 = arith.constant 0 : i32
    return %c0_i32, %c0_i32_0, %c0_i32_1 : i32, i32, i32
  }
  func.func @transform_3(%arg0: i32) -> (i32, i32) {
    %c0_i32 = arith.constant 0 : i32
    %c0_i32_0 = arith.constant 0 : i32
    %c0_i32_1 = arith.constant 0 : i32
    return %c0_i32, %c0_i32_0 : i32, i32
  }
  func.func @transform_4(%arg0: i32) -> (i32, i32) {
    %c0_i32 = arith.constant 0 : i32
    %c0_i32_0 = arith.constant 0 : i32
    %c0_i32_1 = arith.constant 0 : i32
    return %c0_i32, %c0_i32_0 : i32, i32
  }
  func.func @transform_5(%arg0: i32) -> (i32, i32) {
    %c0_i32 = arith.constant 0 : i32
    %c0_i32_0 = arith.constant 0 : i32
    %c0_i32_1 = arith.constant 0 : i32
    return %c0_i32, %c0_i32_0 : i32, i32
  }
  func.func @transform_6(%arg0: i32) -> (i32, i32) {
    %c0_i32 = arith.constant 0 : i32
    %c0_i32_0 = arith.constant 0 : i32
    %c0_i32_1 = arith.constant 0 : i32
    return %c0_i32, %c0_i32_0 : i32, i32
  }
  func.func @transform_7(%arg0: i32) -> (i32, i32) {
    %c0_i32 = arith.constant 0 : i32
    %c0_i32_0 = arith.constant 0 : i32
    %c0_i32_1 = arith.constant 0 : i32
    return %c0_i32, %c0_i32_0 : i32, i32
  }
  func.func @transform_8(%arg0: i32) -> (i32, i32) {
    %c0_i32 = arith.constant 0 : i32
    %c0_i32_0 = arith.constant 0 : i32
    %c0_i32_1 = arith.constant 0 : i32
    return %c0_i32, %c0_i32_0 : i32, i32
  }
  func.func @transform_9(%arg0: i32) -> (i32, i32) {
    %c0_i32 = arith.constant 0 : i32
    %c0_i32_0 = arith.constant 0 : i32
    %c0_i32_1 = arith.constant 0 : i32
    return %c0_i32, %c0_i32_0 : i32, i32
  }
  func.func @transform_10(%arg0: i32) -> (i32, i32) {
    %c0_i32 = arith.constant 0 : i32
    %c0_i32_0 = arith.constant 0 : i32
    %c0_i32_1 = arith.constant 0 : i32
    return %c0_i32, %c0_i32_0 : i32, i32
  }
  func.func @transform_11(%arg0: i32) -> (i32, i32, i32) {
    %c0_i32 = arith.constant 0 : i32
    %c0_i32_0 = arith.constant 0 : i32
    %c0_i32_1 = arith.constant 0 : i32
    return %arg0, %c0_i32, %c0_i32_0 : i32, i32, i32
  }
}

</mosaic_0001>

<bundles_post_ra>
// kernel: tpu_custom_call.1
= control target key start
LH: loop header
LB: loop body
LE: loop exit
PB: predicated region body
PF: predicated region fallthrough
CT: control target
= control target key end

     0   :  { %s25520_s0 = inlined_call_operand.hbm [shape: bf16[2,64,256], index: 0, kind: input, shape index: {}]   ;;  %s25521_s1 = inlined_call_operand.vmem [shape: f32[1,256], index: 1, kind: input, shape index: {}]   ;;  %s25522_s2 = inlined_call_operand.hbm [shape: f32[1,64,64], index: 2, kind: input, shape index: {}]   ;;  %s25523_s3 = inlined_call_operand.hbm [shape: bf16[256,384], index: 3, kind: input, shape index: {}]   ;;  %s25524_s4 = inlined_call_operand.vmem [shape: f32[1,384], index: 4, kind: input, shape index: {}]   ;;  %s25525_s5 = inlined_call_operand.hbm [shape: bf16[128,256], index: 5, kind: input, shape index: {}]   ;;  %s25526_s6 = inlined_call_operand.vmem [shape: f32[1,256], index: 6, kind: input, shape index: {}]   ;;  %s25527_s7 = inlined_call_operand.hbm [shape: bf16[256,128], index: 7, kind: input, shape index: {}]   ;;  %s25528_s8 = inlined_call_operand.vmem [shape: f32[1,128], index: 8, kind: input, shape index: {}]   ;;  %s25529_s9 = inlined_call_operand.hbm [shape: bf16[128,256], index: 9, kind: input, shape index: {}]   ;;  %s25530_s10 = inlined_call_operand.vmem [shape: f32[1,256], index: 10, kind: input, shape index: {}]   ;;  %s25531_s11 = inlined_call_operand.hbm [shape: bf16[2,64,256], index: 11, kind: output, shape index: {}]  }
   0x1   :  { %26006 = sst [smem:[#allocation237_spill]] %s25522_s2 }
   0x2   :  { %26007 = sst [smem:[#allocation238_spill]] %s25523_s3 }
   0x3   :  { %26008 = sst [smem:[#allocation239_spill]] %s25528_s8 }
   0x4   :  { %26009 = sst [smem:[#allocation240_spill]] %s25530_s10 }
   0x5   :  { %26010 = sst [smem:[#allocation241_spill]] %s25531_s11 }
   0x6   :  { %16 = vsyncpa [#allocation3], 0 }
   0x7   :  { %18 = vsyncpa [#allocation3 + $0x1], 0 }
   0x8   :  { %19 = vsyncpa [#allocation6], 0 }
   0x9   :  { %20 = vsyncpa [#allocation9], 0 }
   0xa   :  { %21 = vsyncpa [#allocation12], 0 }
   0xb   :  { %22 = vsyncpa [#allocation4], 0 }
   0xc   :  { %24 = vsyncpa [#allocation4 + $0x1], 0  ;;  %s18511_s17 = smov 0   ;;  %s18513_s18 = smov 0  }
   0xd   :  { %s18515_s19 = smov 0   ;;  %s18517_s20 = smov 0  }
   0xe LB: > { %s18424_s21 = smov [#allocation5]   ;;  %s18532_s23 = sadd.s32 4294967295, %s18422_s20   ;;  %s18422_s20 = sphi %s18517_s20, %s27027_s20   ;;  %s18418_s19 = sphi %s18515_s19, %s27026_s19   ;;  %s18414_s18 = sphi %s18513_s18, %s27025_s18   ;;  %s18410_s17 = sphi %s18511_s17, %s27024_s17  }
   0xf   : > { %s312_s22 = sshll.u32 %s18424_s21, 4  ;;  %p16887_p0 = scmp.ge.s32.totalorder %s18422_s20, 1  ;;  %s18537_s22 = int_to_ptr.vmem [resolvable:$true] %s312_s22 }
  0x10   : > { %p25537_p1 = scmp.eq.s32.totalorder %s18532_s23, 0  ;;  %p297_p2 = scmp.lt.s32.totalorder %s18422_s20, 3 }
  0x11   : > { %s18425_s25 = smov [#allocation8]   ;;  %s18426_s28 = smov [#allocation7]  }
  0x12   : > { %p18539_p3 = pnand %p16887_p0, %p297_p2  ;;  %s341_s26 = sshll.u32 %s18425_s25, 4  ;;  %s18552_s26 = int_to_ptr.vmem [resolvable:$true] %s341_s26 }
  0x13   : > { %s325_s29 = sshll.u32 %s18426_s28, 4  ;;  %s26013_s2 = sld [smem:[#allocation237_spill]]  ;;  %s18554_s29 = int_to_ptr.vmem [resolvable:$true] %s325_s29 }
  0x14   : > { %s26011_s24 = scalar_select %p18539_p3, 1, 0 }
  0x15   : > { %p17521_p5 = pneg %p18539_p3 }
  0x17   : > { %p18548_p6 = pnand %p17521_p5, %p25537_p1 }
  0x19   : > { %s18174_s13 = scalar_lea.hbm %s26013_s2, 1024  ;;  %p18564_p8 = pneg %p18548_p6 }
  0x1a   : > { %p18175_p7 = scmp.ne.s32.totalorder %s26013_s2, %s18174_s13  ;;  %p18181_p11 = scmp.lt.u32.totalorder %s18174_s13, %s26013_s2 }
  0x1c   : > { %p18177_p9 = pnand %p18564_p8, %p18175_p7 }
  0x1e   : > { %p18178_p10 = pneg %p18177_p9 }
  0x20   : > { %p18183_p12 = pnand %p18181_p11, %p18178_p10 }
  0x22   : > { %18186 = shalt.err (!%p18183_p12)
}
  0x23   : > { %s18187_s28 = scalar_lea.vmem %s18537_s22, 1024  ;;  %p18195_p5 = scmp.lt.s32.totalorder %s18537_s22, %s18537_s22 }
  0x24   : > { %p18188_p13 = scmp.ne.s32.totalorder %s18537_s22, %s18187_s28  ;;  %p18196_p4 = scmp.lt.s32.totalorder %s18187_s28, %s18187_s28 }
  0x26   : > { %p18190_p0 = pnand %p18188_p13, %p18564_p8  ;;  %p18197_p7 = por %p18196_p4, %p18195_p5 }
  0x28   : > { %p18191_p2 = pneg %p18190_p0 }
  0x2a   : > { %p18198_p9 = pnand %p18197_p7, %p18191_p2 }
  0x2c   : > { %18201 = shalt.err (!%p18198_p9)
}
  0x2d   : > { %s25533_s30 = smov 128   ;;  %s25535_s12 = smov 8  }
  0x2e   : > { %17524 = dma.hbm_to_vmem [thread:$0]  (!%p18548_p6), %s26013_s2, 1024, %s18537_s22, [#allocation6], %s25533_s30, %s25533_s30, %s25535_s12  }
  0x2f   : > { %s18202_s25 = scalar_lea.hbm %s25525_s5, 2048 }
  0x30   : > { %p18203_p4 = scmp.ne.s32.totalorder %s25525_s5, %s18202_s25  ;;  %p18209_p12 = scmp.lt.u32.totalorder %s18202_s25, %s25525_s5 }
  0x32   : > { %p18205_p10 = pnand %p18203_p4, %p18564_p8 }
  0x34   : > { %p18206_p11 = pneg %p18205_p10 }
  0x36   : > { %p18211_p13 = pnand %p18209_p12, %p18206_p11 }
  0x38   : > { %18214 = shalt.err (!%p18211_p13)
}
  0x39   : > { %s18215_s22 = scalar_lea.vmem %s18552_s26, 2048  ;;  %p18223_p7 = scmp.lt.s32.totalorder %s18552_s26, %s18552_s26 }
  0x3a   : > { %p18216_p0 = scmp.ne.s32.totalorder %s18552_s26, %s18215_s22  ;;  %p18224_p9 = scmp.lt.s32.totalorder %s18215_s22, %s18215_s22 }
  0x3c   : > { %p18218_p2 = pnand %p18216_p0, %p18564_p8  ;;  %p18225_p4 = por %p18224_p9, %p18223_p7 }
  0x3e   : > { %p18219_p5 = pneg %p18218_p2 }
  0x40   : > { %p18226_p10 = pnand %p18225_p4, %p18219_p5 }
  0x42   : > { %18229 = shalt.err (!%p18226_p10)
}
  0x43   : > { %17530 = dma.hbm_to_vmem [thread:$0]  (!%p18548_p6), %s25525_s5, 2048, %s18552_s26, [#allocation9], %s25533_s30, %s25533_s30, %s25535_s12  }
  0x44   : > { %s26015_s3 = sld [smem:[#allocation238_spill]] }
  0x4a   : > { %s18230_s14 = scalar_lea.hbm %s26015_s3, 6144 }
  0x4b   : > { %p18231_p11 = scmp.ne.s32.totalorder %s26015_s3, %s18230_s14  ;;  %p18237_p0 = scmp.lt.u32.totalorder %s18230_s14, %s26015_s3 }
  0x4d   : > { %p18233_p12 = pnand %p18231_p11, %p18564_p8 }
  0x4f   : > { %p18234_p13 = pneg %p18233_p12 }
  0x51   : > { %p18239_p2 = pnand %p18237_p0, %p18234_p13 }
  0x53   : > { %18242 = shalt.err (!%p18239_p2)
}
  0x54   : > { %s18243_s26 = scalar_lea.vmem %s18554_s29, 6144  ;;  %p18251_p4 = scmp.lt.s32.totalorder %s18554_s29, %s18554_s29 }
  0x55   : > { %p18244_p5 = scmp.ne.s32.totalorder %s18554_s29, %s18243_s26  ;;  %p18252_p10 = scmp.lt.s32.totalorder %s18243_s26, %s18243_s26 }
  0x57   : > { %p18246_p7 = pnand %p18244_p5, %p18564_p8  ;;  %p18253_p11 = por %p18252_p10, %p18251_p4 }
  0x59   : > { %p18247_p9 = pneg %p18246_p7 }
  0x5b   : > { %p18254_p12 = pnand %p18253_p11, %p18247_p9 }
  0x5d   : > { %18257 = shalt.err (!%p18254_p12)
}
  0x5e   : > { %s18429_s22 = smov 192   ;;  %s18430_s8 = smov 12  }
  0x5f   : > { %17527 = dma.hbm_to_vmem [thread:$0]  (!%p18548_p6), %s26015_s3, 6144, %s18554_s29, [#allocation6], %s18429_s22, %s18429_s22, %s18430_s8  }
  0x60   : > { %s18431_s13 = smov [#allocation10]   ;;  %s18258_s25 = scalar_lea.hbm %s25527_s7, 2048 }
  0x61   : > { %s357_s14 = sshll.u32 %s18431_s13, 4  ;;  %p18259_p13 = scmp.ne.s32.totalorder %s25527_s7, %s18258_s25  ;;  %s358_s14 = int_to_ptr.vmem [resolvable:$true] %s357_s14 }
  0x62   : > { %p18265_p5 = scmp.lt.u32.totalorder %s18258_s25, %s25527_s7 }
  0x63   : > { %p18261_p0 = pnand %p18259_p13, %p18564_p8 }
  0x65   : > { %p18262_p2 = pneg %p18261_p0 }
  0x67   : > { %p18267_p7 = pnand %p18265_p5, %p18262_p2 }
  0x69   : > { %18270 = shalt.err (!%p18267_p7)
}
  0x6a   : > { %s18271_s29 = scalar_lea.vmem %s358_s14, 2048  ;;  %p18279_p11 = scmp.lt.s32.totalorder %s358_s14, %s358_s14 }
  0x6b   : > { %p18272_p9 = scmp.ne.s32.totalorder %s358_s14, %s18271_s29  ;;  %p18280_p12 = scmp.lt.s32.totalorder %s18271_s29, %s18271_s29 }
  0x6d   : > { %p18274_p4 = pnand %p18272_p9, %p18564_p8  ;;  %p18281_p1 = por %p18280_p12, %p18279_p11 }
  0x6f   : > { %p18275_p10 = pneg %p18274_p4 }
  0x71   : > { %p18282_p3 = pnand %p18281_p1, %p18275_p10 }
  0x73   : > { %18285 = shalt.err (!%p18282_p3)
}
  0x74   : > { %s18432_s22 = smov 64   ;;  %s18433_s8 = smov 4  }
  0x75   : > { %17533 = dma.hbm_to_vmem [thread:$0]  (!%p18548_p6), %s25527_s7, 2048, %s358_s14, [#allocation9], %s18432_s22, %s18432_s22, %s18433_s8  }
  0x76   : > { %s18434_s10 = smov [#allocation11]   ;;  %s18286_s21 = scalar_lea.hbm %s25529_s9, 2048 }
  0x77   : > { %s373_s11 = sshll.u32 %s18434_s10, 4  ;;  %p18287_p1 = scmp.ne.s32.totalorder %s25529_s9, %s18286_s21  ;;  %s374_s11 = int_to_ptr.vmem [resolvable:$true] %s373_s11 }
  0x78   : > { %p18293_p0 = scmp.lt.u32.totalorder %s18286_s21, %s25529_s9 }
  0x79   : > { %p18289_p3 = pnand %p18287_p1, %p18564_p8 }
  0x7b   : > { %p18290_p13 = pneg %p18289_p3 }
  0x7d   : > { %p18295_p2 = pnand %p18293_p0, %p18290_p13 }
  0x7f   : > { %18298 = shalt.err (!%p18295_p2)
}
  0x80   : > { %s18299_s14 = scalar_lea.vmem %s374_s11, 2048  ;;  %p18307_p4 = scmp.lt.s32.totalorder %s374_s11, %s374_s11 }
  0x81   : > { %p18300_p5 = scmp.ne.s32.totalorder %s374_s11, %s18299_s14  ;;  %p18308_p10 = scmp.lt.s32.totalorder %s18299_s14, %s18299_s14 }
  0x83   : > { %p18302_p7 = pnand %p18300_p5, %p18564_p8  ;;  %p18309_p11 = por %p18308_p10, %p18307_p4 }
  0x85   : > { %p18303_p9 = pneg %p18302_p7 }
  0x87   : > { %p18310_p12 = pnand %p18309_p11, %p18303_p9 }
  0x89   : > { %18313 = shalt.err (!%p18310_p12)
}
  0x8a   : > { %s26016_s22 = smov 8   ;;  %s26017_s8 = smov 128  }
  0x8b   : > { %17536 = dma.hbm_to_vmem [thread:$0]  (!%p18548_p6), %s25529_s9, 2048, %s374_s11, [#allocation12], %s26017_s8, %s26017_s8, %s26016_s22  }
  0x8c   : > { %s16886_s27 = sadd.s32 4294967294, %s18422_s20   ;;  %s18678_s16 = sadd.s32 1, %s18422_s20  }
  0x8d   : > { %s37_s10 = sadd.s32 1, %s18418_s19  ;;  %s34_s13 = ssub.s32 %s18422_s20, %s18678_s16 }
  0x8e   : > { %p44_p8 = scmp.ne.s32.totalorder %s18418_s19, %s18414_s18  ;;  %p35_p1 = scmp.eq.s32.totalorder %s34_s13, 0 }
  0x8f   : > { %p45_p3 = scmp.eq.s32.totalorder %s18422_s20, 0  ;;  %p50_p13 = scmp.ne.s32.totalorder %s18414_s18, %s18410_s17 }
  0x90   : > { %p284_p0 = scmp.eq.s32.totalorder %s18532_s23, 1  ;;  %p26018_p5 = scmp.eq.s32.totalorder %s18532_s23, 0 }
  0x91   : > { %s18690_s15 = scalar_select %p35_p1, %s18418_s19, %s37_s10  }
  0x92   : > { %p46_p2 = por %p45_p3, %p44_p8  ;;  %p18694_p7 = por %p26018_p5, %p50_p13 }
  0x93   : > { %p18698_p6 = por %p284_p0, %p44_p8  ;;  %p290_p9 = scmp.eq.s32.totalorder %s16886_s27, 1 }
  0x94   : > { %p17550_p4 = scmp.lt.s32.totalorder %s18422_s20, 2  ;;  %s390_s25 = sand.u32 1, %s18418_s19  }
  0x95   : > { %s26020_s11 = scalar_select %p18698_p6, 1, 0 }
  0x96   : > { %p18704_p10 = por %p290_p9, %p50_p13  ;;  %s16894_s26 = sshll.u32 %s390_s25, 6 }
  0x97   : > { %s17151_s29 = sshll.u32 %s18422_s20, 10  ;;  %s394_s10 = scalar_lea.vmem [#allocation2], %s16894_s26 }
  0x98   : > { %s26021_s28 = scalar_select %p18704_p10, 1, 0 }
  0x99   : > { %s18712_s12 = scalar_lea.hbm %s25520_s0, %s17151_s29  ;;  %s401_s13 = sshll.u32 %s394_s10, 4  ;;  %s18718_s13 = int_to_ptr.vmem [resolvable:$true] %s401_s13 }
  0x9a   : > { %p18714_p11 = pnand %p17550_p4, %p46_p2  ;;  %s18720_s2 = scalar_lea.sflag [#allocation3], %s390_s25 }
  0x9b   : > { %s18314_s3 = scalar_lea.hbm %s18712_s12, 1024  ;;  %s18319_s14 = scalar_lea.hbm %s25520_s0, 2048 }
  0x9c   : > { %p18315_p12 = scmp.ne.s32.totalorder %s18712_s12, %s18314_s3  ;;  %p18316_p8 = pneg %p18714_p11 }
  0x9d   : > { %p18320_p13 = scmp.lt.u32.totalorder %s18712_s12, %s25520_s0  ;;  %p18321_p0 = scmp.lt.u32.totalorder %s18319_s14, %s18314_s3 }
  0x9e   : > { %p18317_p1 = pnand %p18316_p8, %p18315_p12  ;;  %p18323_p5 = scmp.lt.u32.totalorder %s18314_s3, %s18712_s12 }
  0x9f   : > { %p18322_p2 = por %p18321_p0, %p18320_p13 }
  0xa0   : > { %p18318_p3 = pneg %p18317_p1 }
  0xa1   : > { %p18324_p9 = por %p18323_p5, %p18322_p2 }
  0xa3   : > { %p18325_p4 = pnand %p18324_p9, %p18318_p3 }
  0xa5   : > { %18328 = shalt.err (!%p18325_p4)
}
  0xa6   : > { %s18329_s25 = scalar_lea.vmem %s18718_s13, 1024  ;;  %s18435_s26 = smov [#allocation2]  }
  0xa7   : > { %p18330_p12 = scmp.ne.s32.totalorder %s18718_s13, %s18329_s25  ;;  %s18334_s29 = sshll.u32 %s18435_s26, 4  ;;  %s18335_s29 = int_to_ptr.vmem [resolvable:$false] %s18334_s29 }
  0xa8   : > { %s18336_s30 = scalar_lea.vmem %s18335_s29, 2048  ;;  %p18337_p6 = scmp.lt.s32.totalorder %s18718_s13, %s18335_s29 }
  0xa9   : > { %p18332_p1 = pnand %p18330_p12, %p18316_p8  ;;  %p18338_p13 = scmp.lt.s32.totalorder %s18336_s30, %s18329_s25 }
  0xab   : > { %p18333_p10 = pneg %p18332_p1  ;;  %p18339_p0 = por %p18338_p13, %p18337_p6 }
  0xad   : > { %p18340_p2 = pnand %p18339_p0, %p18333_p10 }
  0xaf   : > { %18343 = shalt.err (!%p18340_p2)
}
  0xb0   : > { %17540 = dma.hbm_to_vmem [thread:$0]  (!%p18714_p11), %s18712_s12, 1024, %s18718_s13, %s18720_s2, %s26017_s8, %s26017_s8, %s26016_s22  }
  0xb1   : > { %p26023_p8 = scmp.ne.s32.totalorder %s26011_s24, 0 }
  0xb3   : > { %413 = sbr.rel (%p26023_p8) target bundleno = 3993 (0xf99), region = 64 }
  0xba   : > { %s18754_s3 = sand.u32 1, %s18414_s18  }
  0xbb   : > { %s16898_s14 = sshll.u32 %s18754_s3, 6  ;;  %s416_s10 = scalar_lea.sflag [#allocation3], %s18754_s3 }
  0xbc   : > { %s419_s27 = scalar_lea.vmem [#allocation2], %s16898_s14 }
  0xbd   : > { %18389 = dma.done.wait (%p18694_p7), %s416_s10, 1024  }
  0xbe   : > { %18391 = vsyncadd (%p18694_p7), %s416_s10, 4294966272  ;;  %p26024_p6 = scmp.eq.s32.totalorder %s18532_s23, 0 }
  0xc0   : > { %18393 = dma.done.wait (%p26024_p6), [#allocation6], 7168   ;;  %p26025_p10 = pmov %p26024_p6 }
  0xc1   : > { %p26026_p11 = pmov %p26024_p6 }
  0xc2   : > { %18395 = vsyncadd (%p26025_p10), [#allocation6], 4294960128 }
  0xc3   : > { %18397 = dma.done.wait (%p26026_p11), [#allocation9], 4096   ;;  %p26027_p3 = pmov %p26024_p6 }
  0xc5   : > { %18399 = vsyncadd (%p26027_p3), [#allocation9], 4294963200  ;;  %p26028_p5 = pmov %p26027_p3 }
  0xc6   : > { %p26029_p9 = pmov %p26027_p3 }
  0xc7   : > { %18401 = dma.done.wait (%p26028_p5), [#allocation12], 2048  }
  0xc8   : > { %18403 = vsyncadd (%p26029_p9), [#allocation12], 4294965248  ;;  %v479_v0 = vld [vmem:[%s419_s27] sm:$0xff]  ;;  %v481_v1 = vld [vmem:[%s419_s27 + $0x10] sm:$0xff]  ;;  %v553_v56 = vlaneseq  ;;  %s18436_s21 = smov 96   ;;  %s18437_s12 = smov 112  }
  0xc9   : > { %v480_v2 = vld [vmem:[%s419_s27 + $0x8] sm:$0xff]  ;;  %v18776_v3 = vunpack.c.l.bf16 %v479_v0  ;;  %v18778_v4 = vunpack.c.h.bf16 %v479_v0  ;;  %v18780_v5 = vunpack.c.l.bf16 %v481_v1  ;;  %v18782_v6 = vunpack.c.h.bf16 %v481_v1  ;;  %v482_v7 = vld [vmem:[%s419_s27 + $0x18] sm:$0xff]  ;;  %v483_v8 = vld [vmem:[%s419_s27 + $0x20] sm:$0xff]  ;;  %s18438_s13 = smov 80   ;;  %s18439_s25 = smov 64  }
  0xca   : > { %v18784_v9 = vunpack.c.l.bf16 %v480_v2  ;;  %v18786_v10 = vunpack.c.h.bf16 %v480_v2  ;;  %v18788_v11 = vunpack.c.l.bf16 %v482_v7  ;;  %v18790_v12 = vunpack.c.h.bf16 %v482_v7  ;;  %v484_v13 = vld [vmem:[%s419_s27 + $0x28] sm:$0xff]  ;;  %v485_v16 = vld [vmem:[%s419_s27 + $0x30] sm:$0xff]  ;;  %v486_v19 = vld [vmem:[%s419_s27 + $0x38] sm:$0xff]  ;;  %s18440_s26 = smov 48   ;;  %s18441_s29 = smov 32  }
  0xcb   : > { %26030 = vst [vmem:[#allocation19_spill] sm:$0xff] %v18776_v3  ;;  %26031 = vst [vmem:[#allocation20_spill] sm:$0xff] %v18778_v4  ;;  %v504_v14 = vadd.f32 %v18778_v4, %v18776_v3  ;;  %v510_v15 = vadd.f32 %v18782_v6, %v18780_v5  ;;  %v18796_v17 = vunpack.c.l.bf16 %v483_v8  ;;  %v18798_v18 = vunpack.c.h.bf16 %v483_v8  ;;  %v17754_v32 = vld [vmem:[#allocation7 + $0x4] ss:$12 sps:$4 sm:$0xff]   ;;  %v17756_v33 = vld [vmem:[#allocation7] ss:$12 sps:$4 sm:$0xff]  }
  0xcc   : > { %26032 = vst [vmem:[#allocation21_spill] sm:$0xff] %v18780_v5  ;;  %26033 = vst [vmem:[#allocation22_spill] sm:$0xff] %v18782_v6  ;;  %v507_v20 = vadd.f32 %v18786_v10, %v18784_v9  ;;  %v513_v21 = vadd.f32 %v18790_v12, %v18788_v11  ;;  %v18804_v22 = vunpack.c.l.bf16 %v484_v13  ;;  %v18806_v23 = vunpack.c.h.bf16 %v484_v13  ;;  %v17757_v34 = vld [vmem:[#allocation7 + $0x1c] ss:$12 sps:$4 sm:$0xff]   ;;  %1004 = vmatprep.subr.bf16.mxu0 %v17754_v32  ;;  %v17759_v35 = vld [vmem:[#allocation7 + $0x18] ss:$12 sps:$4 sm:$0xff]  }
  0xcd   : > { %26034 = vst [vmem:[#allocation23_spill] sm:$0xff] %v18784_v9  ;;  %26035 = vst [vmem:[#allocation24_spill] sm:$0xff] %v18786_v10  ;;  %505 = vadd.xlane.f32.xlu0 %v504_v14  ;;  %511 = vadd.xlane.f32.xlu1 %v510_v15  ;;  %v516_v24 = vadd.f32 %v18798_v18, %v18796_v17  ;;  %v18810_v25 = vunpack.c.l.bf16 %v485_v16  ;;  %v18814_v27 = vunpack.c.h.bf16 %v485_v16  ;;  %v18816_v28 = vunpack.c.l.bf16 %v486_v19  ;;  %v17760_v36 = vld [vmem:[#allocation7 + $0x34] ss:$12 sps:$4 sm:$0xff]   ;;  %v17762_v39 = vld [vmem:[#allocation7 + $0x30] ss:$12 sps:$4 sm:$0xff]  }
  0xce   : > { %26036 = vst [vmem:[#allocation25_spill] sm:$0xff] %v18788_v11  ;;  %26037 = vst [vmem:[#allocation26_spill] sm:$0xff] %v18790_v12  ;;  %v519_v26 = vadd.f32 %v18806_v23, %v18804_v22  ;;  %v18818_v29 = vunpack.c.h.bf16 %v486_v19  ;;  %1005 = vmatpush1.bf16.msra.mxu0 %v17756_v33  ;;  %v17780_v37 = vld [vmem:[#allocation7 + $0xc8] ss:$12 sps:$4 sm:$0xff]   ;;  %v17785_v40 = vld [vmem:[#allocation7 + $0xe0] ss:$12 sps:$4 sm:$0xff]  }
  0xcf   : > { %26038 = vst [vmem:[#allocation27_spill] sm:$0xff] %v18796_v17  ;;  %26039 = vst [vmem:[#allocation28_spill] sm:$0xff] %v18798_v18  ;;  %v522_v30 = vadd.f32 %v18814_v27, %v18810_v25  ;;  %1006 = vmatprep.subr.bf16.mxu0 %v17757_v34  ;;  %v17782_v38 = vld [vmem:[#allocation7 + $0x8] ss:$12 sps:$4 sm:$0xff]   ;;  %17161 = vmatprep.subr.bf16.mxu1 %v17780_v37  ;;  %v17763_v41 = vld [vmem:[#allocation7 + $0x4c] ss:$12 sps:$4 sm:$0xff]  }
  0xd0   : > { %26040 = vst [vmem:[#allocation29_spill] sm:$0xff] %v18804_v22  ;;  %26041 = vst [vmem:[#allocation30_spill] sm:$0xff] %v18806_v23  ;;  %v525_v31 = vadd.f32 %v18818_v29, %v18816_v28  ;;  %17162 = vmatpush3.bf16.msra.mxu1 %v17782_v38  ;;  %v17787_v42 = vld [vmem:[#allocation7 + $0x20] ss:$12 sps:$4 sm:$0xff]   ;;  %v17765_v43 = vld [vmem:[#allocation7 + $0x48] ss:$12 sps:$4 sm:$0xff]  }
  0xd1   : > { %26042 = vst [vmem:[#allocation31_spill] sm:$0xff] %v18810_v25  ;;  %508 = vadd.xlane.f32.xlu0 %v507_v20  ;;  %514 = vadd.xlane.f32.xlu1 %v513_v21  ;;  %26043 = vst [vmem:[#allocation32_spill] sm:$0xff] %v18814_v27  ;;  %v17766_v44 = vld [vmem:[#allocation7 + $0x64] ss:$12 sps:$4 sm:$0xff]   ;;  %v17768_v45 = vld [vmem:[#allocation7 + $0x60] ss:$12 sps:$4 sm:$0xff]  }
  0xd2   : > { %26044 = vst [vmem:[#allocation33_spill] sm:$0xff] %v18816_v28  ;;  %26045 = vst [vmem:[#allocation34_spill] sm:$0xff] %v18818_v29  ;;  %1007 = vmatpush1.bf16.msra.mxu0 %v17759_v35  ;;  %17163 = vmatprep.subr.bf16.mxu1 %v17785_v40  ;;  %v17769_v46 = vld [vmem:[#allocation7 + $0x7c] ss:$12 sps:$4 sm:$0xff]   ;;  %v17771_v47 = vld [vmem:[#allocation7 + $0x78] ss:$12 sps:$4 sm:$0xff]  }
  0xd3   : > { %1008 = vmatprep.subr.bf16.mxu0 %v17760_v36  ;;  %v17772_v48 = vld [vmem:[#allocation7 + $0x94] ss:$12 sps:$4 sm:$0xff]   ;;  %v17774_v49 = vld [vmem:[#allocation7 + $0x90] ss:$12 sps:$4 sm:$0xff]   ;;  %v17775_v50 = vld [vmem:[#allocation7 + $0xac] ss:$12 sps:$4 sm:$0xff]  }
  0xd4   : > { %17164 = vmatpush3.bf16.msra.mxu1 %v17787_v42  ;;  %v17777_v51 = vld [vmem:[#allocation7 + $0xa8] ss:$12 sps:$4 sm:$0xff]   ;;  %v17778_v52 = vld [vmem:[#allocation7 + $0xc4] ss:$12 sps:$4 sm:$0xff]   ;;  %v17781_v53 = vld [vmem:[#allocation7 + $0xc0] ss:$12 sps:$4 sm:$0xff]  }
  0xd5   : > { %517 = vadd.xlane.f32.xlu0 %v516_v24  ;;  %520 = vadd.xlane.f32.xlu1 %v519_v26  ;;  %v17783_v54 = vld [vmem:[#allocation7 + $0xdc] ss:$12 sps:$4 sm:$0xff]   ;;  %v17786_v55 = vld [vmem:[#allocation7 + $0xd8] ss:$12 sps:$4 sm:$0xff]   ;;  %v18824_v57 = vshrl.u32 %v553_v56, 7  ;;  %s18442_s30 = smov 16  }
  0xd6   : > { %1009 = vmatpush1.bf16.msra.mxu0 %v17762_v39  ;;  %v503_v60 = vld [vmem:[%s25521_s1] sm:$0x3]  ;;  %vm8558_vm0 = vcmask 130048   ;;  %vm9175_vm1 = vcmask 523264   ;;  %vm18446_vm2 = vmmov 0   ;;  %vm15880_vm3 = vcmask 261120  }
  0xd7   : > { %1010 = vmatprep.subr.bf16.mxu0 %v17763_v41  ;;  %v18827_v58 = vsub.s32 0, %v18824_v57  ;;  %v18830_v59 = vsub.s32 1, %v18824_v57  ;;  %vm15889_vm4 = vcmask 392192   ;;  %vm15906_vm5 = vcmask 654336   ;;  %s27018_s22 = sld [smem:[#allocation239_spill]]  ;;  %p27021_p4 = scmp.ne.s32.totalorder %s26020_s11, 0 }
  0xd8   : > { %vm15915_vm6 = vcmask 785408   ;;  %vm15924_vm7 = vcmask 916480   ;;  %s18448_s2 = smov [#allocation13]  }
  0xd9   : > { %523 = vadd.xlane.f32.xlu0 %v522_v30  ;;  %526 = vadd.xlane.f32.xlu1 %v525_v31  ;;  %26046 = vst [vmem:[#allocation35_spill] sm:$0xff] %v18827_v58  ;;  %26047 = vst [vmem:[#allocation36_spill] sm:$0xff] %v18830_v59  ;;  %v18836_v1 = vrot.slane %v503_v60, %v18827_v58  ;;  %v18839_v2 = vrot.slane %v503_v60, %v18830_v59  ;;  %s18348_s24 = sshll.u32 %s18448_s2, 4  ;;  %s18349_s24 = int_to_ptr.vmem [resolvable:$false] %s18348_s24 }
  0xda   : > { %1011 = vmatpush1.bf16.msra.mxu0 %v17765_v43 }
  0xdb   : > { %1012 = vmatprep.subr.bf16.mxu0 %v17766_v44  ;;  %26048 = vst [vmem:[#allocation37_spill] sm:$0xff] %v18836_v1  ;;  %26049 = vst [vmem:[#allocation38_spill] sm:$0xff] %v18839_v2 }
  0xde   : > { %1013 = vmatpush1.bf16.msra.mxu0 %v17768_v45 }
  0xdf   : > { %1014 = vmatprep.subr.bf16.mxu0 %v17769_v46 }
  0xe2   : > { %1015 = vmatpush1.bf16.msra.mxu0 %v17771_v47 }
  0xe3   : > { %1016 = vmatprep.subr.bf16.mxu0 %v17772_v48 }
  0xe6   : > { %1017 = vmatpush1.bf16.msra.mxu0 %v17774_v49 }
  0xe7   : > { %1018 = vmatprep.subr.bf16.mxu0 %v17775_v50 }
  0xea   : > { %1019 = vmatpush1.bf16.msra.mxu0 %v17777_v51 }
  0xeb   : > { %1020 = vmatprep.subr.bf16.mxu0 %v17778_v52 }
  0xee   : > { %1021 = vmatpush1.bf16.msra.mxu0 %v17781_v53 }
  0xef   : > { %1022 = vmatprep.subr.bf16.mxu0 %v17783_v54 }
  0xf2   : > { %1023 = vmatpush1.bf16.msra.mxu0 %v17786_v55 }
 0x15a   : > { %v506_v61 = vpop.xlane.xlu0 %505  ;;  %v512_v62 = vpop.xlane.xlu1 %511 }
 0x15b   : > { %v528_v63 = vmul.f32 0.0069444445, %v506_v61  ;;  %v530_v0 = vmul.f32 0.0069444445, %v512_v62 }
 0x15d   : > { %v536_v7 = vsub.f32 %v18776_v3, %v528_v63  ;;  %v537_v8 = vsub.f32 %v18778_v4, %v528_v63  ;;  %v540_v13 = vsub.f32 %v18780_v5, %v530_v0  ;;  %v541_v14 = vsub.f32 %v18782_v6, %v530_v0 }
 0x15e   : > { %v509_v15 = vpop.xlane.xlu0 %508  ;;  %v515_v16 = vpop.xlane.xlu1 %514 }
 0x15f   : > { %v529_v19 = vmul.f32 0.0069444445, %v509_v15  ;;  %v531_v20 = vmul.f32 0.0069444445, %v515_v16  ;;  %v18846_v21 = vmul.f32 %v18836_v1, %v536_v7  ;;  %v18849_v24 = vmul.f32 %v18839_v2, %v537_v8 }
 0x160   : > { %v18852_v26 = vmul.f32 %v18836_v1, %v540_v13  ;;  %v18855_v30 = vmul.f32 %v18839_v2, %v541_v14 }
 0x161   : > { %v538_v31 = vsub.f32 %v18784_v9, %v529_v19  ;;  %v539_v32 = vsub.f32 %v18786_v10, %v529_v19  ;;  %v542_v33 = vsub.f32 %v18788_v11, %v531_v20  ;;  %v543_v34 = vsub.f32 %v18790_v12, %v531_v20 }
 0x162   : > { %v518_v35 = vpop.xlane.xlu0 %517  ;;  %v579_v36 = vmul.f32 %v18846_v21, %v18846_v21  ;;  %v580_v37 = vmul.f32 %v18849_v24, %v18849_v24  ;;  %v521_v38 = vpop.xlane.xlu1 %520  ;;  %v583_v39 = vmul.f32 %v18852_v26, %v18852_v26  ;;  %v584_v40 = vmul.f32 %v18855_v30, %v18855_v30 }
 0x163   : > { %v532_v41 = vmul.f32 0.0069444445, %v518_v35  ;;  %v533_v42 = vmul.f32 0.0069444445, %v521_v38  ;;  %v18870_v43 = vmul.f32 %v18836_v1, %v538_v31  ;;  %v18873_v44 = vmul.f32 %v18839_v2, %v539_v32 }
 0x164   : > { %v595_v45 = vadd.f32 %v580_v37, %v579_v36  ;;  %v601_v46 = vadd.f32 %v584_v40, %v583_v39  ;;  %v18876_v47 = vmul.f32 %v18836_v1, %v542_v33  ;;  %v18879_v48 = vmul.f32 %v18839_v2, %v543_v34 }
 0x165   : > { %v544_v49 = vsub.f32 %v18796_v17, %v532_v41  ;;  %v545_v50 = vsub.f32 %v18798_v18, %v532_v41  ;;  %v546_v51 = vsub.f32 %v18804_v22, %v533_v42  ;;  %v547_v52 = vsub.f32 %v18806_v23, %v533_v42 }
 0x166   : > { %596 = vadd.xlane.f32.xlu0 %v595_v45  ;;  %v524_v53 = vpop.xlane.xlu0 %523  ;;  %v581_v54 = vmul.f32 %v18870_v43, %v18870_v43  ;;  %v582_v55 = vmul.f32 %v18873_v44, %v18873_v44  ;;  %v527_v56 = vpop.xlane.xlu1 %526  ;;  %v585_v60 = vmul.f32 %v18876_v47, %v18876_v47  ;;  %v586_v61 = vmul.f32 %v18879_v48, %v18879_v48 }
 0x167   : > { %v534_v62 = vmul.f32 0.0069444445, %v524_v53  ;;  %v535_v63 = vmul.f32 0.0069444445, %v527_v56  ;;  %v18894_v0 = vmul.f32 %v18836_v1, %v544_v49  ;;  %v18897_v7 = vmul.f32 %v18839_v2, %v545_v50  ;;  %v17790_v53 = vld [vmem:[#allocation7 + $0xf8] ss:$12 sps:$4 sm:$0xff]  }
 0x168   : > { %v598_v8 = vadd.f32 %v582_v55, %v581_v54  ;;  %v604_v13 = vadd.f32 %v586_v61, %v585_v60  ;;  %v18900_v14 = vmul.f32 %v18836_v1, %v546_v51  ;;  %v18903_v15 = vmul.f32 %v18839_v2, %v547_v52  ;;  %v17788_v52 = vld [vmem:[#allocation7 + $0xf4] ss:$12 sps:$4 sm:$0xff]   ;;  %v17791_v54 = vld [vmem:[#allocation7 + $0xf0] ss:$12 sps:$4 sm:$0xff]   ;;  %v17792_v55 = vld [vmem:[#allocation7 + $0x38] ss:$12 sps:$4 sm:$0xff]   ;;  %17165 = vmatprep.subr.bf16.mxu1 %v17790_v53 }
 0x169   : > { %v548_v16 = vsub.f32 %v18810_v25, %v534_v62  ;;  %v549_v19 = vsub.f32 %v18814_v27, %v534_v62  ;;  %v550_v20 = vsub.f32 %v18816_v28, %v535_v63  ;;  %v551_v31 = vsub.f32 %v18818_v29, %v535_v63  ;;  %1024 = vmatprep.subr.bf16.mxu0 %v17788_v52  ;;  %v17793_v56 = vld [vmem:[#allocation7 + $0x10c] ss:$12 sps:$4 sm:$0xff]   ;;  %v17795_v60 = vld [vmem:[#allocation7 + $0x110] ss:$12 sps:$4 sm:$0xff]   ;;  %v17796_v61 = vld [vmem:[#allocation7 + $0x108] ss:$12 sps:$4 sm:$0xff]  }
 0x16a   : > { %602 = vadd.xlane.f32.xlu0 %v601_v46  ;;  %599 = vadd.xlane.f32.xlu1 %v598_v8  ;;  %v587_v32 = vmul.f32 %v18894_v0, %v18894_v0  ;;  %v588_v33 = vmul.f32 %v18897_v7, %v18897_v7  ;;  %v589_v34 = vmul.f32 %v18900_v14, %v18900_v14  ;;  %v17797_v62 = vld [vmem:[#allocation7 + $0x50] ss:$12 sps:$4 sm:$0xff]   ;;  %v17800_v8 = vld [vmem:[#allocation7 + $0x128] ss:$12 sps:$4 sm:$0xff]  }
 0x16b   : > { %v590_v35 = vmul.f32 %v18903_v15, %v18903_v15  ;;  %v18918_v36 = vmul.f32 %v18836_v1, %v548_v16  ;;  %v18921_v37 = vmul.f32 %v18839_v2, %v549_v19  ;;  %v18924_v38 = vmul.f32 %v18836_v1, %v550_v20  ;;  %1025 = vmatpush1.bf16.msra.mxu0 %v17791_v54  ;;  %v17798_v63 = vld [vmem:[#allocation7 + $0x124] ss:$12 sps:$4 sm:$0xff]   ;;  %v17802_v16 = vld [vmem:[#allocation7 + $0x68] ss:$12 sps:$4 sm:$0xff]   ;;  %v17805_v20 = vld [vmem:[#allocation7 + $0x140] ss:$12 sps:$4 sm:$0xff]  }
 0x16c   : > { %v607_v39 = vadd.f32 %v588_v33, %v587_v32  ;;  %v18927_v40 = vmul.f32 %v18839_v2, %v551_v31  ;;  %17166 = vmatpush3.bf16.msra.mxu1 %v17792_v55  ;;  %1026 = vmatprep.subr.bf16.mxu0 %v17793_v56  ;;  %v17803_v19 = vld [vmem:[#allocation7 + $0x13c] ss:$12 sps:$4 sm:$0xff]   ;;  %v17806_v31 = vld [vmem:[#allocation7 + $0x138] ss:$12 sps:$4 sm:$0xff]   ;;  %v17807_v32 = vld [vmem:[#allocation7 + $0x80] ss:$12 sps:$4 sm:$0xff]  }
 0x16d   : > { %v591_v41 = vmul.f32 %v18918_v36, %v18918_v36  ;;  %v592_v42 = vmul.f32 %v18921_v37, %v18921_v37  ;;  %v610_v45 = vadd.f32 %v590_v35, %v589_v34  ;;  %v593_v46 = vmul.f32 %v18924_v38, %v18924_v38  ;;  %17167 = vmatprep.subr.bf16.mxu1 %v17795_v60  ;;  %v17808_v33 = vld [vmem:[#allocation7 + $0x154] ss:$12 sps:$4 sm:$0xff]   ;;  %v17810_v34 = vld [vmem:[#allocation7 + $0x158] ss:$12 sps:$4 sm:$0xff]   ;;  %v17811_v35 = vld [vmem:[#allocation7 + $0x150] ss:$12 sps:$4 sm:$0xff]  }
 0x16e   : > { %605 = vadd.xlane.f32.xlu1 %v604_v13  ;;  %608 = vadd.xlane.f32.xlu0 %v607_v39  ;;  %v594_v49 = vmul.f32 %v18927_v40, %v18927_v40  ;;  %v17801_v13 = vld [vmem:[#allocation7 + $0x120] ss:$12 sps:$4 sm:$0xff]   ;;  %v17812_v39 = vld [vmem:[#allocation7 + $0x98] ss:$12 sps:$4 sm:$0xff]  }
 0x16f   : > { %v613_v50 = vadd.f32 %v592_v42, %v591_v41  ;;  %1027 = vmatpush1.bf16.msra.mxu0 %v17796_v61  ;;  %v17813_v41 = vld [vmem:[#allocation7 + $0x16c] ss:$12 sps:$4 sm:$0xff]   ;;  %v17815_v42 = vld [vmem:[#allocation7 + $0x170] ss:$12 sps:$4 sm:$0xff]  }
 0x170   : > { %v616_v51 = vadd.f32 %v594_v49, %v593_v46  ;;  %17168 = vmatpush3.bf16.msra.mxu1 %v17797_v62  ;;  %1028 = vmatprep.subr.bf16.mxu0 %v17798_v63  ;;  %v17817_v46 = vld [vmem:[#allocation7 + $0xb0] ss:$12 sps:$4 sm:$0xff]  }
 0x171   : > { %17169 = vmatprep.subr.bf16.mxu1 %v17800_v8 }
 0x172   : > { %611 = vadd.xlane.f32.xlu1 %v610_v45  ;;  %614 = vadd.xlane.f32.xlu0 %v613_v50  ;;  %v17816_v45 = vld [vmem:[#allocation7 + $0x168] ss:$12 sps:$4 sm:$0xff]  }
 0x173   : > { %1029 = vmatpush1.bf16.msra.mxu0 %v17801_v13 }
 0x174   : > { %17170 = vmatpush3.bf16.msra.mxu1 %v17802_v16  ;;  %1030 = vmatprep.subr.bf16.mxu0 %v17803_v19 }
 0x175   : > { %17171 = vmatprep.subr.bf16.mxu1 %v17805_v20 }
 0x176   : > { %617 = vadd.xlane.f32.xlu1 %v616_v51 }
 0x177   : > { %1031 = vmatpush1.bf16.msra.mxu0 %v17806_v31 }
 0x178   : > { %17172 = vmatpush3.bf16.msra.mxu1 %v17807_v32  ;;  %1032 = vmatprep.subr.bf16.mxu0 %v17808_v33 }
 0x179   : > { %17173 = vmatprep.subr.bf16.mxu1 %v17810_v34 }
 0x17b   : > { %1033 = vmatpush1.bf16.msra.mxu0 %v17811_v35 }
 0x17c   : > { %17174 = vmatpush3.bf16.msra.mxu1 %v17812_v39  ;;  %1034 = vmatprep.subr.bf16.mxu0 %v17813_v41 }
 0x17d   : > { %17175 = vmatprep.subr.bf16.mxu1 %v17815_v42 }
 0x17f   : > { %1035 = vmatpush1.bf16.msra.mxu0 %v17816_v45 }
 0x180   : > { %17176 = vmatpush3.bf16.msra.mxu1 %v17817_v46 }
 0x1f3   : > { %v597_v49 = vpop.xlane.xlu0 %596 }
 0x1f4   : > { %v619_v50 = vmul.f32 0.0069444445, %v597_v49 }
 0x1f6   : > { %v627_v51 = vadd.f32 1e-05, %v619_v50 }
 0x1f7   : > { %v600_v52 = vpop.xlane.xlu1 %599  ;;  %v603_v53 = vpop.xlane.xlu0 %602 }
 0x1f8   : > { %v620_v54 = vmul.f32 0.0069444445, %v600_v52  ;;  %v621_v55 = vmul.f32 0.0069444445, %v603_v53  ;;  %17882 = vrsqrt.f32 %v627_v51 }
 0x1fa   : > { %v628_v56 = vadd.f32 1e-05, %v620_v54  ;;  %v629_v60 = vadd.f32 1e-05, %v621_v55 }
 0x1fb   : > { %v606_v61 = vpop.xlane.xlu1 %605  ;;  %v609_v62 = vpop.xlane.xlu0 %608 }
 0x1fc   : > { %17884 = vrsqrt.f32 %v628_v56  ;;  %v622_v63 = vmul.f32 0.0069444445, %v606_v61  ;;  %v623_v8 = vmul.f32 0.0069444445, %v609_v62 }
 0x1fd   : > { %17886 = vrsqrt.f32 %v629_v60 }
 0x1fe   : > { %v630_v13 = vadd.f32 1e-05, %v622_v63  ;;  %v631_v16 = vadd.f32 1e-05, %v623_v8 }
 0x1ff   : > { %v612_v19 = vpop.xlane.xlu1 %611  ;;  %v615_v31 = vpop.xlane.xlu0 %614 }
 0x200   : > { %17888 = vrsqrt.f32 %v630_v13  ;;  %v624_v20 = vmul.f32 0.0069444445, %v612_v19  ;;  %v625_v35 = vmul.f32 0.0069444445, %v615_v31 }
 0x201   : > { %17890 = vrsqrt.f32 %v631_v16 }
 0x202   : > { %v632_v32 = vadd.f32 1e-05, %v624_v20  ;;  %v17883_v34 = vpop.eup %17882  ;;  %v633_v52 = vadd.f32 1e-05, %v625_v35 }
 0x203   : > { %v618_v33 = vpop.xlane.xlu1 %617  ;;  %v644_v45 = vmul.f32 %v17883_v34, %v18849_v24  ;;  %v643_v49 = vmul.f32 %v17883_v34, %v18846_v21 }
 0x204   : > { %17892 = vrsqrt.f32 %v632_v32  ;;  %v626_v39 = vmul.f32 0.0069444445, %v618_v33 }
 0x206   : > { %v17885_v41 = vpop.eup %17884  ;;  %v634_v42 = vadd.f32 1e-05, %v626_v39 }
 0x207   : > { %v646_v46 = vmul.f32 %v17885_v41, %v18873_v44  ;;  %v645_v50 = vmul.f32 %v17885_v41, %v18870_v43  ;;  %v17887_v51 = vpop.eup %17886 }
 0x208   : > { %17894 = vrsqrt.f32 %v634_v42  ;;  %v648_v56 = vmul.f32 %v17887_v51, %v18855_v30  ;;  %v647_v62 = vmul.f32 %v17887_v51, %v18852_v26 }
 0x209   : > { %v660_v53 = vpack.c.bf16 %v646_v46, %v644_v45  ;;  %v659_v54 = vpack.c.bf16 %v645_v50, %v643_v49  ;;  %17896 = vrsqrt.f32 %v633_v52  ;;  %v743_v50 = vsub.s32 2, %v18824_v57 }
 0x20a   : > { %v17889_v55 = vpop.eup %17888 }
 0x20b   : > { %1036 = vmatprep.mubr.bf16.mxu0 %v660_v53  ;;  %1109 = vmatprep.mubr.bf16.mxu1 %v660_v53  ;;  %v650_v60 = vmul.f32 %v17889_v55, %v18879_v48  ;;  %v17891_v24 = vpop.eup %17890  ;;  %v649_v43 = vmul.f32 %v17889_v55, %v18876_v47 }
 0x20c   : > { %1037 = vmatmul.mubr.bf16.vlgmr.msra.gmra.mrb[0].mxu0 %v659_v54  ;;  %1110 = vmatmul.mubr.bf16.vlgmr.msra.gmra.mrb[0].mxu1 %v659_v54  ;;  %v652_v63 = vmul.f32 %v17891_v24, %v18897_v7  ;;  %v651_v19 = vmul.f32 %v17891_v24, %v18894_v0 }
 0x20d   : > { %v662_v44 = vpack.c.bf16 %v650_v60, %v648_v56  ;;  %v661_v8 = vpack.c.bf16 %v649_v43, %v647_v62 }
 0x20e   : > { %v17893_v21 = vpop.eup %17892 }
 0x20f   : > { %1046 = vmatprep.mubr.bf16.mxu0 %v662_v44  ;;  %1117 = vmatprep.mubr.bf16.mxu1 %v662_v44  ;;  %v654_v61 = vmul.f32 %v17893_v21, %v18903_v15  ;;  %v653_v16 = vmul.f32 %v17893_v21, %v18900_v14  ;;  %v731_v14 = vld [vmem:[%s25524_s4] sm:$0x7] }
 0x210   : > { %v18957_v0 = vrot.slane %v731_v14, %v18827_v58  ;;  %v18963_v34 = vrot.slane %v731_v14, %v18830_v59  ;;  %v18989_v60 = vrot.slane %v731_v14, %v743_v50 }
 0x211   : > { %v664_v30 = vpack.c.bf16 %v654_v61, %v652_v63  ;;  %v663_v20 = vpack.c.bf16 %v653_v16, %v651_v19 }
 0x212   : > { %v17895_v13 = vpop.eup %17894 }
 0x213   : > { %v17897_v48 = vpop.eup %17896  ;;  %v658_v47 = vmul.f32 %v17895_v13, %v18927_v40  ;;  %v657_v7 = vmul.f32 %v17895_v13, %v18924_v38 }
 0x214   : > { %1047 = vmatmul.mubr.bf16.gmra.mrb[4].mxu0 %v661_v8  ;;  %1118 = vmatmul.mubr.bf16.gmra.mrb[4].mxu1 %v661_v8  ;;  %v656_v15 = vmul.f32 %v17897_v48, %v18921_v37  ;;  %v655_v31 = vmul.f32 %v17897_v48, %v18918_v36 }
 0x215   : > { %1056 = vmatprep.mubr.bf16.mxu0 %v664_v30  ;;  %1125 = vmatprep.mubr.bf16.mxu1 %v664_v30 }
 0x216   : > { %v666_v26 = vpack.c.bf16 %v658_v47, %v656_v15  ;;  %v665_v32 = vpack.c.bf16 %v657_v7, %v655_v31 }
 0x21c   : > { %1057 = vmatmul.mubr.bf16.gmra.mrb[8].mxu0 %v663_v20  ;;  %1126 = vmatmul.mubr.bf16.gmra.mrb[8].mxu1 %v663_v20 }
 0x21d   : > { %1066 = vmatprep.mubr.bf16.mxu0 %v666_v26  ;;  %1133 = vmatprep.mubr.bf16.mxu1 %v666_v26 }
 0x224   : > { %1067 = vmatmul.mubr.bf16.gmra.mrb[12].mxu0 %v665_v32  ;;  %1134 = vmatmul.mubr.bf16.gmra.mrb[12].mxu1 %v665_v32 }
 0x2df   : > { %v1038_v37 = vpop.f32.mrb[0].mxu0  ;;  %v17177_v40 = vpop.f32.mrb[0].mxu1 }
 0x2e0   : > { %v18960_v33 = vadd.f32 %v1038_v37, %v18957_v0  ;;  %v1040_v38 = vpop.f32.mrb[1].mxu0  ;;  %v17178_v36 = vpop.f32.mrb[1].mxu1 }
 0x2e1   : > { %v18965_v35 = vadd.f32 %v17178_v36, %v17177_v40  ;;  %v1042_v39 = vpop.f32.mrb[2].mxu0  ;;  %v17180_v41 = vpop.f32.mrb[2].mxu1  ;;  %v18976_v49 = vadd.f32 %v1040_v38, %v18963_v34 }
 0x2e2   : > { %v18967_v42 = vpop.f32.mrb[3].mxu0  ;;  %v17181_v45 = vpop.f32.mrb[3].mxu1  ;;  %1174 = vrot.lane.b32.xlu1 %v18960_v33, %s18436_s21  ;;  %1150 = vrot.lane.b32.xlu0 %v18960_v33, %s18437_s12  ;;  %v18984_v53 = vadd.f32 %v1042_v39, %v18957_v0 }
 0x2e3   : > { %v18973_v46 = vadd.f32 %v17181_v45, %v17180_v41 }
 0x2e6   : > { %2502 = vrot.lane.b32.xlu1 %v18976_v49, %s18436_s21  ;;  %1198 = vrot.lane.b32.xlu0 %v18960_v33, %s18438_s13 }
 0x2e7   : > { %v1048_v51 = vpop.f32.mrb[4].mxu0  ;;  %v17183_v52 = vpop.f32.mrb[4].mxu1 }
 0x2e8   : > { %v18987_v54 = vadd.f32 %v1048_v51, %v18957_v0  ;;  %v1050_v55 = vpop.f32.mrb[5].mxu0  ;;  %v17184_v56 = vpop.f32.mrb[5].mxu1 }
 0x2e9   : > { %v18992_v24 = vadd.f32 %v1050_v55, %v18963_v34  ;;  %v17185_v44 = vadd.f32 %v17184_v56, %v17183_v52  ;;  %v1052_v21 = vpop.f32.mrb[6].mxu0  ;;  %v17186_v43 = vpop.f32.mrb[6].mxu1 }
 0x2ea   : > { %26050 = vst [vmem:[#allocation39_spill] sm:$0xff] %v18987_v54  ;;  %v18995_v61 = vadd.f32 %v1052_v21, %v18957_v0  ;;  %1152 = vrot.lane.b32.xlu1 %v18984_v53, %s18437_s12  ;;  %1222 = vrot.lane.b32.xlu0 %v18960_v33, %s18439_s25  ;;  %v1054_v62 = vpop.f32.mrb[7].mxu0  ;;  %v17187_v63 = vpop.f32.mrb[7].mxu1 }
 0x2eb   : > { %v19002_v8 = vadd.f32 %v17185_v44, %v18989_v60  ;;  %v19005_v30 = vadd.f32 %v1054_v62, %v18963_v34  ;;  %v17188_v13 = vadd.f32 %v17187_v63, %v17186_v43 }
 0x2ec   : > { %26051 = vst [vmem:[#allocation40_spill] sm:$0xff] %v18995_v61 }
 0x2ed   : > { %26052 = vst [vmem:[#allocation41_spill] sm:$0xff] %v19002_v8  ;;  %v19008_v48 = vadd.f32 %v17188_v13, %v18989_v60 }
 0x2ee   : > { %1176 = vrot.lane.b32.xlu1 %v18984_v53, %s18436_s21  ;;  %1246 = vrot.lane.b32.xlu0 %v18960_v33, %s18440_s26 }
 0x2ef   : > { %26053 = vst [vmem:[#allocation42_spill] sm:$0xff] %v19008_v48  ;;  %v1058_v16 = vpop.f32.mrb[8].mxu0  ;;  %v17189_v47 = vpop.f32.mrb[8].mxu1 }
 0x2f0   : > { %v19015_v19 = vadd.f32 %v1058_v16, %v18957_v0  ;;  %v1060_v15 = vpop.f32.mrb[9].mxu0  ;;  %v17190_v20 = vpop.f32.mrb[9].mxu1 }
 0x2f1   : > { %v19018_v26 = vadd.f32 %v1060_v15, %v18963_v34  ;;  %v17191_v7 = vadd.f32 %v17190_v20, %v17189_v47  ;;  %v1062_v31 = vpop.f32.mrb[10].mxu0  ;;  %v17192_v32 = vpop.f32.mrb[10].mxu1 }
 0x2f2   : > { %26054 = vst [vmem:[#allocation43_spill] sm:$0xff] %v19015_v19  ;;  %v19021_v14 = vadd.f32 %v1062_v31, %v18957_v0  ;;  %1200 = vrot.lane.b32.xlu1 %v18984_v53, %s18438_s13  ;;  %1270 = vrot.lane.b32.xlu0 %v18960_v33, %s18441_s29  ;;  %v1064_v37 = vpop.f32.mrb[11].mxu0  ;;  %v17193_v40 = vpop.f32.mrb[11].mxu1 }
 0x2f3   : > { %26055 = vst [vmem:[#allocation44_spill] sm:$0xff] %v19018_v26  ;;  %v19028_v38 = vadd.f32 %v17191_v7, %v18989_v60  ;;  %v19031_v36 = vadd.f32 %v1064_v37, %v18963_v34  ;;  %v17194_v39 = vadd.f32 %v17193_v40, %v17192_v32 }
 0x2f4   : > { %26056 = vst [vmem:[#allocation45_spill] sm:$0xff] %v19021_v14 }
 0x2f5   : > { %26057 = vst [vmem:[#allocation46_spill] sm:$0xff] %v19028_v38  ;;  %26058 = vst [vmem:[#allocation47_spill] sm:$0xff] %v19031_v36  ;;  %v19034_v41 = vadd.f32 %v17194_v39, %v18989_v60  ;;  %v18443_v39 = vmov 1983009808  }
 0x2f6   : > { %1224 = vrot.lane.b32.xlu1 %v18984_v53, %s18439_s25  ;;  %1294 = vrot.lane.b32.xlu0 %v18960_v33, %s18442_s30 }
 0x2f7   : > { %26059 = vst [vmem:[#allocation48_spill] sm:$0xff] %v19034_v41  ;;  %v1068_v45 = vpop.f32.mrb[12].mxu0  ;;  %v17195_v50 = vpop.f32.mrb[12].mxu1 }
 0x2f8   : > { %v19041_v51 = vadd.f32 %v1068_v45, %v18957_v0  ;;  %v1070_v52 = vpop.f32.mrb[13].mxu0  ;;  %v17196_v55 = vpop.f32.mrb[13].mxu1  ;;  %v1321_v45 = vunpack.c.l.s4 %v18443_v39 }
 0x2f9   : > { %v19044_v56 = vadd.f32 %v1070_v52, %v18963_v34  ;;  %v17197_v44 = vadd.f32 %v17196_v55, %v17195_v50  ;;  %v1072_v21 = vpop.f32.mrb[14].mxu0  ;;  %v17198_v43 = vpop.f32.mrb[14].mxu1 }
 0x2fa   : > { %26060 = vst [vmem:[#allocation49_spill] sm:$0xff] %v19041_v51  ;;  %v19047_v62 = vadd.f32 %v1072_v21, %v18957_v0  ;;  %1248 = vrot.lane.b32.xlu1 %v18984_v53, %s18440_s26  ;;  %2478 = vrot.lane.b32.xlu0 %v18976_v49, %s18437_s12  ;;  %v1074_v63 = vpop.f32.mrb[15].mxu0  ;;  %v17199_v13 = vpop.f32.mrb[15].mxu1  ;;  %v19072_v0 = vadd.f32 %v18967_v42, %v18963_v34  ;;  %v1322_v55 = vunpack.c.0.s8 %v1321_v45 }
 0x2fb   : > { %26061 = vst [vmem:[#allocation50_spill] sm:$0xff] %v19044_v56  ;;  %v19054_v16 = vadd.f32 %v17197_v44, %v18989_v60  ;;  %v19057_v47 = vadd.f32 %v1074_v63, %v18963_v34  ;;  %v17200_v15 = vadd.f32 %v17199_v13, %v17198_v43  ;;  %v19088_v34 = vadd.f32 %v18965_v35, %v18989_v60 }
 0x2fc   : > { %26062 = vst [vmem:[#allocation51_spill] sm:$0xff] %v19047_v62  ;;  %v19112_v35 = vadd.f32 %v18973_v46, %v18989_v60  ;;  %v18444_v44 = vmov 1934713408   ;;  %v19193_v2 = vsub.s32 %v1322_v55, %v18824_v57 }
 0x2fd   : > { %26063 = vst [vmem:[#allocation52_spill] sm:$0xff] %v19054_v16  ;;  %26064 = vst [vmem:[#allocation53_spill] sm:$0xff] %v19057_v47  ;;  %v19060_v20 = vadd.f32 %v17200_v15, %v18989_v60  ;;  %v1385_v21 = vunpack.c.l.s4 %v18444_v44 }
 0x2fe   : > { %1272 = vrot.lane.b32.xlu1 %v18984_v53, %s18441_s29  ;;  %2526 = vrot.lane.b32.xlu0 %v18976_v49, %s18438_s13  ;;  %26066 = vst [vmem:[#allocation55_spill] sm:$0xff] %v19112_v35  ;;  %26067 = vst [vmem:[#allocation56_spill] sm:$0xff] %v19193_v2 }
 0x2ff   : > { %26065 = vst [vmem:[#allocation54_spill] sm:$0xff] %v19060_v20  ;;  %v1386_v44 = vunpack.c.0.s8 %v1385_v21 }
 0x301   : > { %v19211_v21 = vsub.s32 %v1386_v44, %v18824_v57 }
 0x302   : > { %1296 = vrot.lane.b32.xlu1 %v18984_v53, %s18442_s30  ;;  %2550 = vrot.lane.b32.xlu0 %v18976_v49, %s18439_s25 }
 0x303   : > { %26068 = vst [vmem:[#allocation57_spill] sm:$0xff] %v19211_v21 }
 0x306   : > { %2480 = vrot.lane.b32.xlu1 %v19072_v0, %s18437_s12  ;;  %2574 = vrot.lane.b32.xlu0 %v18976_v49, %s18440_s26 }
 0x30a   : > { %2504 = vrot.lane.b32.xlu1 %v19072_v0, %s18436_s21  ;;  %2598 = vrot.lane.b32.xlu0 %v18976_v49, %s18441_s29 }
 0x30e   : > { %2528 = vrot.lane.b32.xlu1 %v19072_v0, %s18438_s13  ;;  %2622 = vrot.lane.b32.xlu0 %v18976_v49, %s18442_s30 }
 0x312   : > { %2552 = vrot.lane.b32.xlu1 %v19072_v0, %s18439_s25  ;;  %3806 = vrot.lane.b32.xlu0 %v19088_v34, %s18437_s12 }
 0x316   : > { %2576 = vrot.lane.b32.xlu1 %v19072_v0, %s18440_s26  ;;  %3854 = vrot.lane.b32.xlu0 %v19088_v34, %s18438_s13 }
 0x31a   : > { %2600 = vrot.lane.b32.xlu1 %v19072_v0, %s18441_s29  ;;  %3878 = vrot.lane.b32.xlu0 %v19088_v34, %s18439_s25 }
 0x31e   : > { %2624 = vrot.lane.b32.xlu1 %v19072_v0, %s18442_s30  ;;  %3902 = vrot.lane.b32.xlu0 %v19088_v34, %s18440_s26 }
 0x322   : > { %3830 = vrot.lane.b32.xlu1 %v19088_v34, %s18436_s21  ;;  %3926 = vrot.lane.b32.xlu0 %v19088_v34, %s18441_s29 }
 0x326   : > { %3808 = vrot.lane.b32.xlu1 %v19112_v35, %s18437_s12  ;;  %3950 = vrot.lane.b32.xlu0 %v19088_v34, %s18442_s30 }
 0x32a   : > { %3832 = vrot.lane.b32.xlu1 %v19112_v35, %s18436_s21  ;;  %1154 = vrot.lane.b32.xlu0 %v18987_v54, %s18437_s12 }
 0x32e   : > { %3856 = vrot.lane.b32.xlu1 %v19112_v35, %s18438_s13  ;;  %1178 = vrot.lane.b32.xlu0 %v18987_v54, %s18436_s21 }
 0x332   : > { %3880 = vrot.lane.b32.xlu1 %v19112_v35, %s18439_s25  ;;  %1202 = vrot.lane.b32.xlu0 %v18987_v54, %s18438_s13 }
 0x336   : > { %3904 = vrot.lane.b32.xlu1 %v19112_v35, %s18440_s26  ;;  %1226 = vrot.lane.b32.xlu0 %v18987_v54, %s18439_s25 }
 0x33a   : > { %3928 = vrot.lane.b32.xlu1 %v19112_v35, %s18441_s29  ;;  %1250 = vrot.lane.b32.xlu0 %v18987_v54, %s18440_s26 }
 0x33e   : > { %3952 = vrot.lane.b32.xlu1 %v19112_v35, %s18442_s30  ;;  %1274 = vrot.lane.b32.xlu0 %v18987_v54, %s18441_s29 }
 0x342   : > { %1156 = vrot.lane.b32.xlu1 %v18995_v61, %s18437_s12  ;;  %1298 = vrot.lane.b32.xlu0 %v18987_v54, %s18442_s30 }
 0x346   : > { %1180 = vrot.lane.b32.xlu1 %v18995_v61, %s18436_s21  ;;  %2482 = vrot.lane.b32.xlu0 %v18992_v24, %s18437_s12 }
 0x34a   : > { %1204 = vrot.lane.b32.xlu1 %v18995_v61, %s18438_s13  ;;  %2506 = vrot.lane.b32.xlu0 %v18992_v24, %s18436_s21 }
 0x34e   : > { %1228 = vrot.lane.b32.xlu1 %v18995_v61, %s18439_s25  ;;  %2530 = vrot.lane.b32.xlu0 %v18992_v24, %s18438_s13 }
 0x352   : > { %1252 = vrot.lane.b32.xlu1 %v18995_v61, %s18440_s26  ;;  %2554 = vrot.lane.b32.xlu0 %v18992_v24, %s18439_s25 }
 0x354   : > { %v1175_v42 = vpop.permute.xlu1 %1174  ;;  %v1151_v46 = vpop.permute.xlu0 %1150 }
 0x355   : > { %v1318_v1 = vcombine.low %v18960_v33, %v1175_v42  ;;  %v1319_v45 = vcombine.high %v18960_v33, %v1175_v42 }
 0x356   : > { %1276 = vrot.lane.b32.xlu1 %v18995_v61, %s18441_s29  ;;  %2578 = vrot.lane.b32.xlu0 %v18992_v24, %s18440_s26 }
 0x358   : > { %v19166_v60 = vpop.permute.xlu1 %2502  ;;  %v1199_v7 = vpop.permute.xlu0 %1198 }
 0x359   : > { %v1334_v43 = vcombine.low %v1151_v46, %v1199_v7  ;;  %v1335_v63 = vcombine.high %v1151_v46, %v1199_v7 }
 0x35a   : > { %1300 = vrot.lane.b32.xlu1 %v18995_v61, %s18442_s30  ;;  %2602 = vrot.lane.b32.xlu0 %v18992_v24, %s18441_s29 }
 0x35b   : > { %v1342_v46 = vrot.slane %v1334_v43, %v19193_v2  ;;  %v1349_v7 = vrot.slane %v1335_v63, %v19193_v2 }
 0x35c   : > { %v19172_v31 = vpop.permute.xlu1 %1152  ;;  %v1223_v32 = vpop.permute.xlu0 %1222 }
 0x35e   : > { %2484 = vrot.lane.b32.xlu1 %v19005_v30, %s18437_s12  ;;  %2626 = vrot.lane.b32.xlu0 %v18992_v24, %s18442_s30 }
 0x360   : > { %v19178_v37 = vpop.permute.xlu1 %1176  ;;  %v1247_v40 = vpop.permute.xlu0 %1246 }
 0x361   : > { %v1454_v57 = vcombine.low %v18984_v53, %v19178_v37 }
 0x362   : > { %2508 = vrot.lane.b32.xlu1 %v19005_v30, %s18436_s21  ;;  %3810 = vrot.lane.b32.xlu0 %v19002_v8, %s18437_s12 }
 0x364   : > { %v19184_v50 = vpop.permute.xlu1 %1200  ;;  %v1271_v52 = vpop.permute.xlu0 %1270 }
 0x365   : > { %v1350_v13 = vcombine.low %v1223_v32, %v1271_v52  ;;  %v1351_v29 = vcombine.high %v1223_v32, %v1271_v52  ;;  %v1333_v52 = vrot.slane %v1319_v45, %v19193_v2  ;;  %v1470_v43 = vcombine.low %v19172_v31, %v19184_v50 }
 0x366   : > { %2532 = vrot.lane.b32.xlu1 %v19005_v30, %s18438_s13  ;;  %3834 = vrot.lane.b32.xlu0 %v19002_v8, %s18436_s21 }
 0x367   : > { %v1358_v55 = vrot.slane %v1350_v13, %v19193_v2  ;;  %v1365_v63 = vrot.slane %v1351_v29, %v19193_v2  ;;  %v1455_v29 = vcombine.high %v18984_v53, %v19178_v37 }
 0x368   : > { %v19190_v15 = vpop.permute.xlu1 %1224  ;;  %v1295_v39 = vpop.permute.xlu0 %1294 }
 0x369   : > { %v1366_v28 = vcombine.low %v1247_v40, %v1295_v39  ;;  %v1367_v27 = vcombine.high %v1247_v40, %v1295_v39  ;;  %v1326_v40 = vrot.slane %v1318_v1, %v19193_v2  ;;  %v1398_v39 = vcombine.low %v1333_v52, %v1349_v7 }
 0x36a   : > { %2556 = vrot.lane.b32.xlu1 %v19005_v30, %s18439_s25  ;;  %3858 = vrot.lane.b32.xlu0 %v19002_v8, %s18438_s13  ;;  %v1399_v1 = vcombine.high %v1333_v52, %v1349_v7 }
 0x36b   : > { %v1374_v25 = vrot.slane %v1366_v28, %v19193_v2  ;;  %v1381_v33 = vrot.slane %v1367_v27, %v19193_v2  ;;  %v1382_v27 = vcombine.low %v1326_v40, %v1342_v46  ;;  %v1383_v28 = vcombine.high %v1326_v40, %v1342_v46 }
 0x36c   : > { %v1249_v42 = vpop.permute.xlu1 %1248  ;;  %v19206_v32 = vpop.permute.xlu0 %2478  ;;  %v1471_v46 = vcombine.high %v19172_v31, %v19184_v50  ;;  %v1406_v40 = vrot.slane %v1398_v39, %v19211_v21  ;;  %v1413_v53 = vrot.slane %v1399_v1, %v19211_v21  ;;  %v1462_v31 = vrot.slane %v1454_v57, %v19193_v2 }
 0x36d   : > { %v1414_v13 = vcombine.low %v1358_v55, %v1374_v25  ;;  %v1415_v23 = vcombine.high %v1358_v55, %v1374_v25  ;;  %v1430_v45 = vcombine.low %v1365_v63, %v1381_v33  ;;  %v1431_v44 = vcombine.high %v1365_v63, %v1381_v33 }
 0x36e   : > { %2580 = vrot.lane.b32.xlu1 %v19005_v30, %s18440_s26  ;;  %3882 = vrot.lane.b32.xlu0 %v19002_v8, %s18439_s25  ;;  %v1478_v25 = vrot.slane %v1470_v43, %v19193_v2  ;;  %v1390_v7 = vrot.slane %v1382_v27, %v19211_v21  ;;  %v1397_v33 = vrot.slane %v1383_v28, %v19211_v21 }
 0x36f   : > { %v1422_v55 = vrot.slane %v1414_v13, %v19211_v21  ;;  %v1429_v52 = vrot.slane %v1415_v23, %v19211_v21  ;;  %v1438_v37 = vrot.slane %v1430_v45, %v19211_v21  ;;  %v1445_v50 = vrot.slane %v1431_v44, %v19211_v21 }
 0x370   : > { %v1273_v22 = vpop.permute.xlu1 %1272  ;;  %v19222_v18 = vpop.permute.xlu0 %2526  ;;  %v1469_v13 = vrot.slane %v1455_v29, %v19193_v2  ;;  %v1485_v27 = vrot.slane %v1471_v46, %v19193_v2  ;;  %v1518_v39 = vcombine.low %v1462_v31, %v1478_v25  ;;  %v1519_v17 = vcombine.high %v1462_v31, %v1478_v25 }
 0x371   : > { %v1486_v23 = vcombine.low %v19190_v15, %v1273_v22  ;;  %v1487_v28 = vcombine.high %v19190_v15, %v1273_v22  ;;  %v1446_v1 = vcombine.low %v1390_v7, %v1422_v55  ;;  %v1447_v12 = vcombine.high %v1390_v7, %v1422_v55 }
 0x372   : > { %2604 = vrot.lane.b32.xlu1 %v19005_v30, %s18441_s29  ;;  %3906 = vrot.lane.b32.xlu0 %v19002_v8, %s18440_s26  ;;  %v1448_v57 = vcombine.low %v1397_v33, %v1429_v52  ;;  %v1449_v45 = vcombine.high %v1397_v33, %v1429_v52  ;;  %v1450_v29 = vcombine.low %v1406_v40, %v1438_v37 }
 0x373   : > { %v1451_v46 = vcombine.high %v1406_v40, %v1438_v37  ;;  %v1452_v6 = vcombine.low %v1413_v53, %v1445_v50  ;;  %v1453_v5 = vcombine.high %v1413_v53, %v1445_v50  ;;  %v1494_v15 = vrot.slane %v1486_v23, %v19193_v2 }
 0x374   : > { %v1297_v43 = vpop.permute.xlu1 %1296  ;;  %v19242_v63 = vpop.permute.xlu0 %2550  ;;  %v1501_v25 = vrot.slane %v1487_v28, %v19193_v2  ;;  %v1533_v33 = vrot.slane %v1519_v17, %v19211_v21  ;;  %v1534_v52 = vcombine.low %v1469_v13, %v1485_v27  ;;  %v1535_v40 = vcombine.high %v1469_v13, %v1485_v27 }
 0x375   : > { %v1502_v44 = vcombine.low %v1249_v42, %v1297_v43  ;;  %v1503_v11 = vcombine.high %v1249_v42, %v1297_v43  ;;  %v1526_v42 = vrot.slane %v1518_v39, %v19211_v21  ;;  %v16953_v43 = vpack.c.bf16 %v1450_v29, %v1446_v1 }
 0x376   : > { %2628 = vrot.lane.b32.xlu1 %v19005_v30, %s18442_s30  ;;  %3930 = vrot.lane.b32.xlu0 %v19002_v8, %s18441_s29  ;;  %v16954_v23 = vpack.c.bf16 %v1452_v6, %v1448_v57  ;;  %v16957_v28 = vpack.c.bf16 %v1451_v46, %v1447_v12 }
 0x377   : > { %v1510_v55 = vrot.slane %v1502_v44, %v19193_v2  ;;  %v1517_v7 = vrot.slane %v1503_v11, %v19193_v2  ;;  %v16958_v11 = vpack.c.bf16 %v1453_v5, %v1449_v45 }
 0x378   : > { %v19252_v10 = vpop.permute.xlu1 %2480  ;;  %v19254_v22 = vpop.permute.xlu0 %2574 }
 0x379   : > { %v1550_v53 = vcombine.low %v1494_v15, %v1510_v55  ;;  %v1551_v31 = vcombine.high %v1494_v15, %v1510_v55  ;;  %v1566_v37 = vcombine.low %v1501_v25, %v1517_v7  ;;  %v1567_v50 = vcombine.high %v1501_v25, %v1517_v7 }
 0x37a   : > { %3812 = vrot.lane.b32.xlu1 %v19008_v48, %s18437_s12  ;;  %3954 = vrot.lane.b32.xlu0 %v19002_v8, %s18442_s30  ;;  %v1542_v25 = vrot.slane %v1534_v52, %v19211_v21  ;;  %v1549_v55 = vrot.slane %v1535_v40, %v19211_v21  ;;  %v5133_v52 = vrot.slane %v16953_v43, %v19193_v2 }
 0x37b   : > { %v1558_v17 = vrot.slane %v1550_v53, %v19211_v21  ;;  %v1565_v13 = vrot.slane %v1551_v31, %v19211_v21  ;;  %v1574_v27 = vrot.slane %v1566_v37, %v19211_v21  ;;  %v1581_v15 = vrot.slane %v1567_v50, %v19211_v21 }
 0x37c   : > { %v19266_v44 = vpop.permute.xlu1 %2504  ;;  %v19268_v39 = vpop.permute.xlu0 %2598  ;;  %v5141_v40 = vrot.slane %v16954_v23, %v19193_v2  ;;  %v5201_v31 = vrot.slane %v16957_v28, %v19193_v2 }
 0x37d   : > { %v1582_v5 = vcombine.low %v1526_v42, %v1558_v17  ;;  %v1583_v6 = vcombine.high %v1526_v42, %v1558_v17  ;;  %v1584_v12 = vcombine.low %v1533_v33, %v1565_v13  ;;  %v1585_v1 = vcombine.high %v1533_v33, %v1565_v13 }
 0x37e   : > { %3836 = vrot.lane.b32.xlu1 %v19008_v48, %s18436_s21  ;;  %1158 = vrot.lane.b32.xlu0 %v19015_v19, %s18437_s12  ;;  %v1586_v57 = vcombine.low %v1542_v25, %v1574_v27  ;;  %v1587_v45 = vcombine.high %v1542_v25, %v1574_v27  ;;  %v1588_v29 = vcombine.low %v1549_v55, %v1581_v15 }
 0x37f   : > { %v1589_v46 = vcombine.high %v1549_v55, %v1581_v15  ;;  %v5209_v42 = vrot.slane %v16958_v11, %v19193_v2  ;;  %v5158_v15 = vcombine.low %v5133_v52, %v5141_v40  ;;  %v5159_v55 = vcombine.high %v5133_v52, %v5141_v40 }
 0x380   : > { %v19280_v7 = vpop.permute.xlu1 %2528  ;;  %v19282_v53 = vpop.permute.xlu0 %2622  ;;  %v16955_v33 = vpack.c.bf16 %v1586_v57, %v1582_v5  ;;  %v16956_v37 = vpack.c.bf16 %v1588_v29, %v1584_v12  ;;  %v16959_v50 = vpack.c.bf16 %v1587_v45, %v1583_v6 }
 0x381   : > { %v16960_v17 = vpack.c.bf16 %v1589_v46, %v1585_v1  ;;  %v5226_v25 = vcombine.low %v5201_v31, %v5209_v42  ;;  %v5227_v5 = vcombine.high %v5201_v31, %v5209_v42  ;;  %v19309_v46 = vrot.slane %v5158_v15, %v19211_v21 }
 0x382   : > { %3860 = vrot.lane.b32.xlu1 %v19008_v48, %s18438_s13  ;;  %1182 = vrot.lane.b32.xlu0 %v19015_v19, %s18436_s21  ;;  %v5149_v43 = vrot.slane %v16955_v33, %v19193_v2  ;;  %v5157_v23 = vrot.slane %v16956_v37, %v19193_v2  ;;  %v5217_v28 = vrot.slane %v16959_v50, %v19193_v2 }
 0x383   : > { %v5225_v11 = vrot.slane %v16960_v17, %v19193_v2  ;;  %v19315_v40 = vrot.slane %v5226_v25, %v19211_v21  ;;  %v5173_v42 = vrot.slane %v5159_v55, %v19211_v21  ;;  %v19325_v37 = vrot.slane %v5227_v5, %v19211_v21 }
 0x384   : > { %v19292_v13 = vpop.permute.xlu1 %2552  ;;  %v19294_v27 = vpop.permute.xlu0 %3806  ;;  %v5174_v6 = vcombine.low %v5149_v43, %v5157_v23  ;;  %v5175_v1 = vcombine.high %v5149_v43, %v5157_v23 }
 0x385   : > { %v5242_v12 = vcombine.low %v5217_v28, %v5225_v11  ;;  %v5243_v57 = vcombine.high %v5217_v28, %v5225_v11 }
 0x386   : > { %3884 = vrot.lane.b32.xlu1 %v19008_v48, %s18439_s25  ;;  %1206 = vrot.lane.b32.xlu0 %v19015_v19, %s18438_s13  ;;  %v19312_v52 = vrot.slane %v5174_v6, %v19211_v21  ;;  %v5189_v33 = vrot.slane %v5175_v1, %v19211_v21 }
 0x387   : > { %v19318_v31 = vrot.slane %v5242_v12, %v19211_v21  ;;  %v19328_v50 = vrot.slane %v5243_v57, %v19211_v21 }
 0x388   : > { %v19304_v45 = vpop.permute.xlu1 %2576  ;;  %v19306_v29 = vpop.permute.xlu0 %3854  ;;  %v19334_v17 = vcombine.low %v19309_v46, %v19312_v52  ;;  %v19340_v23 = vcombine.low %v5173_v42, %v5189_v33 }
 0x389   : > { %v19338_v43 = vcombine.low %v19315_v40, %v19318_v31  ;;  %v19344_v28 = vcombine.low %v19325_v37, %v19328_v50  ;;  %v3991_v12 = vcombine.high %v19294_v27, %v19306_v29 }
 0x38a   : > { %3908 = vrot.lane.b32.xlu1 %v19008_v48, %s18440_s26  ;;  %1230 = vrot.lane.b32.xlu0 %v19015_v19, %s18439_s25 }
 0x38b   : > { %v5672_v25 = vpack.i.b16 %v19338_v43, %v19334_v17  ;;  %v5684_v55 = vpack.i.b16 %v19344_v28, %v19340_v23  ;;  %v4005_v4 = vrot.slane %v3991_v12, %v19193_v2 }
 0x38c   : > { %v19346_v11 = vpop.permute.xlu1 %2600  ;;  %v19348_v15 = vpop.permute.xlu0 %3878 }
 0x38d   : > { %17323 = vmatprep.mubr.msk.bf16.mxu1 %vm8558_vm0, %v5672_v25  ;;  %17363 = vmatprep.mubr.msk.bf16.mxu0 %vm8558_vm0, %v5684_v55  ;;  %v19374_v25 = vcombine.high %v5173_v42, %v5189_v33 }
 0x38e   : > { %3932 = vrot.lane.b32.xlu1 %v19008_v48, %s18441_s29  ;;  %1254 = vrot.lane.b32.xlu0 %v19015_v19, %s18440_s26 }
 0x38f   : > { %26069 = vst [vmem:[#allocation58_spill] sm:$0xff] %v19374_v25 }
 0x390   : > { %v19360_v5 = vpop.permute.xlu1 %2624  ;;  %v19362_v6 = vpop.permute.xlu0 %3902 }
 0x392   : > { %3956 = vrot.lane.b32.xlu1 %v19008_v48, %s18442_s30  ;;  %1278 = vrot.lane.b32.xlu0 %v19015_v19, %s18441_s29 }
 0x394   : > { %v19370_v1 = vpop.permute.xlu1 %3830  ;;  %v19372_v57 = vpop.permute.xlu0 %3926 }
 0x395   : > { %v3975_v55 = vcombine.high %v19088_v34, %v19370_v1  ;;  %v4007_v9 = vcombine.high %v19348_v15, %v19372_v57 }
 0x396   : > { %1160 = vrot.lane.b32.xlu1 %v19021_v14, %s18437_s12  ;;  %1302 = vrot.lane.b32.xlu0 %v19015_v19, %s18442_s30 }
 0x397   : > { %v3989_v3 = vrot.slane %v3975_v55, %v19193_v2  ;;  %v4021_v48 = vrot.slane %v4007_v9, %v19193_v2 }
 0x398   : > { %v19386_v59 = vpop.permute.xlu1 %3808  ;;  %v19388_v42 = vpop.permute.xlu0 %3950 }
 0x399   : > { %26070 = vst [vmem:[#allocation59_spill] sm:$0xff] %v19386_v59  ;;  %v4023_v33 = vcombine.high %v19362_v6, %v19388_v42  ;;  %v4055_v58 = vcombine.high %v3989_v3, %v4005_v4 }
 0x39a   : > { %1184 = vrot.lane.b32.xlu1 %v19021_v14, %s18436_s21  ;;  %2486 = vrot.lane.b32.xlu0 %v19018_v26, %s18437_s12 }
 0x39b   : > { %v4037_v8 = vrot.slane %v4023_v33, %v19193_v2  ;;  %v4054_v33 = vcombine.low %v3989_v3, %v4005_v4 }
 0x39c   : > { %v19398_v12 = vpop.permute.xlu1 %3832  ;;  %v19400_v55 = vpop.permute.xlu0 %1154 }
 0x39d   : > { %26071 = vst [vmem:[#allocation60_spill] sm:$0xff] %v19398_v12  ;;  %26072 = vst [vmem:[#allocation61_spill] sm:$0xff] %v19400_v55  ;;  %v4087_v19 = vcombine.high %v4021_v48, %v4037_v8  ;;  %v4086_v9 = vcombine.low %v4021_v48, %v4037_v8  ;;  %v19426_v8 = vrot.slane %v4054_v33, %v19211_v21  ;;  %v5674_v33 = vshrl.u32 %v19338_v43, 16 }
 0x39e   : > { %1208 = vrot.lane.b32.xlu1 %v19021_v14, %s18438_s13  ;;  %2510 = vrot.lane.b32.xlu0 %v19018_v26, %s18436_s21  ;;  %v19464_v43 = vcombine.high %v19309_v46, %v19312_v52 }
 0x39f   : > { %v19419_v35 = vrot.slane %v4086_v9, %v19211_v21  ;;  %v4101_v48 = vrot.slane %v4087_v19, %v19211_v21 }
 0x3a0   : > { %v19406_v61 = vpop.permute.xlu1 %3856  ;;  %v19408_v54 = vpop.permute.xlu0 %1178  ;;  %26086 = vst [vmem:[#allocation75_spill] sm:$0xff] %v19464_v43 }
 0x3a1   : > { %26073 = vst [vmem:[#allocation62_spill] sm:$0xff] %v19406_v61  ;;  %26074 = vst [vmem:[#allocation63_spill] sm:$0xff] %v19408_v54  ;;  %v19436_v9 = vcombine.high %v19426_v8, %v19419_v35  ;;  %v2646_v61 = vcombine.low %v18976_v49, %v19166_v60 }
 0x3a2   : > { %1232 = vrot.lane.b32.xlu1 %v19021_v14, %s18439_s25  ;;  %2534 = vrot.lane.b32.xlu0 %v19018_v26, %s18438_s13 }
 0x3a3   : > { %26079 = vst [vmem:[#allocation68_spill] sm:$0xff] %v19436_v9 }
 0x3a4   : > { %v19414_v55 = vpop.permute.xlu1 %3880  ;;  %v19416_v59 = vpop.permute.xlu0 %1202 }
 0x3a5   : > { %26075 = vst [vmem:[#allocation64_spill] sm:$0xff] %v19414_v55  ;;  %26076 = vst [vmem:[#allocation65_spill] sm:$0xff] %v19416_v59  ;;  %v4069_v55 = vrot.slane %v4055_v58, %v19211_v21  ;;  %v5673_v59 = vshrl.u32 %v19334_v17, 16  ;;  %v19460_v17 = vcombine.high %v19325_v37, %v19328_v50  ;;  %v5679_v37 = vshrl.u32 %v19464_v43, 16 }
 0x3a6   : > { %1256 = vrot.lane.b32.xlu1 %v19021_v14, %s18440_s26  ;;  %2558 = vrot.lane.b32.xlu0 %v19018_v26, %s18439_s25 }
 0x3a7   : > { %v19454_v9 = vpack.i.b16 %v5674_v33, %v5673_v59  ;;  %26085 = vst [vmem:[#allocation74_spill] sm:$0xff] %v19460_v17  ;;  %v5685_v59 = vshrl.u32 %v19340_v23, 16  ;;  %v5686_v33 = vshrl.u32 %v19344_v28, 16  ;;  %v5692_v46 = vshrl.u32 %v19460_v17, 16 }
 0x3a8   : > { %v19428_v3 = vpop.permute.xlu1 %3904  ;;  %v19430_v4 = vpop.permute.xlu0 %1226 }
 0x3a9   : > { %26077 = vst [vmem:[#allocation66_spill] sm:$0xff] %v19428_v3  ;;  %26078 = vst [vmem:[#allocation67_spill] sm:$0xff] %v19430_v4  ;;  %v19444_v3 = vcombine.low %v4069_v55, %v4101_v48  ;;  %v19446_v4 = vcombine.high %v4069_v55, %v4101_v48  ;;  %v19493_v28 = vpack.i.b16 %v5686_v33, %v5685_v59 }
 0x3aa   : > { %1280 = vrot.lane.b32.xlu1 %v19021_v14, %s18441_s29  ;;  %2582 = vrot.lane.b32.xlu0 %v19018_v26, %s18440_s26  ;;  %26084 = vst [vmem:[#allocation73_spill] sm:$0xff] %v19454_v9  ;;  %v5691_v9 = vshrl.u32 %v19374_v25, 16 }
 0x3ab   : > { %26080 = vst [vmem:[#allocation69_spill] sm:$0xff] %v19444_v3  ;;  %26081 = vst [vmem:[#allocation70_spill] sm:$0xff] %v19446_v4 }
 0x3ac   : > { %v19448_v19 = vpop.permute.xlu1 %3928  ;;  %v19450_v58 = vpop.permute.xlu0 %1250  ;;  %26093 = vst [vmem:[#allocation82_spill] sm:$0xff] %v19493_v28  ;;  %v19498_v52 = vpack.i.b16 %v5692_v46, %v5691_v9 }
 0x3ad   : > { %26082 = vst [vmem:[#allocation71_spill] sm:$0xff] %v19448_v19  ;;  %26083 = vst [vmem:[#allocation72_spill] sm:$0xff] %v19450_v58 }
 0x3ae   : > { %1304 = vrot.lane.b32.xlu1 %v19021_v14, %s18442_s30  ;;  %2606 = vrot.lane.b32.xlu0 %v19018_v26, %s18441_s29  ;;  %v19472_v14 = vcombine.high %v19315_v40, %v19318_v31  ;;  %26094 = vst [vmem:[#allocation83_spill] sm:$0xff] %v19498_v52 }
 0x3b0   : > { %v19466_v55 = vpop.permute.xlu1 %3952  ;;  %v19468_v48 = vpop.permute.xlu0 %1274  ;;  %26089 = vst [vmem:[#allocation78_spill] sm:$0xff] %v19472_v14  ;;  %v5680_v40 = vshrl.u32 %v19472_v14, 16 }
 0x3b1   : > { %26087 = vst [vmem:[#allocation76_spill] sm:$0xff] %v19466_v55  ;;  %26088 = vst [vmem:[#allocation77_spill] sm:$0xff] %v19468_v48 }
 0x3b2   : > { %2488 = vrot.lane.b32.xlu1 %v19031_v36, %s18437_s12  ;;  %2630 = vrot.lane.b32.xlu0 %v19018_v26, %s18442_s30  ;;  %v19491_v23 = vpack.i.b16 %v5680_v40, %v5679_v37 }
 0x3b4   : > { %v19487_v31 = vpop.permute.xlu1 %1156  ;;  %v19489_v50 = vpop.permute.xlu0 %1298  ;;  %26092 = vst [vmem:[#allocation81_spill] sm:$0xff] %v19491_v23 }
 0x3b5   : > { %26090 = vst [vmem:[#allocation79_spill] sm:$0xff] %v19487_v31  ;;  %26091 = vst [vmem:[#allocation80_spill] sm:$0xff] %v19489_v50 }
 0x3b6   : > { %2512 = vrot.lane.b32.xlu1 %v19031_v36, %s18436_s21  ;;  %3814 = vrot.lane.b32.xlu0 %v19028_v38, %s18437_s12 }
 0x3b8   : > { %v19502_v43 = vpop.permute.xlu1 %1180  ;;  %v19504_v14 = vpop.permute.xlu0 %2482 }
 0x3b9   : > { %26095 = vst [vmem:[#allocation84_spill] sm:$0xff] %v19502_v43 }
 0x3ba   : > { %2536 = vrot.lane.b32.xlu1 %v19031_v36, %s18438_s13  ;;  %3862 = vrot.lane.b32.xlu0 %v19028_v38, %s18438_s13 }
 0x3bc   : > { %v19510_v59 = vpop.permute.xlu1 %1204  ;;  %v19512_v33 = vpop.permute.xlu0 %2506 }
 0x3bd   : > { %26096 = vst [vmem:[#allocation85_spill] sm:$0xff] %v19510_v59 }
 0x3be   : > { %2560 = vrot.lane.b32.xlu1 %v19031_v36, %s18439_s25  ;;  %3886 = vrot.lane.b32.xlu0 %v19028_v38, %s18439_s25 }
 0x3c0   : > { %v19518_v9 = vpop.permute.xlu1 %1228  ;;  %v19520_v46 = vpop.permute.xlu0 %2530 }
 0x3c1   : > { %26097 = vst [vmem:[#allocation86_spill] sm:$0xff] %v19518_v9 }
 0x3c2   : > { %2584 = vrot.lane.b32.xlu1 %v19031_v36, %s18440_s26  ;;  %3910 = vrot.lane.b32.xlu0 %v19028_v38, %s18440_s26 }
 0x3c4   : > { %v19526_v37 = vpop.permute.xlu1 %1252  ;;  %v19528_v40 = vpop.permute.xlu0 %2554 }
 0x3c5   : > { %26098 = vst [vmem:[#allocation87_spill] sm:$0xff] %v19526_v37 }
 0x3c6   : > { %2608 = vrot.lane.b32.xlu1 %v19031_v36, %s18441_s29  ;;  %3934 = vrot.lane.b32.xlu0 %v19028_v38, %s18441_s29 }
 0x3c8   : > { %v19534_v52 = vpop.permute.xlu1 %1276  ;;  %v19536_v28 = vpop.permute.xlu0 %2578 }
 0x3c9   : > { %26099 = vst [vmem:[#allocation88_spill] sm:$0xff] %v19534_v52 }
 0x3ca   : > { %2632 = vrot.lane.b32.xlu1 %v19031_v36, %s18442_s30  ;;  %3958 = vrot.lane.b32.xlu0 %v19028_v38, %s18442_s30 }
 0x3cc   : > { %v19542_v23 = vpop.permute.xlu1 %1300  ;;  %v19544_v25 = vpop.permute.xlu0 %2602 }
 0x3cd   : > { %26100 = vst [vmem:[#allocation89_spill] sm:$0xff] %v19542_v23 }
 0x3ce   : > { %3838 = vrot.lane.b32.xlu1 %v19028_v38, %s18436_s21  ;;  %1162 = vrot.lane.b32.xlu0 %v19041_v51, %s18437_s12 }
 0x3d0   : > { %v19550_v17 = vpop.permute.xlu1 %2484  ;;  %v19552_v4 = vpop.permute.xlu0 %2626 }
 0x3d2   : > { %3816 = vrot.lane.b32.xlu1 %v19034_v41, %s18437_s12  ;;  %1186 = vrot.lane.b32.xlu0 %v19041_v51, %s18436_s21 }
 0x3d4   : > { %v19558_v3 = vpop.permute.xlu1 %2508  ;;  %v19560_v9 = vpop.permute.xlu0 %3810 }
 0x3d5   : > { %26101 = vst [vmem:[#allocation90_spill] sm:$0xff] %v19560_v9 }
 0x3d6   : > { %3840 = vrot.lane.b32.xlu1 %v19034_v41, %s18436_s21  ;;  %1210 = vrot.lane.b32.xlu0 %v19041_v51, %s18438_s13 }
 0x3d8   : > { %v19566_v38 = vpop.permute.xlu1 %2532  ;;  %v19568_v52 = vpop.permute.xlu0 %3834 }
 0x3d9   : > { %26102 = vst [vmem:[#allocation91_spill] sm:$0xff] %v19568_v52 }
 0x3da   : > { %3864 = vrot.lane.b32.xlu1 %v19034_v41, %s18438_s13  ;;  %1234 = vrot.lane.b32.xlu0 %v19041_v51, %s18439_s25 }
 0x3dc   : > { %v19574_v37 = vpop.permute.xlu1 %2556  ;;  %v19576_v23 = vpop.permute.xlu0 %3858 }
 0x3dd   : > { %26103 = vst [vmem:[#allocation92_spill] sm:$0xff] %v19576_v23 }
 0x3de   : > { %3888 = vrot.lane.b32.xlu1 %v19034_v41, %s18439_s25  ;;  %1258 = vrot.lane.b32.xlu0 %v19041_v51, %s18440_s26 }
 0x3e0   : > { %v19582_v9 = vpop.permute.xlu1 %2580  ;;  %v19584_v31 = vpop.permute.xlu0 %3882 }
 0x3e1   : > { %26104 = vst [vmem:[#allocation93_spill] sm:$0xff] %v19584_v31 }
 0x3e2   : > { %3912 = vrot.lane.b32.xlu1 %v19034_v41, %s18440_s26  ;;  %1282 = vrot.lane.b32.xlu0 %v19041_v51, %s18441_s29 }
 0x3e4   : > { %v19590_v52 = vpop.permute.xlu1 %2604  ;;  %v19592_v59 = vpop.permute.xlu0 %3906 }
 0x3e5   : > { %26105 = vst [vmem:[#allocation94_spill] sm:$0xff] %v19592_v59 }
 0x3e6   : > { %3936 = vrot.lane.b32.xlu1 %v19034_v41, %s18441_s29  ;;  %1306 = vrot.lane.b32.xlu0 %v19041_v51, %s18442_s30 }
 0x3e8   : > { %v19598_v23 = vpop.permute.xlu1 %2628  ;;  %v19600_v43 = vpop.permute.xlu0 %3930 }
 0x3e9   : > { %26106 = vst [vmem:[#allocation95_spill] sm:$0xff] %v19600_v43 }
 0x3ea   : > { %3960 = vrot.lane.b32.xlu1 %v19034_v41, %s18442_s30  ;;  %2490 = vrot.lane.b32.xlu0 %v19044_v56, %s18437_s12 }
 0x3ec   : > { %v19606_v31 = vpop.permute.xlu1 %3812  ;;  %v19608_v19 = vpop.permute.xlu0 %3954 }
 0x3ed   : > { %26107 = vst [vmem:[#allocation96_spill] sm:$0xff] %v19606_v31  ;;  %26108 = vst [vmem:[#allocation97_spill] sm:$0xff] %v19608_v19 }
 0x3ee   : > { %1164 = vrot.lane.b32.xlu1 %v19047_v62, %s18437_s12  ;;  %2514 = vrot.lane.b32.xlu0 %v19044_v56, %s18436_s21 }
 0x3f0   : > { %v19614_v51 = vpop.permute.xlu1 %3836  ;;  %v19616_v59 = vpop.permute.xlu0 %1158 }
 0x3f1   : > { %26109 = vst [vmem:[#allocation98_spill] sm:$0xff] %v19614_v51  ;;  %26110 = vst [vmem:[#allocation99_spill] sm:$0xff] %v19616_v59 }
 0x3f2   : > { %1188 = vrot.lane.b32.xlu1 %v19047_v62, %s18436_s21  ;;  %2538 = vrot.lane.b32.xlu0 %v19044_v56, %s18438_s13 }
 0x3f4   : > { %v19622_v41 = vpop.permute.xlu1 %3860  ;;  %v19624_v31 = vpop.permute.xlu0 %1182 }
 0x3f5   : > { %26111 = vst [vmem:[#allocation100_spill] sm:$0xff] %v19622_v41  ;;  %26112 = vst [vmem:[#allocation101_spill] sm:$0xff] %v19624_v31 }
 0x3f6   : > { %1212 = vrot.lane.b32.xlu1 %v19047_v62, %s18438_s13  ;;  %2562 = vrot.lane.b32.xlu0 %v19044_v56, %s18439_s25 }
 0x3f8   : > { %v19630_v19 = vpop.permute.xlu1 %3884  ;;  %v19632_v51 = vpop.permute.xlu0 %1206 }
 0x3f9   : > { %26113 = vst [vmem:[#allocation102_spill] sm:$0xff] %v19630_v19  ;;  %26114 = vst [vmem:[#allocation103_spill] sm:$0xff] %v19632_v51 }
 0x3fa   : > { %1236 = vrot.lane.b32.xlu1 %v19047_v62, %s18439_s25  ;;  %2586 = vrot.lane.b32.xlu0 %v19044_v56, %s18440_s26 }
 0x3fc   : > { %v19638_v59 = vpop.permute.xlu1 %3908  ;;  %v19640_v41 = vpop.permute.xlu0 %1230 }
 0x3fd   : > { %26115 = vst [vmem:[#allocation104_spill] sm:$0xff] %v19638_v59  ;;  %26116 = vst [vmem:[#allocation105_spill] sm:$0xff] %v19640_v41 }
 0x3fe   : > { %1260 = vrot.lane.b32.xlu1 %v19047_v62, %s18440_s26  ;;  %2610 = vrot.lane.b32.xlu0 %v19044_v56, %s18441_s29 }
 0x400   : > { %v19646_v31 = vpop.permute.xlu1 %3932  ;;  %v19648_v19 = vpop.permute.xlu0 %1254 }
 0x401   : > { %26117 = vst [vmem:[#allocation106_spill] sm:$0xff] %v19646_v31  ;;  %26118 = vst [vmem:[#allocation107_spill] sm:$0xff] %v19648_v19 }
 0x402   : > { %1284 = vrot.lane.b32.xlu1 %v19047_v62, %s18441_s29  ;;  %2634 = vrot.lane.b32.xlu0 %v19044_v56, %s18442_s30 }
 0x404   : > { %v19654_v51 = vpop.permute.xlu1 %3956  ;;  %v19656_v59 = vpop.permute.xlu0 %1278 }
 0x405   : > { %26119 = vst [vmem:[#allocation108_spill] sm:$0xff] %v19654_v51  ;;  %26120 = vst [vmem:[#allocation109_spill] sm:$0xff] %v19656_v59 }
 0x406   : > { %1308 = vrot.lane.b32.xlu1 %v19047_v62, %s18442_s30  ;;  %3818 = vrot.lane.b32.xlu0 %v19054_v16, %s18437_s12 }
 0x408   : > { %v19662_v41 = vpop.permute.xlu1 %1160  ;;  %v19664_v31 = vpop.permute.xlu0 %1302 }
 0x409   : > { %26121 = vst [vmem:[#allocation110_spill] sm:$0xff] %v19662_v41  ;;  %26122 = vst [vmem:[#allocation111_spill] sm:$0xff] %v19664_v31 }
 0x40a   : > { %2492 = vrot.lane.b32.xlu1 %v19057_v47, %s18437_s12  ;;  %3842 = vrot.lane.b32.xlu0 %v19054_v16, %s18436_s21 }
 0x40c   : > { %v19670_v19 = vpop.permute.xlu1 %1184  ;;  %v19672_v51 = vpop.permute.xlu0 %2486 }
 0x40d   : > { %26123 = vst [vmem:[#allocation112_spill] sm:$0xff] %v19670_v19  ;;  %26124 = vst [vmem:[#allocation113_spill] sm:$0xff] %v19672_v51 }
 0x40e   : > { %2516 = vrot.lane.b32.xlu1 %v19057_v47, %s18436_s21  ;;  %3866 = vrot.lane.b32.xlu0 %v19054_v16, %s18438_s13 }
 0x410   : > { %v19678_v62 = vpop.permute.xlu1 %1208  ;;  %v19680_v41 = vpop.permute.xlu0 %2510 }
 0x411   : > { %26125 = vst [vmem:[#allocation114_spill] sm:$0xff] %v19678_v62  ;;  %26126 = vst [vmem:[#allocation115_spill] sm:$0xff] %v19680_v41 }
 0x412   : > { %2540 = vrot.lane.b32.xlu1 %v19057_v47, %s18438_s13  ;;  %3890 = vrot.lane.b32.xlu0 %v19054_v16, %s18439_s25 }
 0x414   : > { %v19686_v31 = vpop.permute.xlu1 %1232  ;;  %v19688_v19 = vpop.permute.xlu0 %2534 }
 0x415   : > { %26127 = vst [vmem:[#allocation116_spill] sm:$0xff] %v19686_v31  ;;  %26128 = vst [vmem:[#allocation117_spill] sm:$0xff] %v19688_v19 }
 0x416   : > { %2564 = vrot.lane.b32.xlu1 %v19057_v47, %s18439_s25  ;;  %3914 = vrot.lane.b32.xlu0 %v19054_v16, %s18440_s26 }
 0x418   : > { %v19694_v59 = vpop.permute.xlu1 %1256  ;;  %v19696_v62 = vpop.permute.xlu0 %2558 }
 0x419   : > { %26129 = vst [vmem:[#allocation118_spill] sm:$0xff] %v19694_v59  ;;  %26130 = vst [vmem:[#allocation119_spill] sm:$0xff] %v19696_v62 }
 0x41a   : > { %2588 = vrot.lane.b32.xlu1 %v19057_v47, %s18440_s26  ;;  %3938 = vrot.lane.b32.xlu0 %v19054_v16, %s18441_s29 }
 0x41c   : > { %v19702_v43 = vpop.permute.xlu1 %1280  ;;  %v19704_v31 = vpop.permute.xlu0 %2582 }
 0x41d   : > { %26131 = vst [vmem:[#allocation120_spill] sm:$0xff] %v19702_v43  ;;  %v2694_v43 = vcombine.low %v19254_v22, %v19282_v53 }
 0x41e   : > { %2612 = vrot.lane.b32.xlu1 %v19057_v47, %s18441_s29  ;;  %3962 = vrot.lane.b32.xlu0 %v19054_v16, %s18442_s30  ;;  %v2662_v16 = vcombine.low %v19206_v32, %v19222_v18 }
 0x41f   : > { %v2702_v12 = vrot.slane %v2694_v43, %v19193_v2 }
 0x420   : > { %v19710_v48 = vpop.permute.xlu1 %1304  ;;  %v19712_v59 = vpop.permute.xlu0 %2606  ;;  %v2670_v56 = vrot.slane %v2662_v16, %v19193_v2  ;;  %v2695_v16 = vcombine.high %v19254_v22, %v19282_v53  ;;  %v2830_v53 = vcombine.low %v19304_v45, %v19360_v5 }
 0x421   : > { %26132 = vst [vmem:[#allocation121_spill] sm:$0xff] %v19710_v48  ;;  %26133 = vst [vmem:[#allocation122_spill] sm:$0xff] %v19712_v59  ;;  %v2678_v48 = vcombine.low %v19242_v63, %v19268_v39 }
 0x422   : > { %2636 = vrot.lane.b32.xlu1 %v19057_v47, %s18442_s30  ;;  %v2709_v22 = vrot.slane %v2695_v16, %v19193_v2 }
 0x423   : > { %v2686_v36 = vrot.slane %v2678_v48, %v19193_v2 }
 0x424   : > { %v19716_v55 = vpop.permute.xlu1 %2488  ;;  %v19718_v58 = vpop.permute.xlu0 %2630 }
 0x425   : > { %26134 = vst [vmem:[#allocation123_spill] sm:$0xff] %v19716_v55  ;;  %v2742_v55 = vcombine.low %v2686_v36, %v2702_v12  ;;  %v2743_v43 = vcombine.high %v2686_v36, %v2702_v12  ;;  %v2647_v36 = vcombine.high %v18976_v49, %v19166_v60 }
 0x426   : > { %3820 = vrot.lane.b32.xlu1 %v19060_v20, %s18437_s12 }
 0x427   : > { %v19755_v48 = vrot.slane %v2742_v55, %v19211_v21  ;;  %v2661_v60 = vrot.slane %v2647_v36, %v19193_v2  ;;  %v2782_v36 = vcombine.low %v19072_v0, %v19266_v44 }
 0x428   : > { %v19724_v50 = vpop.permute.xlu1 %2512  ;;  %v19730_v54 = vpop.permute.xlu0 %3814 }
 0x429   : > { %26135 = vst [vmem:[#allocation124_spill] sm:$0xff] %v19724_v50  ;;  %26136 = vst [vmem:[#allocation125_spill] sm:$0xff] %v19730_v54  ;;  %v2654_v54 = vrot.slane %v2646_v61, %v19193_v2  ;;  %v2663_v61 = vcombine.high %v19206_v32, %v19222_v18 }
 0x42a   : > { %3844 = vrot.lane.b32.xlu1 %v19060_v20, %s18436_s21 }
 0x42b   : > { %v2710_v41 = vcombine.low %v2654_v54, %v2670_v56  ;;  %v2677_v32 = vrot.slane %v2663_v61, %v19193_v2 }
 0x42c   : > { %v19737_v47 = vpop.permute.xlu1 %2536  ;;  %v19741_v50 = vpop.permute.xlu0 %3862 }
 0x42d   : > { %26137 = vst [vmem:[#allocation126_spill] sm:$0xff] %v19737_v47  ;;  %26138 = vst [vmem:[#allocation127_spill] sm:$0xff] %v19741_v50  ;;  %v2711_v47 = vcombine.high %v2654_v54, %v2670_v56  ;;  %v19766_v59 = vrot.slane %v2710_v41, %v19211_v21  ;;  %v2757_v54 = vrot.slane %v2743_v43, %v19211_v21 }
 0x42e   : > { %3868 = vrot.lane.b32.xlu1 %v19060_v20, %s18438_s13  ;;  %v2726_v43 = vcombine.low %v2661_v60, %v2677_v32 }
 0x42f   : > { %v2774_v18 = vcombine.low %v19766_v59, %v19755_v48  ;;  %v2725_v49 = vrot.slane %v2711_v47, %v19211_v21  ;;  %v2814_v47 = vcombine.low %v19292_v13, %v19346_v11 }
 0x430   : > { %v19746_v26 = vpop.permute.xlu1 %2560  ;;  %v19748_v62 = vpop.permute.xlu0 %3886 }
 0x431   : > { %26139 = vst [vmem:[#allocation128_spill] sm:$0xff] %v19746_v26  ;;  %26140 = vst [vmem:[#allocation129_spill] sm:$0xff] %v19748_v62  ;;  %v2679_v26 = vcombine.high %v19242_v63, %v19268_v39  ;;  %v3734_v12 = vpack.c.bf16 %v2774_v18, %v2774_v18  ;;  %v2776_v55 = vcombine.low %v2725_v49, %v2757_v54 }
 0x432   : > { %3892 = vrot.lane.b32.xlu1 %v19060_v20, %s18439_s25  ;;  %v2838_v18 = vrot.slane %v2830_v53, %v19193_v2 }
 0x433   : > { %v2693_v41 = vrot.slane %v2679_v26, %v19193_v2  ;;  %v2798_v26 = vcombine.low %v19252_v10, %v19280_v7 }
 0x434   : > { %v19757_v50 = vpop.permute.xlu1 %2584  ;;  %v19763_v62 = vpop.permute.xlu0 %3910 }
 0x435   : > { %26141 = vst [vmem:[#allocation130_spill] sm:$0xff] %v19757_v50  ;;  %26142 = vst [vmem:[#allocation131_spill] sm:$0xff] %v19763_v62  ;;  %v2758_v39 = vcombine.low %v2693_v41, %v2709_v22  ;;  %v3736_v62 = vpack.c.bf16 %v2776_v55, %v2776_v55  ;;  %v2799_v55 = vcombine.high %v19252_v10, %v19280_v7 }
 0x436   : > { %3916 = vrot.lane.b32.xlu1 %v19060_v20, %s18440_s26 }
 0x437   : > { %v19802_v50 = vrot.slane %v2758_v39, %v19211_v21  ;;  %v2813_v7 = vrot.slane %v2799_v55, %v19193_v2  ;;  %v3974_v55 = vcombine.low %v19088_v34, %v19370_v1 }
 0x438   : > { %v19776_v56 = vpop.permute.xlu1 %2608  ;;  %v19780_v63 = vpop.permute.xlu0 %3934 }
 0x439   : > { %26143 = vst [vmem:[#allocation132_spill] sm:$0xff] %v19776_v56  ;;  %26144 = vst [vmem:[#allocation133_spill] sm:$0xff] %v19780_v63  ;;  %v2759_v63 = vcombine.high %v2693_v41, %v2709_v22  ;;  %v2777_v56 = vcombine.high %v2725_v49, %v2757_v54  ;;  %v19811_v22 = vrot.slane %v2726_v43, %v19211_v21 }
 0x43a   : > { %3940 = vrot.lane.b32.xlu1 %v19060_v20, %s18441_s29  ;;  %v2790_v41 = vrot.slane %v2782_v36, %v19193_v2 }
 0x43b   : > { %v19815_v54 = vrot.slane %v2759_v63, %v19211_v21  ;;  %v2778_v39 = vcombine.low %v19811_v22, %v19802_v50  ;;  %v2815_v63 = vcombine.high %v19292_v13, %v19346_v11 }
 0x43c   : > { %v19788_v16 = vpop.permute.xlu1 %2632  ;;  %5766 = vxpose.xlu0.c.b16.start.end [1/1] (short) (narrow) %v3734_v12, 16  ;;  %v19794_v61 = vpop.permute.xlu0 %3958  ;;  %v2806_v12 = vrot.slane %v2798_v26, %v19193_v2 }
 0x43d   : > { %26145 = vst [vmem:[#allocation134_spill] sm:$0xff] %v19788_v16  ;;  %26146 = vst [vmem:[#allocation135_spill] sm:$0xff] %v19794_v61  ;;  %v2727_v16 = vcombine.high %v2661_v60, %v2677_v32  ;;  %v2822_v61 = vrot.slane %v2814_v47, %v19193_v2  ;;  %v2831_v32 = vcombine.high %v19304_v45, %v19360_v5 }
 0x43e   : > { %3964 = vrot.lane.b32.xlu1 %v19060_v20, %s18442_s30  ;;  %v3737_v60 = vpack.c.bf16 %v2777_v56, %v2777_v56  ;;  %v2846_v43 = vcombine.low %v2790_v41, %v2806_v12  ;;  %v2783_v45 = vcombine.high %v19072_v0, %v19266_v44  ;;  %v3738_v47 = vpack.c.bf16 %v2778_v39, %v2778_v39 }
 0x43f   : > { %v2878_v49 = vcombine.low %v2822_v61, %v2838_v18  ;;  %v2845_v56 = vrot.slane %v2831_v32, %v19193_v2  ;;  %v2847_v13 = vcombine.high %v2790_v41, %v2806_v12  ;;  %v2829_v11 = vrot.slane %v2815_v63, %v19193_v2 }
 0x440   : > { %v19804_v51 = vpop.permute.xlu1 %3838  ;;  %5798 = vxpose.xlu0.c.b16.start.end [1/1] (short) (narrow) %v3736_v62, 16  ;;  %v19808_v19 = vpop.permute.xlu0 %1162  ;;  %v19824_v62 = vrot.slane %v2727_v16, %v19211_v21  ;;  %v2879_v16 = vcombine.high %v2822_v61, %v2838_v18  ;;  %v19847_v0 = vrot.slane %v2846_v43, %v19211_v21  ;;  %v2797_v44 = vrot.slane %v2783_v45, %v19193_v2 }
 0x441   : > { %26147 = vst [vmem:[#allocation136_spill] sm:$0xff] %v19804_v51  ;;  %26148 = vst [vmem:[#allocation137_spill] sm:$0xff] %v19808_v19  ;;  %v19838_v36 = vrot.slane %v2878_v49, %v19211_v21  ;;  %v2894_v18 = vcombine.low %v2829_v11, %v2845_v56  ;;  %v4022_v32 = vcombine.low %v19362_v6, %v19388_v42 }
 0x442   : > { %v2780_v5 = vcombine.low %v19824_v62, %v19815_v54  ;;  %v19855_v12 = vrot.slane %v2879_v16, %v19211_v21  ;;  %v2862_v39 = vcombine.low %v2797_v44, %v2813_v7  ;;  %v4006_v43 = vcombine.low %v19348_v15, %v19372_v57 }
 0x443   : > { %v2910_v49 = vcombine.low %v19847_v0, %v19838_v36  ;;  %v19866_v6 = vrot.slane %v2847_v13, %v19211_v21  ;;  %v3990_v42 = vcombine.low %v19294_v27, %v19306_v29  ;;  %v2895_v45 = vcombine.high %v2829_v11, %v2845_v56 }
 0x444   : > { %v19821_v53 = vpop.permute.xlu1 %3816  ;;  %5814 = vxpose.xlu0.c.b16.start.end [1/1] (short) (narrow) %v3737_v60, 16  ;;  %v19830_v26 = vpop.permute.xlu0 %1186  ;;  %v3740_v61 = vpack.c.bf16 %v2780_v5, %v2780_v5  ;;  %v4030_v5 = vrot.slane %v4022_v32, %v19193_v2  ;;  %v19874_v34 = vrot.slane %v2894_v18, %v19211_v21  ;;  %v2863_v1 = vcombine.high %v2797_v44, %v2813_v7 }
 0x445   : > { %26149 = vst [vmem:[#allocation138_spill] sm:$0xff] %v19821_v53  ;;  %26150 = vst [vmem:[#allocation139_spill] sm:$0xff] %v19830_v26  ;;  %v3742_v16 = vpack.c.bf16 %v2910_v49, %v2910_v49  ;;  %v3982_v57 = vrot.slane %v3974_v55, %v19193_v2  ;;  %v4014_v13 = vrot.slane %v4006_v43, %v19193_v2 }
 0x446   : > { %v19883_v27 = vrot.slane %v2862_v39, %v19211_v21  ;;  %v3998_v29 = vrot.slane %v3990_v42, %v19193_v2  ;;  %v19889_v32 = vrot.slane %v2895_v45, %v19211_v21  ;;  %v19896_v55 = vrot.slane %v2863_v1, %v19211_v21 }
 0x447   : > { %v4070_v56 = vcombine.low %v4014_v13, %v4030_v5  ;;  %v4071_v39 = vcombine.high %v4014_v13, %v4030_v5  ;;  %v2966_v43 = vcombine.low %v19536_v28, %v19552_v4  ;;  %v2950_v1 = vcombine.low %v19528_v40, %v19544_v25 }
 0x448   : > { %v19840_v10 = vpop.permute.xlu1 %3840  ;;  %5830 = vxpose.xlu0.c.b16.start.end [1/1] (short) (narrow) %v3738_v47, 16  ;;  %v19844_v60 = vpop.permute.xlu0 %1210  ;;  %v2912_v47 = vcombine.low %v19866_v6, %v19855_v12  ;;  %v2914_v18 = vcombine.low %v19883_v27, %v19874_v34  ;;  %v4038_v44 = vcombine.low %v3982_v57, %v3998_v29 }
 0x449   : > { %26151 = vst [vmem:[#allocation140_spill] sm:$0xff] %v19840_v10  ;;  %26152 = vst [vmem:[#allocation141_spill] sm:$0xff] %v19844_v60  ;;  %v19903_v45 = vrot.slane %v4070_v56, %v19211_v21 }
 0x44a   : > { %v3744_v11 = vpack.c.bf16 %v2912_v47, %v2912_v47  ;;  %v3746_v42 = vpack.c.bf16 %v2914_v18, %v2914_v18  ;;  %v4039_v47 = vcombine.high %v3982_v57, %v3998_v29  ;;  %v19914_v13 = vrot.slane %v4038_v44, %v19211_v21 }
 0x44b   : > { %v19917_v18 = vrot.slane %v4071_v39, %v19211_v21  ;;  %v2918_v57 = vcombine.low %v18992_v24, %v19512_v33  ;;  %v2974_v29 = vrot.slane %v2966_v43, %v19193_v2 }
 0x44c   : > { %v19857_v41 = vpop.permute.xlu1 %3864  ;;  %5862 = vxpose.xlu0.c.b16.start.end [1/1] (short) (narrow) %v3740_v61, 16  ;;  %v19863_v63 = vpop.permute.xlu0 %1234  ;;  %v19929_v44 = vrot.slane %v4039_v47, %v19211_v21 }
 0x44d   : > { %26153 = vst [vmem:[#allocation142_spill] sm:$0xff] %v19857_v41  ;;  %26154 = vst [vmem:[#allocation143_spill] sm:$0xff] %v19863_v63 }
 0x44e   : > { %v4104_v43 = vcombine.low %v19929_v44, %v19917_v18 }
 0x450   : > { %v19876_v15 = vpop.permute.xlu1 %3888  ;;  %5894 = vxpose.xlu0.c.b16.start.end [1/1] (short) (narrow) %v3742_v16, 16  ;;  %v19880_v61 = vpop.permute.xlu0 %1258  ;;  %v2916_v16 = vcombine.low %v19896_v55, %v19889_v32 }
 0x451   : > { %26155 = vst [vmem:[#allocation144_spill] sm:$0xff] %v19876_v15  ;;  %26156 = vst [vmem:[#allocation145_spill] sm:$0xff] %v19880_v61  ;;  %v4102_v15 = vcombine.low %v19914_v13, %v19903_v45  ;;  %v2951_v61 = vcombine.high %v19528_v40, %v19544_v25  ;;  %v2781_v40 = vcombine.high %v19824_v62, %v19815_v54 }
 0x452   : > { %v3748_v56 = vpack.c.bf16 %v2916_v16, %v2916_v16  ;;  %v2926_v16 = vrot.slane %v2918_v57, %v19193_v2 }
 0x454   : > { %v19891_v7 = vpop.permute.xlu1 %3912  ;;  %5926 = vxpose.xlu0.c.b16.start.end [1/1] (short) (narrow) %v3744_v11, 16  ;;  %v19893_v49 = vpop.permute.xlu0 %1282  ;;  %v2934_v11 = vcombine.low %v19504_v14, %v19520_v46 }
 0x455   : > { %26157 = vst [vmem:[#allocation146_spill] sm:$0xff] %v19891_v7  ;;  %26158 = vst [vmem:[#allocation147_spill] sm:$0xff] %v19893_v49  ;;  %v2958_v7 = vrot.slane %v2950_v1, %v19193_v2  ;;  %v2935_v1 = vcombine.high %v19504_v14, %v19520_v46 }
 0x456   : > { %v2942_v39 = vrot.slane %v2934_v11, %v19193_v2  ;;  %v2779_v11 = vcombine.high %v19811_v22, %v19802_v50  ;;  %v5064_v22 = vpack.c.bf16 %v4104_v43, %v4104_v43  ;;  %v2911_v43 = vcombine.high %v19847_v0, %v19838_v36 }
 0x457   : > { %v3014_v49 = vcombine.low %v2958_v7, %v2974_v29  ;;  %v3015_v50 = vcombine.high %v2958_v7, %v2974_v29  ;;  %v3102_v29 = vcombine.low %v19582_v9, %v19598_v23 }
 0x458   : > { %v19905_v20 = vpop.permute.xlu1 %3936  ;;  %5958 = vxpose.xlu0.c.b16.start.end [1/1] (short) (narrow) %v3746_v42, 16  ;;  %v19911_v5 = vpop.permute.xlu0 %1306  ;;  %v2775_v42 = vcombine.high %v19766_v59, %v19755_v48  ;;  %v5062_v59 = vpack.c.bf16 %v4102_v15, %v4102_v15  ;;  %v3739_v25 = vpack.c.bf16 %v2779_v11, %v2779_v11 }
 0x459   : > { %26159 = vst [vmem:[#allocation148_spill] sm:$0xff] %v19905_v20  ;;  %26160 = vst [vmem:[#allocation149_spill] sm:$0xff] %v19911_v5  ;;  %v19956_v14 = vrot.slane %v3014_v49, %v19211_v21  ;;  %v19975_v62 = vrot.slane %v3015_v50, %v19211_v21  ;;  %v3110_v36 = vrot.slane %v3102_v29, %v19193_v2 }
 0x45a   : > { %v3735_v47 = vpack.c.bf16 %v2775_v42, %v2775_v42  ;;  %v2949_v42 = vrot.slane %v2935_v1, %v19193_v2 }
 0x45c   : > { %v19924_v20 = vpop.permute.xlu1 %3960  ;;  %5990 = vxpose.xlu0.c.b16.start.end [1/1] (short) (narrow) %v3748_v56, 16  ;;  %v19933_v63 = vpop.permute.xlu0 %2490  ;;  %v2982_v56 = vcombine.low %v2926_v16, %v2942_v39 }
 0x45d   : > { %26161 = vst [vmem:[#allocation150_spill] sm:$0xff] %v19924_v20  ;;  %v2967_v20 = vcombine.high %v19536_v28, %v19552_v4  ;;  %v2919_v4 = vcombine.high %v18992_v24, %v19512_v33  ;;  %v4106_v28 = vcombine.low %v19426_v8, %v19419_v35  ;;  %v2983_v24 = vcombine.high %v2926_v16, %v2942_v39 }
 0x45e   : > { %v2965_v33 = vrot.slane %v2951_v61, %v19193_v2  ;;  %v3741_v39 = vpack.c.bf16 %v2781_v40, %v2781_v40  ;;  %v2913_v40 = vcombine.high %v19866_v6, %v19855_v12  ;;  %v3103_v12 = vcombine.high %v19582_v9, %v19598_v23 }
 0x45f   : > { %v2981_v15 = vrot.slane %v2967_v20, %v19193_v2  ;;  %v19967_v20 = vrot.slane %v2982_v56, %v19211_v21  ;;  %v2933_v8 = vrot.slane %v2919_v4, %v19193_v2  ;;  %v5066_v7 = vpack.c.bf16 %v4106_v28, %v4106_v28 }
 0x460   : > { %v19940_v48 = vpop.permute.xlu1 %1164  ;;  %9984 = vxpose.xlu0.c.b16.start.end [1/1] (short) (narrow) %v5062_v59, 16  ;;  %v19948_v57 = vpop.permute.xlu0 %2514  ;;  %v3070_v59 = vcombine.low %v19550_v17, %v19566_v38  ;;  %v19988_v1 = vrot.slane %v2983_v24, %v19211_v21  ;;  %v3054_v4 = vcombine.low %v19005_v30, %v19558_v3 }
 0x461   : > { %26162 = vst [vmem:[#allocation151_spill] sm:$0xff] %v19940_v48  ;;  %5782 = vxpose.xlu1.c.b16.start.end [1/1] (short) (narrow) %v3735_v47, 16  ;;  %v3030_v49 = vcombine.low %v2965_v33, %v2981_v15  ;;  %v3046_v54 = vcombine.low %v19967_v20, %v19956_v14  ;;  %v2998_v16 = vcombine.low %v2933_v8, %v2949_v42 }
 0x462   : > { %v3086_v47 = vcombine.low %v19574_v37, %v19590_v52  ;;  %v3031_v56 = vcombine.high %v2965_v33, %v2981_v15  ;;  %v3048_v28 = vcombine.low %v19988_v1, %v19975_v62  ;;  %v2999_v15 = vcombine.high %v2933_v8, %v2949_v42 }
 0x463   : > { %v3750_v0 = vpack.c.bf16 %v3046_v54, %v3046_v54  ;;  %v19996_v50 = vrot.slane %v3030_v49, %v19211_v21  ;;  %v3078_v24 = vrot.slane %v3070_v59, %v19193_v2  ;;  %v20007_v29 = vrot.slane %v2998_v16, %v19211_v21 }
 0x464   : > { %v19958_v46 = vpop.permute.xlu1 %1188  ;;  %10016 = vxpose.xlu0.c.b16.start.end [1/1] (short) (narrow) %v5064_v22, 16  ;;  %v19964_v35 = vpop.permute.xlu0 %2538  ;;  %v3094_v33 = vrot.slane %v3086_v47, %v19193_v2  ;;  %v3062_v49 = vrot.slane %v3054_v4, %v19193_v2  ;;  %v20011_v54 = vrot.slane %v3031_v56, %v19211_v21  ;;  %v3752_v42 = vpack.c.bf16 %v3048_v28, %v3048_v28 }
 0x465   : > { %26163 = vst [vmem:[#allocation152_spill] sm:$0xff] %v19958_v46  ;;  %5846 = vxpose.xlu1.c.b16.start.end [1/1] (short) (narrow) %v3739_v25, 16  ;;  %v3743_v25 = vpack.c.bf16 %v2911_v43, %v2911_v43  ;;  %v3050_v8 = vcombine.low %v20007_v29, %v19996_v50  ;;  %v3745_v43 = vpack.c.bf16 %v2913_v40, %v2913_v40 }
 0x466   : > { %v3150_v6 = vcombine.low %v3094_v33, %v3110_v36  ;;  %v2915_v16 = vcombine.high %v19883_v27, %v19874_v34  ;;  %v3071_v59 = vcombine.high %v19550_v17, %v19566_v38  ;;  %v3118_v47 = vcombine.low %v3062_v49, %v3078_v24 }
 0x467   : > { %v3087_v56 = vcombine.high %v19574_v37, %v19590_v52  ;;  %v20028_v9 = vrot.slane %v2999_v15, %v19211_v21  ;;  %v3055_v4 = vcombine.high %v19005_v30, %v19558_v3  ;;  %v3117_v34 = vrot.slane %v3103_v12, %v19193_v2 }
 0x468   : > { %v19977_v61 = vpop.permute.xlu1 %1212  ;;  %10048 = vxpose.xlu0.c.b16.start.end [1/1] (short) (narrow) %v5066_v7, 16  ;;  %v19985_v11 = vpop.permute.xlu0 %2562  ;;  %v3754_v27 = vpack.c.bf16 %v3050_v8, %v3050_v8  ;;  %v20036_v17 = vrot.slane %v3150_v6, %v19211_v21  ;;  %v3119_v52 = vcombine.high %v3062_v49, %v3078_v24  ;;  %v3747_v28 = vpack.c.bf16 %v2915_v16, %v2915_v16  ;;  %v26169_v16 = vld [vmem:[#allocation117_spill] sm:$0xff] }
 0x469   : > { %26164 = vst [vmem:[#allocation153_spill] sm:$0xff] %v19977_v61  ;;  %5878 = vxpose.xlu1.c.b16.start.end [1/1] (short) (narrow) %v3741_v39, 16  ;;  %v3052_v38 = vcombine.low %v20028_v9, %v20011_v54  ;;  %v3085_v30 = vrot.slane %v3071_v59, %v19193_v2  ;;  %v3101_v3 = vrot.slane %v3087_v56, %v19193_v2  ;;  %v26170_v59 = vld [vmem:[#allocation113_spill] sm:$0xff]  ;;  %v26171_v56 = vld [vmem:[#allocation122_spill] sm:$0xff] }
 0x46a   : > { %v20047_v40 = vrot.slane %v3118_v47, %v19211_v21  ;;  %v3069_v15 = vrot.slane %v3055_v4, %v19193_v2  ;;  %v20062_v8 = vrot.slane %v3119_v52, %v19211_v21  ;;  %v3206_v47 = vcombine.low %v26170_v59, %v26169_v16  ;;  %v26172_v4 = vld [vmem:[#allocation119_spill] sm:$0xff] }
 0x46c   : > { %v19998_v22 = vpop.permute.xlu1 %1236  ;;  %6022 = vxpose.xlu0.c.b16.start.end [1/1] (short) (narrow) %v3750_v0, 16  ;;  %v20004_v7 = vpop.permute.xlu0 %2586  ;;  %v3151_v0 = vcombine.high %v3094_v33, %v3110_v36  ;;  %v3166_v33 = vcombine.low %v3101_v3, %v3117_v34  ;;  %v3182_v49 = vcombine.low %v20047_v40, %v20036_v17 }
 0x46d   : > { %26165 = vst [vmem:[#allocation154_spill] sm:$0xff] %v19998_v22  ;;  %5910 = vxpose.xlu1.c.b16.start.end [1/1] (short) (narrow) %v3743_v25, 16  ;;  %v2917_v25 = vcombine.high %v19896_v55, %v19889_v32  ;;  %v3238_v32 = vcombine.low %v19704_v31, %v19718_v58  ;;  %v3756_v55 = vpack.c.bf16 %v3052_v38, %v3052_v38 }
 0x46e   : > { %v20051_v24 = vrot.slane %v3151_v0, %v19211_v21  ;;  %v3222_v0 = vcombine.low %v26172_v4, %v26171_v56  ;;  %v3758_v52 = vpack.c.bf16 %v3182_v49, %v3182_v49  ;;  %v20076_v22 = vrot.slane %v3166_v33, %v19211_v21 }
 0x46f   : > { %v3749_v6 = vpack.c.bf16 %v2917_v25, %v2917_v25  ;;  %v26174_v25 = vld [vmem:[#allocation44_spill] sm:$0xff] }
 0x470   : > { %v20017_v39 = vpop.permute.xlu1 %1260  ;;  %6054 = vxpose.xlu0.c.b16.start.end [1/1] (short) (narrow) %v3752_v42, 16  ;;  %v20025_v23 = vpop.permute.xlu0 %2610  ;;  %v4103_v42 = vcombine.high %v19914_v13, %v19903_v45  ;;  %v3184_v38 = vcombine.low %v20062_v8, %v20051_v24  ;;  %v3246_v45 = vrot.slane %v3238_v32, %v19193_v2 }
 0x471   : > { %26166 = vst [vmem:[#allocation155_spill] sm:$0xff] %v20017_v39  ;;  %5942 = vxpose.xlu1.c.b16.start.end [1/1] (short) (narrow) %v3745_v43, 16  ;;  %v3134_v43 = vcombine.low %v3069_v15, %v3085_v30 }
 0x472   : > { %v3760_v49 = vpack.c.bf16 %v3184_v38, %v3184_v38 }
 0x473   : > { %v20085_v32 = vrot.slane %v3134_v43, %v19211_v21  ;;  %v3047_v43 = vcombine.high %v19967_v20, %v19956_v14 }
 0x474   : > { %v20038_v37 = vpop.permute.xlu1 %1284  ;;  %6086 = vxpose.xlu0.c.b16.start.end [1/1] (short) (narrow) %v3754_v27, 16  ;;  %v20044_v36 = vpop.permute.xlu0 %2634  ;;  %v3167_v27 = vcombine.high %v3101_v3, %v3117_v34  ;;  %v4105_v34 = vcombine.high %v19929_v44, %v19917_v18  ;;  %v3214_v3 = vrot.slane %v3206_v47, %v19193_v2 }
 0x475   : > { %26167 = vst [vmem:[#allocation156_spill] sm:$0xff] %v20038_v37  ;;  %5974 = vxpose.xlu1.c.b16.start.end [1/1] (short) (narrow) %v3747_v28, 16  ;;  %v26173_v28 = vld [vmem:[#allocation115_spill] sm:$0xff]  ;;  %v3135_v37 = vcombine.high %v3069_v15, %v3085_v30  ;;  %v3239_v15 = vcombine.high %v19704_v31, %v19718_v58  ;;  %v3186_v18 = vcombine.low %v20085_v32, %v20076_v22 }
 0x476   : > { %v3190_v46 = vcombine.low %v26174_v25, %v26173_v28  ;;  %v20088_v33 = vrot.slane %v3167_v27, %v19211_v21  ;;  %v5065_v47 = vpack.c.bf16 %v4105_v34, %v4105_v34  ;;  %v3207_v27 = vcombine.high %v26170_v59, %v26169_v16 }
 0x477   : > { %v3223_v58 = vcombine.high %v26172_v4, %v26171_v56  ;;  %v3191_v38 = vcombine.high %v26174_v25, %v26173_v28  ;;  %v3253_v20 = vrot.slane %v3239_v15, %v19193_v2  ;;  %v3751_v56 = vpack.c.bf16 %v3047_v43, %v3047_v43  ;;  %v26177_v15 = vld [vmem:[#allocation134_spill] sm:$0xff] }
 0x478   : > { %v20057_v12 = vpop.permute.xlu1 %1308  ;;  %6118 = vxpose.xlu0.c.b16.start.end [1/1] (short) (narrow) %v3756_v55, 16  ;;  %v20073_v13 = vpop.permute.xlu0 %3818  ;;  %v5063_v55 = vpack.c.bf16 %v4103_v42, %v4103_v42  ;;  %v3198_v30 = vrot.slane %v3190_v46, %v19193_v2  ;;  %v3049_v4 = vcombine.high %v19988_v1, %v19975_v62  ;;  %v3051_v43 = vcombine.high %v20007_v29, %v19996_v50 }
 0x479   : > { %26168 = vst [vmem:[#allocation157_spill] sm:$0xff] %v20057_v12  ;;  %6006 = vxpose.xlu1.c.b16.start.end [1/1] (short) (narrow) %v3749_v6, 16  ;;  %26175 = vst [vmem:[#allocation117_spill] sm:$0xff] %v20073_v13  ;;  %v3230_v6 = vrot.slane %v3222_v0, %v19193_v2  ;;  %v20100_v0 = vrot.slane %v3135_v37, %v19211_v21  ;;  %v3237_v25 = vrot.slane %v3223_v58, %v19193_v2  ;;  %v26181_v58 = vld [vmem:[#allocation123_spill] sm:$0xff] }
 0x47a   : > { %v3254_v46 = vcombine.low %v3198_v30, %v3214_v3  ;;  %v3255_v28 = vcombine.high %v3198_v30, %v3214_v3  ;;  %v3753_v30 = vpack.c.bf16 %v3049_v4, %v3049_v4  ;;  %v3755_v12 = vpack.c.bf16 %v3051_v43, %v3051_v43 }
 0x47b   : > { %v3286_v42 = vcombine.low %v3230_v6, %v3246_v45  ;;  %v3188_v14 = vcombine.low %v20100_v0, %v20088_v33  ;;  %v3287_v37 = vcombine.high %v3230_v6, %v3246_v45  ;;  %v3205_v45 = vrot.slane %v3191_v38, %v19193_v2 }
 0x47c   : > { %v20078_v48 = vpop.permute.xlu1 %2492  ;;  %6150 = vxpose.xlu0.c.b16.start.end [1/1] (short) (narrow) %v3758_v52, 16  ;;  %v20106_v31 = vpop.permute.xlu0 %3842  ;;  %v3762_v52 = vpack.c.bf16 %v3186_v18, %v3186_v18  ;;  %v20123_v34 = vrot.slane %v3254_v46, %v19211_v21  ;;  %v26180_v46 = vld [vmem:[#allocation126_spill] sm:$0xff]  ;;  %v3303_v13 = vcombine.high %v3237_v25, %v3253_v20 }
 0x47d   : > { %10000 = vxpose.xlu1.c.b16.start.end [1/1] (short) (narrow) %v5063_v55, 16  ;;  %26176 = vst [vmem:[#allocation113_spill] sm:$0xff] %v20106_v31  ;;  %v20114_v16 = vrot.slane %v3286_v42, %v19211_v21  ;;  %v3221_v55 = vrot.slane %v3207_v27, %v19193_v2  ;;  %v3764_v6 = vpack.c.bf16 %v3188_v14, %v3188_v14  ;;  %v26178_v42 = vld [vmem:[#allocation130_spill] sm:$0xff]  ;;  %v26182_v14 = vld [vmem:[#allocation132_spill] sm:$0xff] }
 0x47e   : > { %v3374_v18 = vcombine.low %v26178_v42, %v26177_v15  ;;  %v20133_v1 = vrot.slane %v3287_v37, %v19211_v21  ;;  %v3342_v38 = vcombine.low %v26181_v58, %v26180_v46  ;;  %v20144_v31 = vrot.slane %v3255_v28, %v19211_v21  ;;  %v26184_v37 = vld [vmem:[#allocation124_spill] sm:$0xff] }
 0x47f   : > { %v3318_v62 = vcombine.low %v20123_v34, %v20114_v16  ;;  %v3270_v27 = vcombine.low %v3205_v45, %v3221_v55  ;;  %v3271_v28 = vcombine.high %v3205_v45, %v3221_v55  ;;  %v20171_v45 = vrot.slane %v3303_v13, %v19211_v21 }
 0x480   : > { %v20095_v44 = vpop.permute.xlu1 %2516  ;;  %6182 = vxpose.xlu0.c.b16.start.end [1/1] (short) (narrow) %v3760_v49, 16  ;;  %v3302_v49 = vcombine.low %v3237_v25, %v3253_v20  ;;  %v3382_v4 = vrot.slane %v3374_v18, %v19193_v2  ;;  %v3320_v50 = vcombine.low %v20144_v31, %v20133_v1  ;;  %v3350_v20 = vrot.slane %v3342_v38, %v19193_v2 }
 0x481   : > { %10032 = vxpose.xlu1.c.b16.start.end [1/1] (short) (narrow) %v5065_v47, 16  ;;  %v20128_v47 = vpop.permute.xlu0 %3866  ;;  %v3766_v39 = vpack.c.bf16 %v3318_v62, %v3318_v62  ;;  %v20161_v18 = vrot.slane %v3270_v27, %v19211_v21 }
 0x482   : > { %26179 = vst [vmem:[#allocation122_spill] sm:$0xff] %v20128_v47  ;;  %v26185_v47 = vld [vmem:[#allocation47_spill] sm:$0xff]  ;;  %v20152_v29 = vrot.slane %v3302_v49, %v19211_v21  ;;  %v3375_v49 = vcombine.high %v26178_v42, %v26177_v15  ;;  %v3183_v15 = vcombine.high %v20047_v40, %v20036_v17 }
 0x483   : > { %v3326_v61 = vcombine.low %v26185_v47, %v26184_v37  ;;  %v3327_v27 = vcombine.high %v26185_v47, %v26184_v37  ;;  %v3185_v37 = vcombine.high %v20062_v8, %v20051_v24 }
 0x484   : > { %v20116_v59 = vpop.permute.xlu1 %2540  ;;  %6214 = vxpose.xlu0.c.b16.start.end [1/1] (short) (narrow) %v3762_v52, 16  ;;  %v26183_v52 = vld [vmem:[#allocation128_spill] sm:$0xff]  ;;  %v3322_v55 = vcombine.low %v20161_v18, %v20152_v29  ;;  %v3389_v13 = vrot.slane %v3375_v49, %v19193_v2  ;;  %v3759_v47 = vpack.c.bf16 %v3183_v15, %v3183_v15 }
 0x485   : > { %6038 = vxpose.xlu1.c.b16.start.end [1/1] (short) (narrow) %v3751_v56, 16  ;;  %v3358_v56 = vcombine.low %v26183_v52, %v26182_v14  ;;  %v20158_v5 = vpop.permute.xlu0 %3890  ;;  %v3334_v62 = vrot.slane %v3326_v61, %v19193_v2  ;;  %v3359_v61 = vcombine.high %v26183_v52, %v26182_v14  ;;  %v3761_v8 = vpack.c.bf16 %v3185_v37, %v3185_v37 }
 0x486   : > { %26186 = vst [vmem:[#allocation119_spill] sm:$0xff] %v20158_v5 }
 0x487   : > { %v3366_v25 = vrot.slane %v3358_v56, %v19193_v2  ;;  %v3390_v42 = vcombine.low %v3334_v62, %v3350_v20  ;;  %v3373_v52 = vrot.slane %v3359_v61, %v19193_v2 }
 0x488   : > { %v20135_v3 = vpop.permute.xlu1 %2564  ;;  %6246 = vxpose.xlu0.c.b16.start.end [1/1] (short) (narrow) %v3764_v6, 16  ;;  %v3053_v6 = vcombine.high %v20028_v9, %v20011_v54  ;;  %v3768_v9 = vpack.c.bf16 %v3320_v50, %v3320_v50 }
 0x489   : > { %6070 = vxpose.xlu1.c.b16.start.end [1/1] (short) (narrow) %v3753_v30, 16  ;;  %v3422_v54 = vcombine.low %v3366_v25, %v3382_v4  ;;  %v3423_v38 = vcombine.high %v3366_v25, %v3382_v4  ;;  %v3391_v4 = vcombine.high %v3334_v62, %v3350_v20  ;;  %v20199_v50 = vrot.slane %v3390_v42, %v19211_v21 }
 0x48a   : > { %v3757_v43 = vpack.c.bf16 %v3053_v6, %v3053_v6  ;;  %v3341_v6 = vrot.slane %v3327_v27, %v19193_v2  ;;  %v3510_v25 = vcombine.low %v20004_v7, %v20044_v36  ;;  %v3187_v20 = vcombine.high %v20085_v32, %v20076_v22  ;;  %v26189_v22 = vld [vmem:[#allocation50_spill] sm:$0xff] }
 0x48b   : > { %v20190_v17 = vrot.slane %v3422_v54, %v19211_v21  ;;  %v3478_v62 = vcombine.low %v19933_v63, %v19964_v35  ;;  %v20218_v61 = vrot.slane %v3391_v4, %v19211_v21  ;;  %v3462_v32 = vcombine.low %v26189_v22, %v19948_v57 }
 0x48c   : > { %6278 = vxpose.xlu0.c.b16.start.end [1/1] (short) (narrow) %v3766_v39, 16  ;;  %v20166_v30 = vpop.permute.xlu1 %2588  ;;  %v3343_v39 = vcombine.high %v26181_v58, %v26180_v46  ;;  %v20185_v46 = vpop.permute.xlu0 %3914  ;;  %v3770_v58 = vpack.c.bf16 %v3322_v55, %v3322_v55  ;;  %v3494_v55 = vcombine.low %v19985_v11, %v20025_v23  ;;  %v3518_v27 = vrot.slane %v3510_v25, %v19193_v2 }
 0x48d   : > { %6102 = vxpose.xlu1.c.b16.start.end [1/1] (short) (narrow) %v3755_v12, 16  ;;  %v20180_v12 = vrot.slane %v3271_v28, %v19211_v21  ;;  %26187 = vst [vmem:[#allocation115_spill] sm:$0xff] %v20185_v46  ;;  %v3438_v28 = vcombine.low %v3373_v52, %v3389_v13  ;;  %v3454_v54 = vcombine.low %v20199_v50, %v20190_v17 }
 0x48e   : > { %v3357_v40 = vrot.slane %v3343_v39, %v19193_v2  ;;  %v3486_v37 = vrot.slane %v3478_v62, %v19193_v2  ;;  %v3502_v4 = vrot.slane %v3494_v55, %v19193_v2  ;;  %v3479_v62 = vcombine.high %v19933_v63, %v19964_v35 }
 0x48f   : > { %v3324_v14 = vcombine.low %v20180_v12, %v20171_v45  ;;  %v20223_v42 = vrot.slane %v3438_v28, %v19211_v21 }
 0x490   : > { %6310 = vxpose.xlu0.c.b16.start.end [1/1] (short) (narrow) %v3768_v9, 16  ;;  %v20194_v56 = vpop.permute.xlu1 %2612  ;;  %v20207_v9 = vrot.slane %v3423_v38, %v19211_v21  ;;  %v3406_v24 = vcombine.low %v3341_v6, %v3357_v40  ;;  %v20215_v39 = vpop.permute.xlu0 %3938  ;;  %v3774_v38 = vpack.c.bf16 %v3454_v54, %v3454_v54 }
 0x491   : > { %6134 = vxpose.xlu1.c.b16.start.end [1/1] (short) (narrow) %v3757_v43, 16  ;;  %v3772_v49 = vpack.c.bf16 %v3324_v14, %v3324_v14  ;;  %26188 = vst [vmem:[#allocation44_spill] sm:$0xff] %v20215_v39  ;;  %v3439_v43 = vcombine.high %v3373_v52, %v3389_v13  ;;  %v3407_v14 = vcombine.high %v3341_v6, %v3357_v40 }
 0x492   : > { %v3189_v13 = vcombine.high %v20100_v0, %v20088_v33  ;;  %v20233_v52 = vrot.slane %v3406_v24, %v19211_v21  ;;  %v3470_v40 = vrot.slane %v3462_v32, %v19193_v2  ;;  %v3511_v33 = vcombine.high %v20004_v7, %v20044_v36 }
 0x493   : > { %v20240_v25 = vrot.slane %v3439_v43, %v19211_v21  ;;  %v3558_v0 = vcombine.low %v3502_v4, %v3518_v27  ;;  %v3495_v7 = vcombine.high %v19985_v11, %v20025_v23  ;;  %v3559_v36 = vcombine.high %v3502_v4, %v3518_v27 }
 0x494   : > { %6342 = vxpose.xlu0.c.b16.start.end [1/1] (short) (narrow) %v3770_v58, 16  ;;  %v20220_v15 = vpop.permute.xlu1 %2636  ;;  %v3456_v58 = vcombine.low %v20218_v61, %v20207_v9  ;;  %v3458_v28 = vcombine.low %v20233_v52, %v20223_v42  ;;  %v20245_v6 = vpop.permute.xlu0 %3962  ;;  %v3765_v24 = vpack.c.bf16 %v3189_v13, %v3189_v13  ;;  %v3526_v55 = vcombine.low %v3470_v40, %v3486_v37 }
 0x495   : > { %6166 = vxpose.xlu1.c.b16.start.end [1/1] (short) (narrow) %v3759_v47, 16  ;;  %v3763_v47 = vpack.c.bf16 %v3187_v20, %v3187_v20  ;;  %26190 = vst [vmem:[#allocation134_spill] sm:$0xff] %v20245_v6  ;;  %v20252_v20 = vrot.slane %v3407_v14, %v19211_v21  ;;  %v3463_v32 = vcombine.high %v26189_v22, %v19948_v57 }
 0x496   : > { %v20266_v63 = vrot.slane %v3558_v0, %v19211_v21  ;;  %v3527_v35 = vcombine.high %v3470_v40, %v3486_v37  ;;  %v3321_v11 = vcombine.high %v20144_v31, %v20133_v1  ;;  %v3493_v23 = vrot.slane %v3479_v62, %v19193_v2 }
 0x497   : > { %v3460_v43 = vcombine.low %v20252_v20, %v20240_v25  ;;  %v3509_v27 = vrot.slane %v3495_v7, %v19193_v2  ;;  %v20273_v57 = vrot.slane %v3526_v55, %v19211_v21  ;;  %v3477_v13 = vrot.slane %v3463_v32, %v19193_v2  ;;  %v26193_v55 = vld [vmem:[#allocation53_spill] sm:$0xff] }
 0x498   : > { %6374 = vxpose.xlu0.c.b16.start.end [1/1] (short) (narrow) %v3772_v49, 16  ;;  %v3776_v49 = vpack.c.bf16 %v3456_v58, %v3456_v58  ;;  %v20247_v54 = vpop.permute.xlu1 %3820  ;;  %v3646_v31 = vcombine.low %v20166_v30, %v20220_v15  ;;  %v3323_v40 = vcombine.high %v20161_v18, %v20152_v29  ;;  %v3598_v7 = vcombine.low %v26193_v55, %v20095_v44 }
 0x499   : > { %6198 = vxpose.xlu1.c.b16.start.end [1/1] (short) (narrow) %v3761_v8, 16  ;;  %26191 = vst [vmem:[#allocation130_spill] sm:$0xff] %v20247_v54  ;;  %v3319_v8 = vcombine.high %v20123_v34, %v20114_v16  ;;  %v3525_v16 = vrot.slane %v3511_v33, %v19193_v2  ;;  %v3780_v14 = vpack.c.bf16 %v3460_v43, %v3460_v43 }
 0x49a   : > { %v3590_v4 = vcombine.low %v20273_v57, %v20266_v63  ;;  %v20290_v33 = vrot.slane %v3527_v35, %v19211_v21  ;;  %v3542_v0 = vcombine.low %v3477_v13, %v3493_v23  ;;  %v3654_v29 = vrot.slane %v3646_v31, %v19193_v2 }
 0x49b   : > { %v3767_v58 = vpack.c.bf16 %v3319_v8, %v3319_v8  ;;  %v3574_v37 = vcombine.low %v3509_v27, %v3525_v16  ;;  %v3575_v8 = vcombine.high %v3509_v27, %v3525_v16  ;;  %v3543_v32 = vcombine.high %v3477_v13, %v3493_v23 }
 0x49c   : > { %6406 = vxpose.xlu0.c.b16.start.end [1/1] (short) (narrow) %v3774_v38, 16  ;;  %v3778_v38 = vpack.c.bf16 %v3458_v28, %v3458_v28  ;;  %v20275_v22 = vpop.permute.xlu1 %3844  ;;  %v3769_v28 = vpack.c.bf16 %v3321_v11, %v3321_v11  ;;  %v3771_v35 = vpack.c.bf16 %v3323_v40, %v3323_v40  ;;  %v3325_v16 = vcombine.high %v20180_v12, %v20171_v45 }
 0x49d   : > { %6230 = vxpose.xlu1.c.b16.start.end [1/1] (short) (narrow) %v3763_v47, 16  ;;  %26192 = vst [vmem:[#allocation126_spill] sm:$0xff] %v20275_v22  ;;  %v20278_v47 = vrot.slane %v3559_v36, %v19211_v21  ;;  %v3782_v36 = vpack.c.bf16 %v3590_v4, %v3590_v4  ;;  %v20304_v43 = vrot.slane %v3574_v37, %v19211_v21 }
 0x49e   : > { %v20313_v27 = vrot.slane %v3542_v0, %v19211_v21  ;;  %v20316_v37 = vrot.slane %v3575_v8, %v19211_v21  ;;  %v3606_v23 = vrot.slane %v3598_v7, %v19193_v2  ;;  %v3647_v13 = vcombine.high %v20166_v30, %v20220_v15 }
 0x49f   : > { %v3592_v62 = vcombine.low %v20290_v33, %v20278_v47  ;;  %v3455_v40 = vcombine.high %v20199_v50, %v20190_v17  ;;  %v20330_v0 = vrot.slane %v3543_v32, %v19211_v21  ;;  %v3631_v15 = vcombine.high %v20135_v3, %v20194_v56 }
 0x4a0   : > { %6438 = vxpose.xlu0.c.b16.start.end [1/1] (short) (narrow) %v3776_v49, 16  ;;  %v3614_v49 = vcombine.low %v20078_v48, %v20116_v59  ;;  %v3594_v12 = vcombine.low %v20313_v27, %v20304_v43  ;;  %v3661_v50 = vrot.slane %v3647_v13, %v19193_v2 }
 0x4a1   : > { %6262 = vxpose.xlu1.c.b16.start.end [1/1] (short) (narrow) %v3765_v24, 16  ;;  %v3630_v24 = vcombine.low %v20135_v3, %v20194_v56  ;;  %v3596_v17 = vcombine.low %v20330_v0, %v20316_v37  ;;  %v3775_v56 = vpack.c.bf16 %v3455_v40, %v3455_v40 }
 0x4a2   : > { %v20263_v34 = vpop.trf.xlu0 }
 0x4a3   : > { %v3638_v11 = vrot.slane %v3630_v24, %v19193_v2  ;;  %v3599_v24 = vcombine.high %v26193_v55, %v20095_v44  ;;  %v3457_v55 = vcombine.high %v20218_v61, %v20207_v9 }
 0x4a4   : > { %6470 = vxpose.xlu0.c.b16.start.end [1/1] (short) (narrow) %v3778_v38, 16  ;;  %v20306_v38 = vpop.permute.xlu1 %3868 }
 0x4a5   : > { %6294 = vxpose.xlu1.c.b16.start.end [1/1] (short) (narrow) %v3767_v58, 16  ;;  %26195 = vst [vmem:[#allocation132_spill] sm:$0xff] %v20306_v38  ;;  %v3622_v58 = vrot.slane %v3614_v49, %v19193_v2  ;;  %v3694_v31 = vcombine.low %v3638_v11, %v3654_v29  ;;  %v3615_v49 = vcombine.high %v20078_v48, %v20116_v59 }
 0x4a6   : > { %v20283_v1 = vpop.trf.xlu0  ;;  %v3786_v48 = vpack.c.bf16 %v3594_v12, %v3594_v12  ;;  %v3777_v12 = vpack.c.bf16 %v3457_v55, %v3457_v55 }
 0x4a7   : > { %v3662_v30 = vcombine.low %v3606_v23, %v3622_v58  ;;  %v20346_v59 = vrot.slane %v3694_v31, %v19211_v21  ;;  %v3663_v32 = vcombine.high %v3606_v23, %v3622_v58  ;;  %v3788_v31 = vpack.c.bf16 %v3596_v17, %v3596_v17 }
 0x4a8   : > { %6502 = vxpose.xlu0.c.b16.start.end [1/1] (short) (narrow) %v3780_v14, 16  ;;  %v3784_v14 = vpack.c.bf16 %v3592_v62, %v3592_v62  ;;  %v20338_v8 = vpop.permute.xlu1 %3892  ;;  %v3695_v62 = vcombine.high %v3638_v11, %v3654_v29  ;;  %v3645_v29 = vrot.slane %v3631_v15, %v19193_v2 }
 0x4a9   : > { %6326 = vxpose.xlu1.c.b16.start.end [1/1] (short) (narrow) %v3769_v28, 16  ;;  %v3773_v28 = vpack.c.bf16 %v3325_v16, %v3325_v16  ;;  %26196 = vst [vmem:[#allocation128_spill] sm:$0xff] %v20338_v8  ;;  %v3613_v16 = vrot.slane %v3599_v24, %v19193_v2  ;;  %v20375_v40 = vrot.slane %v3663_v32, %v19211_v21 }
 0x4aa   : > { %v20301_v18 = vpop.trf.xlu0  ;;  %v20367_v61 = vrot.slane %v3695_v62, %v19211_v21 }
 0x4ab   : > { %26194 = vst [vmem:[#allocation123_spill] sm:$0xff] %v20301_v18 }
 0x4ac   : > { %6534 = vxpose.xlu0.c.b16.start.end [1/1] (short) (narrow) %v3782_v36, 16  ;;  %v3629_v36 = vrot.slane %v3615_v49, %v19193_v2  ;;  %v20369_v58 = vpop.permute.xlu1 %3916  ;;  %v3711_v49 = vcombine.high %v3645_v29, %v3661_v50  ;;  %v3728_v24 = vcombine.low %v20375_v40, %v20367_v61 }
 0x4ad   : > { %6358 = vxpose.xlu1.c.b16.start.end [1/1] (short) (narrow) %v3771_v35, 16  ;;  %v20358_v35 = vrot.slane %v3662_v30, %v19211_v21  ;;  %26198 = vst [vmem:[#allocation47_spill] sm:$0xff] %v20369_v58 }
 0x4ae   : > { %v20321_v45 = vpop.trf.xlu0  ;;  %v20396_v32 = vrot.slane %v3711_v49, %v19211_v21 }
 0x4af   : > { %v6790_v4 = vcombine.low %v20263_v34, %v20321_v45  ;;  %v3726_v9 = vcombine.low %v20358_v35, %v20346_v59 }
 0x4b0   : > { %6566 = vxpose.xlu0.c.b16.start.end [1/1] (short) (narrow) %v3784_v14, 16  ;;  %v3710_v14 = vcombine.low %v3645_v29, %v3661_v50 }
 0x4b1   : > { %6390 = vxpose.xlu1.c.b16.start.end [1/1] (short) (narrow) %v3773_v28, 16  ;;  %v20349_v3 = vrot.slane %v6790_v4, %v19193_v2  ;;  %v3459_v4 = vcombine.high %v20233_v52, %v20223_v42  ;;  %v3678_v28 = vcombine.low %v3613_v16, %v3629_v36  ;;  %v3790_v15 = vpack.c.bf16 %v3726_v9, %v3726_v9 }
 0x4b2   : > { %v20343_v7 = vpop.trf.xlu0  ;;  %v20382_v17 = vrot.slane %v3710_v14, %v19211_v21  ;;  %v3461_v42 = vcombine.high %v20252_v20, %v20240_v25  ;;  %v3679_v52 = vcombine.high %v3613_v16, %v3629_v36  ;;  %v3591_v36 = vcombine.high %v20273_v57, %v20266_v63 }
 0x4b3   : > { %v6806_v44 = vcombine.low %v20283_v1, %v20343_v7  ;;  %v3779_v62 = vpack.c.bf16 %v3459_v4, %v3459_v4  ;;  %v3593_v63 = vcombine.high %v20290_v33, %v20278_v47 }
 0x4b4   : > { %6598 = vxpose.xlu0.c.b16.start.end [1/1] (short) (narrow) %v3786_v48, 16  ;;  %v20387_v48 = vrot.slane %v3678_v28, %v19211_v21  ;;  %v3781_v20 = vpack.c.bf16 %v3461_v42, %v3461_v42  ;;  %v3693_v29 = vrot.slane %v3679_v52, %v19211_v21  ;;  %v3783_v28 = vpack.c.bf16 %v3591_v36, %v3591_v36 }
 0x4b5   : > { %v6814_v11 = vrot.slane %v6806_v44, %v19193_v2  ;;  %6422 = vxpose.xlu1.c.b16.start.end [1/1] (short) (narrow) %v3775_v56, 16  ;;  %v20389_v44 = vpop.permute.xlu1 %3940  ;;  %v3792_v56 = vpack.c.bf16 %v3728_v24, %v3728_v24 }
 0x4b6   : > { %v20362_v13 = vpop.trf.xlu0  ;;  %26200 = vst [vmem:[#allocation53_spill] sm:$0xff] %v20389_v44  ;;  %v3730_v55 = vcombine.low %v20387_v48, %v20382_v17 }
 0x4b7   : > { %26197 = vst [vmem:[#allocation124_spill] sm:$0xff] %v20362_v13  ;;  %v6855_v23 = vcombine.high %v20349_v3, %v6814_v11  ;;  %v6854_v57 = vcombine.low %v20349_v3, %v6814_v11 }
 0x4b8   : > { %6630 = vxpose.xlu0.c.b16.start.end [1/1] (short) (narrow) %v3788_v31, 16  ;;  %v3794_v14 = vpack.c.bf16 %v3730_v55, %v3730_v55  ;;  %v3732_v31 = vcombine.low %v3693_v29, %v20396_v32  ;;  %v3595_v55 = vcombine.high %v20313_v27, %v20304_v43 }
 0x4b9   : > { %6454 = vxpose.xlu1.c.b16.start.end [1/1] (short) (narrow) %v3777_v12, 16  ;;  %v20406_v9 = vpop.permute.xlu1 %3964  ;;  %v6862_v47 = vrot.slane %v6854_v57, %v19211_v21  ;;  %v6869_v3 = vrot.slane %v6855_v23, %v19211_v21 }
 0x4ba   : > { %v20377_v30 = vpop.trf.xlu0  ;;  %26203 = vst [vmem:[#allocation160_spill] sm:$0xff] %v20406_v9  ;;  %v3796_v24 = vpack.c.bf16 %v3732_v31, %v3732_v31 }
 0x4bb   : > { %26199 = vst [vmem:[#allocation50_spill] sm:$0xff] %v20377_v30 }
 0x4bc   : > { %6662 = vxpose.xlu0.c.b16.start.end [1/1] (short) (narrow) %v3790_v15, 16 }
 0x4bd   : > { %6486 = vxpose.xlu1.c.b16.start.end [1/1] (short) (narrow) %v3779_v62, 16 }
 0x4be   : > { %v20391_v50 = vpop.trf.xlu0 }
 0x4bf   : > { %26201 = vst [vmem:[#allocation158_spill] sm:$0xff] %v20391_v50  ;;  %v6822_v25 = vcombine.low %v20362_v13, %v20391_v50 }
 0x4c0   : > { %6694 = vxpose.xlu0.c.b16.start.end [1/1] (short) (narrow) %v3792_v56, 16  ;;  %v3785_v56 = vpack.c.bf16 %v3593_v63, %v3593_v63 }
 0x4c1   : > { %6518 = vxpose.xlu1.c.b16.start.end [1/1] (short) (narrow) %v3781_v20, 16  ;;  %v6830_v12 = vrot.slane %v6822_v25, %v19193_v2  ;;  %v3597_v20 = vcombine.high %v20330_v0, %v20316_v37  ;;  %v3727_v37 = vcombine.high %v20358_v35, %v20346_v59 }
 0x4c2   : > { %v20403_v16 = vpop.trf.xlu0 }
 0x4c3   : > { %26202 = vst [vmem:[#allocation159_spill] sm:$0xff] %v20403_v16  ;;  %v6838_v4 = vcombine.low %v20377_v30, %v20403_v16  ;;  %v26288_v16 = vld [vmem:[#allocation64_spill] sm:$0xff] }
 0x4c4   : > { %6726 = vxpose.xlu0.c.b16.start.end [1/1] (short) (narrow) %v3794_v14, 16  ;;  %v3787_v14 = vpack.c.bf16 %v3595_v55, %v3595_v55 }
 0x4c5   : > { %v6846_v49 = vrot.slane %v6838_v4, %v19193_v2  ;;  %6550 = vxpose.xlu1.c.b16.start.end [1/1] (short) (narrow) %v3783_v28, 16  ;;  %v3789_v28 = vpack.c.bf16 %v3597_v20, %v3597_v20 }
 0x4c6   : > { %v20415_v15 = vpop.trf.xlu0 }
 0x4c7   : > { %26204 = vst [vmem:[#allocation161_spill] sm:$0xff] %v20415_v15  ;;  %v6886_v62 = vcombine.low %v6830_v12, %v6846_v49  ;;  %v6887_v42 = vcombine.high %v6830_v12, %v6846_v49  ;;  %v20417_v52 = vpop.trf.xlu1 }
 0x4c8   : > { %26205 = vst [vmem:[#allocation162_spill] sm:$0xff] %v20417_v52  ;;  %6758 = vxpose.xlu0.c.b16.start.end [1/1] (short) (narrow) %v3796_v24, 16 }
 0x4c9   : > { %6582 = vxpose.xlu1.c.b16.start.end [1/1] (short) (narrow) %v3785_v56, 16  ;;  %v6894_v33 = vrot.slane %v6886_v62, %v19211_v21  ;;  %v6901_v11 = vrot.slane %v6887_v42, %v19211_v21  ;;  %v3791_v62 = vpack.c.bf16 %v3727_v37, %v3727_v37  ;;  %v3729_v42 = vcombine.high %v20375_v40, %v20367_v61 }
 0x4ca   : > { %v20425_v25 = vpop.trf.xlu0  ;;  %v3733_v61 = vcombine.high %v3693_v29, %v20396_v32 }
 0x4cb   : > { %26206 = vst [vmem:[#allocation163_spill] sm:$0xff] %v20425_v25  ;;  %v20429_v36 = vpop.trf.xlu1  ;;  %v20431_v31 = vcombine.high %v6862_v47, %v6894_v33  ;;  %v20433_v43 = vcombine.low %v6869_v3, %v6901_v11  ;;  %v20435_v27 = vcombine.high %v6869_v3, %v6901_v11  ;;  %v3793_v35 = vpack.c.bf16 %v3729_v42, %v3729_v42 }
 0x4cc   : > { %26207 = vst [vmem:[#allocation164_spill] sm:$0xff] %v20429_v36  ;;  %v6926_v23 = vcombine.low %v20417_v52, %v20429_v36  ;;  %v3731_v3 = vcombine.high %v20387_v48, %v20382_v17 }
 0x4cd   : > { %26208 = vst [vmem:[#allocation165_spill] sm:$0xff] %v20433_v43  ;;  %26209 = vst [vmem:[#allocation166_spill] sm:$0xff] %v20435_v27  ;;  %6614 = vxpose.xlu1.c.b16.start.end [1/1] (short) (narrow) %v3787_v14, 16 }
 0x4ce   : > { %v20439_v12 = vpop.trf.xlu0  ;;  %v6934_v63 = vrot.slane %v6926_v23, %v19193_v2  ;;  %v3795_v23 = vpack.c.bf16 %v3731_v3, %v3731_v3 }
 0x4cf   : > { %26210 = vst [vmem:[#allocation167_spill] sm:$0xff] %v20439_v12  ;;  %v20441_v4 = vpop.trf.xlu1  ;;  %v6918_v12 = vcombine.low %v6862_v47, %v6894_v33  ;;  %v7890_v33 = vshrl.u32 %v20431_v31, 16 }
 0x4d0   : > { %26211 = vst [vmem:[#allocation168_spill] sm:$0xff] %v20441_v4  ;;  %v6942_v0 = vcombine.low %v20301_v18, %v20441_v4 }
 0x4d1   : > { %6646 = vxpose.xlu1.c.b16.start.end [1/1] (short) (narrow) %v3789_v28, 16  ;;  %v7882_v47 = vshrl.u32 %v6918_v12, 16 }
 0x4d2   : > { %v6950_v57 = vrot.slane %v6942_v0, %v19193_v2  ;;  %v20449_v49 = vpop.trf.xlu0  ;;  %v3797_v0 = vpack.c.bf16 %v3733_v61, %v3733_v61 }
 0x4d3   : > { %26212 = vst [vmem:[#allocation169_spill] sm:$0xff] %v20449_v49  ;;  %v20451_v24 = vpop.trf.xlu1 }
 0x4d4   : > { %26213 = vst [vmem:[#allocation170_spill] sm:$0xff] %v20451_v24  ;;  %v6991_v56 = vcombine.high %v6934_v63, %v6950_v57  ;;  %v6990_v32 = vcombine.low %v6934_v63, %v6950_v57 }
 0x4d5   : > { %6678 = vxpose.xlu1.c.b16.start.end [1/1] (short) (narrow) %v3791_v62, 16 }
 0x4d6   : > { %v20455_v55 = vpop.trf.xlu0  ;;  %v6998_v22 = vrot.slane %v6990_v32, %v19211_v21  ;;  %v7005_v63 = vrot.slane %v6991_v56, %v19211_v21  ;;  %v7898_v32 = vshrl.u32 %v20433_v43, 16  ;;  %v26285_v43 = vld [vmem:[#allocation77_spill] sm:$0xff] }
 0x4d7   : > { %26214 = vst [vmem:[#allocation171_spill] sm:$0xff] %v20455_v55  ;;  %v20457_v59 = vpop.trf.xlu1 }
 0x4d8   : > { %26215 = vst [vmem:[#allocation172_spill] sm:$0xff] %v20457_v59 }
 0x4d9   : > { %6710 = vxpose.xlu1.c.b16.start.end [1/1] (short) (narrow) %v3793_v35, 16 }
 0x4da   : > { %v20461_v11 = vpop.trf.xlu0 }
 0x4db   : > { %26216 = vst [vmem:[#allocation173_spill] sm:$0xff] %v20461_v11  ;;  %v7062_v20 = vcombine.low %v20449_v49, %v20461_v11  ;;  %v20465_v14 = vpop.trf.xlu1 }
 0x4dc   : > { %26217 = vst [vmem:[#allocation174_spill] sm:$0xff] %v20465_v14  ;;  %v6958_v40 = vcombine.low %v20451_v24, %v20465_v14 }
 0x4dd   : > { %6742 = vxpose.xlu1.c.b16.start.end [1/1] (short) (narrow) %v3795_v23, 16  ;;  %v7070_v37 = vrot.slane %v7062_v20, %v19193_v2 }
 0x4de   : > { %v20470_v28 = vpop.trf.xlu0  ;;  %v6966_v29 = vrot.slane %v6958_v40, %v19193_v2 }
 0x4df   : > { %26218 = vst [vmem:[#allocation175_spill] sm:$0xff] %v20470_v28  ;;  %v7078_v17 = vcombine.low %v20455_v55, %v20470_v28  ;;  %v20475_v48 = vpop.trf.xlu1 }
 0x4e0   : > { %26219 = vst [vmem:[#allocation176_spill] sm:$0xff] %v20475_v48  ;;  %v6974_v62 = vcombine.low %v20457_v59, %v20475_v48 }
 0x4e1   : > { %v7086_v42 = vrot.slane %v7078_v17, %v19193_v2  ;;  %6774 = vxpose.xlu1.c.b16.start.end [1/1] (short) (narrow) %v3797_v0, 16 }
 0x4e2   : > { %v6982_v35 = vrot.slane %v6974_v62, %v19193_v2  ;;  %v20482_v3 = vpop.trf.xlu0 }
 0x4e3   : > { %26220 = vst [vmem:[#allocation177_spill] sm:$0xff] %v20482_v3  ;;  %v7127_v20 = vcombine.high %v7070_v37, %v7086_v42  ;;  %v20484_v23 = vpop.trf.xlu1 }
 0x4e4   : > { %26221 = vst [vmem:[#allocation178_spill] sm:$0xff] %v20484_v23  ;;  %v7022_v25 = vcombine.low %v6966_v29, %v6982_v35  ;;  %v7023_v15 = vcombine.high %v6966_v29, %v6982_v35 }
 0x4e6   : > { %v20486_v61 = vpop.trf.xlu0  ;;  %v7030_v17 = vrot.slane %v7022_v25, %v19211_v21  ;;  %v7037_v57 = vrot.slane %v7023_v15, %v19211_v21 }
 0x4e7   : > { %26222 = vst [vmem:[#allocation179_spill] sm:$0xff] %v20486_v61  ;;  %v20492_v40 = vpop.trf.xlu1 }
 0x4e8   : > { %26223 = vst [vmem:[#allocation180_spill] sm:$0xff] %v20492_v40  ;;  %v7054_v0 = vcombine.low %v6998_v22, %v7030_v17  ;;  %v20494_v62 = vcombine.high %v6998_v22, %v7030_v17  ;;  %v20496_v8 = vcombine.low %v7005_v63, %v7037_v57  ;;  %v20498_v23 = vcombine.high %v7005_v63, %v7037_v57 }
 0x4e9   : > { %v7906_v40 = vshrl.u32 %v20435_v27, 16 }
 0x4ea   : > { %26224 = vst [vmem:[#allocation181_spill] sm:$0xff] %v20496_v8  ;;  %26225 = vst [vmem:[#allocation182_spill] sm:$0xff] %v20498_v23  ;;  %v20502_v29 = vpop.trf.xlu0  ;;  %v7880_v25 = vpack.i.b16 %v7054_v0, %v6918_v12  ;;  %v7883_v56 = vshrl.u32 %v7054_v0, 16  ;;  %v7891_v35 = vshrl.u32 %v20494_v62, 16  ;;  %v7899_v57 = vshrl.u32 %v20496_v8, 16  ;;  %v26286_v8 = vld [vmem:[#allocation67_spill] sm:$0xff] }
 0x4eb   : > { %26226 = vst [vmem:[#allocation183_spill] sm:$0xff] %v20502_v29  ;;  %v7094_v22 = vcombine.low %v20482_v3, %v20502_v29  ;;  %v20509_v17 = vpop.trf.xlu1  ;;  %v7907_v44 = vshrl.u32 %v20498_v23, 16  ;;  %v26277_v29 = vld [vmem:[#allocation65_spill] sm:$0xff] }
 0x4ec   : > { %26227 = vst [vmem:[#allocation184_spill] sm:$0xff] %v20509_v17  ;;  %8134 = vxpose.xlu0.c.b16.start [1/4] (short) (narrow) %v7880_v25, 16  ;;  %v7884_v12 = vpack.i.b16 %v7883_v56, %v7882_v47  ;;  %v20515_v0 = vpack.i.b16 %v7891_v35, %v7890_v33  ;;  %v20520_v54 = vpack.i.b16 %v7899_v57, %v7898_v32 }
 0x4ed   : > { %v20524_v58 = vpack.i.b16 %v7907_v44, %v7906_v40  ;;  %v7102_v63 = vrot.slane %v7094_v22, %v19193_v2  ;;  %v7126_v33 = vcombine.low %v7070_v37, %v7086_v42  ;;  %v7141_v40 = vrot.slane %v7127_v20, %v19211_v21 }
 0x4ee   : > { %26228 = vst [vmem:[#allocation185_spill] sm:$0xff] %v20520_v54  ;;  %8150 = vxpose.xlu1.c.b16.start [1/4] (short) (narrow) %v7884_v12, 16  ;;  %v20522_v38 = vpop.trf.xlu0  ;;  %v26282_v54 = vld [vmem:[#allocation72_spill] sm:$0xff] }
 0x4ef   : > { %26229 = vst [vmem:[#allocation186_spill] sm:$0xff] %v20522_v38  ;;  %26230 = vst [vmem:[#allocation187_spill] sm:$0xff] %v20524_v58  ;;  %v7110_v25 = vcombine.low %v20486_v61, %v20522_v38  ;;  %v20529_v47 = vpop.trf.xlu1  ;;  %v7134_v12 = vrot.slane %v7126_v33, %v19211_v21  ;;  %v26275_v61 = vld [vmem:[#allocation63_spill] sm:$0xff] }
 0x4f0   : > { %26231 = vst [vmem:[#allocation188_spill] sm:$0xff] %v20529_v47  ;;  %v26276_v38 = vld [vmem:[#allocation39_spill] sm:$0xff] }
 0x4f1   : > { %v7118_v56 = vrot.slane %v7110_v25, %v19193_v2  ;;  %v1590_v3 = vcombine.low %v26276_v38, %v26275_v61 }
 0x4f2   : > { %v20532_v35 = vpop.trf.xlu0 }
 0x4f3   : > { %26232 = vst [vmem:[#allocation189_spill] sm:$0xff] %v20532_v35  ;;  %v7158_v15 = vcombine.low %v7102_v63, %v7118_v56  ;;  %v7159_v32 = vcombine.high %v7102_v63, %v7118_v56  ;;  %v20534_v57 = vpop.trf.xlu1 }
 0x4f4   : > { %26233 = vst [vmem:[#allocation190_spill] sm:$0xff] %v20534_v57  ;;  %v7198_v9 = vcombine.low %v20509_v17, %v20534_v57 }
 0x4f5   : > { %v7166_v44 = vrot.slane %v7158_v15, %v19211_v21  ;;  %v7173_v22 = vrot.slane %v7159_v32, %v19211_v21 }
 0x4f6   : > { %v20542_v37 = vpop.trf.xlu0  ;;  %v7206_v20 = vrot.slane %v7198_v9, %v19193_v2 }
 0x4f7   : > { %26234 = vst [vmem:[#allocation191_spill] sm:$0xff] %v20542_v37  ;;  %v20544_v42 = vpop.trf.xlu1  ;;  %v20546_v25 = vcombine.high %v7134_v12, %v7166_v44  ;;  %v20548_v63 = vcombine.low %v7141_v40, %v7173_v22  ;;  %v20550_v56 = vcombine.high %v7141_v40, %v7173_v22  ;;  %v7190_v23 = vcombine.low %v7134_v12, %v7166_v44 }
 0x4f8   : > { %26235 = vst [vmem:[#allocation192_spill] sm:$0xff] %v20544_v42  ;;  %v7214_v15 = vcombine.low %v20529_v47, %v20544_v42 }
 0x4f9   : > { %26236 = vst [vmem:[#allocation193_spill] sm:$0xff] %v20548_v63  ;;  %26237 = vst [vmem:[#allocation194_spill] sm:$0xff] %v20550_v56 }
 0x4fa   : > { %v7222_v33 = vrot.slane %v7214_v15, %v19193_v2  ;;  %v20556_v32 = vpop.trf.xlu0 }
 0x4fb   : > { %26238 = vst [vmem:[#allocation195_spill] sm:$0xff] %v20556_v32  ;;  %v20558_v5 = vpop.trf.xlu1 }
 0x4fc   : > { %26239 = vst [vmem:[#allocation196_spill] sm:$0xff] %v20558_v5  ;;  %v7263_v39 = vcombine.high %v7206_v20, %v7222_v33  ;;  %v7262_v41 = vcombine.low %v7206_v20, %v7222_v33 }
 0x4fe   : > { %v20560_v46 = vpop.trf.xlu0  ;;  %v7277_v57 = vrot.slane %v7263_v39, %v19211_v21 }
 0x4ff   : > { %26240 = vst [vmem:[#allocation197_spill] sm:$0xff] %v20560_v46  ;;  %v20562_v6 = vpop.trf.xlu1 }
 0x500   : > { %26241 = vst [vmem:[#allocation198_spill] sm:$0xff] %v20562_v6 }
 0x502   : > { %v20564_v10 = vpop.trf.xlu0 }
 0x503   : > { %26242 = vst [vmem:[#allocation199_spill] sm:$0xff] %v20564_v10  ;;  %v20566_v40 = vpop.trf.xlu1 }
 0x504   : > { %26243 = vst [vmem:[#allocation200_spill] sm:$0xff] %v20566_v40  ;;  %v7230_v22 = vcombine.low %v20558_v5, %v20566_v40  ;;  %v7270_v40 = vrot.slane %v7262_v41, %v19211_v21 }
 0x506   : > { %v20570_v53 = vpop.trf.xlu0  ;;  %v7238_v26 = vrot.slane %v7230_v22, %v19193_v2 }
 0x507   : > { %26244 = vst [vmem:[#allocation201_spill] sm:$0xff] %v20570_v53  ;;  %v20572_v9 = vpop.trf.xlu1 }
 0x508   : > { %26245 = vst [vmem:[#allocation202_spill] sm:$0xff] %v20572_v9  ;;  %v7246_v15 = vcombine.low %v20562_v6, %v20572_v9 }
 0x50a   : > { %v7254_v19 = vrot.slane %v7246_v15, %v19193_v2  ;;  %v20578_v60 = vpop.trf.xlu0 }
 0x50b   : > { %26246 = vst [vmem:[#allocation203_spill] sm:$0xff] %v20578_v60  ;;  %v20580_v51 = vpop.trf.xlu1 }
 0x50c   : > { %26247 = vst [vmem:[#allocation204_spill] sm:$0xff] %v20580_v51  ;;  %v7294_v58 = vcombine.low %v7238_v26, %v7254_v19  ;;  %v7295_v27 = vcombine.high %v7238_v26, %v7254_v19  ;;  %v7946_v19 = vshrl.u32 %v7190_v23, 16  ;;  %v7954_v26 = vshrl.u32 %v20546_v25, 16 }
 0x50e   : > { %v20582_v5 = vpop.trf.xlu0  ;;  %v7302_v17 = vrot.slane %v7294_v58, %v19211_v21  ;;  %v7309_v20 = vrot.slane %v7295_v27, %v19211_v21 }
 0x50f   : > { %26248 = vst [vmem:[#allocation205_spill] sm:$0xff] %v20582_v5  ;;  %v20588_v33 = vpop.trf.xlu1 }
 0x510   : > { %26249 = vst [vmem:[#allocation206_spill] sm:$0xff] %v20588_v33  ;;  %v7326_v22 = vcombine.low %v7270_v40, %v7302_v17  ;;  %v20590_v15 = vcombine.high %v7270_v40, %v7302_v17  ;;  %v20592_v6 = vcombine.low %v7277_v57, %v7309_v20  ;;  %v20594_v9 = vcombine.high %v7277_v57, %v7309_v20 }
 0x511   : > { %v7962_v20 = vshrl.u32 %v20548_v63, 16  ;;  %v26278_v63 = vld [vmem:[#allocation61_spill] sm:$0xff] }
 0x512   : > { %26250 = vst [vmem:[#allocation207_spill] sm:$0xff] %v20592_v6  ;;  %26251 = vst [vmem:[#allocation208_spill] sm:$0xff] %v20594_v9  ;;  %v20597_v12 = vpop.trf.xlu0  ;;  %v7944_v41 = vpack.i.b16 %v7326_v22, %v7190_v23  ;;  %v7947_v58 = vshrl.u32 %v7326_v22, 16  ;;  %v7955_v27 = vshrl.u32 %v20590_v15, 16  ;;  %v7963_v47 = vshrl.u32 %v20592_v6, 16 }
 0x513   : > { %26252 = vst [vmem:[#allocation209_spill] sm:$0xff] %v20597_v12  ;;  %v20602_v44 = vpop.trf.xlu1  ;;  %v7970_v22 = vshrl.u32 %v20550_v56, 16  ;;  %v7971_v39 = vshrl.u32 %v20594_v9, 16  ;;  %v7382_v23 = vcombine.low %v20570_v53, %v20582_v5  ;;  %v7334_v56 = vcombine.low %v20532_v35, %v20556_v32  ;;  %v26272_v35 = vld [vmem:[#allocation62_spill] sm:$0xff]  ;;  %v26273_v32 = vld [vmem:[#allocation59_spill] sm:$0xff] }
 0x514   : > { %26253 = vst [vmem:[#allocation210_spill] sm:$0xff] %v20602_v44  ;;  %8135 = vxpose.xlu0.c.b16.cont [2/4] (short) (narrow) %v7944_v41, 16  ;;  %v7948_v17 = vpack.i.b16 %v7947_v58, %v7946_v19  ;;  %v20604_v40 = vpack.i.b16 %v7955_v27, %v7954_v26  ;;  %v20618_v26 = vpack.i.b16 %v7963_v47, %v7962_v20 }
 0x515   : > { %v20620_v41 = vpack.i.b16 %v7971_v39, %v7970_v22  ;;  %v7350_v47 = vcombine.low %v20542_v37, %v20560_v46  ;;  %v20640_v20 = vrot.slane %v7382_v23, %v19193_v2  ;;  %v20649_v53 = vrot.slane %v7334_v56, %v19193_v2  ;;  %v26270_v37 = vld [vmem:[#allocation60_spill] sm:$0xff] }
 0x516   : > { %8151 = vxpose.xlu1.c.b16.cont [2/4] (short) (narrow) %v7948_v17, 16  ;;  %v20614_v42 = vpop.trf.xlu0  ;;  %26256 = vst [vmem:[#allocation213_spill] sm:$0xff] %v20618_v26  ;;  %v7366_v17 = vcombine.low %v20564_v10, %v20578_v60  ;;  %v1606_v6 = vcombine.low %v26278_v63, %v26277_v29  ;;  %v1607_v28 = vcombine.high %v26278_v63, %v26277_v29  ;;  %v26283_v29 = vld [vmem:[#allocation76_spill] sm:$0xff]  ;;  %v26284_v63 = vld [vmem:[#allocation66_spill] sm:$0xff] }
 0x517   : > { %26254 = vst [vmem:[#allocation211_spill] sm:$0xff] %v20614_v42  ;;  %v20616_v19 = vpop.trf.xlu1  ;;  %26257 = vst [vmem:[#allocation214_spill] sm:$0xff] %v20620_v41  ;;  %v20652_v5 = vrot.slane %v7350_v47, %v19193_v2  ;;  %v4158_v36 = vcombine.low %v26284_v63, %v26283_v29  ;;  %v4159_v13 = vcombine.high %v26284_v63, %v26283_v29 }
 0x518   : > { %26255 = vst [vmem:[#allocation212_spill] sm:$0xff] %v20616_v19  ;;  %v20637_v39 = vrot.slane %v7366_v17, %v19193_v2  ;;  %v7486_v22 = vcombine.low %v20588_v33, %v20616_v19  ;;  %26264 = vst [vmem:[#allocation221_spill] sm:$0xff] %v20649_v53  ;;  %v7470_v17 = vcombine.low %v20580_v51, %v20602_v44 }
 0x519   : > { %26265 = vst [vmem:[#allocation222_spill] sm:$0xff] %v20652_v5  ;;  %v7398_v56 = vcombine.low %v20649_v53, %v20652_v5  ;;  %v4166_v50 = vrot.slane %v4158_v36, %v19193_v2  ;;  %v20774_v36 = vrot.slane %v4159_v13, %v19193_v2 }
 0x51a   : > { %v20624_v27 = vpop.trf.xlu0  ;;  %26261 = vst [vmem:[#allocation218_spill] sm:$0xff] %v20637_v39  ;;  %v7430_v23 = vcombine.low %v20637_v39, %v20640_v20  ;;  %v20659_v10 = vrot.slane %v7486_v22, %v19193_v2  ;;  %v20668_v47 = vrot.slane %v7470_v17, %v19193_v2  ;;  %v26271_v17 = vld [vmem:[#allocation55_spill] sm:$0xff] }
 0x51b   : > { %v20622_v58 = vpop.trf.xlu1  ;;  %26259 = vst [vmem:[#allocation216_spill] sm:$0xff] %v20624_v27  ;;  %v4110_v46 = vcombine.low %v26271_v17, %v26270_v37  ;;  %v4111_v26 = vcombine.high %v26271_v17, %v26270_v37  ;;  %v1591_v17 = vcombine.high %v26276_v38, %v26275_v61  ;;  %v1598_v38 = vrot.slane %v1590_v3, %v19193_v2 }
 0x51c   : > { %26258 = vst [vmem:[#allocation215_spill] sm:$0xff] %v20622_v58  ;;  %26266 = vst [vmem:[#allocation223_spill] sm:$0xff] %v20659_v10  ;;  %v7534_v22 = vcombine.low %v20668_v47, %v20659_v10  ;;  %v1614_v61 = vrot.slane %v1606_v6, %v19193_v2  ;;  %v1621_v3 = vrot.slane %v1607_v28, %v19193_v2  ;;  %v26287_v6 = vld [vmem:[#allocation71_spill] sm:$0xff]  ;;  %v26299_v28 = vld [vmem:[#allocation89_spill] sm:$0xff] }
 0x51d   : > { %26268 = vst [vmem:[#allocation225_spill] sm:$0xff] %v20668_v47  ;;  %v1605_v30 = vrot.slane %v1591_v17, %v19193_v2  ;;  %v4142_v59 = vcombine.low %v26288_v16, %v26287_v6  ;;  %v26303_v47 = vld [vmem:[#allocation86_spill] sm:$0xff] }
 0x51e   : > { %v20644_v41 = vpop.trf.xlu0  ;;  %v20707_v37 = vrot.slane %v7534_v22, %v19211_v21  ;;  %v20727_v22 = vrot.slane %v4111_v26, %v19193_v2  ;;  %v1622_v26 = vcombine.low %v26286_v8, %v26285_v43  ;;  %v1654_v29 = vcombine.low %v1598_v38, %v1614_v61 }
 0x51f   : > { %v20630_v57 = vpop.trf.xlu1  ;;  %26262 = vst [vmem:[#allocation219_spill] sm:$0xff] %v20644_v41 }
 0x520   : > { %26260 = vst [vmem:[#allocation217_spill] sm:$0xff] %v20630_v57 }
 0x522   : > { %v20672_v44 = vpop.trf.xlu0 }
 0x523   : > { %v20646_v9 = vpop.trf.xlu1  ;;  %26269 = vst [vmem:[#allocation226_spill] sm:$0xff] %v20672_v44 }
 0x524   : > { %26263 = vst [vmem:[#allocation220_spill] sm:$0xff] %v20646_v9  ;;  %v7502_v33 = vcombine.low %v20622_v58, %v20646_v9  ;;  %v20683_v9 = vrot.slane %v7430_v23, %v19211_v21  ;;  %v20698_v23 = vrot.slane %v7398_v56, %v19211_v21 }
 0x526   : > { %v20677_v60 = vrot.slane %v7502_v33, %v19193_v2  ;;  %v4127_v33 = vcombine.high %v26273_v32, %v26272_v35  ;;  %v7462_v55 = vcombine.low %v20698_v23, %v20683_v9  ;;  %v20722_v49 = vpop.trf.xlu0 }
 0x527   : > { %v20663_v19 = vpop.trf.xlu1  ;;  %26279 = vst [vmem:[#allocation55_spill] sm:$0xff] %v20722_v49 }
 0x528   : > { %26267 = vst [vmem:[#allocation224_spill] sm:$0xff] %v20663_v19  ;;  %v7518_v51 = vcombine.low %v20630_v57, %v20663_v19  ;;  %v4126_v57 = vcombine.low %v26273_v32, %v26272_v35  ;;  %v20713_v32 = vrot.slane %v4110_v46, %v19193_v2  ;;  %v26281_v46 = vld [vmem:[#allocation80_spill] sm:$0xff]  ;;  %v8010_v14 = vshrl.u32 %v7462_v55, 16 }
 0x52a   : > { %v20680_v58 = vrot.slane %v7518_v51, %v19193_v2  ;;  %v20716_v56 = vrot.slane %v4126_v57, %v19193_v2  ;;  %v1638_v57 = vcombine.low %v26282_v54, %v26281_v46  ;;  %v20764_v53 = vpop.trf.xlu0 }
 0x52b   : > { %v20689_v19 = vpop.trf.xlu1  ;;  %26290 = vst [vmem:[#allocation63_spill] sm:$0xff] %v20764_v53 }
 0x52c   : > { %26274 = vst [vmem:[#allocation60_spill] sm:$0xff] %v20689_v19  ;;  %v7566_v51 = vcombine.low %v20677_v60, %v20680_v58  ;;  %v4174_v4 = vcombine.low %v20713_v32, %v20716_v56  ;;  %v4175_v17 = vcombine.high %v20713_v32, %v20716_v56  ;;  %v1671_v32 = vcombine.high %v1605_v30, %v1621_v3 }
 0x52d   : > { %v4150_v56 = vrot.slane %v4142_v59, %v19193_v2 }
 0x52e   : > { %v20710_v35 = vrot.slane %v7566_v51, %v19211_v21  ;;  %v20730_v51 = vrot.slane %v4127_v33, %v19193_v2  ;;  %v1639_v33 = vcombine.high %v26282_v54, %v26281_v46  ;;  %v1623_v54 = vcombine.high %v26286_v8, %v26285_v43 }
 0x52f   : > { %v20724_v11 = vpop.trf.xlu1  ;;  %v4143_v8 = vcombine.high %v26288_v16, %v26287_v6  ;;  %v1630_v43 = vrot.slane %v1622_v26, %v19193_v2  ;;  %v4206_v26 = vcombine.low %v4150_v56, %v4166_v50  ;;  %v4207_v6 = vcombine.high %v4150_v56, %v4166_v50 }
 0x530   : > { %26280 = vst [vmem:[#allocation62_spill] sm:$0xff] %v20724_v11  ;;  %v7598_v52 = vcombine.low %v20707_v37, %v20710_v35  ;;  %v1637_v63 = vrot.slane %v1623_v54, %v19193_v2  ;;  %v20790_v54 = vrot.slane %v1654_v29, %v19211_v21  ;;  %v20803_v56 = vrot.slane %v1671_v32, %v19211_v21 }
 0x531   : > { %v20823_v32 = vrot.slane %v4207_v6, %v19211_v21  ;;  %v26300_v6 = vld [vmem:[#allocation87_spill] sm:$0xff] }
 0x532   : > { %v8008_v24 = vpack.i.b16 %v7598_v52, %v7462_v55  ;;  %v8011_v18 = vshrl.u32 %v7598_v52, 16  ;;  %v1646_v52 = vrot.slane %v1638_v57, %v19193_v2  ;;  %v1774_v5 = vcombine.low %v26300_v6, %v26299_v28 }
 0x533   : > { %v20750_v48 = vpop.trf.xlu1 }
 0x534   : > { %26289 = vst [vmem:[#allocation59_spill] sm:$0xff] %v20750_v48  ;;  %8136 = vxpose.xlu0.c.b16.cont [3/4] (short) (narrow) %v8008_v24, 16  ;;  %v8012_v55 = vpack.i.b16 %v8011_v18, %v8010_v14  ;;  %v1653_v18 = vrot.slane %v1639_v33, %v19193_v2  ;;  %v1655_v24 = vcombine.high %v1598_v38, %v1614_v61  ;;  %v26294_v38 = vld [vmem:[#allocation40_spill] sm:$0xff] }
 0x535   : > { %v1670_v14 = vcombine.low %v1605_v30, %v1621_v3  ;;  %v1686_v46 = vcombine.low %v1630_v43, %v1646_v52  ;;  %v1687_v33 = vcombine.high %v1630_v43, %v1646_v52  ;;  %v20782_v30 = vrot.slane %v4143_v8, %v19193_v2  ;;  %v20798_v43 = vpop.trf.xlu0 }
 0x536   : > { %8152 = vxpose.xlu1.c.b16.cont [3/4] (short) (narrow) %v8012_v55, 16  ;;  %v26293_v55 = vld [vmem:[#allocation84_spill] sm:$0xff]  ;;  %v1702_v59 = vcombine.low %v1637_v63, %v1653_v18  ;;  %v20787_v3 = vrot.slane %v4174_v4, %v19211_v21  ;;  %v20793_v16 = vrot.slane %v1655_v24, %v19211_v21  ;;  %v1703_v52 = vcombine.high %v1637_v63, %v1653_v18 }
 0x537   : > { %v20771_v57 = vpop.trf.xlu1  ;;  %v1726_v61 = vcombine.low %v26294_v38, %v26293_v55  ;;  %v1727_v13 = vcombine.high %v26294_v38, %v26293_v55  ;;  %v20796_v50 = vrot.slane %v1670_v14, %v19211_v21  ;;  %26295 = vst [vmem:[#allocation65_spill] sm:$0xff] %v20798_v43  ;;  %v20808_v29 = vrot.slane %v1686_v46, %v19211_v21 }
 0x538   : > { %26291 = vst [vmem:[#allocation39_spill] sm:$0xff] %v20771_v57  ;;  %v20811_v24 = vrot.slane %v4175_v17, %v19211_v21  ;;  %v20814_v14 = vrot.slane %v1687_v33, %v19211_v21  ;;  %v20820_v63 = vrot.slane %v4206_v26, %v19211_v21  ;;  %v1710_v55 = vrot.slane %v1702_v59, %v19211_v21  ;;  %v26298_v26 = vld [vmem:[#allocation79_spill] sm:$0xff] }
 0x539   : > { %v20817_v18 = vrot.slane %v1726_v61, %v19193_v2  ;;  %v20827_v46 = vrot.slane %v1727_v13, %v19193_v2  ;;  %v7638_v17 = vcombine.low %v20672_v44, %v20764_v53  ;;  %v7654_v33 = vcombine.low %v20722_v49, %v20798_v43  ;;  %v26297_v61 = vld [vmem:[#allocation85_spill] sm:$0xff] }
 0x53a   : > { %v20834_v38 = vrot.slane %v1703_v52, %v19211_v21  ;;  %v1742_v4 = vcombine.low %v26298_v26, %v26297_v61  ;;  %v1775_v59 = vcombine.high %v26300_v6, %v26299_v28  ;;  %v1718_v44 = vcombine.low %v20790_v54, %v20808_v29  ;;  %v26302_v6 = vld [vmem:[#allocation88_spill] sm:$0xff] }
 0x53b   : > { %v20800_v8 = vpop.trf.xlu1  ;;  %v1743_v49 = vcombine.high %v26298_v26, %v26297_v61  ;;  %v7606_v52 = vcombine.low %v20597_v12, %v20624_v27  ;;  %v7622_v43 = vcombine.low %v20614_v42, %v20644_v41  ;;  %v1719_v53 = vcombine.high %v20790_v54, %v20808_v29 }
 0x53c   : > { %26296 = vst [vmem:[#allocation61_spill] sm:$0xff] %v20800_v8  ;;  %v1720_v28 = vcombine.low %v20793_v16, %v20814_v14  ;;  %v1758_v10 = vcombine.low %v26303_v47, %v26302_v6  ;;  %v1759_v39 = vcombine.high %v26303_v47, %v26302_v6  ;;  %v1721_v61 = vcombine.high %v20793_v16, %v20814_v14 }
 0x53d   : > { %v20863_v26 = vrot.slane %v7638_v17, %v19193_v2  ;;  %v20866_v42 = vrot.slane %v7654_v33, %v19193_v2  ;;  %v7758_v54 = vcombine.low %v20724_v11, %v20771_v57  ;;  %v1722_v29 = vcombine.low %v20796_v50, %v1710_v55 }
 0x53e   : > { %v1723_v41 = vcombine.high %v20796_v50, %v1710_v55  ;;  %v1782_v12 = vrot.slane %v1774_v5, %v19193_v2  ;;  %v1789_v47 = vrot.slane %v1775_v59, %v19193_v2  ;;  %v1724_v16 = vcombine.low %v20803_v56, %v20834_v38 }
 0x53f   : > { %v20842_v13 = vpop.trf.xlu1  ;;  %26304 = vst [vmem:[#allocation72_spill] sm:$0xff] %v20863_v26  ;;  %26305 = vst [vmem:[#allocation76_spill] sm:$0xff] %v20866_v42  ;;  %v20879_v14 = vrot.slane %v7606_v52, %v19193_v2  ;;  %v20882_v17 = vrot.slane %v7622_v43, %v19193_v2  ;;  %v7742_v33 = vcombine.low %v20689_v19, %v20750_v48 }
 0x540   : > { %26301 = vst [vmem:[#allocation80_spill] sm:$0xff] %v20842_v13  ;;  %v1750_v50 = vrot.slane %v1742_v4, %v19193_v2  ;;  %v1757_v5 = vrot.slane %v1743_v49, %v19193_v2  ;;  %v1766_v55 = vrot.slane %v1758_v10, %v19193_v2  ;;  %v1773_v59 = vrot.slane %v1759_v39, %v19193_v2 }
 0x541   : > { %26307 = vst [vmem:[#allocation77_spill] sm:$0xff] %v20879_v14  ;;  %26308 = vst [vmem:[#allocation67_spill] sm:$0xff] %v20882_v17  ;;  %v1725_v27 = vcombine.high %v20803_v56, %v20834_v38  ;;  %v7702_v52 = vcombine.low %v20863_v26, %v20866_v42  ;;  %v20895_v43 = vrot.slane %v7758_v54, %v19193_v2 }
 0x542   : > { %v1822_v48 = vcombine.low %v1766_v55, %v1782_v12  ;;  %v1823_v4 = vcombine.high %v1766_v55, %v1782_v12  ;;  %v1838_v11 = vcombine.low %v1773_v59, %v1789_v47  ;;  %v1839_v49 = vcombine.high %v1773_v59, %v1789_v47 }
 0x543   : > { %v20874_v6 = vpop.trf.xlu1  ;;  %26309 = vst [vmem:[#allocation71_spill] sm:$0xff] %v20895_v43  ;;  %v16961_v10 = vpack.c.bf16 %v1722_v29, %v1718_v44  ;;  %v7670_v39 = vcombine.low %v20879_v14, %v20882_v17  ;;  %v20904_v56 = vrot.slane %v7742_v33, %v19193_v2  ;;  %v1790_v54 = vcombine.low %v20817_v18, %v1750_v50 }
 0x544   : > { %26306 = vst [vmem:[#allocation66_spill] sm:$0xff] %v20874_v6  ;;  %v7774_v19 = vcombine.low %v20800_v8, %v20874_v6  ;;  %v1791_v8 = vcombine.high %v20817_v18, %v1750_v50  ;;  %v1806_v12 = vcombine.low %v20827_v46, %v1757_v5  ;;  %v1807_v47 = vcombine.high %v20827_v46, %v1757_v5 }
 0x545   : > { %26311 = vst [vmem:[#allocation84_spill] sm:$0xff] %v20904_v56  ;;  %v7806_v44 = vcombine.low %v20904_v56, %v20895_v43  ;;  %v20921_v55 = vrot.slane %v7702_v52, %v19211_v21  ;;  %v1830_v59 = vrot.slane %v1822_v48, %v19211_v21  ;;  %v1837_v18 = vrot.slane %v1823_v4, %v19211_v21 }
 0x546   : > { %v20915_v29 = vrot.slane %v7774_v19, %v19193_v2  ;;  %v1846_v50 = vrot.slane %v1838_v11, %v19211_v21  ;;  %v1853_v46 = vrot.slane %v1839_v49, %v19211_v21  ;;  %v16962_v5 = vpack.c.bf16 %v1724_v16, %v1720_v28 }
 0x547   : > { %v20899_v57 = vpop.trf.xlu1  ;;  %v16965_v6 = vpack.c.bf16 %v1723_v41, %v1719_v53  ;;  %v1805_v52 = vrot.slane %v1791_v8, %v19211_v21  ;;  %v1814_v48 = vrot.slane %v1806_v12, %v19211_v21  ;;  %v1821_v4 = vrot.slane %v1807_v47, %v19211_v21 }
 0x548   : > { %26310 = vst [vmem:[#allocation64_spill] sm:$0xff] %v20899_v57  ;;  %v7790_v38 = vcombine.low %v20842_v13, %v20899_v57  ;;  %26312 = vst [vmem:[#allocation40_spill] sm:$0xff] %v20915_v29  ;;  %v20930_v13 = vrot.slane %v7670_v39, %v19211_v21  ;;  %v16966_v57 = vpack.c.bf16 %v1725_v27, %v1721_v61 }
 0x549   : > { %v7814_v53 = vrot.slane %v7806_v44, %v19211_v21  ;;  %v1856_v16 = vcombine.low %v1805_v52, %v1837_v18  ;;  %v1858_v49 = vcombine.low %v1814_v48, %v1846_v50  ;;  %v1860_v39 = vcombine.low %v1821_v4, %v1853_v46 }
 0x54a   : > { %v20918_v33 = vrot.slane %v7790_v38, %v19193_v2  ;;  %v1798_v38 = vrot.slane %v1790_v54, %v19211_v21  ;;  %v7734_v11 = vcombine.low %v20930_v13, %v20921_v55  ;;  %v5269_v54 = vrot.slane %v16961_v10, %v19193_v2 }
 0x54b   : > { %v5277_v8 = vrot.slane %v16962_v5, %v19193_v2  ;;  %v5337_v12 = vrot.slane %v16965_v6, %v19193_v2  ;;  %v1857_v27 = vcombine.high %v1805_v52, %v1837_v18  ;;  %v1859_v61 = vcombine.high %v1814_v48, %v1846_v50  ;;  %v26409_v50 = vld [vmem:[#allocation224_spill] sm:$0xff] }
 0x54c   : > { %v7838_v19 = vcombine.low %v20915_v29, %v20918_v33  ;;  %v1854_v28 = vcombine.low %v1798_v38, %v1830_v59  ;;  %v1855_v47 = vcombine.high %v1798_v38, %v1830_v59  ;;  %v1861_v17 = vcombine.high %v1821_v4, %v1853_v46 }
 0x54d   : > { %v5345_v56 = vrot.slane %v16966_v57, %v19193_v2  ;;  %v8074_v43 = vshrl.u32 %v7734_v11, 16  ;;  %v4223_v26 = vcombine.high %v20782_v30, %v20774_v36  ;;  %v16964_v29 = vpack.c.bf16 %v1860_v39, %v1856_v16  ;;  %v26381_v57 = vld [vmem:[#allocation179_spill] sm:$0xff] }
 0x54e   : > { %v7846_v41 = vrot.slane %v7838_v19, %v19211_v21  ;;  %v16963_v42 = vpack.c.bf16 %v1858_v49, %v1854_v28  ;;  %v20948_v10 = vcombine.low %v20787_v3, %v20820_v63  ;;  %v5294_v46 = vcombine.low %v5269_v54, %v5277_v8 }
 0x54f   : > { %v16967_v5 = vpack.c.bf16 %v1859_v61, %v1855_v47  ;;  %v16968_v38 = vpack.c.bf16 %v1861_v17, %v1857_v27  ;;  %v26317_v52 = vcombine.low %v20782_v30, %v20774_v36  ;;  %v5295_v4 = vcombine.high %v5269_v54, %v5277_v8 }
 0x550   : > { %v7870_v14 = vcombine.low %v7814_v53, %v7846_v41  ;;  %26313 = vst [vmem:[#allocation85_spill] sm:$0xff] %v20948_v10  ;;  %v26319_v16 = vcombine.high %v20727_v22, %v20730_v51  ;;  %v5285_v17 = vrot.slane %v16963_v42, %v19193_v2  ;;  %v5293_v39 = vrot.slane %v16964_v29, %v19193_v2  ;;  %v26410_v10 = vld [vmem:[#allocation217_spill] sm:$0xff] }
 0x551   : > { %v4230_v48 = vrot.slane %v26317_v52, %v19211_v21  ;;  %v4237_v30 = vrot.slane %v4223_v26, %v19211_v21  ;;  %v5363_v54 = vcombine.high %v5337_v12, %v5345_v56  ;;  %v26320_v8 = vpack.i.b16 %v20494_v62, %v20431_v31 }
 0x552   : > { %v8072_v44 = vpack.i.b16 %v7870_v14, %v7734_v11  ;;  %v8075_v19 = vshrl.u32 %v7870_v14, 16  ;;  %v20956_v14 = vcombine.low %v20811_v24, %v20823_v32  ;;  %v26318_v11 = vcombine.low %v20727_v22, %v20730_v51 }
 0x553   : > { %v4205_v49 = vrot.slane %v26319_v16, %v19211_v21  ;;  %v7599_v47 = vcombine.high %v20707_v37, %v20710_v35  ;;  %v20984_v42 = vcombine.high %v20787_v3, %v20820_v63  ;;  %v20987_v51 = vrot.slane %v5294_v46, %v19211_v21  ;;  %v26336_v16 = vld [vmem:[#allocation218_spill] sm:$0xff] }
 0x554   : > { %8137 = vxpose.xlu0.c.b16.end [4/4] (short) (narrow) %v8072_v44, 16  ;;  %v8076_v6 = vpack.i.b16 %v8075_v19, %v8074_v43  ;;  %26316 = vst [vmem:[#allocation79_spill] sm:$0xff] %v20956_v14  ;;  %v5362_v43 = vcombine.low %v5337_v12, %v5345_v56  ;;  %v4198_v28 = vrot.slane %v26318_v11, %v19211_v21 }
 0x555   : > { %26321 = vst [vmem:[#allocation89_spill] sm:$0xff] %v20984_v42  ;;  %26322 = vst [vmem:[#allocation87_spill] sm:$0xff] %v20987_v51  ;;  %v5353_v26 = vrot.slane %v16967_v5, %v19193_v2  ;;  %v5361_v56 = vrot.slane %v16968_v38, %v19193_v2  ;;  %v20994_v31 = vrot.slane %v5295_v4, %v19211_v21 }
 0x556   : > { %8153 = vxpose.xlu1.c.b16.end [4/4] (short) (narrow) %v8076_v6, 16  ;;  %v20991_v29 = vcombine.low %v4198_v28, %v4230_v48  ;;  %v20997_v62 = vrot.slane %v5362_v43, %v19211_v21  ;;  %v7463_v37 = vcombine.high %v20698_v23, %v20683_v9  ;;  %v21004_v35 = vcombine.high %v20811_v24, %v20823_v32  ;;  %v26375_v6 = vld [vmem:[#allocation193_spill] sm:$0xff] }
 0x557   : > { %26324 = vst [vmem:[#allocation86_spill] sm:$0xff] %v20994_v31  ;;  %v5310_v3 = vcombine.low %v5285_v17, %v5293_v39  ;;  %v21006_v63 = vcombine.low %v4205_v49, %v4237_v30  ;;  %v21008_v12 = vcombine.high %v4198_v28, %v4230_v48  ;;  %v21010_v27 = vcombine.high %v4205_v49, %v4237_v30 }
 0x558   : > { %8166 = vxpose.xlu0.c.b16.start [1/4] (short) (narrow) %v26320_v8, 16  ;;  %26323 = vst [vmem:[#allocation88_spill] sm:$0xff] %v20991_v29  ;;  %26325 = vst [vmem:[#allocation227_spill] sm:$0xff] %v20997_v62  ;;  %v21013_v61 = vrot.slane %v5363_v54, %v19211_v21  ;;  %v5311_v44 = vcombine.high %v5285_v17, %v5293_v39  ;;  %v8019_v9 = vshrl.u32 %v7599_v47, 16  ;;  %v8018_v5 = vshrl.u32 %v7463_v37, 16  ;;  %v26337_v17 = vld [vmem:[#allocation223_spill] sm:$0xff] }
 0x559   : > { %26326 = vst [vmem:[#allocation228_spill] sm:$0xff] %v21004_v35  ;;  %26327 = vst [vmem:[#allocation229_spill] sm:$0xff] %v21006_v63  ;;  %v7871_v23 = vcombine.high %v7814_v53, %v7846_v41  ;;  %v5378_v19 = vcombine.low %v5353_v26, %v5361_v56  ;;  %v5379_v24 = vcombine.high %v5353_v26, %v5361_v56  ;;  %v26339_v54 = vld [vmem:[#allocation91_spill] sm:$0xff]  ;;  %v26340_v8 = vld [vmem:[#allocation41_spill] sm:$0xff] }
 0x55a   : > { %8182 = vxpose.xlu1.c.b16.start [1/4] (short) (narrow) %v20515_v0, 16  ;;  %26328 = vst [vmem:[#allocation230_spill] sm:$0xff] %v21008_v12  ;;  %26329 = vst [vmem:[#allocation231_spill] sm:$0xff] %v21010_v27  ;;  %v26331_v0 = vpack.i.b16 %v20590_v15, %v20546_v25  ;;  %v8016_v46 = vpack.i.b16 %v7599_v47, %v7463_v37  ;;  %v7735_v38 = vcombine.high %v20930_v13, %v20921_v55  ;;  %v26341_v56 = vld [vmem:[#allocation92_spill] sm:$0xff]  ;;  %v26373_v53 = vld [vmem:[#allocation171_spill] sm:$0xff] }
 0x55b   : > { %26330 = vst [vmem:[#allocation232_spill] sm:$0xff] %v21013_v61  ;;  %v21028_v15 = vrot.slane %v5310_v3, %v19211_v21  ;;  %v21037_v52 = vrot.slane %v5311_v44, %v19211_v21  ;;  %v7567_v13 = vcombine.high %v20677_v60, %v20680_v58  ;;  %v8020_v55 = vpack.i.b16 %v8019_v9, %v8018_v5  ;;  %v26338_v60 = vld [vmem:[#allocation225_spill] sm:$0xff]  ;;  %v26345_v3 = vld [vmem:[#allocation40_spill] sm:$0xff] }
 0x55c   : > { %8167 = vxpose.xlu0.c.b16.cont [2/4] (short) (narrow) %v26331_v0, 16  ;;  %v8083_v48 = vshrl.u32 %v7871_v23, 16  ;;  %v21042_v4 = vrot.slane %v5378_v19, %v19211_v21  ;;  %v21045_v43 = vrot.slane %v5379_v24, %v19211_v21  ;;  %v6791_v11 = vcombine.high %v20263_v34, %v20321_v45  ;;  %v26342_v34 = vld [vmem:[#allocation90_spill] sm:$0xff]  ;;  %v26394_v29 = vld [vmem:[#allocation196_spill] sm:$0xff] }
 0x55d   : > { %26332 = vst [vmem:[#allocation233_spill] sm:$0xff] %v21028_v15  ;;  %26333 = vst [vmem:[#allocation234_spill] sm:$0xff] %v21037_v52  ;;  %v6807_v28 = vcombine.high %v20283_v1, %v20343_v7  ;;  %v7431_v49 = vcombine.high %v26336_v16, %v20640_v20  ;;  %v7535_v58 = vcombine.high %v26338_v60, %v26337_v17  ;;  %v8082_v30 = vshrl.u32 %v7735_v38, 16  ;;  %v26343_v7 = vld [vmem:[#allocation222_spill] sm:$0xff]  ;;  %v26344_v20 = vld [vmem:[#allocation221_spill] sm:$0xff] }
 0x55e   : > { %8183 = vxpose.xlu1.c.b16.cont [2/4] (short) (narrow) %v20604_v40, 16  ;;  %26334 = vst [vmem:[#allocation235_spill] sm:$0xff] %v21042_v4  ;;  %26335 = vst [vmem:[#allocation236_spill] sm:$0xff] %v21045_v43  ;;  %v8080_v39 = vpack.i.b16 %v7871_v23, %v7735_v38  ;;  %v4246_v47 = vcombine.low %v26340_v8, %v26339_v54  ;;  %v4262_v45 = vcombine.low %v26342_v34, %v26341_v56  ;;  %v26348_v24 = vld [vmem:[#allocation158_spill] sm:$0xff]  ;;  %v26350_v38 = vld [vmem:[#allocation176_spill] sm:$0xff] }
 0x55f   : > { %v7399_v37 = vcombine.high %v26344_v20, %v26343_v7  ;;  %v7839_v44 = vcombine.high %v26345_v3, %v20918_v33  ;;  %v8084_v0 = vpack.i.b16 %v8083_v48, %v8082_v30  ;;  %v21068_v9 = vrot.slane %v7567_v13, %v19211_v21  ;;  %v26352_v17 = vld [vmem:[#allocation76_spill] sm:$0xff]  ;;  %v26356_v7 = vld [vmem:[#allocation159_spill] sm:$0xff]  ;;  %v26357_v20 = vld [vmem:[#allocation50_spill] sm:$0xff] }
 0x560   : > { %8168 = vxpose.xlu0.c.b16.cont [3/4] (short) (narrow) %v8016_v46, 16  ;;  %v21071_v23 = vrot.slane %v6791_v11, %v19193_v2  ;;  %v21074_v19 = vrot.slane %v6807_v28, %v19193_v2  ;;  %v26349_v46 = vld [vmem:[#allocation124_spill] sm:$0xff]  ;;  %v21085_v13 = vrot.slane %v7431_v49, %v19211_v21  ;;  %v21088_v11 = vrot.slane %v7535_v58, %v19211_v21  ;;  %v26364_v49 = vld [vmem:[#allocation181_spill] sm:$0xff] }
 0x561   : > { %v6823_v5 = vcombine.high %v26349_v46, %v26348_v24  ;;  %v26353_v60 = vld [vmem:[#allocation72_spill] sm:$0xff]  ;;  %v21091_v28 = vrot.slane %v4246_v47, %v19193_v2  ;;  %v6839_v3 = vcombine.high %v26357_v20, %v26356_v7  ;;  %v26359_v46 = vld [vmem:[#allocation123_spill] sm:$0xff]  ;;  %v26365_v40 = vld [vmem:[#allocation165_spill] sm:$0xff]  ;;  %v21105_v58 = vrot.slane %v7399_v37, %v19211_v21 }
 0x562   : > { %8184 = vxpose.xlu1.c.b16.cont [3/4] (short) (narrow) %v8020_v55, 16  ;;  %26346 = vst [vmem:[#allocation218_spill] sm:$0xff] %v21071_v23  ;;  %26347 = vst [vmem:[#allocation223_spill] sm:$0xff] %v21074_v19  ;;  %v26351_v55 = vld [vmem:[#allocation172_spill] sm:$0xff]  ;;  %v7703_v33 = vcombine.high %v26353_v60, %v26352_v17  ;;  %v26361_v17 = vld [vmem:[#allocation170_spill] sm:$0xff]  ;;  %v26366_v41 = vpack.i.b16 %v26364_v49, %v26365_v40  ;;  %v7600_v47 = vcombine.low %v21088_v11, %v21068_v9 }
 0x563   : > { %v6975_v16 = vcombine.high %v26351_v55, %v26350_v38  ;;  %v26355_v48 = vld [vmem:[#allocation84_spill] sm:$0xff]  ;;  %v26360_v55 = vld [vmem:[#allocation174_spill] sm:$0xff]  ;;  %v21110_v7 = vrot.slane %v7839_v44, %v19211_v21  ;;  %v21113_v20 = vrot.slane %v4262_v45, %v19193_v2  ;;  %v21123_v40 = vrot.slane %v6823_v5, %v19193_v2  ;;  %v26369_v37 = vld [vmem:[#allocation185_spill] sm:$0xff] }
 0x564   : > { %8169 = vxpose.xlu0.c.b16.end [4/4] (short) (narrow) %v8080_v39, 16  ;;  %v26354_v39 = vld [vmem:[#allocation71_spill] sm:$0xff]  ;;  %v26358_v24 = vld [vmem:[#allocation168_spill] sm:$0xff]  ;;  %v6959_v60 = vcombine.high %v26361_v17, %v26360_v55  ;;  %v26368_v55 = vld [vmem:[#allocation162_spill] sm:$0xff]  ;;  %v7464_v44 = vcombine.low %v21105_v58, %v21085_v13  ;;  %v21129_v45 = vrot.slane %v7703_v33, %v19211_v21  ;;  %v7519_v59 = vcombine.high %v26410_v10, %v26409_v50 }
 0x565   : > { %v7807_v30 = vcombine.high %v26355_v48, %v26354_v39  ;;  %v6943_v38 = vcombine.high %v26359_v46, %v26358_v24  ;;  %v26362_v39 = vld [vmem:[#allocation67_spill] sm:$0xff]  ;;  %v6870_v24 = vcombine.low %v21071_v23, %v21074_v19  ;;  %v26367_v46 = vld [vmem:[#allocation164_spill] sm:$0xff]  ;;  %v26370_v49 = vld [vmem:[#allocation173_spill] sm:$0xff]  ;;  %v7465_v50 = vcombine.high %v21105_v58, %v21085_v13 }
 0x566   : > { %8185 = vxpose.xlu1.c.b16.end [4/4] (short) (narrow) %v8084_v0, 16  ;;  %v26363_v0 = vld [vmem:[#allocation77_spill] sm:$0xff]  ;;  %v6927_v17 = vcombine.high %v26368_v55, %v26367_v46  ;;  %v21143_v55 = vrot.slane %v6959_v60, %v19193_v2  ;;  %v26374_v33 = vld [vmem:[#allocation207_spill] sm:$0xff]  ;;  %v8024_v18 = vpack.i.b16 %v7600_v47, %v7464_v44  ;;  %v8026_v1 = vshrl.u32 %v7464_v44, 16  ;;  %v26390_v44 = vld [vmem:[#allocation184_spill] sm:$0xff] }
 0x567   : > { %v7671_v48 = vcombine.high %v26363_v0, %v26362_v39  ;;  %v21132_v39 = vrot.slane %v7807_v30, %v19211_v21  ;;  %v21135_v0 = vrot.slane %v6839_v3, %v19193_v2  ;;  %v26371_v5 = vld [vmem:[#allocation169_spill] sm:$0xff]  ;;  %v26376_v32 = vpack.i.b16 %v26374_v33, %v26375_v6  ;;  %v26383_v33 = vld [vmem:[#allocation188_spill] sm:$0xff]  ;;  %v26419_v58 = vld [vmem:[#allocation210_spill] sm:$0xff] }
 0x568   : > { %8198 = vxpose.xlu0.c.b16.start [1/4] (short) (narrow) %v26366_v41, 16  ;;  %v21120_v41 = vrot.slane %v6975_v16, %v19193_v2  ;;  %v21138_v16 = vrot.slane %v6943_v38, %v19193_v2  ;;  %v7063_v46 = vcombine.high %v26371_v5, %v26370_v49  ;;  %v8027_v30 = vshrl.u32 %v7600_v47, 16  ;;  %v26378_v49 = vld [vmem:[#allocation183_spill] sm:$0xff]  ;;  %v26379_v5 = vld [vmem:[#allocation177_spill] sm:$0xff]  ;;  %v26389_v47 = vld [vmem:[#allocation190_spill] sm:$0xff] }
 0x569   : > { %v21151_v3 = vrot.slane %v7671_v48, %v19211_v21  ;;  %v7872_v38 = vcombine.low %v21132_v39, %v21110_v7  ;;  %v21156_v22 = vrot.slane %v6927_v17, %v19193_v2  ;;  %v26384_v48 = vld [vmem:[#allocation213_spill] sm:$0xff]  ;;  %v6902_v26 = vcombine.low %v21123_v40, %v21135_v0  ;;  %v26432_v23 = vld [vmem:[#allocation66_spill] sm:$0xff] }
 0x56a   : > { %8214 = vxpose.xlu1.c.b16.start [1/4] (short) (narrow) %v26369_v37, 16  ;;  %v26372_v37 = vld [vmem:[#allocation175_spill] sm:$0xff]  ;;  %v7038_v60 = vcombine.low %v21143_v55, %v21120_v41 }
 0x56b   : > { %v7079_v25 = vcombine.high %v26373_v53, %v26372_v37  ;;  %26377 = vst [vmem:[#allocation225_spill] sm:$0xff] %v21156_v22  ;;  %v7095_v53 = vcombine.high %v26379_v5, %v26378_v49  ;;  %v26380_v37 = vld [vmem:[#allocation186_spill] sm:$0xff]  ;;  %v7736_v17 = vcombine.low %v21151_v3, %v21129_v45  ;;  %v7006_v27 = vcombine.low %v21156_v22, %v21138_v16 }
 0x56c   : > { %8199 = vxpose.xlu0.c.b16.cont [2/4] (short) (narrow) %v26376_v32, 16  ;;  %v7111_v6 = vcombine.high %v26381_v57, %v26380_v37  ;;  %v26382_v32 = vld [vmem:[#allocation192_spill] sm:$0xff]  ;;  %v21174_v49 = vrot.slane %v7063_v46, %v19193_v2  ;;  %v26386_v57 = vld [vmem:[#allocation202_spill] sm:$0xff]  ;;  %v8091_v12 = vshrl.u32 %v7872_v38, 16 }
 0x56d   : > { %v7215_v36 = vcombine.high %v26383_v33, %v26382_v32  ;;  %v26387_v5 = vld [vmem:[#allocation198_spill] sm:$0xff]  ;;  %v21179_v32 = vrot.slane %v7079_v25, %v19193_v2  ;;  %v7199_v33 = vcombine.high %v26390_v44, %v26389_v47  ;;  %v21184_v63 = vrot.slane %v7095_v53, %v19193_v2  ;;  %v26393_v46 = vld [vmem:[#allocation200_spill] sm:$0xff]  ;;  %v26402_v44 = vld [vmem:[#allocation189_spill] sm:$0xff] }
 0x56e   : > { %8215 = vxpose.xlu1.c.b16.cont [2/4] (short) (narrow) %v26384_v48, 16  ;;  %26385 = vst [vmem:[#allocation91_spill] sm:$0xff] %v21174_v49  ;;  %v7247_v37 = vcombine.high %v26387_v5, %v26386_v57  ;;  %v8028_v48 = vpack.i.b16 %v8027_v30, %v8026_v1  ;;  %v21187_v35 = vrot.slane %v7111_v6, %v19193_v2  ;;  %v8090_v30 = vshrl.u32 %v7736_v17, 16 }
 0x56f   : > { %26388 = vst [vmem:[#allocation41_spill] sm:$0xff] %v21179_v32  ;;  %26391 = vst [vmem:[#allocation92_spill] sm:$0xff] %v21184_v63  ;;  %v7231_v42 = vcombine.high %v26394_v29, %v26393_v46  ;;  %v21192_v57 = vrot.slane %v7038_v60, %v19211_v21  ;;  %v26395_v25 = vcombine.high %v26340_v8, %v26339_v54  ;;  %v26408_v60 = vld [vmem:[#allocation201_spill] sm:$0xff] }
 0x570   : > { %8200 = vxpose.xlu0.c.b16.cont [3/4] (short) (narrow) %v8024_v18, 16  ;;  %26392 = vst [vmem:[#allocation90_spill] sm:$0xff] %v21187_v35  ;;  %v21201_v18 = vrot.slane %v7215_v36, %v19193_v2  ;;  %v8088_v1 = vpack.i.b16 %v7872_v38, %v7736_v17  ;;  %v26397_v53 = vcombine.high %v26342_v34, %v26341_v56 }
 0x571   : > { %v21198_v5 = vrot.slane %v26395_v25, %v19193_v2  ;;  %v21212_v6 = vrot.slane %v7247_v37, %v19193_v2  ;;  %v21215_v54 = vrot.slane %v7006_v27, %v19211_v21  ;;  %v7142_v36 = vcombine.low %v21174_v49, %v21179_v32  ;;  %v26405_v25 = vld [vmem:[#allocation203_spill] sm:$0xff] }
 0x572   : > { %26396 = vst [vmem:[#allocation222_spill] sm:$0xff] %v21201_v18  ;;  %8216 = vxpose.xlu1.c.b16.cont [3/4] (short) (narrow) %v8028_v48, 16  ;;  %v21207_v29 = vrot.slane %v26397_v53, %v19193_v2  ;;  %v21220_v8 = vrot.slane %v7199_v33, %v19193_v2  ;;  %v8092_v38 = vpack.i.b16 %v8091_v12, %v8090_v30  ;;  %v26401_v12 = vld [vmem:[#allocation195_spill] sm:$0xff]  ;;  %v26403_v33 = vld [vmem:[#allocation197_spill] sm:$0xff] }
 0x573   : > { %26398 = vst [vmem:[#allocation221_spill] sm:$0xff] %v21212_v6  ;;  %v21223_v56 = vrot.slane %v6902_v26, %v19211_v21  ;;  %v7174_v34 = vcombine.low %v21184_v63, %v21187_v35  ;;  %v21228_v17 = vrot.slane %v7231_v42, %v19193_v2  ;;  %v21231_v27 = vrot.slane %v6870_v24, %v19211_v21  ;;  %v26404_v48 = vld [vmem:[#allocation191_spill] sm:$0xff]  ;;  %v26407_v53 = vld [vmem:[#allocation205_spill] sm:$0xff]  ;;  %v26424_v24 = vld [vmem:[#allocation194_spill] sm:$0xff] }
 0x574   : > { %26399 = vst [vmem:[#allocation40_spill] sm:$0xff] %v21220_v8  ;;  %8201 = vxpose.xlu0.c.b16.end [4/4] (short) (narrow) %v8088_v1, 16  ;;  %v21235_v37 = vcombine.low %v21215_v54, %v21192_v57  ;;  %v7278_v47 = vcombine.low %v21220_v8, %v21201_v18  ;;  %v7335_v26 = vcombine.high %v26402_v44, %v26401_v12  ;;  %v26406_v1 = vld [vmem:[#allocation199_spill] sm:$0xff]  ;;  %v26411_v12 = vld [vmem:[#allocation212_spill] sm:$0xff]  ;;  %v26412_v44 = vld [vmem:[#allocation206_spill] sm:$0xff] }
 0x575   : > { %26400 = vst [vmem:[#allocation158_spill] sm:$0xff] %v21228_v17  ;;  %v7351_v46 = vcombine.high %v26404_v48, %v26403_v33  ;;  %v7367_v42 = vcombine.high %v26406_v1, %v26405_v25  ;;  %v7310_v30 = vcombine.low %v21228_v17, %v21212_v6  ;;  %v7383_v14 = vcombine.high %v26408_v60, %v26407_v53  ;;  %v26413_v33 = vld [vmem:[#allocation182_spill] sm:$0xff]  ;;  %v26416_v60 = vld [vmem:[#allocation220_spill] sm:$0xff]  ;;  %v26417_v53 = vld [vmem:[#allocation215_spill] sm:$0xff] }
 0x576   : > { %8217 = vxpose.xlu1.c.b16.end [4/4] (short) (narrow) %v8092_v38, 16  ;;  %v7487_v49 = vcombine.high %v26412_v44, %v26411_v12  ;;  %v26414_v48 = vld [vmem:[#allocation166_spill] sm:$0xff]  ;;  %v7601_v38 = vcombine.high %v21088_v11, %v21068_v9  ;;  %v21262_v25 = vcombine.low %v21231_v27, %v21223_v56  ;;  %v21265_v1 = vrot.slane %v7142_v36, %v19211_v21  ;;  %v26418_v44 = vld [vmem:[#allocation187_spill] sm:$0xff]  ;;  %v26428_v63 = vld [vmem:[#allocation65_spill] sm:$0xff] }
 0x577   : > { %v26415_v32 = vpack.i.b16 %v26413_v33, %v26414_v48  ;;  %v7503_v10 = vcombine.high %v26417_v53, %v26416_v60  ;;  %v7915_v12 = vshrl.u32 %v21235_v37, 16  ;;  %v21276_v9 = vrot.slane %v7335_v26, %v19193_v2  ;;  %v26421_v60 = vld [vmem:[#allocation64_spill] sm:$0xff]  ;;  %v26430_v6 = vld [vmem:[#allocation39_spill] sm:$0xff] }
 0x578   : > { %v21279_v11 = vrot.slane %v7351_v46, %v19193_v2  ;;  %v21282_v36 = vrot.slane %v7367_v42, %v19193_v2  ;;  %v21286_v33 = vrot.slane %v7278_v47, %v19211_v21  ;;  %v21289_v13 = vrot.slane %v7383_v14, %v19193_v2  ;;  %v26422_v53 = vld [vmem:[#allocation80_spill] sm:$0xff] }
 0x579   : > { %8230 = vxpose.xlu0.c.b16.start [1/4] (short) (narrow) %v26415_v32, 16  ;;  %v21273_v32 = vrot.slane %v7174_v34, %v19211_v21  ;;  %v26420_v34 = vld [vmem:[#allocation204_spill] sm:$0xff]  ;;  %v21294_v26 = vrot.slane %v7519_v59, %v19193_v2  ;;  %v21297_v46 = vrot.slane %v7310_v30, %v19211_v21  ;;  %v21300_v42 = vrot.slane %v7487_v49, %v19193_v2  ;;  %v26427_v30 = vld [vmem:[#allocation226_spill] sm:$0xff]  ;;  %v26429_v49 = vld [vmem:[#allocation55_spill] sm:$0xff] }
 0x57a   : > { %8246 = vxpose.xlu1.c.b16.start [1/4] (short) (narrow) %v26418_v44, 16  ;;  %v7471_v48 = vcombine.high %v26420_v34, %v26419_v58  ;;  %v7791_v44 = vcombine.high %v26422_v53, %v26421_v60  ;;  %v26423_v47 = vld [vmem:[#allocation208_spill] sm:$0xff]  ;;  %v8035_v14 = vshrl.u32 %v7601_v38, 16  ;;  %v7873_v58 = vcombine.high %v21132_v39, %v21110_v7  ;;  %v26426_v34 = vld [vmem:[#allocation63_spill] sm:$0xff]  ;;  %v26431_v60 = vld [vmem:[#allocation62_spill] sm:$0xff] }
 0x57b   : > { %v26425_v8 = vpack.i.b16 %v26423_v47, %v26424_v24  ;;  %v21310_v59 = vrot.slane %v7503_v10, %v19193_v2  ;;  %v7639_v18 = vcombine.high %v26427_v30, %v26426_v34  ;;  %v7655_v35 = vcombine.high %v26429_v49, %v26428_v63  ;;  %v26433_v24 = vld [vmem:[#allocation61_spill] sm:$0xff]  ;;  %v26434_v47 = vld [vmem:[#allocation214_spill] sm:$0xff]  ;;  %v26435_v10 = vld [vmem:[#allocation216_spill] sm:$0xff] }
 0x57c   : > { %v8034_v17 = vshrl.u32 %v7465_v50, 16  ;;  %v7759_v53 = vcombine.high %v26431_v60, %v26430_v6  ;;  %v8032_v19 = vpack.i.b16 %v7601_v38, %v7465_v50  ;;  %v7737_v7 = vcombine.high %v21151_v3, %v21129_v45  ;;  %v26436_v34 = vld [vmem:[#allocation209_spill] sm:$0xff]  ;;  %v26437_v63 = vld [vmem:[#allocation219_spill] sm:$0xff] }
 0x57d   : > { %8231 = vxpose.xlu0.c.b16.cont [2/4] (short) (narrow) %v26425_v8, 16  ;;  %v7775_v8 = vcombine.high %v26433_v24, %v26432_v23  ;;  %v21324_v39 = vrot.slane %v7471_v48, %v19193_v2  ;;  %v7607_v30 = vcombine.high %v26436_v34, %v26435_v10  ;;  %v26438_v49 = vld [vmem:[#allocation211_spill] sm:$0xff]  ;;  %v7582_v6 = vcombine.low %v21310_v59, %v21294_v26  ;;  %v26440_v23 = vld [vmem:[#allocation60_spill] sm:$0xff] }
 0x57e   : > { %8247 = vxpose.xlu1.c.b16.cont [2/4] (short) (narrow) %v26434_v47, 16  ;;  %v7623_v22 = vcombine.high %v26438_v49, %v26437_v63  ;;  %v26439_v60 = vld [vmem:[#allocation59_spill] sm:$0xff]  ;;  %v21335_v38 = vrot.slane %v7791_v44, %v19193_v2  ;;  %v8036_v45 = vpack.i.b16 %v8035_v14, %v8034_v17  ;;  %v8099_v3 = vshrl.u32 %v7873_v58, 16 }
 0x57f   : > { %v7743_v24 = vcombine.high %v26440_v23, %v26439_v60  ;;  %v7446_v50 = vcombine.low %v21282_v36, %v21289_v13  ;;  %v7550_v48 = vcombine.low %v21324_v39, %v21300_v42  ;;  %v21342_v47 = vrot.slane %v7639_v18, %v19193_v2 }
 0x580   : > { %v21345_v10 = vrot.slane %v7655_v35, %v19193_v2  ;;  %v21348_v34 = vrot.slane %v7759_v53, %v19193_v2  ;;  %v21351_v44 = vrot.slane %v7775_v8, %v19193_v2  ;;  %v8098_v17 = vshrl.u32 %v7737_v7, 16 }
 0x581   : > { %8232 = vxpose.xlu0.c.b16.cont [3/4] (short) (narrow) %v8032_v19, 16  ;;  %26441 = vst [vmem:[#allocation124_spill] sm:$0xff] %v21342_v47  ;;  %v8096_v19 = vpack.i.b16 %v7873_v58, %v7737_v7  ;;  %v7414_v14 = vcombine.low %v21276_v9, %v21279_v11  ;;  %v21356_v63 = vrot.slane %v7607_v30, %v19193_v2  ;;  %v7914_v49 = vshrl.u32 %v21262_v25, 16 }
 0x582   : > { %26442 = vst [vmem:[#allocation176_spill] sm:$0xff] %v21348_v34  ;;  %8248 = vxpose.xlu1.c.b16.cont [3/4] (short) (narrow) %v8036_v45, 16  ;;  %v21359_v18 = vrot.slane %v7623_v22, %v19193_v2  ;;  %v7330_v35 = vcombine.low %v21286_v33, %v21297_v46  ;;  %v21364_v53 = vrot.slane %v7743_v24, %v19193_v2 }
 0x583   : > { %26443 = vst [vmem:[#allocation172_spill] sm:$0xff] %v21356_v63  ;;  %v7854_v8 = vcombine.low %v21351_v44, %v21335_v38  ;;  %v8100_v58 = vpack.i.b16 %v8099_v3, %v8098_v17  ;;  %v21369_v7 = vrot.slane %v7582_v6, %v19211_v21  ;;  %v4326_v30 = vcombine.low %v21198_v5, %v21207_v29 }
 0x584   : > { %26444 = vst [vmem:[#allocation76_spill] sm:$0xff] %v21359_v18  ;;  %26445 = vst [vmem:[#allocation72_spill] sm:$0xff] %v21364_v53  ;;  %v7912_v22 = vpack.i.b16 %v21235_v37, %v21262_v25  ;;  %v7194_v60 = vcombine.low %v21265_v1, %v21273_v32  ;;  %v7718_v23 = vcombine.low %v21342_v47, %v21345_v10 }
 0x585   : > { %8233 = vxpose.xlu0.c.b16.end [4/4] (short) (narrow) %v8096_v19, 16  ;;  %v7822_v24 = vcombine.low %v21364_v53, %v21348_v34  ;;  %v21383_v6 = vrot.slane %v7446_v50, %v19211_v21  ;;  %v21386_v45 = vrot.slane %v7550_v48, %v19211_v21  ;;  %v4327_v37 = vcombine.high %v21198_v5, %v21207_v29  ;;  %v26448_v29 = vld [vmem:[#allocation95_spill] sm:$0xff]  ;;  %v26451_v34 = vld [vmem:[#allocation97_spill] sm:$0xff] }
 0x586   : > { %8249 = vxpose.xlu1.c.b16.end [4/4] (short) (narrow) %v8100_v58, 16  ;;  %v7916_v25 = vpack.i.b16 %v7915_v12, %v7914_v49  ;;  %v21391_v3 = vrot.slane %v7414_v14, %v19211_v21  ;;  %v26446_v19 = vcombine.low %v21091_v28, %v21113_v20  ;;  %v7686_v50 = vcombine.low %v21356_v63, %v21359_v18  ;;  %v26449_v12 = vld [vmem:[#allocation93_spill] sm:$0xff] }
 0x587   : > { %v7979_v58 = vshrl.u32 %v7330_v35, 16  ;;  %v7602_v48 = vcombine.low %v21386_v45, %v21369_v7  ;;  %v21404_v5 = vrot.slane %v7854_v8, %v19211_v21  ;;  %v4278_v14 = vcombine.low %v26449_v12, %v26448_v29 }
 0x588   : > { %v21397_v17 = vrot.slane %v26446_v19, %v19211_v21  ;;  %v4279_v49 = vcombine.high %v26449_v12, %v26448_v29  ;;  %v7978_v53 = vshrl.u32 %v7194_v60, 16  ;;  %v26450_v19 = vcombine.high %v21091_v28, %v21113_v20  ;;  %v26452_v29 = vld [vmem:[#allocation94_spill] sm:$0xff] }
 0x589   : > { %8262 = vxpose.xlu0.c.b16.start [1/4] (short) (narrow) %v7912_v22, 16  ;;  %v7976_v22 = vpack.i.b16 %v7330_v35, %v7194_v60  ;;  %v7466_v18 = vcombine.low %v21391_v3, %v21383_v6  ;;  %v21419_v8 = vrot.slane %v7718_v23, %v19211_v21  ;;  %v4294_v12 = vcombine.low %v26452_v29, %v26451_v34 }
 0x58a   : > { %26447 = vst [vmem:[#allocation71_spill] sm:$0xff] %v21397_v17  ;;  %v21414_v63 = vrot.slane %v26450_v19, %v19211_v21  ;;  %8278 = vxpose.xlu1.c.b16.start [1/4] (short) (narrow) %v7916_v25, 16  ;;  %v21422_v17 = vrot.slane %v7822_v24, %v19211_v21  ;;  %v21427_v47 = vrot.slane %v4326_v30, %v19211_v21  ;;  %v8043_v60 = vshrl.u32 %v7602_v48, 16 }
 0x58b   : > { %v21431_v28 = vcombine.low %v20987_v51, %v21028_v15  ;;  %v21435_v20 = vcombine.low %v20997_v62, %v21042_v4  ;;  %v7980_v35 = vpack.i.b16 %v7979_v58, %v7978_v53  ;;  %v21438_v23 = vrot.slane %v7686_v50, %v19211_v21  ;;  %v26455_v62 = vld [vmem:[#allocation100_spill] sm:$0xff]  ;;  %v26486_v15 = vld [vmem:[#allocation111_spill] sm:$0xff] }
 0x58c   : > { %v7874_v24 = vcombine.low %v21422_v17, %v21404_v5  ;;  %v4295_v30 = vcombine.high %v26452_v29, %v26451_v34  ;;  %v21445_v25 = vrot.slane %v4327_v37, %v19211_v21  ;;  %v21449_v19 = vcombine.low %v20994_v31, %v21037_v52  ;;  %v26456_v4 = vld [vmem:[#allocation96_spill] sm:$0xff]  ;;  %v26459_v52 = vld [vmem:[#allocation101_spill] sm:$0xff] }
 0x58d   : > { %8263 = vxpose.xlu0.c.b16.cont [2/4] (short) (narrow) %v7976_v22, 16  ;;  %v21453_v53 = vcombine.low %v21013_v61, %v21045_v43  ;;  %v21456_v50 = vrot.slane %v4278_v14, %v19193_v2  ;;  %v8040_v58 = vpack.i.b16 %v7602_v48, %v7466_v18  ;;  %v8042_v22 = vshrl.u32 %v7466_v18, 16  ;;  %v26457_v61 = vld [vmem:[#allocation98_spill] sm:$0xff] }
 0x58e   : > { %26453 = vst [vmem:[#allocation84_spill] sm:$0xff] %v21449_v19  ;;  %8279 = vxpose.xlu1.c.b16.cont [2/4] (short) (narrow) %v7980_v35, 16  ;;  %v7738_v34 = vcombine.low %v21438_v23, %v21419_v8  ;;  %v21461_v37 = vrot.slane %v4279_v49, %v19193_v2  ;;  %v4302_v29 = vrot.slane %v4294_v12, %v19193_v2  ;;  %v8107_v18 = vshrl.u32 %v7874_v24, 16  ;;  %v26458_v12 = vld [vmem:[#allocation42_spill] sm:$0xff] }
 0x58f   : > { %26454 = vst [vmem:[#allocation159_spill] sm:$0xff] %v21453_v53  ;;  %v4398_v51 = vcombine.low %v26456_v4, %v26455_v62  ;;  %v4399_v14 = vcombine.high %v26456_v4, %v26455_v62  ;;  %v8044_v48 = vpack.i.b16 %v8043_v60, %v8042_v22  ;;  %v7059_v35 = vcombine.high %v21215_v54, %v21192_v57  ;;  %v26460_v62 = vld [vmem:[#allocation43_spill] sm:$0xff] }
 0x590   : > { %v21473_v49 = vrot.slane %v4295_v30, %v19193_v2  ;;  %v4382_v43 = vcombine.low %v26458_v12, %v26457_v61  ;;  %v4383_v31 = vcombine.high %v26458_v12, %v26457_v61  ;;  %v1862_v4 = vcombine.low %v26460_v62, %v26459_v52 }
 0x591   : > { %8264 = vxpose.xlu0.c.b16.cont [3/4] (short) (narrow) %v8040_v58, 16  ;;  %v8104_v60 = vpack.i.b16 %v7874_v24, %v7738_v34  ;;  %v8106_v58 = vshrl.u32 %v7738_v34, 16  ;;  %v6923_v57 = vcombine.high %v21231_v27, %v21223_v56  ;;  %v4342_v54 = vcombine.low %v21456_v50, %v4302_v29 }
 0x592   : > { %8280 = vxpose.xlu1.c.b16.cont [3/4] (short) (narrow) %v8044_v48, 16  ;;  %v4343_v30 = vcombine.high %v21456_v50, %v4302_v29  ;;  %v21488_v22 = vrot.slane %v4398_v51, %v19193_v2  ;;  %v1863_v61 = vcombine.high %v26460_v62, %v26459_v52  ;;  %v21493_v12 = vrot.slane %v4399_v14, %v19193_v2  ;;  %v26461_v62 = vld [vmem:[#allocation103_spill] sm:$0xff] }
 0x593   : > { %v8108_v48 = vpack.i.b16 %v8107_v18, %v8106_v58  ;;  %v7923_v24 = vshrl.u32 %v7059_v35, 16  ;;  %v7331_v34 = vcombine.high %v21286_v33, %v21297_v46  ;;  %v4358_v56 = vcombine.low %v21461_v37, %v21473_v49 }
 0x594   : > { %v4359_v27 = vcombine.high %v21461_v37, %v21473_v49  ;;  %v21502_v51 = vrot.slane %v4382_v43, %v19193_v2  ;;  %v21505_v52 = vrot.slane %v4383_v31, %v19193_v2  ;;  %v21508_v50 = vrot.slane %v1862_v4, %v19193_v2  ;;  %v26462_v4 = vld [vmem:[#allocation99_spill] sm:$0xff] }
 0x595   : > { %8265 = vxpose.xlu0.c.b16.end [4/4] (short) (narrow) %v8104_v60, 16  ;;  %v7920_v29 = vpack.i.b16 %v7059_v35, %v6923_v57  ;;  %v7922_v14 = vshrl.u32 %v6923_v57, 16  ;;  %v7195_v33 = vcombine.high %v21265_v1, %v21273_v32  ;;  %v21517_v43 = vrot.slane %v1863_v61, %v19193_v2  ;;  %v26495_v32 = vld [vmem:[#allocation116_spill] sm:$0xff] }
 0x596   : > { %8281 = vxpose.xlu1.c.b16.end [4/4] (short) (narrow) %v8108_v48, 16  ;;  %v4446_v46 = vcombine.low %v21502_v51, %v21488_v22  ;;  %v4447_v37 = vcombine.high %v21502_v51, %v21488_v22  ;;  %v7039_v31 = vcombine.high %v21143_v55, %v21120_v41  ;;  %v7987_v49 = vshrl.u32 %v7331_v34, 16  ;;  %v26463_v41 = vld [vmem:[#allocation225_spill] sm:$0xff]  ;;  %v26465_v48 = vld [vmem:[#allocation218_spill] sm:$0xff] }
 0x597   : > { %v7924_v35 = vpack.i.b16 %v7923_v24, %v7922_v14  ;;  %v7603_v1 = vcombine.high %v21386_v45, %v21369_v7  ;;  %v1878_v60 = vcombine.low %v26462_v4, %v26461_v62  ;;  %v6903_v58 = vcombine.high %v21123_v40, %v21135_v0  ;;  %v26464_v45 = vld [vmem:[#allocation223_spill] sm:$0xff] }
 0x598   : > { %v7007_v55 = vcombine.high %v26463_v41, %v21138_v16  ;;  %v1879_v57 = vcombine.high %v26462_v4, %v26461_v62  ;;  %v7984_v22 = vpack.i.b16 %v7331_v34, %v7195_v33  ;;  %v7986_v61 = vshrl.u32 %v7195_v33, 16  ;;  %v26466_v16 = vld [vmem:[#allocation221_spill] sm:$0xff]  ;;  %v26471_v4 = vld [vmem:[#allocation40_spill] sm:$0xff] }
 0x599   : > { %8294 = vxpose.xlu0.c.b16.start [1/4] (short) (narrow) %v7920_v29, 16  ;;  %v7467_v7 = vcombine.high %v21391_v3, %v21383_v6  ;;  %v6871_v24 = vcombine.high %v26465_v48, %v26464_v45  ;;  %v21540_v51 = vrot.slane %v7039_v31, %v19211_v21  ;;  %v21543_v40 = vrot.slane %v4342_v54, %v19211_v21  ;;  %v26467_v29 = vld [vmem:[#allocation158_spill] sm:$0xff] }
 0x59a   : > { %8310 = vxpose.xlu1.c.b16.start [1/4] (short) (narrow) %v7924_v35, 16  ;;  %v21546_v0 = vrot.slane %v4343_v30, %v19211_v21  ;;  %v7311_v14 = vcombine.high %v26467_v29, %v26466_v16  ;;  %v7988_v34 = vpack.i.b16 %v7987_v49, %v7986_v61  ;;  %v8051_v33 = vshrl.u32 %v7603_v1, 16  ;;  %v26468_v3 = vld [vmem:[#allocation90_spill] sm:$0xff]  ;;  %v26469_v35 = vld [vmem:[#allocation92_spill] sm:$0xff]  ;;  %v26473_v61 = vld [vmem:[#allocation91_spill] sm:$0xff] }
 0x59b   : > { %v7875_v6 = vcombine.high %v21422_v17, %v21404_v5  ;;  %v7175_v62 = vcombine.high %v26469_v35, %v26468_v3  ;;  %v26470_v31 = vld [vmem:[#allocation222_spill] sm:$0xff]  ;;  %v21557_v54 = vrot.slane %v6903_v58, %v19211_v21  ;;  %v21560_v30 = vrot.slane %v7007_v55, %v19211_v21  ;;  %v26472_v5 = vld [vmem:[#allocation41_spill] sm:$0xff] }
 0x59c   : > { %v7279_v41 = vcombine.high %v26471_v4, %v26470_v31  ;;  %v8048_v45 = vpack.i.b16 %v7603_v1, %v7467_v7  ;;  %v7739_v49 = vcombine.high %v21438_v23, %v21419_v8  ;;  %v21565_v17 = vrot.slane %v4358_v56, %v19211_v21  ;;  %v26475_v4 = vld [vmem:[#allocation176_spill] sm:$0xff] }
 0x59d   : > { %8295 = vxpose.xlu0.c.b16.cont [2/4] (short) (narrow) %v7984_v22, 16  ;;  %v8050_v22 = vshrl.u32 %v7467_v7, 16  ;;  %v7143_v48 = vcombine.high %v26473_v61, %v26472_v5  ;;  %v21570_v16 = vrot.slane %v6871_v24, %v19211_v21  ;;  %v7060_v58 = vcombine.low %v21560_v30, %v21540_v51  ;;  %v26477_v5 = vld [vmem:[#allocation71_spill] sm:$0xff] }
 0x59e   : > { %8311 = vxpose.xlu1.c.b16.cont [2/4] (short) (narrow) %v7988_v34, 16  ;;  %v21575_v55 = vrot.slane %v4359_v27, %v19211_v21  ;;  %v7583_v1 = vcombine.high %v21310_v59, %v21294_v26  ;;  %v8115_v23 = vshrl.u32 %v7875_v6, 16  ;;  %v21580_v56 = vrot.slane %v7311_v14, %v19211_v21 }
 0x59f   : > { %v8052_v8 = vpack.i.b16 %v8051_v33, %v8050_v22  ;;  %v6924_v7 = vcombine.low %v21570_v16, %v21557_v54  ;;  %v21585_v24 = vrot.slane %v7175_v62, %v19211_v21  ;;  %v21588_v29 = vrot.slane %v7279_v41, %v19211_v21 }
 0x5a0   : > { %v21591_v27 = vrot.slane %v4446_v46, %v19211_v21  ;;  %v7447_v26 = vcombine.high %v21282_v36, %v21289_v13  ;;  %v7551_v59 = vcombine.high %v21324_v39, %v21300_v42  ;;  %v8112_v14 = vpack.i.b16 %v7875_v6, %v7739_v49 }
 0x5a1   : > { %8296 = vxpose.xlu0.c.b16.cont [3/4] (short) (narrow) %v8048_v45, 16  ;;  %v8114_v34 = vshrl.u32 %v7739_v49, 16  ;;  %v7415_v33 = vcombine.high %v21276_v9, %v21279_v11  ;;  %v7931_v3 = vshrl.u32 %v7060_v58, 16  ;;  %v21600_v35 = vrot.slane %v7143_v48, %v19211_v21  ;;  %v26479_v48 = vld [vmem:[#allocation172_spill] sm:$0xff] }
 0x5a2   : > { %8312 = vxpose.xlu1.c.b16.cont [3/4] (short) (narrow) %v8052_v8, 16  ;;  %v21603_v62 = vrot.slane %v4447_v37, %v19211_v21  ;;  %v7855_v46 = vcombine.high %v21351_v44, %v21335_v38  ;;  %v7332_v13 = vcombine.low %v21588_v29, %v21580_v56  ;;  %v21610_v42 = vrot.slane %v7583_v1, %v19211_v21  ;;  %v26474_v37 = vld [vmem:[#allocation124_spill] sm:$0xff] }
 0x5a3   : > { %v8116_v36 = vpack.i.b16 %v8115_v23, %v8114_v34  ;;  %v1886_v9 = vrot.slane %v1878_v60, %v19193_v2  ;;  %v7928_v11 = vpack.i.b16 %v7060_v58, %v6924_v7  ;;  %v7930_v39 = vshrl.u32 %v6924_v7, 16  ;;  %v26476_v38 = vld [vmem:[#allocation72_spill] sm:$0xff] }
 0x5a4   : > { %v7196_v6 = vcombine.low %v21600_v35, %v21585_v24  ;;  %v7719_v31 = vcombine.high %v26474_v37, %v21345_v10  ;;  %v7823_v44 = vcombine.high %v26476_v38, %v26475_v4  ;;  %v21620_v41 = vrot.slane %v7447_v26, %v19211_v21  ;;  %v26478_v10 = vld [vmem:[#allocation76_spill] sm:$0xff] }
 0x5a5   : > { %8297 = vxpose.xlu0.c.b16.end [4/4] (short) (narrow) %v8112_v14, 16  ;;  %v21623_v45 = vrot.slane %v7551_v59, %v19211_v21  ;;  %v1893_v60 = vrot.slane %v1879_v57, %v19193_v2  ;;  %v7932_v22 = vpack.i.b16 %v7931_v3, %v7930_v39  ;;  %v21627_v49 = vrot.slane %v7415_v33, %v19211_v21 }
 0x5a6   : > { %8313 = vxpose.xlu1.c.b16.end [4/4] (short) (narrow) %v8116_v36, 16  ;;  %v21631_v61 = vcombine.low %v26477_v5, %v21543_v40  ;;  %v7687_v58 = vcombine.high %v26479_v48, %v26478_v10  ;;  %v7995_v1 = vshrl.u32 %v7332_v13, 16  ;;  %v21638_v23 = vrot.slane %v7855_v46, %v19211_v21 }
 0x5a7   : > { %v7604_v8 = vcombine.low %v21623_v45, %v21610_v42  ;;  %v1926_v57 = vcombine.low %v21508_v50, %v1886_v9  ;;  %v1927_v7 = vcombine.high %v21508_v50, %v1886_v9  ;;  %v7994_v26 = vshrl.u32 %v7196_v6, 16 }
 0x5a8   : > { %v21644_v59 = vcombine.low %v21414_v63, %v21546_v0  ;;  %v7992_v14 = vpack.i.b16 %v7332_v13, %v7196_v6  ;;  %v7468_v34 = vcombine.low %v21627_v49, %v21620_v41  ;;  %v21649_v33 = vrot.slane %v7719_v31, %v19211_v21 }
 0x5a9   : > { %8326 = vxpose.xlu0.c.b16.start [1/4] (short) (narrow) %v7928_v11, 16  ;;  %v21652_v3 = vrot.slane %v7823_v44, %v19211_v21  ;;  %v21656_v46 = vcombine.high %v26477_v5, %v21543_v40  ;;  %v21660_v50 = vcombine.low %v21427_v47, %v21565_v17  ;;  %v21664_v36 = vcombine.high %v21414_v63, %v21546_v0  ;;  %v26481_v5 = vld [vmem:[#allocation102_spill] sm:$0xff]  ;;  %v26494_v0 = vld [vmem:[#allocation120_spill] sm:$0xff] }
 0x5aa   : > { %8342 = vxpose.xlu1.c.b16.start [1/4] (short) (narrow) %v7932_v22, 16  ;;  %v21668_v13 = vcombine.low %v21445_v25, %v21575_v55  ;;  %v7996_v9 = vpack.i.b16 %v7995_v1, %v7994_v26  ;;  %v8059_v11 = vshrl.u32 %v7604_v8, 16  ;;  %v21671_v39 = vrot.slane %v7687_v58, %v19211_v21  ;;  %v26480_v22 = vld [vmem:[#allocation106_spill] sm:$0xff]  ;;  %v26482_v58 = vld [vmem:[#allocation108_spill] sm:$0xff] }
 0x5ab   : > { %v7876_v40 = vcombine.low %v21652_v3, %v21638_v23  ;;  %v21676_v6 = vrot.slane %v1926_v57, %v19211_v21  ;;  %v1942_v37 = vcombine.low %v21517_v43, %v1893_v60  ;;  %v1943_v63 = vcombine.high %v21517_v43, %v1893_v60  ;;  %v26483_v43 = vld [vmem:[#allocation104_spill] sm:$0xff]  ;;  %v26484_v57 = vld [vmem:[#allocation109_spill] sm:$0xff] }
 0x5ac   : > { %v21683_v31 = vrot.slane %v1927_v7, %v19211_v21  ;;  %v8056_v4 = vpack.i.b16 %v7604_v8, %v7468_v34  ;;  %v8058_v38 = vshrl.u32 %v7468_v34, 16  ;;  %v7740_v44 = vcombine.low %v21671_v39, %v21649_v33  ;;  %v26485_v7 = vld [vmem:[#allocation105_spill] sm:$0xff] }
 0x5ad   : > { %8327 = vxpose.xlu0.c.b16.cont [2/4] (short) (narrow) %v7992_v14, 16  ;;  %v4414_v10 = vcombine.low %v26481_v5, %v26480_v22  ;;  %v4415_v48 = vcombine.high %v26481_v5, %v26480_v22  ;;  %v4430_v60 = vcombine.low %v26483_v43, %v26482_v58  ;;  %v4431_v1 = vcombine.high %v26483_v43, %v26482_v58  ;;  %v26487_v58 = vld [vmem:[#allocation107_spill] sm:$0xff] }
 0x5ae   : > { %8343 = vxpose.xlu1.c.b16.cont [2/4] (short) (narrow) %v7996_v9, 16  ;;  %v1894_v26 = vcombine.low %v26485_v7, %v26484_v57  ;;  %v8060_v8 = vpack.i.b16 %v8059_v11, %v8058_v38  ;;  %v8123_v14 = vshrl.u32 %v7876_v40, 16  ;;  %v7061_v34 = vcombine.high %v21560_v30, %v21540_v51 }
 0x5af   : > { %v21700_v9 = vrot.slane %v1942_v37, %v19211_v21  ;;  %v21703_v22 = vrot.slane %v1943_v63, %v19211_v21  ;;  %v1895_v5 = vcombine.high %v26485_v7, %v26484_v57  ;;  %v1910_v43 = vcombine.low %v26487_v58, %v26486_v15  ;;  %v26489_v7 = vld [vmem:[#allocation118_spill] sm:$0xff] }
 0x5b0   : > { %v8120_v11 = vpack.i.b16 %v7876_v40, %v7740_v44  ;;  %v8122_v38 = vshrl.u32 %v7740_v44, 16  ;;  %v6925_v51 = vcombine.high %v21570_v16, %v21557_v54  ;;  %v21714_v30 = vrot.slane %v4414_v10, %v19193_v2 }
 0x5b1   : > { %8328 = vxpose.xlu0.c.b16.cont [3/4] (short) (narrow) %v8056_v4, 16  ;;  %v1911_v4 = vcombine.high %v26487_v58, %v26486_v15  ;;  %v21717_v37 = vrot.slane %v4415_v48, %v19193_v2  ;;  %v21720_v63 = vrot.slane %v4430_v60, %v19193_v2  ;;  %v21723_v57 = vrot.slane %v4431_v1, %v19193_v2  ;;  %v26488_v48 = vld [vmem:[#allocation121_spill] sm:$0xff] }
 0x5b2   : > { %8344 = vxpose.xlu1.c.b16.cont [3/4] (short) (narrow) %v8060_v8, 16  ;;  %v1902_v15 = vrot.slane %v1894_v26, %v19193_v2  ;;  %v8124_v40 = vpack.i.b16 %v8123_v14, %v8122_v38  ;;  %v7939_v44 = vshrl.u32 %v7061_v34, 16  ;;  %v7333_v54 = vcombine.high %v21588_v29, %v21580_v56  ;;  %v26490_v56 = vld [vmem:[#allocation112_spill] sm:$0xff]  ;;  %v26491_v29 = vld [vmem:[#allocation45_spill] sm:$0xff]  ;;  %v26493_v38 = vld [vmem:[#allocation110_spill] sm:$0xff] }
 0x5b3   : > { %v21729_v16 = vrot.slane %v1895_v5, %v19193_v2  ;;  %v1918_v10 = vrot.slane %v1910_v43, %v19193_v2  ;;  %v2046_v60 = vcombine.low %v26489_v7, %v26488_v48  ;;  %v2047_v1 = vcombine.high %v26489_v7, %v26488_v48 }
 0x5b4   : > { %v1925_v8 = vrot.slane %v1911_v4, %v19193_v2  ;;  %v7936_v26 = vpack.i.b16 %v7061_v34, %v6925_v51  ;;  %v7938_v14 = vshrl.u32 %v6925_v51, 16  ;;  %v7197_v58 = vcombine.high %v21600_v35, %v21585_v24 }
 0x5b5   : > { %8329 = vxpose.xlu0.c.b16.end [4/4] (short) (narrow) %v8120_v11, 16  ;;  %v1998_v5 = vcombine.low %v26491_v29, %v26490_v56  ;;  %v26492_v11 = vld [vmem:[#allocation114_spill] sm:$0xff]  ;;  %v2030_v18 = vcombine.low %v26495_v32, %v26494_v0  ;;  %v2031_v48 = vcombine.high %v26495_v32, %v26494_v0  ;;  %v8003_v51 = vshrl.u32 %v7333_v54, 16 }
 0x5b6   : > { %8345 = vxpose.xlu1.c.b16.end [4/4] (short) (narrow) %v8124_v40, 16  ;;  %v2014_v43 = vcombine.low %v26493_v38, %v26492_v11  ;;  %v2015_v4 = vcombine.high %v26493_v38, %v26492_v11  ;;  %v7940_v34 = vpack.i.b16 %v7939_v44, %v7938_v14  ;;  %v7605_v24 = vcombine.high %v21623_v45, %v21610_v42 }
 0x5b7   : > { %v1958_v35 = vcombine.low %v1902_v15, %v1918_v10  ;;  %v1999_v40 = vcombine.high %v26491_v29, %v26490_v56  ;;  %v2054_v7 = vrot.slane %v2046_v60, %v19193_v2  ;;  %v2061_v19 = vrot.slane %v2047_v1, %v19193_v2 }
 0x5b8   : > { %v1959_v53 = vcombine.high %v1902_v15, %v1918_v10  ;;  %v8000_v32 = vpack.i.b16 %v7333_v54, %v7197_v58  ;;  %v8002_v0 = vshrl.u32 %v7197_v58, 16  ;;  %v2006_v44 = vrot.slane %v1998_v5, %v19193_v2 }
 0x5b9   : > { %8358 = vxpose.xlu0.c.b16.start [1/4] (short) (narrow) %v7936_v26, 16  ;;  %v7469_v26 = vcombine.high %v21627_v49, %v21620_v41  ;;  %v2022_v14 = vrot.slane %v2014_v43, %v19193_v2  ;;  %v2038_v42 = vrot.slane %v2030_v18, %v19193_v2  ;;  %v2045_v45 = vrot.slane %v2031_v48, %v19193_v2 }
 0x5ba   : > { %8374 = vxpose.xlu1.c.b16.start [1/4] (short) (narrow) %v7940_v34, 16  ;;  %v2029_v56 = vrot.slane %v2015_v4, %v19193_v2  ;;  %v8004_v60 = vpack.i.b16 %v8003_v51, %v8002_v0  ;;  %v8067_v1 = vshrl.u32 %v7605_v24, 16  ;;  %v7877_v15 = vcombine.high %v21652_v3, %v21638_v23 }
 0x5bb   : > { %v2013_v54 = vrot.slane %v1999_v40, %v19193_v2  ;;  %v2094_v10 = vcombine.low %v2038_v42, %v2054_v7  ;;  %v2095_v41 = vcombine.high %v2038_v42, %v2054_v7  ;;  %v2110_v49 = vcombine.low %v2045_v45, %v2061_v19 }
 0x5bc   : > { %v2111_v58 = vcombine.high %v2045_v45, %v2061_v19  ;;  %v8064_v29 = vpack.i.b16 %v7605_v24, %v7469_v26  ;;  %v8066_v5 = vshrl.u32 %v7469_v26, 16  ;;  %v7741_v18 = vcombine.high %v21671_v39, %v21649_v33 }
 0x5bd   : > { %8359 = vxpose.xlu0.c.b16.cont [2/4] (short) (narrow) %v8000_v32, 16  ;;  %v1974_v11 = vcombine.low %v21729_v16, %v1925_v8  ;;  %v1975_v38 = vcombine.high %v21729_v16, %v1925_v8  ;;  %v2062_v43 = vcombine.low %v2006_v44, %v2022_v14  ;;  %v2063_v48 = vcombine.high %v2006_v44, %v2022_v14 }
 0x5be   : > { %8375 = vxpose.xlu1.c.b16.cont [2/4] (short) (narrow) %v8004_v60, 16  ;;  %v2078_v4 = vcombine.low %v2013_v54, %v2029_v56  ;;  %v2079_v23 = vcombine.high %v2013_v54, %v2029_v56  ;;  %v8068_v3 = vpack.i.b16 %v8067_v1, %v8066_v5  ;;  %v8131_v34 = vshrl.u32 %v7877_v15, 16 }
 0x5bf   : > { %v1966_v51 = vrot.slane %v1958_v35, %v19211_v21  ;;  %v1973_v19 = vrot.slane %v1959_v53, %v19211_v21  ;;  %v2102_v24 = vrot.slane %v2094_v10, %v19211_v21  ;;  %v2109_v40 = vrot.slane %v2095_v41, %v19211_v21 }
 0x5c0   : > { %v2118_v33 = vrot.slane %v2110_v49, %v19211_v21  ;;  %v2125_v39 = vrot.slane %v2111_v58, %v19211_v21  ;;  %v8128_v16 = vpack.i.b16 %v7877_v15, %v7741_v18  ;;  %v8130_v8 = vshrl.u32 %v7741_v18, 16 }
 0x5c1   : > { %8360 = vxpose.xlu0.c.b16.cont [3/4] (short) (narrow) %v8064_v29, 16  ;;  %v4478_v7 = vcombine.low %v21714_v30, %v21720_v63  ;;  %v1982_v32 = vrot.slane %v1974_v11, %v19211_v21  ;;  %v1989_v35 = vrot.slane %v1975_v38, %v19211_v21  ;;  %v2070_v53 = vrot.slane %v2062_v43, %v19211_v21  ;;  %v26496_v38 = vld [vmem:[#allocation69_spill] sm:$0xff] }
 0x5c2   : > { %8376 = vxpose.xlu1.c.b16.cont [3/4] (short) (narrow) %v8068_v3, 16  ;;  %v2077_v0 = vrot.slane %v2063_v48, %v19211_v21  ;;  %v2086_v26 = vrot.slane %v2078_v4, %v19211_v21  ;;  %v2093_v44 = vrot.slane %v2079_v23, %v19211_v21  ;;  %v8132_v14 = vpack.i.b16 %v8131_v34, %v8130_v8  ;;  %v26498_v34 = vld [vmem:[#allocation68_spill] sm:$0xff] }
 0x5c3   : > { %v1990_v42 = vcombine.low %v21676_v6, %v1966_v51  ;;  %v1991_v45 = vcombine.high %v21676_v6, %v1966_v51  ;;  %v1992_v56 = vcombine.low %v21683_v31, %v1973_v19  ;;  %v1993_v60 = vcombine.high %v21683_v31, %v1973_v19 }
 0x5c4   : > { %v2126_v1 = vcombine.low %v2070_v53, %v2102_v24  ;;  %v2128_v15 = vcombine.low %v2077_v0, %v2109_v40  ;;  %v2130_v54 = vcombine.low %v2086_v26, %v2118_v33  ;;  %v2132_v10 = vcombine.low %v2093_v44, %v2125_v39 }
 0x5c5   : > { %8361 = vxpose.xlu0.c.b16.end [4/4] (short) (narrow) %v8128_v16, 16  ;;  %v2127_v41 = vcombine.high %v2070_v53, %v2102_v24  ;;  %v2129_v49 = vcombine.high %v2077_v0, %v2109_v40  ;;  %v2131_v58 = vcombine.high %v2086_v26, %v2118_v33  ;;  %v2133_v29 = vcombine.high %v2093_v44, %v2125_v39 }
 0x5c6   : > { %8377 = vxpose.xlu1.c.b16.end [4/4] (short) (narrow) %v8132_v14, 16  ;;  %v1994_v5 = vcombine.low %v21700_v9, %v1982_v32  ;;  %v1995_v18 = vcombine.high %v21700_v9, %v1982_v32  ;;  %v1996_v11 = vcombine.low %v21703_v22, %v1989_v35  ;;  %v1997_v6 = vcombine.high %v21703_v22, %v1989_v35  ;;  %v26500_v32 = vld [vmem:[#allocation85_spill] sm:$0xff] }
 0x5c7   : > { %v26497_v31 = vpack.c.bf16 %v26496_v38, %v26496_v38  ;;  %v4479_v43 = vcombine.high %v21714_v30, %v21720_v63  ;;  %v4494_v48 = vcombine.low %v21717_v37, %v21723_v57  ;;  %v5080_v4 = vpack.c.bf16 %v21644_v59, %v21644_v59 }
 0x5c8   : > { %v5079_v9 = vpack.c.bf16 %v21656_v46, %v21656_v46  ;;  %v16971_v23 = vpack.c.bf16 %v2130_v54, %v2126_v1  ;;  %v16972_v3 = vpack.c.bf16 %v2132_v10, %v2128_v15  ;;  %v26499_v22 = vpack.c.bf16 %v26498_v34, %v26498_v34 }
 0x5c9   : > { %10080 = vxpose.xlu0.c.b16.start.end [1/1] (short) (narrow) %v26497_v31, 16  ;;  %v5082_v51 = vpack.c.bf16 %v21660_v50, %v21660_v50  ;;  %v5081_v30 = vpack.c.bf16 %v21664_v36, %v21664_v36  ;;  %v4495_v63 = vcombine.high %v21717_v37, %v21723_v57  ;;  %v16975_v19 = vpack.c.bf16 %v2131_v58, %v2127_v41 }
 0x5ca   : > { %10064 = vxpose.xlu1.c.b16.start.end [1/1] (short) (narrow) %v26499_v22, 16  ;;  %v16976_v24 = vpack.c.bf16 %v2133_v29, %v2129_v49  ;;  %v4486_v40 = vrot.slane %v4478_v7, %v19211_v21  ;;  %v16969_v33 = vpack.c.bf16 %v1994_v5, %v1990_v42  ;;  %v16970_v39 = vpack.c.bf16 %v1996_v11, %v1992_v56  ;;  %v26502_v7 = vld [vmem:[#allocation70_spill] sm:$0xff]  ;;  %v26508_v11 = vld [vmem:[#allocation89_spill] sm:$0xff] }
 0x5cb   : > { %v16973_v16 = vpack.c.bf16 %v1995_v18, %v1991_v45  ;;  %v16974_v8 = vpack.c.bf16 %v1997_v6, %v1993_v60  ;;  %v26501_v35 = vpack.c.bf16 %v26500_v32, %v26500_v32  ;;  %v5084_v53 = vpack.c.bf16 %v21668_v13, %v21668_v13  ;;  %v26534_v32 = vld [vmem:[#allocation49_spill] sm:$0xff] }
 0x5cc   : > { %v21819_v0 = vcombine.high %v21427_v47, %v21565_v17  ;;  %v4493_v37 = vrot.slane %v4479_v43, %v19211_v21  ;;  %v4502_v57 = vrot.slane %v4494_v48, %v19211_v21  ;;  %v26503_v26 = vpack.c.bf16 %v26502_v7, %v26502_v7 }
 0x5cd   : > { %10112 = vxpose.xlu0.c.b16.start.end [1/1] (short) (narrow) %v26501_v35, 16  ;;  %v21828_v44 = vcombine.high %v21445_v25, %v21575_v55  ;;  %v26504_v14 = vcombine.low %v21505_v52, %v21493_v12  ;;  %v5421_v47 = vrot.slane %v16971_v23, %v19193_v2  ;;  %v5429_v17 = vrot.slane %v16972_v3, %v19193_v2  ;;  %v26505_v25 = vld [vmem:[#allocation79_spill] sm:$0xff] }
 0x5ce   : > { %10096 = vxpose.xlu1.c.b16.start.end [1/1] (short) (narrow) %v26503_v26, 16  ;;  %v21837_v45 = vcombine.low %v21591_v27, %v4486_v40  ;;  %v4509_v56 = vrot.slane %v4495_v63, %v19211_v21  ;;  %v5489_v60 = vrot.slane %v16975_v19, %v19193_v2  ;;  %v5497_v1 = vrot.slane %v16976_v24, %v19193_v2  ;;  %v26533_v26 = vld [vmem:[#allocation139_spill] sm:$0xff] }
 0x5cf   : > { %v4470_v42 = vrot.slane %v26504_v14, %v19211_v21  ;;  %v26506_v55 = vpack.c.bf16 %v26505_v25, %v26505_v25  ;;  %v5405_v15 = vrot.slane %v16969_v33, %v19193_v2  ;;  %v5413_v54 = vrot.slane %v16970_v39, %v19193_v2 }
 0x5d0   : > { %v5473_v10 = vrot.slane %v16973_v16, %v19193_v2  ;;  %v5481_v41 = vrot.slane %v16974_v8, %v19193_v2  ;;  %v21850_v49 = vcombine.low %v21603_v62, %v4493_v37  ;;  %v21853_v58 = vcombine.high %v21591_v27, %v4486_v40  ;;  %v26512_v16 = vld [vmem:[#allocation228_spill] sm:$0xff] }
 0x5d1   : > { %10144 = vxpose.xlu0.c.b16.start.end [1/1] (short) (narrow) %v26506_v55, 16  ;;  %v21855_v29 = vcombine.low %v4470_v42, %v4502_v57  ;;  %v26507_v5 = vcombine.high %v21505_v52, %v21493_v12  ;;  %v26509_v6 = vpack.c.bf16 %v26508_v11, %v26508_v11  ;;  %v5083_v38 = vpack.c.bf16 %v21819_v0, %v21819_v0  ;;  %v26510_v52 = vld [vmem:[#allocation88_spill] sm:$0xff]  ;;  %v26525_v11 = vld [vmem:[#allocation46_spill] sm:$0xff] }
 0x5d2   : > { %v5085_v31 = vpack.c.bf16 %v21828_v44, %v21828_v44  ;;  %v21869_v27 = vcombine.high %v21603_v62, %v4493_v37  ;;  %v5446_v43 = vcombine.low %v5421_v47, %v5429_v17  ;;  %v5514_v23 = vcombine.low %v5489_v60, %v5497_v1 }
 0x5d3   : > { %v4477_v18 = vrot.slane %v26507_v5, %v19211_v21  ;;  %10128 = vxpose.xlu1.c.b16.start.end [1/1] (short) (narrow) %v26509_v6, 16  ;;  %v5447_v3 = vcombine.high %v5421_v47, %v5429_v17  ;;  %v5515_v12 = vcombine.high %v5489_v60, %v5497_v1  ;;  %v26511_v34 = vpack.c.bf16 %v26510_v52, %v26510_v52  ;;  %v26516_v60 = vld [vmem:[#allocation135_spill] sm:$0xff] }
 0x5d4   : > { %v5086_v22 = vpack.c.bf16 %v21837_v45, %v21837_v45  ;;  %v5430_v63 = vcombine.low %v5405_v15, %v5413_v54  ;;  %v5498_v19 = vcombine.low %v5473_v10, %v5481_v41  ;;  %v5431_v24 = vcombine.high %v5405_v15, %v5413_v54  ;;  %v26522_v54 = vld [vmem:[#allocation127_spill] sm:$0xff] }
 0x5d5   : > { %v21871_v48 = vcombine.low %v4477_v18, %v4509_v56  ;;  %10176 = vxpose.xlu0.c.b16.start.end [1/1] (short) (narrow) %v26511_v34, 16  ;;  %v5499_v39 = vcombine.high %v5473_v10, %v5481_v41  ;;  %v26513_v8 = vpack.c.bf16 %v26512_v16, %v26512_v16  ;;  %v21889_v35 = vcombine.high %v4470_v42, %v4502_v57  ;;  %v26517_v57 = vld [vmem:[#allocation131_spill] sm:$0xff]  ;;  %v26523_v10 = vld [vmem:[#allocation125_spill] sm:$0xff] }
 0x5d6   : > { %v21891_v37 = vcombine.high %v4477_v18, %v4509_v56  ;;  %v21894_v7 = vrot.slane %v5446_v43, %v19211_v21  ;;  %v21899_v14 = vrot.slane %v5514_v23, %v19211_v21  ;;  %v21902_v47 = vrot.slane %v5447_v3, %v19211_v21  ;;  %v26518_v56 = vld [vmem:[#allocation229_spill] sm:$0xff]  ;;  %v26524_v18 = vld [vmem:[#allocation136_spill] sm:$0xff] }
 0x5d7   : > { %10160 = vxpose.xlu1.c.b16.start.end [1/1] (short) (narrow) %v26513_v8, 16  ;;  %v21905_v17 = vrot.slane %v5515_v12, %v19211_v21  ;;  %v4566_v42 = vcombine.low %v26517_v57, %v26516_v60  ;;  %v26519_v1 = vpack.c.bf16 %v26518_v56, %v26518_v56  ;;  %v21913_v25 = vrot.slane %v5430_v63, %v19211_v21  ;;  %v26526_v23 = vld [vmem:[#allocation133_spill] sm:$0xff]  ;;  %v26528_v63 = vld [vmem:[#allocation230_spill] sm:$0xff] }
 0x5d8   : > { %26514 = vst [vmem:[#allocation50_spill] sm:$0xff] %v21894_v7  ;;  %26515 = vst [vmem:[#allocation168_spill] sm:$0xff] %v21899_v14  ;;  %v21916_v55 = vrot.slane %v5498_v19, %v19211_v21  ;;  %v21919_v15 = vrot.slane %v5431_v24, %v19211_v21  ;;  %v4534_v41 = vcombine.low %v26523_v10, %v26522_v54  ;;  %v26527_v3 = vld [vmem:[#allocation129_spill] sm:$0xff] }
 0x5d9   : > { %10208 = vxpose.xlu0.c.b16.start.end [1/1] (short) (narrow) %v26519_v1, 16  ;;  %26520 = vst [vmem:[#allocation123_spill] sm:$0xff] %v21913_v25  ;;  %v4535_v5 = vcombine.high %v26523_v10, %v26522_v54  ;;  %v4518_v6 = vcombine.low %v26525_v11, %v26524_v18  ;;  %v21928_v43 = vrot.slane %v5499_v39, %v19211_v21  ;;  %v26530_v16 = vld [vmem:[#allocation141_spill] sm:$0xff] }
 0x5da   : > { %26521 = vst [vmem:[#allocation174_spill] sm:$0xff] %v21916_v55  ;;  %v4550_v12 = vcombine.low %v26527_v3, %v26526_v23  ;;  %v4551_v52 = vcombine.high %v26527_v3, %v26526_v23  ;;  %v4567_v34 = vcombine.high %v26517_v57, %v26516_v60  ;;  %v26529_v19 = vpack.c.bf16 %v26528_v63, %v26528_v63  ;;  %v26531_v39 = vld [vmem:[#allocation137_spill] sm:$0xff] }
 0x5db   : > { %v21941_v24 = vcombine.low %v21913_v25, %v21894_v7  ;;  %v2150_v8 = vcombine.low %v26531_v39, %v26530_v16  ;;  %v21947_v56 = vcombine.low %v21916_v55, %v21899_v14  ;;  %v21951_v1 = vcombine.low %v21919_v15, %v21902_v47 }
 0x5dc   : > { %10192 = vxpose.xlu1.c.b16.start.end [1/1] (short) (narrow) %v26529_v19, 16  ;;  %v21955_v60 = vcombine.low %v21928_v43, %v21905_v17  ;;  %v4574_v57 = vrot.slane %v4566_v42, %v19193_v2  ;;  %v2151_v54 = vcombine.high %v26531_v39, %v26530_v16  ;;  %v26532_v10 = vpack.c.bf16 %v21631_v61, %v21631_v61 }
 0x5dd   : > { %v4542_v63 = vrot.slane %v4534_v41, %v19193_v2  ;;  %v4519_v19 = vcombine.high %v26525_v11, %v26524_v18  ;;  %v4526_v42 = vrot.slane %v4518_v6, %v19193_v2  ;;  %v2134_v16 = vcombine.low %v26534_v32, %v26533_v26  ;;  %v26535_v41 = vld [vmem:[#allocation231_spill] sm:$0xff]  ;;  %v26539_v6 = vld [vmem:[#allocation140_spill] sm:$0xff] }
 0x5de   : > { %10240 = vxpose.xlu0.c.b16.start.end [1/1] (short) (narrow) %v26532_v10, 16  ;;  %v21974_v39 = vrot.slane %v4535_v5, %v19193_v2  ;;  %v4558_v61 = vrot.slane %v4550_v12, %v19193_v2  ;;  %v21978_v10 = vrot.slane %v4567_v34, %v19193_v2  ;;  %v2135_v3 = vcombine.high %v26534_v32, %v26533_v26  ;;  %v26537_v32 = vld [vmem:[#allocation142_spill] sm:$0xff]  ;;  %v26540_v5 = vld [vmem:[#allocation48_spill] sm:$0xff] }
 0x5df   : > { %v26536_v23 = vpack.c.bf16 %v26535_v41, %v26535_v41  ;;  %v21986_v18 = vrot.slane %v4551_v52, %v19193_v2  ;;  %v2158_v11 = vrot.slane %v2150_v8, %v19193_v2  ;;  %v2165_v33 = vrot.slane %v2151_v54, %v19193_v2  ;;  %v26538_v26 = vld [vmem:[#allocation138_spill] sm:$0xff] }
 0x5e0   : > { %v4614_v12 = vcombine.low %v4558_v61, %v4574_v57  ;;  %v4615_v34 = vcombine.high %v4558_v61, %v4574_v57  ;;  %v4670_v40 = vcombine.low %v26538_v26, %v26537_v32  ;;  %v4533_v52 = vrot.slane %v4519_v19, %v19193_v2 }
 0x5e1   : > { %10224 = vxpose.xlu1.c.b16.start.end [1/1] (short) (narrow) %v26536_v23, 16  ;;  %v4582_v8 = vcombine.low %v4526_v42, %v4542_v63  ;;  %v2142_v23 = vrot.slane %v2134_v16, %v19193_v2  ;;  %v4671_v41 = vcombine.high %v26538_v26, %v26537_v32  ;;  %v4630_v57 = vcombine.low %v21986_v18, %v21978_v10 }
 0x5e2   : > { %10272 = vxpose.xlu0.c.b16.start.end [1/1] (short) (narrow) %v5080_v4, 16  ;;  %v4583_v61 = vcombine.high %v4526_v42, %v4542_v63  ;;  %v2149_v54 = vrot.slane %v2135_v3, %v19193_v2  ;;  %v4654_v62 = vcombine.low %v26540_v5, %v26539_v6  ;;  %v4631_v59 = vcombine.high %v21986_v18, %v21978_v10  ;;  %v26541_v18 = vld [vmem:[#allocation149_spill] sm:$0xff] }
 0x5e3   : > { %v4655_v4 = vcombine.high %v26540_v5, %v26539_v6  ;;  %v2198_v19 = vcombine.low %v2142_v23, %v2158_v11  ;;  %v2199_v16 = vcombine.high %v2142_v23, %v2158_v11  ;;  %v22016_v63 = vrot.slane %v4670_v40, %v19193_v2  ;;  %v26542_v11 = vld [vmem:[#allocation145_spill] sm:$0xff] }
 0x5e4   : > { %v2214_v32 = vcombine.low %v2149_v54, %v2165_v33  ;;  %v2215_v26 = vcombine.high %v2149_v54, %v2165_v33  ;;  %v4622_v46 = vrot.slane %v4614_v12, %v19211_v21  ;;  %v22024_v3 = vrot.slane %v4671_v41, %v19193_v2 }
 0x5e5   : > { %10256 = vxpose.xlu1.c.b16.start.end [1/1] (short) (narrow) %v5079_v9, 16  ;;  %v4598_v9 = vcombine.low %v4533_v52, %v21974_v39  ;;  %v4590_v42 = vrot.slane %v4582_v8, %v19211_v21  ;;  %v4629_v10 = vrot.slane %v4615_v34, %v19211_v21  ;;  %v4599_v33 = vcombine.high %v4533_v52, %v21974_v39  ;;  %v26543_v34 = vld [vmem:[#allocation147_spill] sm:$0xff] }
 0x5e6   : > { %10304 = vxpose.xlu0.c.b16.start.end [1/1] (short) (narrow) %v5082_v51, 16  ;;  %v4662_v40 = vrot.slane %v4654_v62, %v19193_v2  ;;  %v2182_v5 = vcombine.low %v26542_v11, %v26541_v18  ;;  %v4597_v50 = vrot.slane %v4583_v61, %v19211_v21  ;;  %v22037_v51 = vrot.slane %v4655_v4, %v19193_v2  ;;  %v26544_v52 = vld [vmem:[#allocation143_spill] sm:$0xff] }
 0x5e7   : > { %v22040_v6 = vrot.slane %v2198_v19, %v19211_v21  ;;  %v22043_v12 = vrot.slane %v2199_v16, %v19211_v21  ;;  %v2183_v62 = vcombine.high %v26542_v11, %v26541_v18  ;;  %v22048_v39 = vrot.slane %v2214_v32, %v19211_v21  ;;  %v26545_v32 = vld [vmem:[#allocation150_spill] sm:$0xff] }
 0x5e8   : > { %v22051_v36 = vrot.slane %v2215_v26, %v19211_v21  ;;  %v2166_v8 = vcombine.low %v26544_v52, %v26543_v34  ;;  %v4719_v23 = vcombine.high %v4662_v40, %v22016_v63  ;;  %v4734_v41 = vcombine.low %v22037_v51, %v22024_v3  ;;  %v26546_v26 = vld [vmem:[#allocation146_spill] sm:$0xff] }
 0x5e9   : > { %10288 = vxpose.xlu1.c.b16.start.end [1/1] (short) (narrow) %v5081_v30, 16  ;;  %v4718_v30 = vcombine.low %v4662_v40, %v22016_v63  ;;  %v2167_v61 = vcombine.high %v26544_v52, %v26543_v34  ;;  %v22064_v54 = vcombine.low %v4590_v42, %v4622_v46  ;;  %v4735_v4 = vcombine.high %v22037_v51, %v22024_v3  ;;  %v26548_v51 = vld [vmem:[#allocation144_spill] sm:$0xff] }
 0x5ea   : > { %10336 = vxpose.xlu0.c.b16.start.end [1/1] (short) (narrow) %v5084_v53, 16  ;;  %v2190_v19 = vrot.slane %v2182_v5, %v19193_v2  ;;  %v22072_v13 = vcombine.low %v4597_v50, %v4629_v10  ;;  %v4606_v53 = vrot.slane %v4598_v9, %v19211_v21  ;;  %v2197_v16 = vrot.slane %v2183_v62, %v19193_v2  ;;  %v26547_v5 = vld [vmem:[#allocation148_spill] sm:$0xff] }
 0x5eb   : > { %v4702_v63 = vcombine.low %v26546_v26, %v26545_v32  ;;  %v22078_v40 = vcombine.high %v4590_v42, %v4622_v46  ;;  %v4638_v18 = vrot.slane %v4630_v57, %v19211_v21  ;;  %v2174_v3 = vrot.slane %v2166_v8, %v19193_v2 }
 0x5ec   : > { %v22085_v0 = vcombine.high %v4597_v50, %v4629_v10  ;;  %v4645_v9 = vrot.slane %v4631_v59, %v19211_v21  ;;  %v2181_v11 = vrot.slane %v2167_v61, %v19193_v2  ;;  %v4686_v46 = vcombine.low %v26548_v51, %v26547_v5 }
 0x5ed   : > { %10320 = vxpose.xlu1.c.b16.start.end [1/1] (short) (narrow) %v5083_v38, 16  ;;  %v4613_v38 = vrot.slane %v4599_v33, %v19211_v21  ;;  %v4703_v57 = vcombine.high %v26546_v26, %v26545_v32  ;;  %v4687_v45 = vcombine.high %v26548_v51, %v26547_v5  ;;  %v22103_v10 = vcombine.low %v4606_v53, %v4638_v18 }
 0x5ee   : > { %10368 = vxpose.xlu0.c.b16.start.end [1/1] (short) (narrow) %v5086_v22, 16  ;;  %v2230_v22 = vcombine.low %v2174_v3, %v2190_v19  ;;  %v2231_v33 = vcombine.high %v2174_v3, %v2190_v19  ;;  %v2246_v50 = vcombine.low %v2181_v11, %v2197_v16  ;;  %v4710_v62 = vrot.slane %v4702_v63, %v19193_v2  ;;  %v26557_v63 = vld [vmem:[#allocation156_spill] sm:$0xff] }
 0x5ef   : > { %v26549_v52 = vpack.c.bf16 %v21850_v49, %v21850_v49  ;;  %v22111_v8 = vcombine.low %v4613_v38, %v4645_v9  ;;  %v22113_v44 = vcombine.high %v4606_v53, %v4638_v18  ;;  %v22116_v61 = vcombine.high %v4613_v38, %v4645_v9  ;;  %v22184_v53 = vpop.trf.xlu0 }
 0x5f0   : > { %v4694_v19 = vrot.slane %v4686_v46, %v19193_v2  ;;  %v2247_v32 = vcombine.high %v2181_v11, %v2197_v16  ;;  %v22120_v26 = vrot.slane %v4703_v57, %v19193_v2  ;;  %v22125_v49 = vrot.slane %v4687_v45, %v19193_v2 }
 0x5f1   : > { %10352 = vxpose.xlu1.c.b16.start.end [1/1] (short) (narrow) %v5085_v31, 16  ;;  %v4726_v31 = vrot.slane %v4718_v30, %v19211_v21  ;;  %v22128_v3 = vrot.slane %v2230_v22, %v19211_v21  ;;  %v26550_v30 = vpack.c.bf16 %v21853_v58, %v21853_v58  ;;  %v4733_v16 = vrot.slane %v4719_v23, %v19211_v21  ;;  %v26555_v58 = vld [vmem:[#allocation153_spill] sm:$0xff] }
 0x5f2   : > { %10400 = vxpose.xlu0.c.b16.start.end [1/1] (short) (narrow) %v26549_v52, 16  ;;  %v2245_v18 = vrot.slane %v2231_v33, %v19211_v21  ;;  %v2254_v38 = vrot.slane %v2246_v50, %v19211_v21  ;;  %v4750_v9 = vcombine.low %v4694_v19, %v4710_v62  ;;  %v4751_v11 = vcombine.high %v4694_v19, %v4710_v62  ;;  %v26552_v62 = vld [vmem:[#allocation157_spill] sm:$0xff] }
 0x5f3   : > { %v26551_v5 = vpack.c.bf16 %v21855_v29, %v21855_v29  ;;  %v22148_v23 = vrot.slane %v4734_v41, %v19211_v21  ;;  %v2261_v57 = vrot.slane %v2247_v32, %v19211_v21  ;;  %v4766_v45 = vcombine.low %v22125_v49, %v22120_v26  ;;  %v26553_v41 = vld [vmem:[#allocation155_spill] sm:$0xff] }
 0x5f4   : > { %v22156_v22 = vrot.slane %v4735_v4, %v19211_v21  ;;  %v2262_v33 = vcombine.low %v22040_v6, %v22128_v3  ;;  %v2263_v50 = vcombine.high %v22040_v6, %v22128_v3  ;;  %v2318_v52 = vcombine.low %v26553_v41, %v26552_v62  ;;  %v26556_v6 = vld [vmem:[#allocation151_spill] sm:$0xff] }
 0x5f5   : > { %10384 = vxpose.xlu1.c.b16.start.end [1/1] (short) (narrow) %v26550_v30, 16  ;;  %v2319_v19 = vcombine.high %v26553_v41, %v26552_v62  ;;  %v26554_v32 = vpack.c.bf16 %v21869_v27, %v21869_v27  ;;  %v2264_v30 = vcombine.low %v22043_v12, %v2245_v18  ;;  %v2266_v4 = vcombine.low %v22048_v39, %v2254_v38  ;;  %v26558_v62 = vld [vmem:[#allocation154_spill] sm:$0xff]  ;;  %v26561_v29 = vld [vmem:[#allocation51_spill] sm:$0xff] }
 0x5f6   : > { %10432 = vxpose.xlu0.c.b16.start.end [1/1] (short) (narrow) %v26551_v5, 16  ;;  %v4758_v5 = vrot.slane %v4750_v9, %v19211_v21  ;;  %v4765_v46 = vrot.slane %v4751_v11, %v19211_v21  ;;  %v2286_v3 = vcombine.low %v26556_v6, %v26555_v58  ;;  %v2287_v51 = vcombine.high %v26556_v6, %v26555_v58  ;;  %v26560_v11 = vld [vmem:[#allocation152_spill] sm:$0xff] }
 0x5f7   : > { %v2302_v41 = vcombine.low %v26558_v62, %v26557_v63  ;;  %v2303_v27 = vcombine.high %v26558_v62, %v26557_v63  ;;  %v2265_v9 = vcombine.high %v22043_v12, %v2245_v18  ;;  %v2270_v34 = vcombine.low %v26561_v29, %v26560_v11 }
 0x5f8   : > { %v2271_v58 = vcombine.high %v26561_v29, %v26560_v11  ;;  %v4774_v6 = vrot.slane %v4766_v45, %v19211_v21  ;;  %v2267_v59 = vcombine.high %v22048_v39, %v2254_v38  ;;  %v2268_v63 = vcombine.low %v22051_v36, %v2261_v57 }
 0x5f9   : > { %10416 = vxpose.xlu1.c.b16.start.end [1/1] (short) (narrow) %v26554_v32, 16  ;;  %v26559_v32 = vpack.c.bf16 %v21871_v48, %v21871_v48  ;;  %v2326_v62 = vrot.slane %v2318_v52, %v19193_v2  ;;  %v2333_v48 = vrot.slane %v2319_v19, %v19193_v2  ;;  %v26562_v12 = vpack.c.bf16 %v21889_v35, %v21889_v35 }
 0x5fa   : > { %v2269_v18 = vcombine.high %v22051_v36, %v2261_v57  ;;  %v16977_v42 = vpack.c.bf16 %v2266_v4, %v2262_v33  ;;  %v22202_v29 = vcombine.low %v4726_v31, %v4758_v5  ;;  %v22204_v45 = vcombine.low %v4733_v16, %v4765_v46 }
 0x5fb   : > { %10464 = vxpose.xlu0.c.b16.start.end [1/1] (short) (narrow) %v26559_v32, 16  ;;  %v22196_v32 = vpop.trf.xlu1  ;;  %v2294_v39 = vrot.slane %v2286_v3, %v19193_v2  ;;  %v2301_v38 = vrot.slane %v2287_v51, %v19193_v2  ;;  %v2310_v52 = vrot.slane %v2302_v41, %v19193_v2  ;;  %v2317_v19 = vrot.slane %v2303_v27, %v19193_v2  ;;  %v22220_v41 = vpop.trf.xlu0 }
 0x5fc   : > { %v26563_v11 = vpack.c.bf16 %v22064_v54, %v22064_v54  ;;  %v2278_v35 = vrot.slane %v2270_v34, %v19193_v2  ;;  %v2285_v36 = vrot.slane %v2271_v58, %v19193_v2  ;;  %v22215_v57 = vcombine.high %v4726_v31, %v4758_v5 }
 0x5fd   : > { %10448 = vxpose.xlu1.c.b16.start.end [1/1] (short) (narrow) %v26562_v12, 16  ;;  %v22218_v33 = vcombine.low %v22148_v23, %v4774_v6  ;;  %v2366_v4 = vcombine.low %v2310_v52, %v2326_v62  ;;  %v2367_v3 = vcombine.high %v2310_v52, %v2326_v62  ;;  %v2382_v51 = vcombine.low %v2317_v19, %v2333_v48 }
 0x5fe   : > { %v2383_v12 = vcombine.high %v2317_v19, %v2333_v48  ;;  %v26564_v27 = vpack.c.bf16 %v21891_v37, %v21891_v37  ;;  %v22225_v54 = vpack.c.bf16 %v2268_v63, %v2264_v30  ;;  %v22227_v34 = vpack.c.bf16 %v2267_v59, %v2263_v50 }
 0x5ff   : > { %10496 = vxpose.xlu0.c.b16.start.end [1/1] (short) (narrow) %v26563_v11, 16  ;;  %v22229_v58 = vpack.c.bf16 %v2269_v18, %v2265_v9  ;;  %v22231_v31 = vcombine.high %v4733_v16, %v4765_v46  ;;  %v2334_v5 = vcombine.low %v2278_v35, %v2294_v39  ;;  %v2335_v11 = vcombine.high %v2278_v35, %v2294_v39  ;;  %v22233_v52 = vpop.trf.xlu1  ;;  %v26567_v18 = vld [vmem:[#allocation134_spill] sm:$0xff]  ;;  %v26577_v16 = vld [vmem:[#allocation52_spill] sm:$0xff] }
 0x600   : > { %v2350_v55 = vcombine.low %v2285_v36, %v2301_v38  ;;  %v2351_v62 = vcombine.high %v2285_v36, %v2301_v38  ;;  %v26565_v48 = vpack.c.bf16 %v22072_v13, %v22072_v13  ;;  %v5102_v37 = vpack.c.bf16 %v22202_v29, %v22202_v29  ;;  %v26568_v29 = vld [vmem:[#allocation115_spill] sm:$0xff] }
 0x601   : > { %10480 = vxpose.xlu1.c.b16.start.end [1/1] (short) (narrow) %v26564_v27, 16  ;;  %v2374_v50 = vrot.slane %v2366_v4, %v19211_v21  ;;  %v2381_v30 = vrot.slane %v2367_v3, %v19211_v21  ;;  %v2390_v9 = vrot.slane %v2382_v51, %v19211_v21  ;;  %v2397_v13 = vrot.slane %v2383_v12, %v19211_v21  ;;  %v22268_v12 = vpop.trf.xlu0 }
 0x602   : > { %v26566_v63 = vpack.c.bf16 %v22078_v40, %v22078_v40  ;;  %v4838_v39 = vcombine.low %v26568_v29, %v26567_v18  ;;  %v26569_v19 = vcombine.high %v22125_v49, %v22120_v26  ;;  %v22262_v36 = vcombine.high %v22148_v23, %v4774_v6  ;;  %v26572_v26 = vld [vmem:[#allocation117_spill] sm:$0xff]  ;;  %v26574_v23 = vld [vmem:[#allocation119_spill] sm:$0xff] }
 0x603   : > { %10528 = vxpose.xlu0.c.b16.start.end [1/1] (short) (narrow) %v26565_v48, 16  ;;  %v2342_v4 = vrot.slane %v2334_v5, %v19211_v21  ;;  %v2349_v3 = vrot.slane %v2335_v11, %v19211_v21  ;;  %v2358_v40 = vrot.slane %v2350_v55, %v19211_v21  ;;  %v2365_v51 = vrot.slane %v2351_v62, %v19211_v21  ;;  %v26571_v48 = vld [vmem:[#allocation122_spill] sm:$0xff]  ;;  %v22282_v46 = vpop.trf.xlu1 }
 0x604   : > { %v4781_v35 = vrot.slane %v26569_v19, %v19211_v21  ;;  %v26570_v27 = vpack.c.bf16 %v22103_v10, %v22103_v10  ;;  %v4806_v49 = vcombine.low %v26572_v26, %v26571_v48  ;;  %v4839_v5 = vcombine.high %v26568_v29, %v26567_v18 }
 0x605   : > { %10512 = vxpose.xlu1.c.b16.start.end [1/1] (short) (narrow) %v26566_v63, 16  ;;  %v26573_v63 = vld [vmem:[#allocation44_spill] sm:$0xff]  ;;  %v22280_v11 = vrot.slane %v16977_v42, %v19193_v2  ;;  %v2398_v55 = vcombine.low %v2342_v4, %v2374_v50  ;;  %v2400_v62 = vcombine.low %v2349_v3, %v2381_v30  ;;  %v2402_v19 = vcombine.low %v2358_v40, %v2390_v9 }
 0x606   : > { %v4822_v6 = vcombine.low %v26574_v23, %v26573_v63  ;;  %v2404_v38 = vcombine.low %v2365_v51, %v2397_v13  ;;  %v26575_v10 = vpack.c.bf16 %v22085_v0, %v22085_v0  ;;  %v4807_v14 = vcombine.high %v26572_v26, %v26571_v48 }
 0x607   : > { %10560 = vxpose.xlu0.c.b16.start.end [1/1] (short) (narrow) %v26570_v27, 16  ;;  %v26576_v27 = vld [vmem:[#allocation113_spill] sm:$0xff]  ;;  %v4823_v42 = vcombine.high %v26574_v23, %v26573_v63  ;;  %v4846_v18 = vrot.slane %v4838_v39, %v19193_v2  ;;  %v2399_v29 = vcombine.high %v2342_v4, %v2374_v50  ;;  %v26578_v7 = vpack.c.bf16 %v22111_v8, %v22111_v8  ;;  %v22310_v8 = vpop.trf.xlu0 }
 0x608   : > { %v4790_v59 = vcombine.low %v26577_v16, %v26576_v27  ;;  %v4791_v25 = vcombine.high %v26577_v16, %v26576_v27  ;;  %v22300_v0 = vcombine.low %v22156_v22, %v4781_v35  ;;  %v2403_v48 = vcombine.high %v2358_v40, %v2390_v9 }
 0x609   : > { %10544 = vxpose.xlu1.c.b16.start.end [1/1] (short) (narrow) %v26575_v10, 16  ;;  %v22303_v10 = vcombine.high %v22156_v22, %v4781_v35  ;;  %v4814_v26 = vrot.slane %v4806_v49, %v19193_v2  ;;  %v4830_v63 = vrot.slane %v4822_v6, %v19193_v2  ;;  %v22308_v50 = vrot.slane %v4839_v5, %v19193_v2  ;;  %v22318_v6 = vpop.trf.xlu1 }
 0x60a   : > { %v2401_v39 = vcombine.high %v2349_v3, %v2381_v30  ;;  %v2405_v16 = vcombine.high %v2365_v51, %v2397_v13  ;;  %v16979_v4 = vpack.c.bf16 %v2402_v19, %v2398_v55  ;;  %v16980_v23 = vpack.c.bf16 %v2404_v38, %v2400_v62 }
 0x60b   : > { %10592 = vxpose.xlu0.c.b16.start.end [1/1] (short) (narrow) %v26578_v7, 16  ;;  %v26579_v7 = vpack.c.bf16 %v22113_v44, %v22113_v44  ;;  %v4798_v22 = vrot.slane %v4790_v59, %v19193_v2  ;;  %v4821_v9 = vrot.slane %v4807_v14, %v19193_v2  ;;  %v4837_v35 = vrot.slane %v4823_v42, %v19193_v2 }
 0x60c   : > { %v4886_v40 = vcombine.low %v4830_v63, %v4846_v18  ;;  %v4887_v49 = vcombine.high %v4830_v63, %v4846_v18  ;;  %v5549_v30 = vrot.slane %v22225_v54, %v19193_v2  ;;  %v22324_v13 = vrot.slane %v22227_v34, %v19193_v2 }
 0x60d   : > { %10576 = vxpose.xlu1.c.b16.start.end [1/1] (short) (narrow) %v26579_v7, 16  ;;  %v22328_v44 = vrot.slane %v22229_v58, %v19193_v2  ;;  %v16983_v59 = vpack.c.bf16 %v2403_v48, %v2399_v29  ;;  %v4805_v14 = vrot.slane %v4791_v25, %v19193_v2  ;;  %v4854_v38 = vcombine.low %v4798_v22, %v4814_v26  ;;  %v22344_v27 = vpop.trf.xlu1 }
 0x60e   : > { %v4902_v3 = vcombine.low %v4837_v35, %v22308_v50  ;;  %v16984_v51 = vpack.c.bf16 %v2405_v16, %v2401_v39  ;;  %v4855_v5 = vcombine.high %v4798_v22, %v4814_v26  ;;  %v26580_v54 = vpack.c.bf16 %v22116_v61, %v22116_v61 }
 0x60f   : > { %10624 = vxpose.xlu0.c.b16.start.end [1/1] (short) (narrow) %v5102_v37, 16  ;;  %v22332_v37 = vpop.trf.xlu0  ;;  %v5557_v34 = vrot.slane %v16979_v4, %v19193_v2  ;;  %v5565_v55 = vrot.slane %v16980_v23, %v19193_v2  ;;  %v4870_v58 = vcombine.low %v4805_v14, %v4821_v9  ;;  %v5108_v62 = vpack.c.bf16 %v22300_v0, %v22300_v0 }
 0x610   : > { %v5107_v25 = vpack.c.bf16 %v22262_v36, %v22262_v36  ;;  %v4894_v19 = vrot.slane %v4886_v40, %v19211_v21  ;;  %v26581_v42 = vpack.c.bf16 %v22204_v45, %v22204_v45  ;;  %v4901_v18 = vrot.slane %v4887_v49, %v19211_v21 }
 0x611   : > { %10608 = vxpose.xlu1.c.b16.start.end [1/1] (short) (narrow) %v26580_v54, 16  ;;  %v5566_v29 = vcombine.low %v22280_v11, %v5549_v30  ;;  %v5567_v0 = vcombine.high %v22280_v11, %v5549_v30  ;;  %v4871_v48 = vcombine.high %v4805_v14, %v4821_v9  ;;  %v4862_v36 = vrot.slane %v4854_v38, %v19211_v21  ;;  %v22395_v54 = vpop.trf.xlu1 }
 0x612   : > { %v4910_v26 = vrot.slane %v4902_v3, %v19211_v21  ;;  %v5634_v63 = vcombine.low %v22324_v13, %v22328_v44  ;;  %v26582_v45 = vpack.c.bf16 %v22215_v57, %v22215_v57  ;;  %v4869_v39 = vrot.slane %v4855_v5, %v19211_v21  ;;  %v26584_v3 = vld [vmem:[#allocation160_spill] sm:$0xff] }
 0x613   : > { %10656 = vxpose.xlu0.c.b16.start.end [1/1] (short) (narrow) %v26581_v42, 16  ;;  %v5582_v16 = vcombine.low %v5557_v34, %v5565_v55  ;;  %v22363_v4 = vrot.slane %v16983_v59, %v19193_v2  ;;  %v22366_v11 = vrot.slane %v16984_v51, %v19193_v2  ;;  %v4903_v23 = vcombine.high %v4837_v35, %v22308_v50  ;;  %v22370_v40 = vpop.trf.xlu0  ;;  %v26585_v51 = vld [vmem:[#allocation47_spill] sm:$0xff]  ;;  %v26587_v42 = vld [vmem:[#allocation132_spill] sm:$0xff] }
 0x614   : > { %v4918_v7 = vcombine.low %v4862_v36, %v4894_v19  ;;  %v4878_v22 = vrot.slane %v4870_v58, %v19211_v21  ;;  %v5583_v9 = vcombine.high %v5557_v34, %v5565_v55  ;;  %v26583_v57 = vpack.c.bf16 %v22218_v33, %v22218_v33  ;;  %v26592_v58 = vld [vmem:[#allocation54_spill] sm:$0xff] }
 0x615   : > { %10640 = vxpose.xlu1.c.b16.start.end [1/1] (short) (narrow) %v26582_v45, 16  ;;  %v4920_v49 = vcombine.low %v4869_v39, %v4901_v18  ;;  %v22376_v30 = vrot.slane %v5566_v29, %v19211_v21  ;;  %v22379_v59 = vrot.slane %v5567_v0, %v19211_v21  ;;  %v22383_v35 = vcombine.high %v4862_v36, %v4894_v19  ;;  %v26588_v29 = vld [vmem:[#allocation130_spill] sm:$0xff]  ;;  %v26590_v45 = vld [vmem:[#allocation128_spill] sm:$0xff] }
 0x616   : > { %v22385_v14 = vcombine.low %v4878_v22, %v4910_v26  ;;  %v22388_v38 = vrot.slane %v4871_v48, %v19211_v21  ;;  %v22391_v33 = vrot.slane %v5634_v63, %v19211_v21  ;;  %v4974_v5 = vcombine.low %v26585_v51, %v26584_v3  ;;  %v26591_v19 = vld [vmem:[#allocation126_spill] sm:$0xff] }
 0x617   : > { %10688 = vxpose.xlu0.c.b16.start.end [1/1] (short) (narrow) %v26583_v57, 16  ;;  %v26586_v34 = vpack.c.bf16 %v22231_v31, %v22231_v31  ;;  %v22401_v55 = vrot.slane %v5582_v16, %v19211_v21  ;;  %v4942_v0 = vcombine.low %v26588_v29, %v26587_v42  ;;  %v5110_v48 = vpack.c.bf16 %v4918_v7, %v4918_v7  ;;  %v26589_v31 = vld [vmem:[#allocation53_spill] sm:$0xff] }
 0x618   : > { %v22410_v36 = vrot.slane %v4903_v23, %v19211_v21  ;;  %v22413_v63 = vrot.slane %v5583_v9, %v19211_v21  ;;  %v4958_v16 = vcombine.low %v26590_v45, %v26589_v31  ;;  %v8390_v57 = vcombine.low %v22184_v53, %v22268_v12 }
 0x619   : > { %10672 = vxpose.xlu1.c.b16.start.end [1/1] (short) (narrow) %v26586_v34, 16  ;;  %v8398_v34 = vcombine.low %v22220_v41, %v22310_v8  ;;  %v5112_v50 = vpack.c.bf16 %v4920_v49, %v4920_v49  ;;  %v4926_v7 = vcombine.low %v26592_v58, %v26591_v19  ;;  %v4927_v23 = vcombine.high %v26592_v58, %v26591_v19 }
 0x61a   : > { %v5111_v9 = vpack.c.bf16 %v22383_v35, %v22383_v35  ;;  %v5114_v61 = vpack.c.bf16 %v22385_v14, %v22385_v14  ;;  %v4943_v53 = vcombine.high %v26588_v29, %v26587_v42  ;;  %v4982_v12 = vrot.slane %v4974_v5, %v19193_v2 }
 0x61b   : > { %10720 = vxpose.xlu0.c.b16.start.end [1/1] (short) (narrow) %v5108_v62, 16  ;;  %v8458_v41 = vcombine.low %v22196_v32, %v22282_v46  ;;  %v8466_v8 = vcombine.low %v22233_v52, %v22318_v6  ;;  %v8334_v62 = vpop.trf.xlu0  ;;  %v22437_v49 = vrot.slane %v4942_v0, %v19193_v2  ;;  %v4959_v35 = vcombine.high %v26590_v45, %v26589_v31  ;;  %v8350_v6 = vpop.trf.xlu1 }
 0x61c   : > { %v4921_v14 = vcombine.high %v4869_v39, %v4901_v18  ;;  %v4924_v58 = vcombine.low %v22388_v38, %v22410_v36  ;;  %v4966_v5 = vrot.slane %v4958_v16, %v19193_v2  ;;  %v4975_v32 = vcombine.high %v26585_v51, %v26584_v3 }
 0x61d   : > { %10704 = vxpose.xlu1.c.b16.start.end [1/1] (short) (narrow) %v5107_v25, 16  ;;  %v8397_v46 = vrot.slane %v8390_v57, %v19193_v2  ;;  %v8405_v52 = vrot.slane %v8398_v34, %v19193_v2  ;;  %v4934_v25 = vrot.slane %v4926_v7, %v19193_v2  ;;  %v22450_v19 = vrot.slane %v4927_v23, %v19193_v2 }
 0x61e   : > { %v8406_v18 = vcombine.low %v22332_v37, %v8334_v62  ;;  %v4923_v39 = vcombine.high %v4878_v22, %v4910_v26  ;;  %v22454_v42 = vrot.slane %v4943_v53, %v19193_v2  ;;  %v5022_v29 = vcombine.low %v4966_v5, %v4982_v12 }
 0x61f   : > { %10752 = vxpose.xlu0.c.b16.start.end [1/1] (short) (narrow) %v5110_v48, 16  ;;  %v8465_v3 = vrot.slane %v8458_v41, %v19193_v2  ;;  %v8473_v51 = vrot.slane %v8466_v8, %v19193_v2  ;;  %v26593_v0 = vpack.c.bf16 %v22303_v10, %v22303_v10  ;;  %v8366_v48 = vpop.trf.xlu0  ;;  %v8474_v31 = vcombine.low %v22344_v27, %v8350_v6 }
 0x620   : > { %v8414_v45 = vcombine.low %v22370_v40, %v8366_v48  ;;  %v5113_v16 = vpack.c.bf16 %v4921_v14, %v4921_v14  ;;  %v5116_v37 = vpack.c.bf16 %v4924_v58, %v4924_v58  ;;  %v4990_v26 = vcombine.low %v4934_v25, %v22437_v49  ;;  %v8382_v7 = vpop.trf.xlu1 }
 0x621   : > { %10736 = vxpose.xlu1.c.b16.start.end [1/1] (short) (narrow) %v26593_v0, 16  ;;  %v22465_v22 = vrot.slane %v4959_v35, %v19193_v2  ;;  %v22468_v57 = vrot.slane %v4975_v32, %v19193_v2  ;;  %v8422_v34 = vcombine.low %v8397_v46, %v8405_v52  ;;  %v5023_v10 = vcombine.high %v4966_v5, %v4982_v12 }
 0x622   : > { %v8413_v23 = vrot.slane %v8406_v18, %v19193_v2  ;;  %v8421_v27 = vrot.slane %v8414_v45, %v19193_v2  ;;  %v8482_v40 = vcombine.low %v22395_v54, %v8382_v7  ;;  %v8490_v53 = vcombine.low %v8465_v3, %v8473_v51 }
 0x623   : > { %10784 = vxpose.xlu0.c.b16.start.end [1/1] (short) (narrow) %v5112_v50, 16  ;;  %v8491_v41 = vcombine.high %v8465_v3, %v8473_v51  ;;  %v8423_v8 = vcombine.high %v8397_v46, %v8405_v52  ;;  %v5030_v62 = vrot.slane %v5022_v29, %v19211_v21  ;;  %v8481_v35 = vrot.slane %v8474_v31, %v19193_v2 }
 0x624   : > { %v8438_v14 = vcombine.low %v8413_v23, %v8421_v27  ;;  %v8439_v58 = vcombine.high %v8413_v23, %v8421_v27  ;;  %v8489_v32 = vrot.slane %v8482_v40, %v19193_v2  ;;  %v4991_v50 = vcombine.high %v4934_v25, %v22437_v49 }
 0x625   : > { %10768 = vxpose.xlu1.c.b16.start.end [1/1] (short) (narrow) %v5111_v9, 16  ;;  %v5038_v12 = vcombine.low %v22465_v22, %v22468_v57  ;;  %v22480_v5 = vrot.slane %v8422_v34, %v19211_v21  ;;  %v4998_v54 = vrot.slane %v4990_v26, %v19211_v21  ;;  %v8498_v18 = vrot.slane %v8490_v53, %v19211_v21 }
 0x626   : > { %v8446_v9 = vrot.slane %v8438_v14, %v19211_v21  ;;  %v8453_v46 = vrot.slane %v8439_v58, %v19211_v21  ;;  %v8506_v52 = vcombine.low %v8481_v35, %v8489_v32  ;;  %v8507_v6 = vcombine.high %v8481_v35, %v8489_v32  ;;  %v26595_v32 = vld [vmem:[#allocation167_spill] sm:$0xff] }
 0x627   : > { %10816 = vxpose.xlu0.c.b16.start.end [1/1] (short) (narrow) %v5114_v61, 16  ;;  %v8437_v29 = vrot.slane %v8423_v8, %v19211_v21  ;;  %v5054_v49 = vcombine.low %v4998_v54, %v5030_v62  ;;  %v5037_v25 = vrot.slane %v5023_v10, %v19211_v21  ;;  %v8505_v3 = vrot.slane %v8491_v41, %v19211_v21 }
 0x628   : > { %v8514_v61 = vrot.slane %v8506_v52, %v19211_v21  ;;  %v8521_v51 = vrot.slane %v8507_v6, %v19211_v21  ;;  %v8454_v0 = vcombine.low %v22480_v5, %v8446_v9  ;;  %v5115_v48 = vpack.c.bf16 %v4923_v39, %v4923_v39 }
 0x629   : > { %10800 = vxpose.xlu1.c.b16.start.end [1/1] (short) (narrow) %v5113_v16, 16  ;;  %v4925_v31 = vcombine.high %v22388_v38, %v22410_v36  ;;  %v5005_v45 = vrot.slane %v4991_v50, %v19211_v21  ;;  %v26594_v16 = vcombine.low %v22363_v4, %v22366_v11  ;;  %v5006_v34 = vcombine.low %v22450_v19, %v22454_v42  ;;  %v26596_v50 = vld [vmem:[#allocation161_spill] sm:$0xff] }
 0x62a   : > { %v8522_v7 = vcombine.low %v8498_v18, %v8514_v61  ;;  %v22503_v10 = vcombine.low %v8437_v29, %v8453_v46  ;;  %v22505_v23 = vcombine.low %v8505_v3, %v8521_v51  ;;  %v5118_v39 = vpack.c.bf16 %v5054_v49, %v5054_v49 }
 0x62b   : > { %10848 = vxpose.xlu0.c.b16.start.end [1/1] (short) (narrow) %v5116_v37, 16  ;;  %v22499_v26 = vrot.slane %v26594_v16, %v19211_v21  ;;  %v22507_v37 = vcombine.high %v8505_v3, %v8521_v51  ;;  %v5056_v38 = vcombine.low %v5005_v45, %v5037_v25  ;;  %v5046_v36 = vrot.slane %v5038_v12, %v19211_v21 }
 0x62c   : > { %v8528_v27 = vpack.i.b16 %v8522_v7, %v8454_v0  ;;  %v8544_v40 = vpack.i.b16 %v22505_v23, %v22503_v10  ;;  %v8530_v53 = vshrl.u32 %v8454_v0, 16  ;;  %v8531_v41 = vshrl.u32 %v8522_v7, 16 }
 0x62d   : > { %10832 = vxpose.xlu1.c.b16.start.end [1/1] (short) (narrow) %v5115_v48, 16  ;;  %v5039_v8 = vcombine.high %v22465_v22, %v22468_v57  ;;  %v5117_v35 = vpack.c.bf16 %v4925_v31, %v4925_v31  ;;  %v22514_v14 = vcombine.high %v8437_v29, %v8453_v46  ;;  %v5055_v58 = vcombine.high %v4998_v54, %v5030_v62  ;;  %v26597_v62 = vld [vmem:[#allocation163_spill] sm:$0xff] }
 0x62e   : > { %v11008_v52 = vcombine.low %v26596_v50, %v26595_v32  ;;  %17321 = vmatprep.subr.bf16.mxu1 %v8528_v27  ;;  %17361 = vmatprep.subr.bf16.mxu0 %v8544_v40  ;;  %v8532_v12 = vpack.i.b16 %v8531_v41, %v8530_v53  ;;  %v5014_v6 = vrot.slane %v5006_v34, %v19211_v21  ;;  %v26602_v34 = vld [vmem:[#allocation84_spill] sm:$0xff] }
 0x62f   : > { %10880 = vxpose.xlu0.c.b16.start.end [1/1] (short) (narrow) %v5118_v39, 16  ;;  %v5007_v49 = vcombine.high %v22450_v19, %v22454_v42  ;;  %17322 = vmatpush3.bf16.msra.mxu1 %v8528_v27  ;;  %v22521_v3 = vpop.trf.xlu0  ;;  %v8552_v22 = vpack.i.b16 %v22507_v37, %v22514_v14  ;;  %v5120_v57 = vpack.c.bf16 %v5056_v38, %v5056_v38 }
 0x630   : > { %17362 = vmatpush3.bf16.msra.mxu0 %v8544_v40  ;;  %v11024_v54 = vcombine.low %v26597_v62, %v22521_v3  ;;  %17331 = vmatprep.subr.bf16.mxu1 %v8532_v12  ;;  %v22527_v46 = vcombine.high %v8498_v18, %v8514_v61  ;;  %v5058_v29 = vcombine.low %v5014_v6, %v5046_v36  ;;  %v22529_v51 = vpop.trf.xlu1 }
 0x631   : > { %10864 = vxpose.xlu1.c.b16.start.end [1/1] (short) (narrow) %v5117_v35, 16  ;;  %17381 = vmatprep.subr.bf16.mxu0 %v8552_v22  ;;  %26598 = vst [vmem:[#allocation170_spill] sm:$0xff] %v22529_v51  ;;  %v5119_v19 = vpack.c.bf16 %v5055_v58, %v5055_v58  ;;  %v5057_v42 = vcombine.high %v5005_v45, %v5037_v25  ;;  %v26601_v45 = vld [vmem:[#allocation159_spill] sm:$0xff] }
 0x632   : > { %v5053_v0 = vrot.slane %v5039_v8, %v19211_v21  ;;  %v22533_v48 = vrot.slane %v11008_v52, %v19193_v2  ;;  %v22536_v31 = vrot.slane %v11024_v54, %v19193_v2  ;;  %v26599_v16 = vpack.i.b16 %v21435_v20, %v21431_v28  ;;  %v26608_v54 = vld [vmem:[#allocation180_spill] sm:$0xff] }
 0x633   : > { %10912 = vxpose.xlu0.c.b16.start.end [1/1] (short) (narrow) %v5120_v57, 16  ;;  %v22543_v18 = vcombine.high %v22480_v5, %v8446_v9  ;;  %v26600_v25 = vcombine.high %v22363_v4, %v22366_v11  ;;  %v26603_v7 = vpack.i.b16 %v26601_v45, %v26602_v34  ;;  %v22555_v39 = vpop.trf.xlu0  ;;  %v5021_v38 = vrot.slane %v5007_v49, %v19211_v21  ;;  %v26617_v9 = vld [vmem:[#allocation232_spill] sm:$0xff] }
 0x634   : > { %17324 = vmatmul.mubr.msk.bf16.vlgmr.msra.gmra.mrb[16].mxu1 %vm8558_vm0, %v26599_v16  ;;  %v22560_v5 = vcombine.low %v22376_v30, %v22401_v55  ;;  %v26604_v4 = vcombine.high %v22324_v13, %v22328_v44  ;;  %v26605_v27 = vpack.i.b16 %v21947_v56, %v21941_v24  ;;  %v5122_v53 = vpack.c.bf16 %v5058_v29, %v5058_v29  ;;  %v26606_v13 = vld [vmem:[#allocation178_spill] sm:$0xff]  ;;  %v22586_v35 = vpop.trf.xlu1 }
 0x635   : > { %v22549_v61 = vrot.slane %v26600_v25, %v19211_v21  ;;  %17364 = vmatmul.mubr.msk.bf16.vlgmr.msra.gmra.mrb[16].mxu0 %vm8558_vm0, %v26603_v7  ;;  %10896 = vxpose.xlu1.c.b16.start.end [1/1] (short) (narrow) %v5119_v19, 16  ;;  %v8536_v40 = vpack.i.b16 %v22527_v46, %v22543_v18  ;;  %v22578_v41 = vcombine.low %v22391_v33, %v22499_v26 }
 0x636   : > { %v22566_v11 = vrot.slane %v26604_v4, %v19211_v21  ;;  %17327 = vmatprep.mubr.msk.bf16.mxu1 %vm8558_vm0, %v26605_v27  ;;  %v11144_v44 = vcombine.low %v26606_v13, %v22529_v51  ;;  %17332 = vmatpush3.bf16.msra.mxu1 %v8532_v12  ;;  %v26607_v8 = vpack.i.b16 %v21955_v60, %v21951_v1 }
 0x637   : > { %v5121_v58 = vpack.c.bf16 %v5057_v42, %v5057_v42  ;;  %v5060_v52 = vcombine.low %v5021_v38, %v5053_v0  ;;  %17382 = vmatpush3.bf16.msra.mxu0 %v8552_v22  ;;  %17341 = vmatprep.subr.bf16.mxu1 %v8536_v40  ;;  %v22590_v49 = vcombine.low %v22379_v59, %v22413_v63  ;;  %v22598_v19 = vpop.trf.xlu0 }
 0x638   : > { %17367 = vmatprep.mubr.msk.bf16.mxu0 %vm8558_vm0, %v26607_v8  ;;  %v22594_v57 = vcombine.low %v22566_v11, %v22549_v61  ;;  %v5059_v12 = vcombine.high %v5014_v6, %v5046_v36  ;;  %v11160_v29 = vcombine.low %v26608_v54, %v22586_v35  ;;  %10944 = vxpose.xlu0.c.b16.start.end [1/1] (short) (narrow) %v5122_v53, 16  ;;  %v5697_v8 = vshrl.u32 %v21431_v28, 16 }
 0x639   : > { %10928 = vxpose.xlu1.c.b16.start.end [1/1] (short) (narrow) %v5121_v58, 16  ;;  %v5744_v22 = vpack.i.b16 %v22578_v41, %v22560_v5  ;;  %v22603_v42 = vrot.slane %v11144_v44, %v19193_v2  ;;  %v22608_v25 = vpop.trf.xlu1  ;;  %v5124_v7 = vpack.c.bf16 %v5060_v52, %v5060_v52  ;;  %v5061_v4 = vcombine.high %v5021_v38, %v5053_v0  ;;  %v26609_v52 = vld [vmem:[#allocation73_spill] sm:$0xff]  ;;  %v26610_v0 = vld [vmem:[#allocation74_spill] sm:$0xff] }
 0x63a   : > { %v22606_v16 = vrot.slane %v11160_v29, %v19193_v2  ;;  %v5756_v36 = vpack.i.b16 %v22594_v57, %v22590_v49  ;;  %v5123_v6 = vpack.c.bf16 %v5059_v12, %v5059_v12  ;;  %v5698_v58 = vshrl.u32 %v21435_v20, 16  ;;  %v26611_v38 = vld [vmem:[#allocation58_spill] sm:$0xff]  ;;  %v26616_v20 = vld [vmem:[#allocation236_spill] sm:$0xff] }
 0x63b   : > { %v22615_v53 = vpop.trf.xlu0  ;;  %v26612_v12 = vpack.i.b16 %v26610_v0, %v26611_v38  ;;  %v5722_v28 = vshrl.u32 %v21947_v56, 16  ;;  %v5125_v27 = vpack.c.bf16 %v5061_v4, %v5061_v4  ;;  %v22638_v13 = vcombine.high %v26617_v9, %v26616_v20 }
 0x63c   : > { %17328 = vmatmul.mubr.msk.bf16.gmra.mrb[20].mxu1 %vm8558_vm0, %v5744_v22  ;;  %10976 = vxpose.xlu0.c.b16.start.end [1/1] (short) (narrow) %v5124_v7, 16  ;;  %v11040_v44 = vcombine.low %v22555_v39, %v22615_v53  ;;  %v26614_v22 = vld [vmem:[#allocation234_spill] sm:$0xff]  ;;  %v22646_v0 = vcombine.high %v21928_v43, %v21905_v17  ;;  %v5699_v9 = vpack.i.b16 %v5698_v58, %v5697_v8  ;;  %v5745_v8 = vshrl.u32 %v22560_v5, 16 }
 0x63d   : > { %17368 = vmatmul.mubr.msk.bf16.gmra.mrb[20].mxu0 %vm8558_vm0, %v5756_v36  ;;  %10960 = vxpose.xlu1.c.b16.start.end [1/1] (short) (narrow) %v5123_v6, 16  ;;  %v22628_v29 = vpop.trf.xlu1  ;;  %v26615_v7 = vld [vmem:[#allocation86_spill] sm:$0xff]  ;;  %v5721_v6 = vshrl.u32 %v21941_v24, 16  ;;  %v5746_v58 = vshrl.u32 %v22578_v41, 16  ;;  %v22685_v20 = vcombine.high %v22566_v11, %v22549_v61  ;;  %v26619_v5 = vcombine.high %v22533_v48, %v22536_v31 }
 0x63e   : > { %17333 = vmatprep.mubr.msk.bf16.mxu1 %vm8558_vm0, %v26609_v52  ;;  %17383 = vmatprep.mubr.msk.bf16.mxu0 %vm8558_vm0, %v26612_v12  ;;  %26613 = vst [vmem:[#allocation67_spill] sm:$0xff] %v22628_v29  ;;  %v22632_v36 = vcombine.high %v26615_v7, %v26614_v22  ;;  %v22642_v52 = vcombine.high %v21919_v15, %v21902_v47  ;;  %v8539_v12 = vshrl.u32 %v22527_v46, 16  ;;  %v8538_v47 = vshrl.u32 %v22543_v18, 16 }
 0x63f   : > { %v22648_v38 = vpop.trf.xlu0  ;;  %v11048_v24 = vrot.slane %v11040_v44, %v19193_v2  ;;  %v5723_v22 = vpack.i.b16 %v5722_v28, %v5721_v6  ;;  %v11087_v41 = vrot.slane %v26619_v5, %v19211_v21  ;;  %v26627_v5 = vld [vmem:[#allocation123_spill] sm:$0xff] }
 0x640   : > { %v11056_v56 = vcombine.low %v22598_v19, %v22648_v38  ;;  %v5714_v43 = vpack.i.b16 %v22638_v13, %v22632_v36  ;;  %v5738_v46 = vpack.i.b16 %v22646_v0, %v22642_v52  ;;  %v22668_v18 = vpack.i.b16 %v8539_v12, %v8538_v47 }
 0x641   : > { %10992 = vxpose.xlu1.c.b16.start.end [1/1] (short) (narrow) %v5125_v27, 16  ;;  %v11072_v27 = vcombine.low %v22533_v48, %v22536_v31  ;;  %v11208_v48 = vcombine.low %v22603_v42, %v22606_v16 }
 0x642   : > { %v22654_v4 = vpop.trf.xlu1  ;;  %v11064_v15 = vrot.slane %v11056_v56, %v19193_v2 }
 0x643   : > { %v11176_v17 = vcombine.low %v22608_v25, %v22654_v4  ;;  %v11080_v61 = vrot.slane %v11072_v27, %v19211_v21 }
 0x644   : > { %17334 = vmatmul.mubr.msk.bf16.vlgmr.msra.gmra.mrb[24].mxu1 %vm8558_vm0, %v5699_v9  ;;  %v22670_v44 = vpop.trf.xlu0  ;;  %v11104_v7 = vcombine.low %v11048_v24, %v11064_v15  ;;  %v11105_v6 = vcombine.high %v11048_v24, %v11064_v15  ;;  %v5747_v9 = vpack.i.b16 %v5746_v58, %v5745_v8  ;;  %v26625_v8 = vld [vmem:[#allocation227_spill] sm:$0xff] }
 0x645   : > { %17342 = vmatpush3.bf16.msra.mxu1 %v8536_v40  ;;  %17337 = vmatprep.mubr.msk.bf16.mxu1 %vm8558_vm0, %v5723_v22  ;;  %26618 = vst [vmem:[#allocation77_spill] sm:$0xff] %v22670_v44  ;;  %v22681_v40 = vcombine.high %v22379_v59, %v22413_v63  ;;  %v11184_v24 = vrot.slane %v11176_v17, %v19193_v2  ;;  %v26621_v59 = vld [vmem:[#allocation233_spill] sm:$0xff]  ;;  %v26622_v63 = vld [vmem:[#allocation87_spill] sm:$0xff] }
 0x646   : > { %17384 = vmatmul.mubr.msk.bf16.vlgmr.msra.gmra.mrb[24].mxu0 %vm8558_vm0, %v5714_v43  ;;  %17351 = vmatprep.subr.bf16.mxu1 %v22668_v18  ;;  %v11119_v12 = vrot.slane %v11105_v6, %v19211_v21  ;;  %v22699_v47 = vcombine.high %v26622_v63, %v26621_v59  ;;  %v11112_v11 = vrot.slane %v11104_v7, %v19211_v21  ;;  %v26626_v6 = vld [vmem:[#allocation50_spill] sm:$0xff]  ;;  %v26628_v7 = vld [vmem:[#allocation168_spill] sm:$0xff] }
 0x647   : > { %17387 = vmatprep.mubr.msk.bf16.mxu0 %vm8558_vm0, %v5738_v46  ;;  %v22677_v28 = vpop.trf.xlu1  ;;  %v26624_v46 = vld [vmem:[#allocation235_spill] sm:$0xff]  ;;  %v22718_v27 = vcombine.high %v26627_v5, %v26626_v6  ;;  %v26629_v59 = vld [vmem:[#allocation174_spill] sm:$0xff] }
 0x648   : > { %v11192_v56 = vcombine.low %v22628_v29, %v22677_v28  ;;  %v22695_v22 = vpop.trf.xlu0  ;;  %v22706_v15 = vcombine.low %v11087_v41, %v11119_v12  ;;  %v22708_v17 = vcombine.high %v11087_v41, %v11119_v12  ;;  %v22714_v58 = vcombine.high %v26625_v8, %v26624_v46  ;;  %v26630_v46 = vld [vmem:[#allocation78_spill] sm:$0xff]  ;;  %v26631_v8 = vld [vmem:[#allocation75_spill] sm:$0xff] }
 0x649   : > { %26620 = vst [vmem:[#allocation181_spill] sm:$0xff] %v22695_v22  ;;  %v22722_v63 = vcombine.high %v26629_v59, %v26628_v7  ;;  %v22724_v51 = vcombine.high %v11080_v61, %v11112_v11  ;;  %v5762_v41 = vpack.i.b16 %v22685_v20, %v22681_v40  ;;  %v8547_v12 = vshrl.u32 %v22505_v23, 16 }
 0x64a   : > { %v11200_v31 = vrot.slane %v11192_v56, %v19193_v2  ;;  %26623 = vst [vmem:[#allocation165_spill] sm:$0xff] %v22708_v17  ;;  %v26632_v32 = vpack.i.b16 %v26630_v46, %v26631_v8  ;;  %v11136_v5 = vcombine.low %v11080_v61, %v11112_v11  ;;  %v8546_v7 = vshrl.u32 %v22503_v10, 16 }
 0x64b   : > { %v22710_v43 = vpop.trf.xlu1  ;;  %v5702_v10 = vpack.i.b16 %v22714_v58, %v22699_v47  ;;  %v5726_v61 = vpack.i.b16 %v22722_v63, %v22718_v27  ;;  %v12108_v8 = vshrl.u32 %v22724_v51, 16 }
 0x64c   : > { %v11240_v56 = vcombine.low %v11184_v24, %v11200_v31  ;;  %v11241_v50 = vcombine.high %v11184_v24, %v11200_v31  ;;  %17338 = vmatmul.mubr.msk.bf16.gmra.mrb[28].mxu1 %vm8558_vm0, %v5747_v9  ;;  %v22734_v6 = vpop.trf.xlu0  ;;  %v11216_v9 = vrot.slane %v11208_v48, %v19211_v21  ;;  %v22753_v11 = vpack.i.b16 %v8547_v12, %v8546_v7 }
 0x64d   : > { %17343 = vmatprep.mubr.msk.bf16.mxu1 %vm8558_vm0, %v26632_v32  ;;  %26633 = vst [vmem:[#allocation164_spill] sm:$0xff] %v22734_v6  ;;  %v11280_v24 = vcombine.low %v22670_v44, %v22734_v6  ;;  %v26634_v32 = vcombine.high %v22603_v42, %v22606_v16  ;;  %v12100_v48 = vshrl.u32 %v11136_v5, 16 }
 0x64e   : > { %v11255_v59 = vrot.slane %v11241_v50, %v19211_v21  ;;  %17388 = vmatmul.mubr.msk.bf16.gmra.mrb[28].mxu0 %vm8558_vm0, %v5762_v41  ;;  %v11248_v23 = vrot.slane %v11240_v56, %v19211_v21 }
 0x64f   : > { %v11223_v31 = vrot.slane %v26634_v32, %v19211_v21  ;;  %v22747_v46 = vpop.trf.xlu1  ;;  %v22765_v32 = vrot.slane %v11280_v24, %v19193_v2 }
 0x650   : > { %26635 = vst [vmem:[#allocation162_spill] sm:$0xff] %v22747_v46  ;;  %v11272_v50 = vcombine.low %v11216_v9, %v11248_v23  ;;  %v22755_v41 = vcombine.high %v11216_v9, %v11248_v23  ;;  %v22757_v56 = vpop.trf.xlu0 }
 0x651   : > { %26636 = vst [vmem:[#allocation185_spill] sm:$0xff] %v22757_v56  ;;  %v22760_v42 = vcombine.low %v11223_v31, %v11255_v59  ;;  %v22762_v16 = vcombine.high %v11223_v31, %v11255_v59  ;;  %v11296_v12 = vcombine.low %v22695_v22, %v22757_v56  ;;  %v12116_v31 = vshrl.u32 %v22706_v15, 16 }
 0x652   : > { %v12098_v44 = vpack.i.b16 %v11272_v50, %v11136_v5  ;;  %v12101_v6 = vshrl.u32 %v11272_v50, 16  ;;  %v12109_v23 = vshrl.u32 %v22755_v41, 16 }
 0x653   : > { %26637 = vst [vmem:[#allocation173_spill] sm:$0xff] %v22762_v16  ;;  %v22769_v7 = vpop.trf.xlu1  ;;  %v12117_v29 = vshrl.u32 %v22760_v42, 16  ;;  %v12125_v50 = vshrl.u32 %v22762_v16, 16  ;;  %v11304_v9 = vrot.slane %v11296_v12, %v19193_v2  ;;  %v5728_v16 = vshrl.u32 %v22722_v63, 16 }
 0x654   : > { %v11416_v24 = vcombine.low %v22710_v43, %v22769_v7  ;;  %17344 = vmatmul.mubr.msk.bf16.vlgmr.msra.gmra.mrb[32].mxu1 %vm8558_vm0, %v5702_v10  ;;  %12352 = vxpose.xlu0.c.b16.start [1/4] (short) (narrow) %v12098_v44, 16  ;;  %v12102_v5 = vpack.i.b16 %v12101_v6, %v12100_v48  ;;  %v22785_v22 = vpop.trf.xlu0  ;;  %v22787_v59 = vpack.i.b16 %v12109_v23, %v12108_v8 }
 0x655   : > { %17352 = vmatpush3.bf16.msra.mxu1 %v22668_v18  ;;  %17347 = vmatprep.mubr.msk.bf16.mxu1 %vm8558_vm0, %v5726_v61  ;;  %26638 = vst [vmem:[#allocation169_spill] sm:$0xff] %v22785_v22  ;;  %v5599_v44 = vcombine.high %v22376_v30, %v22401_v55  ;;  %v5667_v6 = vcombine.high %v22391_v33, %v22499_v26  ;;  %v12124_v18 = vshrl.u32 %v22708_v17, 16  ;;  %v5727_v17 = vshrl.u32 %v22718_v27, 16 }
 0x656   : > { %17371 = vmatprep.subr.bf16.mxu1 %v22753_v11  ;;  %12368 = vxpose.xlu1.c.b16.start [1/4] (short) (narrow) %v12102_v5, 16  ;;  %v22794_v10 = vpack.i.b16 %v12117_v29, %v12116_v31  ;;  %v11345_v48 = vcombine.high %v22765_v32, %v11304_v9  ;;  %v22801_v8 = vrot.slane %v11416_v24, %v19193_v2  ;;  %v26641_v24 = vld [vmem:[#allocation81_spill] sm:$0xff] }
 0x657   : > { %v22797_v61 = vpop.trf.xlu1  ;;  %v22805_v23 = vpack.i.b16 %v12125_v50, %v12124_v18  ;;  %v5750_v26 = vpack.i.b16 %v5667_v6, %v5599_v44  ;;  %v5703_v50 = vshrl.u32 %v22699_v47, 16  ;;  %v5704_v18 = vshrl.u32 %v22714_v58, 16 }
 0x658   : > { %v11432_v12 = vcombine.low %v22747_v46, %v22797_v61  ;;  %v22809_v33 = vpop.trf.xlu0  ;;  %v8554_v58 = vshrl.u32 %v22514_v14, 16  ;;  %v5729_v46 = vpack.i.b16 %v5728_v16, %v5727_v17  ;;  %v5752_v16 = vshrl.u32 %v5667_v6, 16 }
 0x659   : > { %26639 = vst [vmem:[#allocation175_spill] sm:$0xff] %v22805_v23  ;;  %26640 = vst [vmem:[#allocation171_spill] sm:$0xff] %v22809_v33  ;;  %v5705_v23 = vpack.i.b16 %v5704_v18, %v5703_v50  ;;  %v5709_v6 = vshrl.u32 %v26602_v34, 16 }
 0x65a   : > { %v11440_v55 = vrot.slane %v11432_v12, %v19193_v2 }
 0x65b   : > { %v22812_v29 = vpop.trf.xlu1 }
 0x65c   : > { %v11481_v5 = vcombine.high %v22801_v8, %v11440_v55  ;;  %17348 = vmatmul.mubr.msk.bf16.gmra.mrb[36].mxu1 %vm8558_vm0, %v5750_v26  ;;  %v22818_v31 = vpop.trf.xlu0  ;;  %v8555_v26 = vshrl.u32 %v22507_v37, 16  ;;  %v11480_v18 = vcombine.low %v22801_v8, %v11440_v55 }
 0x65d   : > { %17353 = vmatprep.mubr.msk.bf16.mxu1 %vm8558_vm0, %v26641_v24  ;;  %26642 = vst [vmem:[#allocation207_spill] sm:$0xff] %v22818_v31  ;;  %v11312_v30 = vcombine.low %v22785_v22, %v22818_v31  ;;  %v11344_v24 = vcombine.low %v22765_v32, %v11304_v9  ;;  %v5751_v32 = vshrl.u32 %v5599_v44, 16 }
 0x65e   : > { %v22841_v37 = vpack.i.b16 %v8555_v26, %v8554_v58  ;;  %v11495_v55 = vrot.slane %v11481_v5, %v19211_v21 }
 0x65f   : > { %v22824_v12 = vpop.trf.xlu1  ;;  %v11320_v47 = vrot.slane %v11312_v30, %v19193_v2  ;;  %v11352_v30 = vrot.slane %v11344_v24, %v19211_v21 }
 0x661   : > { %v22829_v56 = vpop.trf.xlu0 }
 0x662   : > { %v11328_v22 = vcombine.low %v22809_v33, %v22829_v56 }
 0x663   : > { %v22836_v31 = vpop.trf.xlu1 }
 0x664   : > { %v11448_v27 = vcombine.low %v22812_v29, %v22836_v31  ;;  %17354 = vmatmul.mubr.msk.bf16.vlgmr.msra.gmra.mrb[40].mxu1 %vm8558_vm0, %v5705_v23  ;;  %v11336_v63 = vrot.slane %v11328_v22, %v19193_v2  ;;  %v11359_v23 = vrot.slane %v11345_v48, %v19211_v21  ;;  %v5753_v48 = vpack.i.b16 %v5752_v16, %v5751_v32 }
 0x665   : > { %17372 = vmatpush3.bf16.msra.mxu1 %v22753_v11  ;;  %17357 = vmatprep.mubr.msk.bf16.mxu1 %vm8558_vm0, %v5729_v46  ;;  %v22846_v14 = vpop.trf.xlu0 }
 0x666   : > { %26643 = vst [vmem:[#allocation193_spill] sm:$0xff] %v22846_v14  ;;  %17391 = vmatprep.subr.bf16.mxu1 %v22841_v37  ;;  %v11376_v9 = vcombine.low %v11320_v47, %v11336_v63  ;;  %v11377_v17 = vcombine.high %v11320_v47, %v11336_v63  ;;  %v11456_v22 = vrot.slane %v11448_v27, %v19193_v2  ;;  %v5710_v47 = vshrl.u32 %v26601_v45, 16  ;;  %v26647_v45 = vld [vmem:[#allocation82_spill] sm:$0xff] }
 0x667   : > { %v22851_v50 = vpop.trf.xlu1  ;;  %v5733_v63 = vshrl.u32 %v21951_v1, 16  ;;  %v11488_v1 = vrot.slane %v11480_v18, %v19211_v21 }
 0x668   : > { %v11464_v11 = vcombine.low %v22824_v12, %v22851_v50  ;;  %v11391_v46 = vrot.slane %v11377_v17, %v19211_v21  ;;  %v11384_v44 = vrot.slane %v11376_v9, %v19211_v21  ;;  %v5734_v17 = vshrl.u32 %v21955_v60, 16 }
 0x669   : > { %v22859_v26 = vpop.trf.xlu0 }
 0x66a   : > { %26644 = vst [vmem:[#allocation183_spill] sm:$0xff] %v22859_v26  ;;  %v11472_v24 = vrot.slane %v11464_v11, %v19193_v2  ;;  %v22864_v58 = vcombine.high %v11352_v30, %v11384_v44  ;;  %v22870_v9 = vcombine.low %v11359_v23, %v11391_v46  ;;  %v22872_v8 = vcombine.high %v11359_v23, %v11391_v46 }
 0x66b   : > { %v22866_v27 = vpop.trf.xlu1  ;;  %v11408_v32 = vcombine.low %v11352_v30, %v11384_v44  ;;  %v5711_v23 = vpack.i.b16 %v5710_v47, %v5709_v6  ;;  %v5735_v46 = vpack.i.b16 %v5734_v17, %v5733_v63 }
 0x66c   : > { %26645 = vst [vmem:[#allocation177_spill] sm:$0xff] %v22870_v9  ;;  %26646 = vst [vmem:[#allocation186_spill] sm:$0xff] %v22872_v8  ;;  %v11512_v34 = vcombine.low %v11456_v22, %v11472_v24  ;;  %v11513_v33 = vcombine.high %v11456_v22, %v11472_v24  ;;  %17358 = vmatmul.mubr.msk.bf16.gmra.mrb[44].mxu1 %vm8558_vm0, %v5753_v48  ;;  %v12180_v6 = vshrl.u32 %v22870_v9, 16 }
 0x66d   : > { %17373 = vmatprep.mubr.msk.bf16.mxu1 %vm8558_vm0, %v26647_v45  ;;  %v22878_v16 = vpop.trf.xlu0  ;;  %v12164_v24 = vshrl.u32 %v11408_v32, 16 }
 0x66e   : > { %26648 = vst [vmem:[#allocation179_spill] sm:$0xff] %v22878_v16  ;;  %v11527_v60 = vrot.slane %v11513_v33, %v19211_v21  ;;  %v11520_v5 = vrot.slane %v11512_v34, %v19211_v21  ;;  %v11552_v22 = vcombine.low %v22846_v14, %v22878_v16  ;;  %v12172_v33 = vshrl.u32 %v22864_v58, 16 }
 0x66f   : > { %v22882_v11 = vpop.trf.xlu1 }
 0x670   : > { %26649 = vst [vmem:[#allocation192_spill] sm:$0xff] %v22882_v11  ;;  %v22887_v30 = vcombine.low %v11495_v55, %v11527_v60  ;;  %v22889_v44 = vcombine.high %v11495_v55, %v11527_v60  ;;  %v11544_v45 = vcombine.low %v11488_v1, %v11520_v5  ;;  %v22893_v18 = vcombine.high %v11488_v1, %v11520_v5 }
 0x671   : > { %v22891_v48 = vpop.trf.xlu0  ;;  %v12188_v55 = vshrl.u32 %v22872_v8, 16  ;;  %v11560_v16 = vrot.slane %v11552_v22, %v19193_v2 }
 0x672   : > { %26650 = vst [vmem:[#allocation188_spill] sm:$0xff] %v22889_v44  ;;  %26651 = vst [vmem:[#allocation213_spill] sm:$0xff] %v22891_v48  ;;  %v11568_v47 = vcombine.low %v22859_v26, %v22891_v48  ;;  %v12181_v63 = vshrl.u32 %v22887_v30, 16  ;;  %v12162_v60 = vpack.i.b16 %v11544_v45, %v11408_v32  ;;  %v12165_v14 = vshrl.u32 %v11544_v45, 16 }
 0x673   : > { %v22903_v34 = vpop.trf.xlu1  ;;  %v12173_v5 = vshrl.u32 %v22893_v18, 16  ;;  %v12189_v1 = vshrl.u32 %v22889_v44, 16 }
 0x674   : > { %17374 = vmatmul.mubr.msk.bf16.vlgmr.msra.gmra.mrb[48].mxu1 %vm8558_vm0, %v5711_v23  ;;  %v11576_v26 = vrot.slane %v11568_v47, %v19193_v2  ;;  %v12166_v48 = vpack.i.b16 %v12165_v14, %v12164_v24  ;;  %v22917_v45 = vpack.i.b16 %v12181_v63, %v12180_v6  ;;  %v11688_v22 = vcombine.low %v22866_v27, %v22903_v34 }
 0x675   : > { %17392 = vmatpush3.bf16.msra.mxu1 %v22841_v37  ;;  %17377 = vmatprep.mubr.msk.bf16.mxu1 %vm8558_vm0, %v5735_v46  ;;  %v22913_v17 = vpop.trf.xlu0  ;;  %v22915_v32 = vpack.i.b16 %v12173_v5, %v12172_v33  ;;  %v5757_v23 = vshrl.u32 %v22590_v49, 16  ;;  %v5758_v47 = vshrl.u32 %v22594_v57, 16  ;;  %v22926_v46 = vpack.i.b16 %v12189_v1, %v12188_v55 }
 0x676   : > { %26652 = vst [vmem:[#allocation202_spill] sm:$0xff] %v22913_v17  ;;  %v11617_v9 = vcombine.high %v11560_v16, %v11576_v26  ;;  %12353 = vxpose.xlu0.c.b16.cont [2/4] (short) (narrow) %v12162_v60, 16  ;;  %12369 = vxpose.xlu1.c.b16.cont [2/4] (short) (narrow) %v12166_v48, 16  ;;  %v11696_v6 = vrot.slane %v11688_v22, %v19193_v2  ;;  %v26657_v48 = vld [vmem:[#allocation83_spill] sm:$0xff]  ;;  %v5715_v5 = vshrl.u32 %v22632_v36, 16  ;;  %v5716_v22 = vshrl.u32 %v22638_v13, 16 }
 0x677   : > { %v22924_v37 = vpop.trf.xlu1  ;;  %26654 = vst [vmem:[#allocation190_spill] sm:$0xff] %v22926_v46  ;;  %v5759_v63 = vpack.i.b16 %v5758_v47, %v5757_v23  ;;  %v5739_v23 = vshrl.u32 %v22642_v52, 16  ;;  %v5740_v47 = vshrl.u32 %v22646_v0, 16  ;;  %v5763_v0 = vshrl.u32 %v22681_v40, 16 }
 0x678   : > { %26653 = vst [vmem:[#allocation198_spill] sm:$0xff] %v22924_v37  ;;  %v11704_v24 = vcombine.low %v22882_v11, %v22924_v37 }
 0x679   : > { %v22932_v33 = vpop.trf.xlu0  ;;  %v5741_v46 = vpack.i.b16 %v5740_v47, %v5739_v23  ;;  %v11631_v23 = vrot.slane %v11617_v9, %v19211_v21 }
 0x67a   : > { %26655 = vst [vmem:[#allocation184_spill] sm:$0xff] %v22932_v33  ;;  %v11712_v49 = vrot.slane %v11704_v24, %v19193_v2 }
 0x67b   : > { %v22936_v57 = vpop.trf.xlu1 }
 0x67c   : > { %26656 = vst [vmem:[#allocation200_spill] sm:$0xff] %v22936_v57  ;;  %v11753_v60 = vcombine.high %v11696_v6, %v11712_v49  ;;  %17378 = vmatmul.mubr.msk.bf16.gmra.mrb[52].mxu1 %vm8558_vm0, %v5759_v63 }
 0x67d   : > { %17393 = vmatprep.mubr.msk.bf16.mxu1 %vm8558_vm0, %v26657_v48  ;;  %v22941_v55 = vpop.trf.xlu0  ;;  %v5717_v48 = vpack.i.b16 %v5716_v22, %v5715_v5 }
 0x67e   : > { %26658 = vst [vmem:[#allocation196_spill] sm:$0xff] %v22941_v55  ;;  %v11584_v1 = vcombine.low %v22913_v17, %v22941_v55 }
 0x67f   : > { %v22947_v14 = vpop.trf.xlu1 }
 0x680   : > { %26659 = vst [vmem:[#allocation195_spill] sm:$0xff] %v22947_v14  ;;  %v11592_v63 = vrot.slane %v11584_v1, %v19193_v2  ;;  %v11616_v1 = vcombine.low %v11560_v16, %v11576_v26 }
 0x681   : > { %v22951_v24 = vpop.trf.xlu0 }
 0x682   : > { %26660 = vst [vmem:[#allocation189_spill] sm:$0xff] %v22951_v24  ;;  %v11600_v8 = vcombine.low %v22932_v33, %v22951_v24  ;;  %v5764_v33 = vshrl.u32 %v22685_v20, 16  ;;  %v11624_v16 = vrot.slane %v11616_v1, %v19211_v21 }
 0x683   : > { %v22956_v44 = vpop.trf.xlu1 }
 0x684   : > { %26661 = vst [vmem:[#allocation197_spill] sm:$0xff] %v22956_v44  ;;  %v11720_v13 = vcombine.low %v22936_v57, %v22956_v44  ;;  %17394 = vmatmul.mubr.msk.bf16.vlgmr.msra.gmra.mrb[56].mxu1 %vm8558_vm0, %v5717_v48  ;;  %v11608_v36 = vrot.slane %v11600_v8, %v19193_v2  ;;  %v11752_v48 = vcombine.low %v11696_v6, %v11712_v49 }
 0x685   : > { %17397 = vmatprep.mubr.msk.bf16.mxu1 %vm8558_vm0, %v5741_v46  ;;  %v22963_v52 = vpop.trf.xlu0  ;;  %v5765_v26 = vpack.i.b16 %v5764_v33, %v5763_v0 }
 0x686   : > { %26662 = vst [vmem:[#allocation191_spill] sm:$0xff] %v22963_v52  ;;  %v11648_v5 = vcombine.low %v11592_v63, %v11608_v36  ;;  %v11649_v22 = vcombine.high %v11592_v63, %v11608_v36  ;;  %v11728_v24 = vrot.slane %v11720_v13, %v19193_v2  ;;  %v11767_v36 = vrot.slane %v11753_v60, %v19211_v21 }
 0x687   : > { %v22968_v47 = vpop.trf.xlu1  ;;  %v11760_v33 = vrot.slane %v11752_v48, %v19211_v21 }
 0x688   : > { %26663 = vst [vmem:[#allocation203_spill] sm:$0xff] %v22968_v47  ;;  %v11736_v8 = vcombine.low %v22947_v14, %v22968_v47  ;;  %v11663_v46 = vrot.slane %v11649_v22, %v19211_v21  ;;  %v11656_v20 = vrot.slane %v11648_v5, %v19211_v21 }
 0x689   : > { %v22974_v17 = vpop.trf.xlu0 }
 0x68a   : > { %26664 = vst [vmem:[#allocation199_spill] sm:$0xff] %v22974_v17  ;;  %v11744_v40 = vrot.slane %v11736_v8, %v19193_v2  ;;  %v22981_v63 = vcombine.low %v11631_v23, %v11663_v46  ;;  %v22983_v13 = vcombine.high %v11631_v23, %v11663_v46  ;;  %v22987_v6 = vcombine.high %v11624_v16, %v11656_v20 }
 0x68b   : > { %v22979_v9 = vpop.trf.xlu1  ;;  %v11680_v5 = vcombine.low %v11624_v16, %v11656_v20 }
 0x68c   : > { %26665 = vst [vmem:[#allocation205_spill] sm:$0xff] %v22979_v9  ;;  %26666 = vst [vmem:[#allocation201_spill] sm:$0xff] %v22983_v13  ;;  %v11784_v14 = vcombine.low %v11728_v24, %v11744_v40  ;;  %v11785_v22 = vcombine.high %v11728_v24, %v11744_v40  ;;  %17398 = vmatmul.mubr.msk.bf16.gmra.mrb[60].mxu1 %vm8558_vm0, %v5765_v26  ;;  %v12236_v24 = vshrl.u32 %v22987_v6, 16  ;;  %v12244_v47 = vshrl.u32 %v22981_v63, 16 }
 0x68d   : > { %v22989_v49 = vpop.trf.xlu0 }
 0x68e   : > { %26667 = vst [vmem:[#allocation224_spill] sm:$0xff] %v22989_v49  ;;  %v11799_v0 = vrot.slane %v11785_v22, %v19211_v21  ;;  %v11792_v23 = vrot.slane %v11784_v14, %v19211_v21  ;;  %v11824_v60 = vcombine.low %v22963_v52, %v22989_v49  ;;  %v12228_v22 = vshrl.u32 %v11680_v5, 16 }
 0x68f   : > { %v22993_v1 = vpop.trf.xlu1 }
 0x690   : > { %26668 = vst [vmem:[#allocation217_spill] sm:$0xff] %v22993_v1  ;;  %v22999_v8 = vcombine.low %v11767_v36, %v11799_v0  ;;  %v23001_v46 = vcombine.high %v11767_v36, %v11799_v0  ;;  %v11816_v26 = vcombine.low %v11760_v33, %v11792_v23  ;;  %v23005_v48 = vcombine.high %v11760_v33, %v11792_v23 }
 0x691   : > { %v23003_v40 = vpop.trf.xlu0  ;;  %v12252_v33 = vshrl.u32 %v22983_v13, 16  ;;  %v11832_v23 = vrot.slane %v11824_v60, %v19193_v2 }
 0x692   : > { %26669 = vst [vmem:[#allocation212_spill] sm:$0xff] %v23001_v46  ;;  %26670 = vst [vmem:[#allocation206_spill] sm:$0xff] %v23003_v40  ;;  %v11840_v14 = vcombine.low %v22974_v17, %v23003_v40  ;;  %v12245_v16 = vshrl.u32 %v22999_v8, 16  ;;  %v12226_v36 = vpack.i.b16 %v11816_v26, %v11680_v5  ;;  %v12237_v0 = vshrl.u32 %v23005_v48, 16 }
 0x693   : > { %v23013_v52 = vpop.trf.xlu1  ;;  %v12229_v49 = vshrl.u32 %v11816_v26, 16  ;;  %v12253_v20 = vshrl.u32 %v23001_v46, 16 }
 0x694   : > { %26671 = vst [vmem:[#allocation182_spill] sm:$0xff] %v23013_v52  ;;  %v11848_v55 = vrot.slane %v11840_v14, %v19193_v2  ;;  %12354 = vxpose.xlu0.c.b16.cont [3/4] (short) (narrow) %v12226_v36, 16  ;;  %v23021_v40 = vpack.i.b16 %v12237_v0, %v12236_v24  ;;  %v23023_v44 = vpack.i.b16 %v12245_v16, %v12244_v47 }
 0x695   : > { %v23019_v57 = vpop.trf.xlu0  ;;  %v12230_v17 = vpack.i.b16 %v12229_v49, %v12228_v22  ;;  %v11960_v5 = vcombine.low %v22979_v9, %v23013_v52  ;;  %v23030_v60 = vpack.i.b16 %v12253_v20, %v12252_v33 }
 0x696   : > { %26672 = vst [vmem:[#allocation166_spill] sm:$0xff] %v23019_v57  ;;  %v11889_v26 = vcombine.high %v11832_v23, %v11848_v55  ;;  %v11888_v46 = vcombine.low %v11832_v23, %v11848_v55 }
 0x697   : > { %v23028_v11 = vpop.trf.xlu1  ;;  %12370 = vxpose.xlu1.c.b16.cont [3/4] (short) (narrow) %v12230_v17, 16  ;;  %26674 = vst [vmem:[#allocation215_spill] sm:$0xff] %v23030_v60  ;;  %v11968_v47 = vrot.slane %v11960_v5, %v19193_v2 }
 0x698   : > { %26673 = vst [vmem:[#allocation220_spill] sm:$0xff] %v23028_v11  ;;  %v11976_v49 = vcombine.low %v22993_v1, %v23028_v11  ;;  %v11903_v1 = vrot.slane %v11889_v26, %v19211_v21 }
 0x699   : > { %v23036_v24 = vpop.trf.xlu0 }
 0x69a   : > { %26675 = vst [vmem:[#allocation187_spill] sm:$0xff] %v23036_v24  ;;  %v11984_v22 = vrot.slane %v11976_v49, %v19193_v2 }
 0x69b   : > { %v23040_v16 = vpop.trf.xlu1 }
 0x69c   : > { %26676 = vst [vmem:[#allocation210_spill] sm:$0xff] %v23040_v16  ;;  %v12025_v36 = vcombine.high %v11968_v47, %v11984_v22  ;;  %v12024_v9 = vcombine.low %v11968_v47, %v11984_v22 }
 0x69e   : > { %v23044_v17 = vpop.trf.xlu0  ;;  %v12032_v22 = vrot.slane %v12024_v9, %v19211_v21 }
 0x69f   : > { %v23042_v0 = vpop.trf.xlu1  ;;  %26678 = vst [vmem:[#allocation64_spill] sm:$0xff] %v23044_v17  ;;  %v11856_v20 = vcombine.low %v23019_v57, %v23044_v17 }
 0x6a0   : > { %26677 = vst [vmem:[#allocation204_spill] sm:$0xff] %v23042_v0 }
 0x6a1   : > { %v11864_v13 = vrot.slane %v11856_v20, %v19193_v2 }
 0x6a2   : > { %v23048_v33 = vpop.trf.xlu0 }
 0x6a3   : > { %26679 = vst [vmem:[#allocation80_spill] sm:$0xff] %v23048_v33  ;;  %v23050_v14 = vpop.trf.xlu1  ;;  %v11872_v5 = vcombine.low %v23036_v24, %v23048_v33  ;;  %v11896_v33 = vrot.slane %v11888_v46, %v19211_v21 }
 0x6a4   : > { %26680 = vst [vmem:[#allocation208_spill] sm:$0xff] %v23050_v14  ;;  %v11992_v49 = vcombine.low %v23040_v16, %v23050_v14 }
 0x6a5   : > { %v11880_v60 = vrot.slane %v11872_v5, %v19193_v2 }
 0x6a6   : > { %v12000_v52 = vrot.slane %v11992_v49, %v19193_v2 }
 0x6a7   : > { %v23059_v11 = vpop.trf.xlu1  ;;  %v11920_v57 = vcombine.low %v11864_v13, %v11880_v60  ;;  %v11921_v17 = vcombine.high %v11864_v13, %v11880_v60  ;;  %v12039_v13 = vrot.slane %v12025_v36, %v19211_v21 }
 0x6a8   : > { %26681 = vst [vmem:[#allocation194_spill] sm:$0xff] %v23059_v11  ;;  %v12008_v20 = vcombine.low %v23042_v0, %v23059_v11 }
 0x6a9   : > { %v11935_v24 = vrot.slane %v11921_v17, %v19211_v21  ;;  %v11928_v55 = vrot.slane %v11920_v57, %v19211_v21 }
 0x6aa   : > { %v12016_v23 = vrot.slane %v12008_v20, %v19193_v2 }
 0x6ab   : > { %v11953_v5 = vcombine.high %v11896_v33, %v11928_v55  ;;  %v23068_v26 = vcombine.low %v11903_v1, %v11935_v24  ;;  %v23070_v16 = vcombine.high %v11903_v1, %v11935_v24  ;;  %v11952_v49 = vcombine.low %v11896_v33, %v11928_v55 }
 0x6ac   : > { %v12056_v60 = vcombine.low %v12000_v52, %v12016_v23  ;;  %v12057_v47 = vcombine.high %v12000_v52, %v12016_v23 }
 0x6ad   : > { %v12300_v0 = vshrl.u32 %v11953_v5, 16  ;;  %v12292_v57 = vshrl.u32 %v11952_v49, 16  ;;  %v12308_v1 = vshrl.u32 %v23068_v26, 16  ;;  %v12316_v24 = vshrl.u32 %v23070_v16, 16 }
 0x6ae   : > { %v12071_v17 = vrot.slane %v12057_v47, %v19211_v21  ;;  %v12064_v46 = vrot.slane %v12056_v60, %v19211_v21 }
 0x6b0   : > { %v12088_v11 = vcombine.low %v12032_v22, %v12064_v46  ;;  %v12089_v20 = vcombine.high %v12032_v22, %v12064_v46  ;;  %v23076_v14 = vcombine.low %v12039_v13, %v12071_v17  ;;  %v23078_v37 = vcombine.high %v12039_v13, %v12071_v17 }
 0x6b1   : > { %v12234_v46 = vpack.i.b16 %v23005_v48, %v22987_v6 }
 0x6b2   : > { %v12290_v52 = vpack.i.b16 %v12088_v11, %v11952_v49  ;;  %v12301_v36 = vshrl.u32 %v12089_v20, 16  ;;  %v12293_v9 = vshrl.u32 %v12088_v11, 16  ;;  %v12309_v33 = vshrl.u32 %v23076_v14, 16 }
 0x6b3   : > { %v12317_v23 = vshrl.u32 %v23078_v37, 16  ;;  %v26682_v11 = vpack.i.b16 %v22755_v41, %v22724_v51  ;;  %v26683_v49 = vpack.i.b16 %v22893_v18, %v22864_v58 }
 0x6b4   : > { %12355 = vxpose.xlu0.c.b16.end [4/4] (short) (narrow) %v12290_v52, 16  ;;  %v12294_v13 = vpack.i.b16 %v12293_v9, %v12292_v57  ;;  %v23088_v47 = vpack.i.b16 %v12301_v36, %v12300_v0  ;;  %v23090_v22 = vpack.i.b16 %v12309_v33, %v12308_v1  ;;  %v12298_v57 = vpack.i.b16 %v12089_v20, %v11953_v5 }
 0x6b5   : > { %v23092_v17 = vpack.i.b16 %v12317_v23, %v12316_v24 }
 0x6b6   : > { %12371 = vxpose.xlu1.c.b16.end [4/4] (short) (narrow) %v12294_v13, 16 }
 0x6b8   : > { %12384 = vxpose.xlu0.c.b16.start [1/4] (short) (narrow) %v26682_v11, 16 }
 0x6bc   : > { %12385 = vxpose.xlu0.c.b16.cont [2/4] (short) (narrow) %v26683_v49, 16 }
 0x6c0   : > { %12386 = vxpose.xlu0.c.b16.cont [3/4] (short) (narrow) %v12234_v46, 16 }
 0x6c4   : > { %12387 = vxpose.xlu0.c.b16.end [4/4] (short) (narrow) %v12298_v57, 16 }
 0x707   : > { %v23102_v0 = vpop.f32.mrb[16].mxu1 }
 0x708   : > { %26684 = vst [vmem:[#allocation63_spill] sm:$0xff] %v23102_v0  ;;  %v23104_v1 = vpop.f32.mrb[16].mxu0  ;;  %v23106_v24 = vpop.f32.mrb[17].mxu1  ;;  %v9182_v51 = vsel %vm9175_vm1, %v23102_v0, -inf }
 0x709   : > { %26685 = vst [vmem:[#allocation226_spill] sm:$0xff] %v23104_v1  ;;  %26686 = vst [vmem:[#allocation65_spill] sm:$0xff] %v23106_v24  ;;  %v23110_v41 = vpop.f32.mrb[17].mxu0  ;;  %v23112_v58 = vpop.f32.mrb[18].mxu1  ;;  %9183 = vmax.xlane.f32.xlu0 %v9182_v51  ;;  %v9176_v20 = vsel %vm9175_vm1, %v23106_v24, -inf }
 0x70a   : > { %26687 = vst [vmem:[#allocation55_spill] sm:$0xff] %v23110_v41  ;;  %26688 = vst [vmem:[#allocation39_spill] sm:$0xff] %v23112_v58  ;;  %v23114_v18 = vpop.f32.mrb[18].mxu0  ;;  %v23116_v6 = vpop.f32.mrb[19].mxu1  ;;  %v9185_v48 = vsel %vm9175_vm1, %v23112_v58, -inf }
 0x70b   : > { %26689 = vst [vmem:[#allocation62_spill] sm:$0xff] %v23114_v18  ;;  %26690 = vst [vmem:[#allocation66_spill] sm:$0xff] %v23116_v6  ;;  %v23120_v5 = vpop.f32.mrb[19].mxu0  ;;  %9186 = vmax.xlane.f32.xlu1 %v9185_v48  ;;  %v9179_v52 = vsel %vm9175_vm1, %v23116_v6, -inf }
 0x70c   : > { %26691 = vst [vmem:[#allocation61_spill] sm:$0xff] %v23120_v5 }
 0x70d   : > { %9177 = vmax.xlane.f32.xlu0 %v9176_v20 }
 0x70f   : > { %v23126_v36 = vpop.f32.mrb[20].mxu1  ;;  %9180 = vmax.xlane.f32.xlu1 %v9179_v52 }
 0x710   : > { %26692 = vst [vmem:[#allocation214_spill] sm:$0xff] %v23126_v36  ;;  %v23128_v9 = vpop.f32.mrb[21].mxu1  ;;  %v9194_v33 = vsel %vm9175_vm1, %v23126_v36, -inf  ;;  %v23132_v23 = vpop.f32.mrb[20].mxu0 }
 0x711   : > { %26693 = vst [vmem:[#allocation216_spill] sm:$0xff] %v23128_v9  ;;  %26694 = vst [vmem:[#allocation209_spill] sm:$0xff] %v23132_v23  ;;  %v23134_v13 = vpop.f32.mrb[22].mxu1  ;;  %9195 = vmax.xlane.f32.xlu0 %v9194_v33  ;;  %v23136_v11 = vpop.f32.mrb[21].mxu0  ;;  %v9188_v48 = vsel %vm9175_vm1, %v23128_v9, -inf }
 0x712   : > { %26695 = vst [vmem:[#allocation219_spill] sm:$0xff] %v23134_v13  ;;  %26696 = vst [vmem:[#allocation211_spill] sm:$0xff] %v23136_v11  ;;  %v23138_v49 = vpop.f32.mrb[23].mxu1  ;;  %v9197_v46 = vsel %vm9175_vm1, %v23134_v13, -inf  ;;  %v23142_v57 = vpop.f32.mrb[22].mxu0 }
 0x713   : > { %26697 = vst [vmem:[#allocation59_spill] sm:$0xff] %v23138_v49  ;;  %26698 = vst [vmem:[#allocation60_spill] sm:$0xff] %v23142_v57  ;;  %9198 = vmax.xlane.f32.xlu1 %v9197_v46  ;;  %v23144_v51 = vpop.f32.mrb[23].mxu0  ;;  %v9191_v20 = vsel %vm9175_vm1, %v23138_v49, -inf }
 0x714   : > { %26699 = vst [vmem:[#allocation95_spill] sm:$0xff] %v23144_v51 }
 0x715   : > { %9189 = vmax.xlane.f32.xlu0 %v9188_v48 }
 0x717   : > { %v23150_v52 = vpop.f32.mrb[24].mxu1  ;;  %9192 = vmax.xlane.f32.xlu1 %v9191_v20 }
 0x718   : > { %26700 = vst [vmem:[#allocation93_spill] sm:$0xff] %v23150_v52  ;;  %v23152_v33 = vpop.f32.mrb[25].mxu1  ;;  %v9206_v60 = vsel %vm9175_vm1, %v23150_v52, -inf }
 0x719   : > { %26701 = vst [vmem:[#allocation97_spill] sm:$0xff] %v23152_v33  ;;  %v23156_v55 = vpop.f32.mrb[24].mxu0  ;;  %v23158_v46 = vpop.f32.mrb[26].mxu1  ;;  %9207 = vmax.xlane.f32.xlu0 %v9206_v60  ;;  %v9200_v49 = vsel %vm9175_vm1, %v23152_v33, -inf }
 0x71a   : > { %26702 = vst [vmem:[#allocation94_spill] sm:$0xff] %v23156_v55  ;;  %26703 = vst [vmem:[#allocation100_spill] sm:$0xff] %v23158_v46  ;;  %v23160_v36 = vpop.f32.mrb[25].mxu0  ;;  %v23162_v13 = vpop.f32.mrb[27].mxu1  ;;  %v9209_v48 = vsel %vm9175_vm1, %v23158_v46, -inf }
 0x71b   : > { %26704 = vst [vmem:[#allocation96_spill] sm:$0xff] %v23160_v36  ;;  %26705 = vst [vmem:[#allocation98_spill] sm:$0xff] %v23162_v13  ;;  %v23166_v9 = vpop.f32.mrb[26].mxu0  ;;  %9210 = vmax.xlane.f32.xlu1 %v9209_v48  ;;  %v9203_v60 = vsel %vm9175_vm1, %v23162_v13, -inf }
 0x71c   : > { %26706 = vst [vmem:[#allocation42_spill] sm:$0xff] %v23166_v9  ;;  %v23168_v20 = vpop.f32.mrb[27].mxu0 }
 0x71d   : > { %26707 = vst [vmem:[#allocation101_spill] sm:$0xff] %v23168_v20  ;;  %9201 = vmax.xlane.f32.xlu0 %v9200_v49 }
 0x71f   : > { %v23172_v55 = vpop.f32.mrb[28].mxu1 }
 0x720   : > { %26708 = vst [vmem:[#allocation43_spill] sm:$0xff] %v23172_v55  ;;  %v23174_v52 = vpop.f32.mrb[29].mxu1  ;;  %v9218_v46 = vsel %vm9175_vm1, %v23172_v55, -inf }
 0x721   : > { %26709 = vst [vmem:[#allocation103_spill] sm:$0xff] %v23174_v52  ;;  %v23178_v36 = vpop.f32.mrb[28].mxu0  ;;  %v23180_v23 = vpop.f32.mrb[30].mxu1  ;;  %9204 = vmax.xlane.f32.xlu0 %v9203_v60 }
 0x722   : > { %26710 = vst [vmem:[#allocation99_spill] sm:$0xff] %v23178_v36  ;;  %26711 = vst [vmem:[#allocation225_spill] sm:$0xff] %v23180_v23  ;;  %v23182_v9 = vpop.f32.mrb[29].mxu0  ;;  %v23184_v48 = vpop.f32.mrb[31].mxu1  ;;  %v9221_v20 = vsel %vm9175_vm1, %v23180_v23, -inf  ;;  %v9212_v23 = vsel %vm9175_vm1, %v23174_v52, -inf }
 0x723   : > { %26712 = vst [vmem:[#allocation223_spill] sm:$0xff] %v23182_v9  ;;  %26713 = vst [vmem:[#allocation218_spill] sm:$0xff] %v23184_v48  ;;  %v23188_v49 = vpop.f32.mrb[30].mxu0  ;;  %9222 = vmax.xlane.f32.xlu1 %v9221_v20  ;;  %v9215_v36 = vsel %vm9175_vm1, %v23184_v48, -inf }
 0x724   : > { %26714 = vst [vmem:[#allocation221_spill] sm:$0xff] %v23188_v49  ;;  %v23190_v0 = vpop.f32.mrb[31].mxu0 }
 0x725   : > { %26715 = vst [vmem:[#allocation158_spill] sm:$0xff] %v23190_v0  ;;  %9219 = vmax.xlane.f32.xlu0 %v9218_v46 }
 0x727   : > { %v23196_v60 = vpop.f32.mrb[32].mxu1  ;;  %9216 = vmax.xlane.f32.xlu1 %v9215_v36 }
 0x728   : > { %26716 = vst [vmem:[#allocation90_spill] sm:$0xff] %v23196_v60  ;;  %v23198_v9 = vpop.f32.mrb[33].mxu1  ;;  %v26813_v60 = vld [vmem:[#allocation212_spill] sm:$0xff] }
 0x729   : > { %26717 = vst [vmem:[#allocation92_spill] sm:$0xff] %v23198_v9  ;;  %v23202_v11 = vpop.f32.mrb[34].mxu1  ;;  %9213 = vmax.xlane.f32.xlu0 %v9212_v23  ;;  %v9224_v46 = vsel %vm9175_vm1, %v23198_v9, -inf }
 0x72a   : > { %26718 = vst [vmem:[#allocation222_spill] sm:$0xff] %v23202_v11  ;;  %v23204_v20 = vpop.f32.mrb[35].mxu1 }
 0x72b   : > { %26719 = vst [vmem:[#allocation40_spill] sm:$0xff] %v23204_v20  ;;  %v9227_v49 = vsel %vm9175_vm1, %v23204_v20, -inf }
 0x72c   : > { %9228 = vmax.xlane.f32.xlu1 %v9227_v49 }
 0x72d   : > { %9225 = vmax.xlane.f32.xlu0 %v9224_v46 }
 0x72f   : > { %v23210_v0 = vpop.f32.mrb[36].mxu1 }
 0x730   : > { %26720 = vst [vmem:[#allocation41_spill] sm:$0xff] %v23210_v0  ;;  %v23212_v36 = vpop.f32.mrb[37].mxu1  ;;  %v26788_v0 = vld [vmem:[#allocation206_spill] sm:$0xff] }
 0x731   : > { %26721 = vst [vmem:[#allocation91_spill] sm:$0xff] %v23212_v36  ;;  %v23214_v55 = vpop.f32.mrb[38].mxu1  ;;  %v26792_v36 = vld [vmem:[#allocation64_spill] sm:$0xff] }
 0x732   : > { %26722 = vst [vmem:[#allocation124_spill] sm:$0xff] %v23214_v55  ;;  %v23216_v52 = vpop.f32.mrb[39].mxu1 }
 0x733   : > { %26723 = vst [vmem:[#allocation176_spill] sm:$0xff] %v23216_v52  ;;  %v26798_v52 = vld [vmem:[#allocation173_spill] sm:$0xff] }
 0x737   : > { %v23218_v48 = vpop.f32.mrb[40].mxu1 }
 0x738   : > { %26724 = vst [vmem:[#allocation72_spill] sm:$0xff] %v23218_v48  ;;  %v23220_v23 = vpop.f32.mrb[41].mxu1  ;;  %v26796_v48 = vld [vmem:[#allocation80_spill] sm:$0xff] }
 0x739   : > { %26725 = vst [vmem:[#allocation71_spill] sm:$0xff] %v23220_v23  ;;  %v23222_v57 = vpop.f32.mrb[42].mxu1  ;;  %v9248_v49 = vsel %vm9175_vm1, %v23220_v23, -inf }
 0x73a   : > { %26726 = vst [vmem:[#allocation76_spill] sm:$0xff] %v23222_v57  ;;  %v23226_v20 = vpop.f32.mrb[43].mxu1  ;;  %9249 = vmax.xlane.f32.xlu0 %v9248_v49  ;;  %v26794_v57 = vld [vmem:[#allocation194_spill] sm:$0xff] }
 0x73b   : > { %26727 = vst [vmem:[#allocation172_spill] sm:$0xff] %v23226_v20  ;;  %v9251_v46 = vsel %vm9175_vm1, %v23226_v20, -inf }
 0x73e   : > { %9252 = vmax.xlane.f32.xlu0 %v9251_v46 }
 0x73f   : > { %v23230_v9 = vpop.f32.mrb[44].mxu1 }
 0x740   : > { %26728 = vst [vmem:[#allocation106_spill] sm:$0xff] %v23230_v9  ;;  %v23232_v58 = vpop.f32.mrb[45].mxu1 }
 0x741   : > { %26729 = vst [vmem:[#allocation102_spill] sm:$0xff] %v23232_v58  ;;  %v23234_v33 = vpop.f32.mrb[46].mxu1  ;;  %v26790_v58 = vld [vmem:[#allocation208_spill] sm:$0xff] }
 0x742   : > { %26730 = vst [vmem:[#allocation108_spill] sm:$0xff] %v23234_v33  ;;  %v23236_v1 = vpop.f32.mrb[47].mxu1 }
 0x743   : > { %26731 = vst [vmem:[#allocation104_spill] sm:$0xff] %v23236_v1 }
 0x747   : > { %v23238_v24 = vpop.f32.mrb[48].mxu1 }
 0x748   : > { %26732 = vst [vmem:[#allocation109_spill] sm:$0xff] %v23238_v24  ;;  %v23240_v51 = vpop.f32.mrb[49].mxu1 }
 0x749   : > { %26733 = vst [vmem:[#allocation105_spill] sm:$0xff] %v23240_v51  ;;  %v23242_v23 = vpop.f32.mrb[50].mxu1 }
 0x74a   : > { %26734 = vst [vmem:[#allocation111_spill] sm:$0xff] %v23242_v23  ;;  %v23244_v13 = vpop.f32.mrb[51].mxu1  ;;  %v26786_v23 = vld [vmem:[#allocation220_spill] sm:$0xff] }
 0x74b   : > { %26735 = vst [vmem:[#allocation107_spill] sm:$0xff] %v23244_v13 }
 0x74f   : > { %v23246_v49 = vpop.f32.mrb[52].mxu1 }
 0x750   : > { %26736 = vst [vmem:[#allocation121_spill] sm:$0xff] %v23246_v49  ;;  %v23248_v20 = vpop.f32.mrb[53].mxu1 }
 0x751   : > { %26737 = vst [vmem:[#allocation118_spill] sm:$0xff] %v23248_v20  ;;  %v23250_v46 = vpop.f32.mrb[54].mxu1 }
 0x752   : > { %26738 = vst [vmem:[#allocation112_spill] sm:$0xff] %v23250_v46  ;;  %v23252_v41 = vpop.f32.mrb[55].mxu1 }
 0x753   : > { %26739 = vst [vmem:[#allocation45_spill] sm:$0xff] %v23252_v41  ;;  %v26777_v41 = vld [vmem:[#allocation189_spill] sm:$0xff] }
 0x757   : > { %v23254_v18 = vpop.f32.mrb[56].mxu1 }
 0x758   : > { %26740 = vst [vmem:[#allocation114_spill] sm:$0xff] %v23254_v18  ;;  %v23256_v6 = vpop.f32.mrb[57].mxu1  ;;  %v11025_v18 = vcombine.high %v26597_v62, %v22521_v3  ;;  %v26751_v62 = vld [vmem:[#allocation170_spill] sm:$0xff] }
 0x759   : > { %26741 = vst [vmem:[#allocation110_spill] sm:$0xff] %v23256_v6  ;;  %v23258_v9 = vpop.f32.mrb[58].mxu1  ;;  %12400 = vxpose.xlu1.c.b16.start [1/4] (short) (narrow) %v22787_v59, 16  ;;  %v11161_v59 = vcombine.high %v26608_v54, %v22586_v35  ;;  %v26752_v6 = vld [vmem:[#allocation178_spill] sm:$0xff] }
 0x75a   : > { %26742 = vst [vmem:[#allocation120_spill] sm:$0xff] %v23258_v9  ;;  %v23261_v24 = vpop.f32.mrb[59].mxu1  ;;  %v11041_v9 = vcombine.high %v22555_v39, %v22615_v53  ;;  %v11145_v35 = vcombine.high %v26752_v6, %v26751_v62  ;;  %v23291_v54 = vrot.slane %v11025_v18, %v19193_v2  ;;  %v26759_v62 = vld [vmem:[#allocation207_spill] sm:$0xff] }
 0x75b   : > { %26743 = vst [vmem:[#allocation116_spill] sm:$0xff] %v23261_v24  ;;  %v23294_v39 = vrot.slane %v11161_v59, %v19193_v2  ;;  %v26757_v59 = vld [vmem:[#allocation185_spill] sm:$0xff] }
 0x75d   : > { %12401 = vxpose.xlu1.c.b16.cont [2/4] (short) (narrow) %v22915_v32, 16  ;;  %v11057_v32 = vcombine.high %v22598_v19, %v22648_v38  ;;  %v23297_v19 = vrot.slane %v11041_v9, %v19193_v2 }
 0x75f   : > { %v23264_v51 = vpop.f32.mrb[60].mxu1 }
 0x760   : > { %26744 = vst [vmem:[#allocation69_spill] sm:$0xff] %v23264_v51  ;;  %v23266_v49 = vpop.f32.mrb[61].mxu1  ;;  %v11177_v51 = vcombine.high %v22608_v25, %v22654_v4  ;;  %v23300_v25 = vrot.slane %v11057_v32, %v19193_v2  ;;  %v26758_v32 = vld [vmem:[#allocation181_spill] sm:$0xff] }
 0x761   : > { %26745 = vst [vmem:[#allocation68_spill] sm:$0xff] %v23266_v49  ;;  %v23268_v20 = vpop.f32.mrb[62].mxu1  ;;  %12402 = vxpose.xlu1.c.b16.cont [3/4] (short) (narrow) %v23021_v40, 16  ;;  %v26749_v49 = vld [vmem:[#allocation167_spill] sm:$0xff] }
 0x762   : > { %26746 = vst [vmem:[#allocation85_spill] sm:$0xff] %v23268_v20  ;;  %v23271_v46 = vpop.f32.mrb[63].mxu1  ;;  %v26748_v20 = vld [vmem:[#allocation67_spill] sm:$0xff]  ;;  %v23303_v53 = vrot.slane %v11177_v51, %v19193_v2  ;;  %v11120_v9 = vcombine.low %v23297_v19, %v23300_v25  ;;  %v11417_v51 = vcombine.high %v22710_v43, %v22769_v7 }
 0x763   : > { %26747 = vst [vmem:[#allocation70_spill] sm:$0xff] %v23271_v46  ;;  %v11193_v40 = vcombine.high %v26748_v20, %v22677_v28  ;;  %v26750_v46 = vld [vmem:[#allocation161_spill] sm:$0xff]  ;;  %v23313_v28 = vrot.slane %v11145_v35, %v19193_v2  ;;  %v26754_v20 = vld [vmem:[#allocation164_spill] sm:$0xff]  ;;  %v26761_v43 = vld [vmem:[#allocation171_spill] sm:$0xff] }
 0x764   : > { %v11009_v3 = vcombine.high %v26750_v46, %v26749_v49  ;;  %v26756_v49 = vld [vmem:[#allocation162_spill] sm:$0xff]  ;;  %v26760_v35 = vld [vmem:[#allocation169_spill] sm:$0xff]  ;;  %v11329_v7 = vcombine.high %v26761_v43, %v22829_v56  ;;  %v23360_v56 = vrot.slane %v11417_v51, %v19193_v2  ;;  %v11689_v51 = vcombine.high %v22866_v27, %v22903_v34  ;;  %v26772_v43 = vld [vmem:[#allocation200_spill] sm:$0xff] }
 0x765   : > { %12403 = vxpose.xlu1.c.b16.end [4/4] (short) (narrow) %v23088_v47, 16  ;;  %v23306_v38 = vrot.slane %v11193_v40, %v19193_v2  ;;  %v26753_v47 = vpack.i.b16 %v22760_v42, %v22706_v15  ;;  %v11224_v6 = vcombine.low %v23313_v28, %v23294_v39  ;;  %v26755_v15 = vld [vmem:[#allocation77_spill] sm:$0xff]  ;;  %v11433_v46 = vcombine.high %v26756_v49, %v22797_v61  ;;  %v26778_v27 = vld [vmem:[#allocation184_spill] sm:$0xff] }
 0x766   : > { %v23310_v4 = vrot.slane %v11009_v3, %v19193_v2  ;;  %v11281_v42 = vcombine.high %v26755_v15, %v26754_v20  ;;  %v11297_v40 = vcombine.high %v26758_v32, %v26757_v59  ;;  %v11449_v3 = vcombine.high %v22812_v29, %v22836_v31  ;;  %v26762_v20 = vld [vmem:[#allocation177_spill] sm:$0xff]  ;;  %v26767_v32 = vld [vmem:[#allocation198_spill] sm:$0xff] }
 0x767   : > { %v26763_v15 = vpack.i.b16 %v22887_v30, %v26762_v20  ;;  %v23350_v49 = vrot.slane %v11224_v6, %v19211_v21  ;;  %v23353_v29 = vrot.slane %v11120_v9, %v19211_v21  ;;  %v23381_v9 = vrot.slane %v11329_v7, %v19193_v2  ;;  %v26773_v20 = vld [vmem:[#allocation196_spill] sm:$0xff] }
 0x768   : > { %v11088_v18 = vcombine.low %v23310_v4, %v23291_v54  ;;  %v23369_v30 = vrot.slane %v11297_v40, %v19193_v2  ;;  %v26768_v40 = vld [vmem:[#allocation192_spill] sm:$0xff]  ;;  %v11601_v34 = vcombine.high %v26778_v27, %v26777_v41  ;;  %v26779_v41 = vpack.i.b16 %v23076_v14, %v23068_v26 }
 0x769   : > { %12432 = vxpose.xlu1.c.b16.start [1/4] (short) (narrow) %v22794_v10, 16  ;;  %v11256_v10 = vcombine.low %v23303_v53, %v23306_v38  ;;  %v26784_v27 = vld [vmem:[#allocation224_spill] sm:$0xff] }
 0x76a   : > { %v23347_v61 = vrot.slane %v11088_v18, %v19211_v21  ;;  %v23372_v18 = vrot.slane %v11449_v3, %v19193_v2  ;;  %v11705_v3 = vcombine.high %v26768_v40, %v26767_v32  ;;  %v23444_v26 = vrot.slane %v11601_v34, %v19193_v2  ;;  %v26793_v34 = vld [vmem:[#allocation166_spill] sm:$0xff] }
 0x76b   : > { %12416 = vxpose.xlu0.c.b16.start [1/4] (short) (narrow) %v26753_v47, 16  ;;  %v11313_v47 = vcombine.high %v26760_v35, %v26759_v62  ;;  %v23356_v31 = vrot.slane %v11256_v10, %v19211_v21  ;;  %v26764_v10 = vpack.i.b16 %v22999_v8, %v22981_v63  ;;  %v26769_v62 = vld [vmem:[#allocation213_spill] sm:$0xff]  ;;  %v26770_v35 = vld [vmem:[#allocation183_spill] sm:$0xff]  ;;  %v11857_v55 = vcombine.high %v26793_v34, %v26792_v36 }
 0x76c   : > { %v26775_v63 = vld [vmem:[#allocation203_spill] sm:$0xff] }
 0x76d   : > { %12433 = vxpose.xlu1.c.b16.cont [2/4] (short) (narrow) %v22917_v45, 16  ;;  %v11465_v45 = vcombine.high %v22824_v12, %v22851_v50  ;;  %v23363_v12 = vrot.slane %v11281_v42, %v19193_v2  ;;  %v23366_v50 = vrot.slane %v11433_v46, %v19193_v2  ;;  %v23375_v6 = vrot.slane %v11313_v47, %v19193_v2  ;;  %v26765_v42 = vld [vmem:[#allocation179_spill] sm:$0xff]  ;;  %v26766_v46 = vld [vmem:[#allocation193_spill] sm:$0xff] }
 0x76e   : > { %v11553_v59 = vcombine.high %v26766_v46, %v26765_v42  ;;  %v11569_v47 = vcombine.high %v26770_v35, %v26769_v62  ;;  %v26776_v8 = vld [vmem:[#allocation195_spill] sm:$0xff]  ;;  %v23405_v42 = vcombine.low %v23347_v61, %v23353_v29  ;;  %v23409_v46 = vcombine.low %v23350_v49, %v23356_v31 }
 0x76f   : > { %12417 = vxpose.xlu0.c.b16.cont [2/4] (short) (narrow) %v26763_v15, 16  ;;  %v26774_v15 = vld [vmem:[#allocation202_spill] sm:$0xff]  ;;  %v11496_v32 = vcombine.low %v23360_v56, %v23366_v50  ;;  %v11360_v40 = vcombine.low %v23363_v12, %v23369_v30  ;;  %v23423_v35 = vrot.slane %v11689_v51, %v19193_v2  ;;  %v26781_v51 = vld [vmem:[#allocation175_spill] sm:$0xff]  ;;  %v23497_v34 = vrot.slane %v11857_v55, %v19193_v2 }
 0x770   : > { %v11585_v24 = vcombine.high %v26774_v15, %v26773_v20  ;;  %v23432_v20 = vrot.slane %v11569_v47, %v19193_v2  ;;  %v26785_v47 = vld [vmem:[#allocation191_spill] sm:$0xff] }
 0x771   : > { %12434 = vxpose.xlu1.c.b16.cont [3/4] (short) (narrow) %v23023_v44, 16  ;;  %v23378_v44 = vrot.slane %v11465_v45, %v19193_v2  ;;  %v26771_v45 = vld [vmem:[#allocation197_spill] sm:$0xff]  ;;  %26806 = vst [vmem:[#allocation131_spill] sm:$0xff] %v23497_v34 }
 0x772   : > { %v11721_v7 = vcombine.high %v26772_v43, %v26771_v45  ;;  %v23426_v45 = vrot.slane %v11553_v59, %v19193_v2  ;;  %v23429_v43 = vrot.slane %v11705_v3, %v19193_v2  ;;  %v26782_v59 = vld [vmem:[#allocation182_spill] sm:$0xff]  ;;  %v26783_v3 = vld [vmem:[#allocation205_spill] sm:$0xff] }
 0x773   : > { %12418 = vxpose.xlu0.c.b16.cont [3/4] (short) (narrow) %v26764_v10, 16  ;;  %v11737_v10 = vcombine.high %v26776_v8, %v26775_v63  ;;  %v11528_v62 = vcombine.low %v23372_v18, %v23378_v44  ;;  %v23438_v63 = vrot.slane %v11585_v24, %v19193_v2  ;;  %v11961_v8 = vcombine.high %v26783_v3, %v26782_v59  ;;  %v26789_v24 = vld [vmem:[#allocation199_spill] sm:$0xff] }
 0x774   : > { %v23435_v15 = vrot.slane %v11721_v7, %v19193_v2  ;;  %v26787_v7 = vld [vmem:[#allocation217_spill] sm:$0xff]  ;;  %v11841_v5 = vcombine.high %v26789_v24, %v26788_v0  ;;  %v26797_v59 = vld [vmem:[#allocation187_spill] sm:$0xff]  ;;  %v11368_v0 = vrot.slane %v11360_v40, %v19211_v21  ;;  %v11768_v36 = vcombine.low %v23423_v35, %v23429_v43 }
 0x775   : > { %12435 = vxpose.xlu1.c.b16.end [4/4] (short) (narrow) %v23090_v22, 16  ;;  %v11392_v22 = vcombine.low %v23375_v6, %v23381_v9  ;;  %26780 = vst [vmem:[#allocation79_spill] sm:$0xff] %v23438_v63  ;;  %v23441_v14 = vrot.slane %v11737_v10, %v19193_v2  ;;  %v11977_v13 = vcombine.high %v26787_v7, %v26786_v23  ;;  %v26791_v10 = vld [vmem:[#allocation210_spill] sm:$0xff] }
 0x776   : > { %v11993_v33 = vcombine.high %v26791_v10, %v26790_v58  ;;  %v11873_v3 = vcombine.high %v26797_v59, %v26796_v48  ;;  %v23467_v23 = vrot.slane %v11496_v32, %v19211_v21  ;;  %v11536_v58 = vrot.slane %v11528_v62, %v19211_v21  ;;  %v26801_v32 = vld [vmem:[#allocation190_spill] sm:$0xff] }
 0x777   : > { %12419 = vxpose.xlu0.c.b16.end [4/4] (short) (narrow) %v26779_v41, 16  ;;  %v11825_v41 = vcombine.high %v26785_v47, %v26784_v27  ;;  %v26799_v27 = vld [vmem:[#allocation165_spill] sm:$0xff]  ;;  %v11400_v7 = vrot.slane %v11392_v22, %v19211_v21  ;;  %v11800_v48 = vcombine.low %v23435_v15, %v23441_v14  ;;  %v23482_v40 = vrot.slane %v11961_v8, %v19193_v2  ;;  %v26810_v59 = vld [vmem:[#allocation186_spill] sm:$0xff] }
 0x778   : > { %v26800_v47 = vpack.i.b16 %v26798_v52, %v26799_v27  ;;  %v11664_v52 = vcombine.low %v23438_v63, %v23444_v26  ;;  %v23488_v22 = vrot.slane %v11977_v13, %v19193_v2  ;;  %v23491_v24 = vrot.slane %v11841_v5, %v19193_v2  ;;  %v26812_v13 = vld [vmem:[#allocation215_spill] sm:$0xff] }
 0x779   : > { %12464 = vxpose.xlu1.c.b16.start [1/4] (short) (narrow) %v26781_v51, 16  ;;  %v26795_v51 = vld [vmem:[#allocation204_spill] sm:$0xff]  ;;  %26802 = vst [vmem:[#allocation89_spill] sm:$0xff] %v23482_v40  ;;  %v23485_v62 = vrot.slane %v11825_v41, %v19193_v2  ;;  %v23494_v10 = vrot.slane %v11993_v33, %v19193_v2  ;;  %v23503_v8 = vrot.slane %v11873_v3, %v19193_v2  ;;  %v12132_v5 = vshrl.u32 %v23405_v42, 16 }
 0x77a   : > { %v12009_v1 = vcombine.high %v26795_v51, %v26794_v57  ;;  %v11632_v57 = vcombine.low %v23426_v45, %v23432_v20  ;;  %26804 = vst [vmem:[#allocation228_spill] sm:$0xff] %v23488_v22  ;;  %v26809_v41 = vld [vmem:[#allocation188_spill] sm:$0xff]  ;;  %v12133_v33 = vshrl.u32 %v23409_v46, 16  ;;  %v11548_v55 = vcombine.low %v23467_v23, %v11536_v58 }
 0x77b   : > { %12448 = vxpose.xlu0.c.b16.start [1/4] (short) (narrow) %v26800_v47, 16  ;;  %26803 = vst [vmem:[#allocation88_spill] sm:$0xff] %v23485_v62  ;;  %26805 = vst [vmem:[#allocation135_spill] sm:$0xff] %v23494_v10  ;;  %v26811_v27 = vpack.i.b16 %v26809_v41, %v26810_v59  ;;  %v11412_v47 = vcombine.low %v11368_v0, %v11400_v7  ;;  %v11808_v3 = vrot.slane %v11800_v48, %v19211_v21 }
 0x77c   : > { %v23500_v51 = vrot.slane %v12009_v1, %v19193_v2  ;;  %26808 = vst [vmem:[#allocation127_spill] sm:$0xff] %v23503_v8  ;;  %v11640_v1 = vrot.slane %v11632_v57, %v19211_v21  ;;  %v11672_v2 = vrot.slane %v11664_v52, %v19211_v21  ;;  %v12040_v41 = vcombine.low %v23482_v40, %v23488_v22 }
 0x77d   : > { %12465 = vxpose.xlu1.c.b16.cont [2/4] (short) (narrow) %v26801_v32, 16  ;;  %v11776_v32 = vrot.slane %v11768_v36, %v19211_v21  ;;  %v11904_v59 = vcombine.low %v23485_v62, %v23491_v24  ;;  %v26814_v36 = vld [vmem:[#allocation201_spill] sm:$0xff]  ;;  %v12134_v57 = vpack.i.b16 %v12133_v33, %v12132_v5  ;;  %v12196_v48 = vshrl.u32 %v11412_v47, 16 }
 0x77e   : > { %26807 = vst [vmem:[#allocation229_spill] sm:$0xff] %v23500_v51  ;;  %v26815_v11 = vpack.i.b16 %v26813_v60, %v26814_v36  ;;  %v12197_v52 = vshrl.u32 %v11548_v55, 16  ;;  %v11684_v63 = vcombine.low %v11640_v1, %v11672_v2  ;;  %v12048_v22 = vrot.slane %v12040_v41, %v19211_v21  ;;  %v23537_v60 = vpop.trf.xlu0 }
 0x77f   : > { %12449 = vxpose.xlu0.c.b16.cont [2/4] (short) (narrow) %v26811_v27, 16  ;;  %v12072_v27 = vcombine.low %v23494_v10, %v23500_v51  ;;  %v11820_v40 = vcombine.low %v11776_v32, %v11808_v3  ;;  %v11912_v62 = vrot.slane %v11904_v59, %v19211_v21 }
 0x780   : > { %v12260_v5 = vshrl.u32 %v11684_v63, 16 }
 0x781   : > { %12466 = vxpose.xlu1.c.b16.cont [3/4] (short) (narrow) %v26812_v13, 16  ;;  %v11936_v13 = vcombine.low %v23497_v34, %v23503_v8  ;;  %v12080_v10 = vrot.slane %v12072_v27, %v19211_v21  ;;  %v26816_v34 = vpack.i.b16 %v23078_v37, %v23070_v16  ;;  %v12261_v33 = vshrl.u32 %v11820_v40, 16 }
 0x782   : > { %v12194_v27 = vpack.i.b16 %v11548_v55, %v11412_v47  ;;  %v11277_v37 = vcombine.high %v23350_v49, %v23356_v31  ;;  %v23541_v16 = vpop.trf.xlu0  ;;  %v11121_v55 = vcombine.high %v23297_v19, %v23300_v25  ;;  %v11821_v19 = vcombine.high %v11776_v32, %v11808_v3 }
 0x783   : > { %12450 = vxpose.xlu0.c.b16.cont [3/4] (short) (narrow) %v26815_v11, 16  ;;  %v11944_v51 = vrot.slane %v11936_v13, %v19211_v21  ;;  %v12198_v11 = vpack.i.b16 %v12197_v52, %v12196_v48  ;;  %v12092_v59 = vcombine.low %v12048_v22, %v12080_v10  ;;  %v12262_v13 = vpack.i.b16 %v12261_v33, %v12260_v5 }
 0x784   : > { %v12141_v47 = vshrl.u32 %v11277_v37, 16  ;;  %v11257_v52 = vcombine.high %v23303_v53, %v23306_v38  ;;  %v23557_v25 = vrot.slane %v11121_v55, %v19211_v21  ;;  %v11529_v38 = vcombine.high %v23372_v18, %v23378_v44  ;;  %v26823_v55 = vld [vmem:[#allocation127_spill] sm:$0xff] }
 0x785   : > { %12467 = vxpose.xlu1.c.b16.end [4/4] (short) (narrow) %v23092_v17, 16  ;;  %v12130_v17 = vpack.i.b16 %v23409_v46, %v23405_v42  ;;  %v11956_v41 = vcombine.low %v11912_v62, %v11944_v51  ;;  %v12325_v8 = vshrl.u32 %v12092_v59, 16  ;;  %v12258_v42 = vpack.i.b16 %v11820_v40, %v11684_v63 }
 0x786   : > { %v11141_v46 = vcombine.high %v23347_v61, %v23353_v29  ;;  %v11089_v63 = vcombine.high %v23310_v4, %v23291_v54  ;;  %v11225_v61 = vcombine.high %v23313_v28, %v23294_v39  ;;  %v23560_v53 = vrot.slane %v11257_v52, %v19211_v21  ;;  %v26824_v52 = vld [vmem:[#allocation131_spill] sm:$0xff] }
 0x787   : > { %12451 = vxpose.xlu0.c.b16.end [4/4] (short) (narrow) %v26816_v34, 16  ;;  %v12324_v36 = vshrl.u32 %v11956_v41, 16  ;;  %v11413_v34 = vcombine.high %v11368_v0, %v11400_v7  ;;  %v12322_v49 = vpack.i.b16 %v12092_v59, %v11956_v41  ;;  %v11685_v7 = vcombine.high %v11640_v1, %v11672_v2 }
 0x788   : > { %v12140_v31 = vshrl.u32 %v11141_v46, 16  ;;  %v11497_v54 = vcombine.high %v23360_v56, %v23366_v50  ;;  %v11361_v39 = vcombine.high %v23363_v12, %v23369_v30  ;;  %v11393_v4 = vcombine.high %v23375_v6, %v23381_v9 }
 0x789   : > { %12496 = vxpose.xlu1.c.b16.start [1/4] (short) (narrow) %v12134_v57, 16  ;;  %v11549_v57 = vcombine.high %v23467_v23, %v11536_v58  ;;  %v12326_v48 = vpack.i.b16 %v12325_v8, %v12324_v36  ;;  %v12204_v29 = vshrl.u32 %v11413_v34, 16  ;;  %v12138_v2 = vpack.i.b16 %v11277_v37, %v11141_v46  ;;  %v26818_v36 = vld [vmem:[#allocation88_spill] sm:$0xff]  ;;  %v26820_v46 = vld [vmem:[#allocation89_spill] sm:$0xff] }
 0x78a   : > { %v12142_v58 = vpack.i.b16 %v12141_v47, %v12140_v31  ;;  %v23571_v28 = vrot.slane %v11089_v63, %v19211_v21  ;;  %v23574_v40 = vrot.slane %v11225_v61, %v19211_v21  ;;  %v12268_v56 = vshrl.u32 %v11685_v7, 16 }
 0x78b   : > { %12480 = vxpose.xlu0.c.b16.start [1/4] (short) (narrow) %v12130_v17, 16  ;;  %v12205_v23 = vshrl.u32 %v11549_v57, 16  ;;  %v12269_v50 = vshrl.u32 %v11821_v19, 16  ;;  %v11957_v32 = vcombine.high %v11912_v62, %v11944_v51  ;;  %v12093_v12 = vcombine.high %v12048_v22, %v12080_v10  ;;  %v26817_v17 = vld [vmem:[#allocation79_spill] sm:$0xff] }
 0x78c   : > { %v23577_v30 = vrot.slane %v11497_v54, %v19211_v21  ;;  %v23580_v18 = vrot.slane %v11361_v39, %v19211_v21  ;;  %v11142_v6 = vcombine.low %v23571_v28, %v23557_v25  ;;  %v11278_v44 = vcombine.low %v23574_v40, %v23560_v53 }
 0x78d   : > { %12497 = vxpose.xlu1.c.b16.cont [2/4] (short) (narrow) %v12198_v11, 16  ;;  %v12206_v8 = vpack.i.b16 %v12205_v23, %v12204_v29  ;;  %v23587_v9 = vrot.slane %v11529_v38, %v19211_v21  ;;  %v23590_v1 = vrot.slane %v11393_v4, %v19211_v21  ;;  %v11633_v62 = vcombine.high %v23426_v45, %v23432_v20  ;;  %v23605_v20 = vpop.trf.xlu1 }
 0x78e   : > { %v12202_v10 = vpack.i.b16 %v11549_v57, %v11413_v34  ;;  %v11769_v51 = vcombine.high %v23423_v35, %v23429_v43  ;;  %v11801_v3 = vcombine.high %v23435_v15, %v23441_v14  ;;  %v11665_v11 = vcombine.high %v26817_v17, %v23444_v26  ;;  %v26821_v57 = vld [vmem:[#allocation229_spill] sm:$0xff] }
 0x78f   : > { %12481 = vxpose.xlu0.c.b16.cont [2/4] (short) (narrow) %v12194_v27, 16  ;;  %v12270_v5 = vpack.i.b16 %v12269_v50, %v12268_v56  ;;  %v12332_v33 = vshrl.u32 %v11957_v32, 16  ;;  %v12333_v41 = vshrl.u32 %v12093_v12, 16  ;;  %v12148_v59 = vshrl.u32 %v11142_v6, 16 }
 0x790   : > { %v12149_v27 = vshrl.u32 %v11278_v44, 16  ;;  %v23603_v45 = vrot.slane %v11633_v62, %v19211_v21  ;;  %v11414_v35 = vcombine.low %v23580_v18, %v23590_v1  ;;  %v11550_v43 = vcombine.low %v23577_v30, %v23587_v9 }
 0x791   : > { %12498 = vxpose.xlu1.c.b16.cont [3/4] (short) (narrow) %v12262_v13, 16  ;;  %v12266_v13 = vpack.i.b16 %v11821_v19, %v11685_v7  ;;  %v11783_v15 = vrot.slane %v11769_v51, %v19211_v21  ;;  %v11815_v14 = vrot.slane %v11801_v3, %v19211_v21  ;;  %v11679_v26 = vrot.slane %v11665_v11, %v19211_v21 }
 0x792   : > { %v11905_v37 = vcombine.high %v26818_v36, %v23491_v24  ;;  %v12334_v63 = vpack.i.b16 %v12333_v41, %v12332_v33  ;;  %v12330_v61 = vpack.i.b16 %v12093_v12, %v11957_v32  ;;  %v12150_v29 = vpack.i.b16 %v12149_v27, %v12148_v59 }
 0x793   : > { %12482 = vxpose.xlu0.c.b16.cont [3/4] (short) (narrow) %v12258_v42, 16  ;;  %v26819_v42 = vld [vmem:[#allocation228_spill] sm:$0xff]  ;;  %v12213_v24 = vshrl.u32 %v11550_v43, 16  ;;  %v11686_v7 = vcombine.low %v23603_v45, %v11679_v26  ;;  %v11822_v4 = vcombine.low %v11783_v15, %v11815_v14  ;;  %v12210_v51 = vpack.i.b16 %v11550_v43, %v11414_v35 }
 0x794   : > { %v12041_v34 = vcombine.high %v26820_v46, %v26819_v42  ;;  %v11919_v23 = vrot.slane %v11905_v37, %v19211_v21  ;;  %v11279_v33 = vcombine.high %v23574_v40, %v23560_v53  ;;  %v11415_v41 = vcombine.high %v23580_v18, %v23590_v1 }
 0x795   : > { %12499 = vxpose.xlu1.c.b16.end [4/4] (short) (narrow) %v12326_v48, 16  ;;  %v26822_v48 = vld [vmem:[#allocation135_spill] sm:$0xff]  ;;  %v12276_v50 = vshrl.u32 %v11686_v7, 16  ;;  %v12277_v32 = vshrl.u32 %v11822_v4, 16  ;;  %v11551_v59 = vcombine.high %v23577_v30, %v23587_v9  ;;  %v11823_v18 = vcombine.high %v11783_v15, %v11815_v14 }
 0x796   : > { %v23554_v0 = vpop.xlane.xlu0 %9183  ;;  %v12073_v47 = vcombine.high %v26822_v48, %v26821_v57  ;;  %v12055_v19 = vrot.slane %v12041_v34, %v19211_v21  ;;  %v12220_v36 = vshrl.u32 %v11415_v41, 16 }
 0x797   : > { %12483 = vxpose.xlu0.c.b16.end [4/4] (short) (narrow) %v12322_v49, 16  ;;  %v11937_v49 = vcombine.high %v26824_v52, %v26823_v55  ;;  %v12278_v17 = vpack.i.b16 %v12277_v32, %v12276_v50  ;;  %v12221_v37 = vshrl.u32 %v11551_v59, 16  ;;  %v12285_v34 = vshrl.u32 %v11823_v18, 16 }
 0x798   : > { %v12087_v54 = vrot.slane %v12073_v47, %v19211_v21  ;;  %v23629_v38 = vpop.xlane.xlu1 %9186  ;;  %v12218_v47 = vpack.i.b16 %v11551_v59, %v11415_v41  ;;  %v26831_v41 = vld [vmem:[#allocation124_spill] sm:$0xff] }
 0x799   : > { %12528 = vxpose.xlu1.c.b16.start [1/4] (short) (narrow) %v12142_v58, 16  ;;  %v12212_v58 = vshrl.u32 %v11414_v35, 16  ;;  %v11951_v39 = vrot.slane %v11937_v49, %v19211_v21  ;;  %v12157_v35 = vshrl.u32 %v11279_v33, 16  ;;  %v12222_v9 = vpack.i.b16 %v12221_v37, %v12220_v36  ;;  %v26833_v36 = vld [vmem:[#allocation56_spill] sm:$0xff] }
 0x79a   : > { %v23594_v22 = vpop.xlane.xlu0 %9177  ;;  %v12094_v62 = vcombine.low %v12055_v19, %v12087_v54  ;;  %v12095_v48 = vcombine.high %v12055_v19, %v12087_v54  ;;  %v26825_v19 = vld [vmem:[#allocation222_spill] sm:$0xff]  ;;  %v9245_v59 = vsel %vm9175_vm1, %v26831_v41, -inf }
 0x79b   : > { %12512 = vxpose.xlu0.c.b16.start [1/4] (short) (narrow) %v12138_v2, 16  ;;  %v12214_v56 = vpack.i.b16 %v12213_v24, %v12212_v58  ;;  %v11958_v12 = vcombine.low %v11919_v23, %v11951_v39  ;;  %v11959_v57 = vcombine.high %v11919_v23, %v11951_v39  ;;  %v9233_v54 = vsel %vm9175_vm1, %v26825_v19, -inf  ;;  %v26826_v39 = vld [vmem:[#allocation90_spill] sm:$0xff] }
 0x79c   : > { %v12349_v15 = vshrl.u32 %v12095_v48, 16 }
 0x79d   : > { %12529 = vxpose.xlu1.c.b16.cont [2/4] (short) (narrow) %v12206_v8, 16  ;;  %v12146_v8 = vpack.i.b16 %v11278_v44, %v11142_v6  ;;  %v12340_v11 = vshrl.u32 %v11958_v12, 16  ;;  %v12274_v6 = vpack.i.b16 %v11822_v4, %v11686_v7  ;;  %v11143_v44 = vcombine.high %v23571_v28, %v23557_v25 }
 0x79e   : > { %v23622_v31 = vpop.xlane.xlu0 %9195  ;;  %v12338_v53 = vpack.i.b16 %v12094_v62, %v11958_v12  ;;  %v11687_v28 = vcombine.high %v23603_v45, %v11679_v26  ;;  %v12348_v45 = vshrl.u32 %v11959_v57, 16  ;;  %v9230_v4 = vsel %vm9175_vm1, %v26826_v39, -inf  ;;  %v26828_v12 = vld [vmem:[#allocation72_spill] sm:$0xff] }
 0x79f   : > { %12513 = vxpose.xlu0.c.b16.cont [2/4] (short) (narrow) %v12202_v10, 16  ;;  %v23633_v10 = vpop.xlane.xlu1 %9180  ;;  %v12156_v40 = vshrl.u32 %v11143_v44, 16  ;;  %v12154_v30 = vpack.i.b16 %v11279_v33, %v11143_v44 }
 0x7a0   : > { %v12284_v46 = vshrl.u32 %v11687_v28, 16  ;;  %v12282_v26 = vpack.i.b16 %v11823_v18, %v11687_v28  ;;  %v26834_v28 = vld [vmem:[#allocation108_spill] sm:$0xff] }
 0x7a1   : > { %12530 = vxpose.xlu1.c.b16.cont [3/4] (short) (narrow) %v12270_v5, 16  ;;  %v12341_v5 = vshrl.u32 %v12094_v62, 16  ;;  %v12158_v25 = vpack.i.b16 %v12157_v35, %v12156_v40  ;;  %v9254_v62 = vsel %vm9175_vm1, %v26828_v12, -inf  ;;  %v26832_v35 = vld [vmem:[#allocation91_spill] sm:$0xff]  ;;  %v9269_v18 = vsel %vm9175_vm1, %v26834_v28, -inf }
 0x7a2   : > { %v23631_v2 = vpop.xlane.xlu0 %9189  ;;  %v12286_v52 = vpack.i.b16 %v12285_v34, %v12284_v46  ;;  %v26835_v46 = vld [vmem:[#allocation102_spill] sm:$0xff] }
 0x7a3   : > { %12514 = vxpose.xlu0.c.b16.cont [3/4] (short) (narrow) %v12266_v13, 16  ;;  %v23645_v27 = vpop.xlane.xlu1 %9198  ;;  %v12342_v13 = vpack.i.b16 %v12341_v5, %v12340_v11  ;;  %v26830_v5 = vld [vmem:[#allocation76_spill] sm:$0xff]  ;;  %v9260_v34 = vsel %vm9175_vm1, %v26835_v46, -inf }
 0x7a4   : > { %v9257_v33 = vsel %vm9175_vm1, %v26830_v5, -inf }
 0x7a5   : > { %12531 = vxpose.xlu1.c.b16.end [4/4] (short) (narrow) %v12334_v63, 16  ;;  %v12350_v63 = vpack.i.b16 %v12349_v15, %v12348_v45  ;;  %v26837_v45 = vld [vmem:[#allocation41_spill] sm:$0xff] }
 0x7a6   : > { %v23635_v3 = vpop.xlane.xlu0 %9207  ;;  %v9242_v15 = vsel %vm9175_vm1, %v26837_v45, -inf }
 0x7a7   : > { %12515 = vxpose.xlu0.c.b16.end [4/4] (short) (narrow) %v12330_v61, 16  ;;  %v23650_v1 = vpop.xlane.xlu1 %9192  ;;  %v12346_v61 = vpack.i.b16 %v12095_v48, %v11959_v57 }
 0x7a9   : > { %12560 = vxpose.xlu1.c.b16.start [1/4] (short) (narrow) %v12150_v29, 16 }
 0x7aa   : > { %v23647_v43 = vpop.xlane.xlu0 %9201 }
 0x7ab   : > { %12544 = vxpose.xlu0.c.b16.start [1/4] (short) (narrow) %v12146_v8, 16  ;;  %v23654_v55 = vpop.xlane.xlu1 %9210 }
 0x7ad   : > { %12561 = vxpose.xlu1.c.b16.cont [2/4] (short) (narrow) %v12214_v56, 16  ;;  %v26827_v56 = vld [vmem:[#allocation176_spill] sm:$0xff] }
 0x7ae   : > { %v23652_v42 = vpop.xlane.xlu0 %9204  ;;  %v9239_v50 = vsel %vm9175_vm1, %v26827_v56, -inf }
 0x7af   : > { %12545 = vxpose.xlu0.c.b16.cont [2/4] (short) (narrow) %v12210_v51, 16  ;;  %v26829_v51 = vld [vmem:[#allocation104_spill] sm:$0xff] }
 0x7b0   : > { %v23658_v49 = vpop.xlane.xlu1 %9222 }
 0x7b1   : > { %12562 = vxpose.xlu1.c.b16.cont [3/4] (short) (narrow) %v12278_v17, 16  ;;  %v9263_v17 = vsel %vm9175_vm1, %v26829_v51, -inf }
 0x7b2   : > { %v23656_v14 = vpop.xlane.xlu0 %9219 }
 0x7b3   : > { %12546 = vxpose.xlu0.c.b16.cont [3/4] (short) (narrow) %v12274_v6, 16 }
 0x7b4   : > { %v23662_v23 = vpop.xlane.xlu1 %9216 }
 0x7b5   : > { %12563 = vxpose.xlu1.c.b16.end [4/4] (short) (narrow) %v12342_v13, 16 }
 0x7b6   : > { %v23660_v29 = vpop.xlane.xlu0 %9213 }
 0x7b7   : > { %12547 = vxpose.xlu0.c.b16.end [4/4] (short) (narrow) %v12338_v53, 16  ;;  %v9236_v53 = vsel %vm9175_vm1, %v26832_v35, -inf }
 0x7b9   : > { %12592 = vxpose.xlu1.c.b16.start [1/4] (short) (narrow) %v12158_v25, 16  ;;  %v23666_v24 = vpop.xlane.xlu1 %9228 }
 0x7ba   : > { %v23664_v58 = vpop.xlane.xlu0 %9225 }
 0x7bb   : > { %12576 = vxpose.xlu0.c.b16.start [1/4] (short) (narrow) %v12154_v30, 16 }
 0x7bd   : > { %12593 = vxpose.xlu1.c.b16.cont [2/4] (short) (narrow) %v12222_v9, 16 }
 0x7bf   : > { %12577 = vxpose.xlu0.c.b16.cont [2/4] (short) (narrow) %v12218_v47, 16  ;;  %v12408_v8 = vpop.trf.xlu1  ;;  %v26836_v47 = vld [vmem:[#allocation61_spill] sm:$0xff] }
 0x7c1   : > { %12594 = vxpose.xlu1.c.b16.cont [3/4] (short) (narrow) %v12286_v52, 16  ;;  %v9275_v52 = vsel %vm9175_vm1, %v26836_v47, -inf }
 0x7c3   : > { %12578 = vxpose.xlu0.c.b16.cont [3/4] (short) (narrow) %v12282_v26, 16  ;;  %v26838_v26 = vld [vmem:[#allocation107_spill] sm:$0xff] }
 0x7c5   : > { %12595 = vxpose.xlu1.c.b16.end [4/4] (short) (narrow) %v12350_v63, 16  ;;  %v9299_v63 = vsel %vm9175_vm1, %v26838_v26, -inf }
 0x7c7   : > { %12579 = vxpose.xlu0.c.b16.end [4/4] (short) (narrow) %v12346_v61, 16  ;;  %v23668_v7 = vpop.xlane.xlu0 %9249  ;;  %v26839_v61 = vld [vmem:[#allocation106_spill] sm:$0xff] }
 0x7cb   : > { %v23676_v32 = vpop.xlane.xlu0 %9252 }
 0x7cf   : > { %v12440_v11 = vpop.trf.xlu1 }
 0x7d0   : > { %v12676_v44 = vcombine.low %v23605_v20, %v12440_v11 }
 0x7d1   : > { %v12424_v6 = vpop.trf.xlu0 }
 0x7d2   : > { %9234 = vmax.xlane.f32.xlu1 %v9233_v54  ;;  %v12608_v13 = vcombine.low %v23537_v60, %v12424_v6  ;;  %v23691_v37 = vrot.slane %v12676_v44, %v26833_v36  ;;  %v9266_v54 = vsel %vm9175_vm1, %v26839_v61, -inf  ;;  %v26843_v6 = vld [vmem:[#allocation98_spill] sm:$0xff] }
 0x7d3   : > { %v9377_v44 = vsub.f32 %v26843_v6, %v23652_v42 }
 0x7d4   : > { %9231 = vmax.xlane.f32.xlu0 %v9230_v4  ;;  %v23696_v20 = vrot.slane %v12608_v13, %v26833_v36  ;;  %v26840_v4 = vld [vmem:[#allocation66_spill] sm:$0xff] }
 0x7d6   : > { %9240 = vmax.xlane.f32.xlu1 %v9239_v50  ;;  %v26841_v50 = vld [vmem:[#allocation62_spill] sm:$0xff] }
 0x7d8   : > { %9255 = vmax.xlane.f32.xlu0 %v9254_v62  ;;  %v9281_v62 = vsel %vm9175_vm1, %v26841_v50, -inf }
 0x7da   : > { %9264 = vmax.xlane.f32.xlu1 %v9263_v17  ;;  %v26842_v17 = vld [vmem:[#allocation55_spill] sm:$0xff] }
 0x7db   : > { %v9272_v11 = vsel %vm9175_vm1, %v26842_v17, -inf }
 0x7dc   : > { %9258 = vmax.xlane.f32.xlu0 %v9257_v33 }
 0x7de   : > { %9246 = vmax.xlane.f32.xlu1 %v9245_v59  ;;  %v26844_v59 = vld [vmem:[#allocation111_spill] sm:$0xff] }
 0x7df   : > { %v12472_v40 = vpop.trf.xlu1  ;;  %v9305_v13 = vsel %vm9175_vm1, %v26844_v59, -inf }
 0x7e0   : > { %9237 = vmax.xlane.f32.xlu0 %v9236_v53  ;;  %v12684_v25 = vcombine.low %v12408_v8, %v12472_v40  ;;  %v9369_v8 = vsub.f32 %v26840_v4, %v23633_v10  ;;  %v26845_v53 = vld [vmem:[#allocation105_spill] sm:$0xff]  ;;  %v9450_v40 = vmul.f32 1.442695, %v9377_v44 }
 0x7e1   : > { %v12456_v30 = vpop.trf.xlu0  ;;  %v9296_v10 = vsel %vm9175_vm1, %v26845_v53, -inf }
 0x7e2   : > { %9270 = vmax.xlane.f32.xlu1 %v9269_v18  ;;  %v12616_v9 = vcombine.low %v23541_v16, %v12456_v30  ;;  %v23700_v60 = vrot.slane %v12684_v25, %v26833_v36  ;;  %v9434_v33 = vmul.f32 1.442695, %v9369_v8  ;;  %v26846_v25 = vld [vmem:[#allocation95_spill] sm:$0xff]  ;;  %v26847_v30 = vld [vmem:[#allocation65_spill] sm:$0xff] }
 0x7e3   : > { %v9287_v18 = vsel %vm9175_vm1, %v26846_v25, -inf  ;;  %v26851_v8 = vld [vmem:[#allocation109_spill] sm:$0xff] }
 0x7e4   : > { %9261 = vmax.xlane.f32.xlu0 %v9260_v34  ;;  %v23705_v57 = vrot.slane %v12616_v9, %v26833_v36  ;;  %17898 = vpow2.f32 %v9434_v33  ;;  %v9368_v9 = vsub.f32 %v26847_v30, %v23594_v22  ;;  %v26848_v34 = vld [vmem:[#allocation226_spill] sm:$0xff]  ;;  %v26853_v33 = vld [vmem:[#allocation60_spill] sm:$0xff]  ;;  %v26866_v16 = vld [vmem:[#allocation101_spill] sm:$0xff] }
 0x7e5   : > { %v9278_v42 = vsel %vm9175_vm1, %v26848_v34, -inf  ;;  %17900 = vpow2.f32 %v9450_v40  ;;  %v9293_v6 = vsel %vm9175_vm1, %v26853_v33, -inf  ;;  %v26854_v40 = vld [vmem:[#allocation211_spill] sm:$0xff]  ;;  %v26855_v30 = vld [vmem:[#allocation100_spill] sm:$0xff]  ;;  %v9323_v48 = vsel %vm9175_vm1, %v26866_v16, -inf }
 0x7e6   : > { %9276 = vmax.xlane.f32.xlu1 %v9275_v52  ;;  %v26849_v52 = vld [vmem:[#allocation45_spill] sm:$0xff] }
 0x7e8   : > { %9243 = vmax.xlane.f32.xlu0 %v9242_v15  ;;  %v9311_v15 = vsel %vm9175_vm1, %v26849_v52, -inf }
 0x7ea   : > { %9300 = vmax.xlane.f32.xlu1 %v9299_v63  ;;  %v9432_v63 = vmul.f32 1.442695, %v9368_v9  ;;  %v9379_v9 = vsub.f32 %v26855_v30, %v23654_v55  ;;  %v23769_v30 = vld [vmem:[#allocation5] sm:$0xff] }
 0x7ec   : > { %9267 = vmax.xlane.f32.xlu0 %v9266_v54  ;;  %v26850_v54 = vld [vmem:[#allocation97_spill] sm:$0xff]  ;;  %17902 = vpow2.f32 %v9432_v63  ;;  %v26858_v63 = vld [vmem:[#allocation118_spill] sm:$0xff] }
 0x7ed   : > { %v9376_v4 = vsub.f32 %v26850_v54, %v23647_v43  ;;  %v9284_v43 = vsel %vm9175_vm1, %v26854_v40, -inf }
 0x7ee   : > { %9282 = vmax.xlane.f32.xlu1 %v9281_v62  ;;  %v9302_v62 = vsel %vm9175_vm1, %v26851_v8, -inf  ;;  %v17899_v44 = vpop.eup %17898 }
 0x7ef   : > { %v17901_v54 = vpop.eup %17900 }
 0x7f0   : > { %9273 = vmax.xlane.f32.xlu0 %v9272_v11  ;;  %v26852_v11 = vld [vmem:[#allocation39_spill] sm:$0xff] }
 0x7f1   : > { %v9371_v22 = vsub.f32 %v26852_v11, %v23629_v38 }
 0x7f2   : > { %9306 = vmax.xlane.f32.xlu1 %v9305_v13  ;;  %v9448_v13 = vmul.f32 1.442695, %v9376_v4  ;;  %v9308_v4 = vsel %vm9175_vm1, %v26858_v63, -inf }
 0x7f4   : > { %9297 = vmax.xlane.f32.xlu0 %v9296_v10  ;;  %v23747_v10 = vld [vmem:[#allocation5 + $0x8] sm:$0xff]  ;;  %17904 = vpow2.f32 %v9448_v13 }
 0x7f5   : > { %v23763_v55 = vmul.f32 %v17901_v54, %v23747_v10 }
 0x7f6   : > { %9288 = vmax.xlane.f32.xlu1 %v9287_v18  ;;  %v9438_v18 = vmul.f32 1.442695, %v9371_v22  ;;  %v26860_v22 = vld [vmem:[#allocation63_spill] sm:$0xff] }
 0x7f7   : > { %26859 = vst [vmem:[#allocation136_spill] sm:$0xff] %v23763_v55 }
 0x7f8   : > { %9279 = vmax.xlane.f32.xlu0 %v9278_v42  ;;  %v26856_v42 = vld [vmem:[#allocation112_spill] sm:$0xff]  ;;  %17906 = vpow2.f32 %v9438_v18  ;;  %v9659_v18 = vsel %vm9175_vm1, %v23763_v55, 0.0  ;;  %v12504_v55 = vpop.trf.xlu1 }
 0x7f9   : > { %v9317_v38 = vsel %vm9175_vm1, %v26856_v42, -inf }
 0x7fa   : > { %9312 = vmax.xlane.f32.xlu1 %v9311_v15  ;;  %v23756_v15 = vmul.f32 %v17899_v44, %v23747_v10  ;;  %v26861_v44 = vld [vmem:[#allocation209_spill] sm:$0xff] }
 0x7fb   : > { %v9290_v13 = vsel %vm9175_vm1, %v26861_v44, -inf }
 0x7fc   : > { %9303 = vmax.xlane.f32.xlu0 %v9302_v62  ;;  %26857 = vst [vmem:[#allocation125_spill] sm:$0xff] %v23756_v15  ;;  %v9454_v62 = vmul.f32 1.442695, %v9379_v9  ;;  %v9635_v11 = vsel %vm9175_vm1, %v23756_v15, 0.0 }
 0x7fe   : > { %9294 = vmax.xlane.f32.xlu1 %v9293_v6  ;;  %v9370_v6 = vsub.f32 %v26860_v22, %v23554_v0  ;;  %17908 = vpow2.f32 %v9454_v62  ;;  %v26865_v62 = vld [vmem:[#allocation59_spill] sm:$0xff] }
 0x800   : > { %9285 = vmax.xlane.f32.xlu0 %v9284_v43  ;;  %v17903_v43 = vpop.eup %17902  ;;  %v9436_v9 = vmul.f32 1.442695, %v9370_v6 }
 0x801   : > { %v17905_v22 = vpop.eup %17904 }
 0x802   : > { %9318 = vmax.xlane.f32.xlu1 %v9317_v38  ;;  %v26862_v38 = vld [vmem:[#allocation93_spill] sm:$0xff]  ;;  %v17907_v6 = vpop.eup %17906  ;;  %17910 = vpow2.f32 %v9436_v9 }
 0x803   : > { %v9378_v54 = vsub.f32 %v26862_v38, %v23635_v3  ;;  %v23784_v3 = vld [vmem:[#allocation5 + $0x18] sm:$0xff] }
 0x804   : > { %9309 = vmax.xlane.f32.xlu0 %v9308_v4  ;;  %v26863_v4 = vld [vmem:[#allocation121_spill] sm:$0xff]  ;;  %v23796_v9 = vmul.f32 %v17907_v6, %v23784_v3 }
 0x805   : > { %v9314_v0 = vsel %vm9175_vm1, %v26863_v4, -inf  ;;  %v9452_v15 = vmul.f32 1.442695, %v9378_v54  ;;  %v23791_v4 = vmul.f32 %v17905_v22, %v23769_v30  ;;  %v26871_v22 = vld [vmem:[#allocation216_spill] sm:$0xff] }
 0x806   : > { %9636 = vadd.xlane.f32.xlu1 %v9635_v11  ;;  %v23778_v11 = vmul.f32 %v17903_v43, %v23769_v30  ;;  %26870 = vst [vmem:[#allocation129_spill] sm:$0xff] %v23796_v9 }
 0x807   : > { %26868 = vst [vmem:[#allocation133_spill] sm:$0xff] %v23791_v4  ;;  %17912 = vpow2.f32 %v9452_v15 }
 0x808   : > { %9291 = vmax.xlane.f32.xlu0 %v9290_v13  ;;  %26864 = vst [vmem:[#allocation46_spill] sm:$0xff] %v23778_v11  ;;  %v9373_v13 = vsub.f32 %v26865_v62, %v23650_v1  ;;  %v9632_v43 = vsel %vm9175_vm1, %v23778_v11, 0.0  ;;  %v12488_v1 = vpop.trf.xlu0  ;;  %v26869_v62 = vld [vmem:[#allocation116_spill] sm:$0xff] }
 0x809   : > { %v9347_v16 = vsel %vm9175_vm1, %v26869_v62, -inf }
 0x80a   : > { %9660 = vadd.xlane.f32.xlu1 %v9659_v18  ;;  %v26867_v18 = vld [vmem:[#allocation218_spill] sm:$0xff] }
 0x80b   : > { %v9381_v38 = vsub.f32 %v26867_v18, %v23662_v23  ;;  %v9656_v23 = vsel %vm9175_vm1, %v23791_v4, 0.0  ;;  %v12536_v18 = vpop.trf.xlu1  ;;  %v23809_v4 = vld [vmem:[#allocation5 + $0x10] sm:$0xff] }
 0x80c   : > { %9315 = vmax.xlane.f32.xlu0 %v9314_v0  ;;  %v9442_v0 = vmul.f32 1.442695, %v9373_v13  ;;  %v9372_v13 = vsub.f32 %v26871_v22, %v23631_v2  ;;  %v12520_v11 = vpop.trf.xlu0  ;;  %v26874_v22 = vld [vmem:[#allocation103_spill] sm:$0xff] }
 0x80d   : > { %v9458_v54 = vmul.f32 1.442695, %v9381_v38 }
 0x80e   : > { %9324 = vmax.xlane.f32.xlu1 %v9323_v48  ;;  %v17909_v48 = vpop.eup %17908  ;;  %17914 = vpow2.f32 %v9442_v0  ;;  %v9440_v0 = vmul.f32 1.442695, %v9372_v13 }
 0x80f   : > { %v23805_v6 = vmul.f32 %v17909_v48, %v23784_v3  ;;  %17916 = vpow2.f32 %v9458_v54  ;;  %v17911_v38 = vpop.eup %17910  ;;  %v26875_v48 = vld [vmem:[#allocation219_spill] sm:$0xff]  ;;  %v26876_v54 = vld [vmem:[#allocation110_spill] sm:$0xff] }
 0x810   : > { %9633 = vadd.xlane.f32.xlu0 %v9632_v43  ;;  %v9641_v43 = vsel %vm9175_vm1, %v23796_v9, 0.0  ;;  %v9380_v9 = vsub.f32 %v26874_v22, %v23660_v29  ;;  %v9344_v62 = vsel %vm9175_vm1, %v26876_v54, -inf  ;;  %17918 = vpow2.f32 %v9440_v0  ;;  %v23824_v22 = vld [vmem:[#allocation5 + $0x28] sm:$0xff] }
 0x811   : > { %26872 = vst [vmem:[#allocation230_spill] sm:$0xff] %v23805_v6  ;;  %v9665_v2 = vsel %vm9175_vm1, %v23805_v6, 0.0  ;;  %v17913_v44 = vpop.eup %17912  ;;  %v26878_v6 = vld [vmem:[#allocation42_spill] sm:$0xff] }
 0x812   : > { %9348 = vmax.xlane.f32.xlu1 %v9347_v16  ;;  %v26873_v16 = vld [vmem:[#allocation96_spill] sm:$0xff]  ;;  %v9329_v63 = vsel %vm9175_vm1, %v26878_v6, -inf  ;;  %v9456_v29 = vmul.f32 1.442695, %v9380_v9 }
 0x813   : > { %v9320_v15 = vsel %vm9175_vm1, %v26873_v16, -inf  ;;  %v12552_v16 = vpop.trf.xlu0 }
 0x814   : > { %9657 = vadd.xlane.f32.xlu0 %v9656_v23  ;;  %v12568_v23 = vpop.trf.xlu1  ;;  %17920 = vpow2.f32 %v9456_v29 }
 0x815   : > { %v12692_v13 = vcombine.low %v12504_v55, %v12568_v23  ;;  %v23831_v55 = vmul.f32 %v17913_v44, %v23809_v4 }
 0x816   : > { %9642 = vadd.xlane.f32.xlu1 %v9641_v43  ;;  %v9375_v43 = vsub.f32 %v26875_v48, %v23645_v27  ;;  %v26879_v48 = vld [vmem:[#allocation225_spill] sm:$0xff] }
 0x817   : > { %v9383_v54 = vsub.f32 %v26879_v48, %v23658_v49 }
 0x818   : > { %9321 = vmax.xlane.f32.xlu0 %v9320_v15  ;;  %v23820_v15 = vmul.f32 %v17911_v38, %v23809_v4  ;;  %v17915_v42 = vpop.eup %17914  ;;  %v9446_v27 = vmul.f32 1.442695, %v9375_v43 }
 0x819   : > { %v17917_v9 = vpop.eup %17916  ;;  %v23839_v49 = vmul.f32 %v17915_v42, %v23824_v22 }
 0x81a   : > { %9666 = vadd.xlane.f32.xlu1 %v9665_v2  ;;  %26877 = vst [vmem:[#allocation141_spill] sm:$0xff] %v23820_v15  ;;  %v12624_v2 = vcombine.low %v12488_v1, %v12552_v16  ;;  %v9638_v38 = vsel %vm9175_vm1, %v23820_v15, 0.0  ;;  %v26880_v16 = vld [vmem:[#allocation120_spill] sm:$0xff]  ;;  %17922 = vpow2.f32 %v9446_v27  ;;  %v23849_v29 = vmul.f32 %v17917_v9, %v23824_v22 }
 0x81b   : > { %v9353_v23 = vsel %vm9175_vm1, %v26880_v16, -inf  ;;  %v9647_v27 = vsel %vm9175_vm1, %v23839_v49, 0.0 }
 0x81c   : > { %9345 = vmax.xlane.f32.xlu0 %v9344_v62  ;;  %v12699_v62 = vrot.slane %v12692_v13, %v26833_v36  ;;  %v12631_v43 = vrot.slane %v12624_v2, %v26833_v36  ;;  %v9462_v13 = vmul.f32 1.442695, %v9383_v54 }
 0x81e   : > { %9330 = vmax.xlane.f32.xlu1 %v9329_v63  ;;  %v12708_v63 = vcombine.low %v23691_v37, %v23700_v60  ;;  %17924 = vpow2.f32 %v9462_v13 }
 0x81f   : > { %v12600_v40 = vpop.trf.xlu1 }
 0x820   : > { %v12700_v0 = vcombine.low %v12536_v18, %v12600_v40  ;;  %9639 = vadd.xlane.f32.xlu0 %v9638_v38  ;;  %v26881_v40 = vld [vmem:[#allocation214_spill] sm:$0xff]  ;;  %v9662_v38 = vsel %vm9175_vm1, %v23831_v55, 0.0  ;;  %v23854_v2 = vrot.slane %v12708_v63, %v19211_v21  ;;  %v26885_v63 = vld [vmem:[#allocation43_spill] sm:$0xff] }
 0x821   : > { %v12584_v1 = vpop.trf.xlu0  ;;  %v9374_v18 = vsub.f32 %v26881_v40, %v23622_v31  ;;  %v26883_v31 = vcombine.high %v23691_v37, %v23700_v60  ;;  %v26886_v40 = vld [vmem:[#allocation94_spill] sm:$0xff]  ;;  %v23870_v60 = vld [vmem:[#allocation5 + $0x20] sm:$0xff] }
 0x822   : > { %v12707_v44 = vrot.slane %v12700_v0, %v26833_v36  ;;  %v12632_v48 = vcombine.low %v12520_v11, %v12584_v1  ;;  %9354 = vmax.xlane.f32.xlu1 %v9353_v23  ;;  %v12640_v11 = vcombine.low %v23696_v20, %v23705_v57  ;;  %26882 = vst [vmem:[#allocation137_spill] sm:$0xff] %v23854_v2  ;;  %v17919_v23 = vpop.eup %17918  ;;  %v9326_v37 = vsel %vm9175_vm1, %v26886_v40, -inf }
 0x823   : > { %v12723_v54 = vrot.slane %v26883_v31, %v19211_v21 }
 0x824   : > { %v12724_v15 = vcombine.low %v12699_v62, %v12707_v44  ;;  %v12725_v16 = vcombine.high %v12699_v62, %v12707_v44  ;;  %v12639_v42 = vrot.slane %v12632_v48, %v26833_v36  ;;  %9663 = vadd.xlane.f32.xlu0 %v9662_v38  ;;  %v9444_v44 = vmul.f32 1.442695, %v9374_v18 }
 0x825   : > { %v9382_v48 = vsub.f32 %v26885_v63, %v23656_v14  ;;  %v23883_v18 = vrot.slane %v12640_v11, %v19211_v21  ;;  %v26891_v14 = vcombine.high %v23696_v20, %v23705_v57  ;;  %v26894_v11 = vld [vmem:[#allocation40_spill] sm:$0xff] }
 0x826   : > { %v23863_v62 = vrot.slane %v12724_v15, %v19211_v21  ;;  %v12739_v0 = vrot.slane %v12725_v16, %v19211_v21  ;;  %v12656_v9 = vcombine.low %v12631_v43, %v12639_v42  ;;  %v12657_v1 = vcombine.high %v12631_v43, %v12639_v42  ;;  %9648 = vadd.xlane.f32.xlu1 %v9647_v27 }
 0x827   : > { %v9671_v43 = vsel %vm9175_vm1, %v23849_v29, 0.0  ;;  %26890 = vst [vmem:[#allocation138_spill] sm:$0xff] %v23883_v18  ;;  %v12655_v13 = vrot.slane %v26891_v14, %v19211_v21  ;;  %v9385_v63 = vsub.f32 %v26894_v11, %v23666_v24  ;;  %17926 = vpow2.f32 %v9444_v44  ;;  %v26898_v14 = vld [vmem:[#allocation158_spill] sm:$0xff]  ;;  %v26900_v44 = vld [vmem:[#allocation172_spill] sm:$0xff] }
 0x828   : > { %26884 = vst [vmem:[#allocation139_spill] sm:$0xff] %v23863_v62  ;;  %v23874_v15 = vcombine.high %v23854_v2, %v23863_v62  ;;  %v23876_v38 = vcombine.low %v12723_v54, %v12739_v0  ;;  %v23878_v16 = vcombine.high %v12723_v54, %v12739_v0  ;;  %9327 = vmax.xlane.f32.xlu0 %v9326_v37  ;;  %v26893_v54 = vld [vmem:[#allocation114_spill] sm:$0xff] }
 0x829   : > { %v23890_v42 = vrot.slane %v12656_v9, %v19211_v21  ;;  %v12671_v31 = vrot.slane %v12657_v1, %v19211_v21  ;;  %v9350_v27 = vsel %vm9175_vm1, %v26893_v54, -inf  ;;  %v23896_v0 = vmul.f32 %v17919_v23, %v23870_v60  ;;  %v17921_v9 = vpop.eup %17920  ;;  %v23922_v2 = vld [vmem:[#allocation5 + $0x38] sm:$0xff] }
 0x82a   : > { %26887 = vst [vmem:[#allocation49_spill] sm:$0xff] %v23874_v15  ;;  %26888 = vst [vmem:[#allocation231_spill] sm:$0xff] %v23876_v38  ;;  %9672 = vadd.xlane.f32.xlu1 %v9671_v43  ;;  %v9460_v1 = vmul.f32 1.442695, %v9382_v48  ;;  %v12754_v43 = vshrl.u32 %v23874_v15, 16  ;;  %v9335_v23 = vsel %vm9175_vm1, %v26898_v14, -inf  ;;  %v17923_v21 = vpop.eup %17922  ;;  %v23927_v36 = vmul.f32 %v17921_v9, %v23870_v60 }
 0x82b   : > { %26889 = vst [vmem:[#allocation142_spill] sm:$0xff] %v23878_v16  ;;  %26892 = vst [vmem:[#allocation140_spill] sm:$0xff] %v23890_v42  ;;  %v23902_v37 = vcombine.high %v23883_v18, %v23890_v42  ;;  %v23904_v20 = vcombine.low %v12655_v13, %v12671_v31  ;;  %v23906_v57 = vcombine.high %v12655_v13, %v12671_v31  ;;  %v12760_v24 = vshrl.u32 %v23876_v38, 16 }
 0x82c   : > { %9351 = vmax.xlane.f32.xlu0 %v9350_v27  ;;  %v12766_v11 = vshrl.u32 %v23878_v16, 16  ;;  %v9466_v62 = vmul.f32 1.442695, %v9385_v63  ;;  %v9644_v18 = vsel %vm9175_vm1, %v23896_v0, 0.0  ;;  %v23940_v16 = vmul.f32 %v17923_v21, %v23922_v2 }
 0x82d   : > { %26895 = vst [vmem:[#allocation48_spill] sm:$0xff] %v23902_v37  ;;  %26896 = vst [vmem:[#allocation149_spill] sm:$0xff] %v23904_v20  ;;  %v12753_v13 = vshrl.u32 %v23902_v37, 16  ;;  %v12759_v48 = vshrl.u32 %v23904_v20, 16  ;;  %v12765_v27 = vshrl.u32 %v23906_v57, 16  ;;  %v9393_v20 = vsub.f32 %v26900_v44, %v23676_v32  ;;  %v23955_v44 = vld [vmem:[#allocation5 + $0x30] sm:$0xff] }
 0x82e   : > { %26897 = vst [vmem:[#allocation145_spill] sm:$0xff] %v23906_v57  ;;  %9336 = vmax.xlane.f32.xlu1 %v9335_v23  ;;  %v17925_v23 = vpop.eup %17924  ;;  %v26903_v57 = vld [vmem:[#allocation70_spill] sm:$0xff]  ;;  %v25982_v15 = vmov 0.0   ;;  %17928 = vpow2.f32 %v9460_v1  ;;  %v9668_v32 = vsel %vm9175_vm1, %v23927_v36, 0.0  ;;  %v9653_v9 = vsel %vm9175_vm1, %v23940_v16, 0.0 }
 0x82f   : > { %v23929_v37 = vpack.i.b16 %v12754_v43, %v12753_v13  ;;  %v23933_v38 = vpack.i.b16 %v12760_v24, %v12759_v48  ;;  %v23935_v31 = vpack.i.b16 %v12766_v11, %v12765_v27  ;;  %v9359_v63 = vsel %vm9175_vm1, %v26903_v57, -inf  ;;  %17401 = vmatprep.subr.bf16.mxu0 %v25982_v15  ;;  %17413 = vmatprep.subr.bf16.mxu1 %v25982_v15  ;;  %v26905_v24 = vld [vmem:[#allocation92_spill] sm:$0xff]  ;;  %v26906_v13 = vld [vmem:[#allocation223_spill] sm:$0xff] }
 0x830   : > { %9645 = vadd.xlane.f32.xlu0 %v9644_v18  ;;  %17930 = vpow2.f32 %v9466_v62  ;;  %v9482_v18 = vmul.f32 1.442695, %v9393_v20  ;;  %v23949_v43 = vmul.f32 %v17925_v23, %v23922_v2  ;;  %v9384_v11 = vsub.f32 %v26905_v24, %v23664_v58  ;;  %v26907_v48 = vld [vmem:[#allocation71_spill] sm:$0xff]  ;;  %v26908_v23 = vld [vmem:[#allocation68_spill] sm:$0xff] }
 0x831   : > { %26899 = vst [vmem:[#allocation147_spill] sm:$0xff] %v23929_v37  ;;  %26901 = vst [vmem:[#allocation143_spill] sm:$0xff] %v23933_v38  ;;  %v17927_v21 = vpop.eup %17926  ;;  %v9332_v1 = vsel %vm9175_vm1, %v26906_v13, -inf  ;;  %v9392_v27 = vsub.f32 %v26907_v48, %v23668_v7 }
 0x832   : > { %26902 = vst [vmem:[#allocation150_spill] sm:$0xff] %v23935_v31  ;;  %9360 = vmax.xlane.f32.xlu1 %v9359_v63  ;;  %26904 = vst [vmem:[#allocation146_spill] sm:$0xff] %v23949_v43  ;;  %17932 = vpow2.f32 %v9482_v18  ;;  %v9677_v62 = vsel %vm9175_vm1, %v23949_v43, 0.0  ;;  %v9464_v20 = vmul.f32 1.442695, %v9384_v11  ;;  %v9356_v63 = vsel %vm9175_vm1, %v26908_v23, -inf }
 0x833   : > { %v23964_v58 = vmul.f32 %v17927_v21, %v23955_v44  ;;  %v26909_v18 = vld [vmem:[#allocation221_spill] sm:$0xff] }
 0x834   : > { %9669 = vadd.xlane.f32.xlu0 %v9668_v32  ;;  %17934 = vpow2.f32 %v9464_v20 }
 0x835   : > { %v9650_v11 = vsel %vm9175_vm1, %v23964_v58, 0.0 }
 0x836   : > { %9654 = vadd.xlane.f32.xlu1 %v9653_v9  ;;  %v9341_v9 = vsel %vm9175_vm1, %v26909_v18, -inf }
 0x838   : > { %9333 = vmax.xlane.f32.xlu0 %v9332_v1  ;;  %v17929_v32 = vpop.eup %17928  ;;  %v9480_v1 = vmul.f32 1.442695, %v9392_v27 }
 0x839   : > { %v23971_v7 = vmul.f32 %v17929_v32, %v23955_v44 }
 0x83a   : > { %9678 = vadd.xlane.f32.xlu1 %v9677_v62  ;;  %v17931_v24 = vpop.eup %17930  ;;  %v26911_v62 = vld [vmem:[#allocation85_spill] sm:$0xff]  ;;  %17936 = vpow2.f32 %v9480_v1 }
 0x83b   : > { %26910 = vst [vmem:[#allocation148_spill] sm:$0xff] %v23971_v7  ;;  %v9365_v21 = vsel %vm9175_vm1, %v26911_v62, -inf  ;;  %v23976_v48 = vmul.f32 %v17931_v24, %v23747_v10  ;;  %v9674_v20 = vsel %vm9175_vm1, %v23971_v7, 0.0  ;;  %v26915_v1 = vld [vmem:[#allocation69_spill] sm:$0xff] }
 0x83c   : > { %9357 = vmax.xlane.f32.xlu0 %v9356_v63  ;;  %v17933_v63 = vpop.eup %17932 }
 0x83d   : > { %26912 = vst [vmem:[#allocation144_spill] sm:$0xff] %v23976_v48  ;;  %v9683_v27 = vsel %vm9175_vm1, %v23976_v48, 0.0  ;;  %v23983_v32 = vmul.f32 %v17933_v63, %v23747_v10 }
 0x83e   : > { %9342 = vmax.xlane.f32.xlu1 %v9341_v9  ;;  %v26914_v9 = vld [vmem:[#allocation99_spill] sm:$0xff]  ;;  %v17935_v15 = vpop.eup %17934 }
 0x83f   : > { %26913 = vst [vmem:[#allocation157_spill] sm:$0xff] %v23983_v32  ;;  %v9707_v24 = vsel %vm9175_vm1, %v23983_v32, 0.0 }
 0x840   : > { %9651 = vadd.xlane.f32.xlu0 %v9650_v11  ;;  %v9338_v11 = vsel %vm9175_vm1, %v26914_v9, -inf }
 0x842   : > { %9366 = vmax.xlane.f32.xlu1 %v9365_v21  ;;  %v9362_v21 = vsel %vm9175_vm1, %v26915_v1, -inf }
 0x844   : > { %9675 = vadd.xlane.f32.xlu0 %v9674_v20  ;;  %v23992_v20 = vmul.f32 %v17935_v15, %v23769_v30  ;;  %v17937_v31 = vpop.eup %17936 }
 0x846   : > { %9684 = vadd.xlane.f32.xlu1 %v9683_v27  ;;  %26916 = vst [vmem:[#allocation155_spill] sm:$0xff] %v23992_v20  ;;  %v9680_v63 = vsel %vm9175_vm1, %v23992_v20, 0.0  ;;  %v23997_v27 = vmul.f32 %v17937_v31, %v23769_v30 }
 0x848   : > { %9339 = vmax.xlane.f32.xlu0 %v9338_v11  ;;  %26917 = vst [vmem:[#allocation153_spill] sm:$0xff] %v23997_v27  ;;  %v9704_v11 = vsel %vm9175_vm1, %v23997_v27, 0.0 }
 0x84a   : > { %9708 = vadd.xlane.f32.xlu1 %v9707_v24 }
 0x84c   : > { %9363 = vmax.xlane.f32.xlu0 %v9362_v21  ;;  %v26918_v21 = vmov 0.0  }
 0x84d   : > { %17409 = vmatprep.mubr.msk.bf16.mxu0 %vm18446_vm2, %v26918_v21  ;;  %17421 = vmatprep.mubr.msk.bf16.mxu1 %vm18446_vm2, %v26918_v21 }
 0x850   : > { %9681 = vadd.xlane.f32.xlu0 %v9680_v63 }
 0x854   : > { %9705 = vadd.xlane.f32.xlu0 %v9704_v11 }
 0x85f   : > { %v9235_v24 = vpop.xlane.xlu1 %9234 }
 0x860   : > { %v9387_v38 = vsub.f32 %v26825_v19, %v9235_v24 }
 0x861   : > { %v9232_v37 = vpop.xlane.xlu0 %9231 }
 0x862   : > { %v9470_v32 = vmul.f32 1.442695, %v9387_v38  ;;  %v9386_v15 = vsub.f32 %v26826_v39, %v9232_v37 }
 0x863   : > { %v9241_v48 = vpop.xlane.xlu1 %9240 }
 0x864   : > { %17938 = vpow2.f32 %v9470_v32  ;;  %v9468_v31 = vmul.f32 1.442695, %v9386_v15  ;;  %v9389_v63 = vsub.f32 %v26827_v56, %v9241_v48 }
 0x865   : > { %v9256_v11 = vpop.xlane.xlu0 %9255 }
 0x866   : > { %17940 = vpow2.f32 %v9468_v31  ;;  %v9394_v19 = vsub.f32 %v26828_v12, %v9256_v11  ;;  %v9474_v37 = vmul.f32 1.442695, %v9389_v63 }
 0x867   : > { %v9265_v24 = vpop.xlane.xlu1 %9264 }
 0x868   : > { %v9484_v38 = vmul.f32 1.442695, %v9394_v19  ;;  %v9397_v39 = vsub.f32 %v26829_v51, %v9265_v24 }
 0x869   : > { %v9259_v27 = vpop.xlane.xlu0 %9258 }
 0x86a   : > { %17942 = vpow2.f32 %v9484_v38  ;;  %v9395_v20 = vsub.f32 %v26830_v5, %v9259_v27  ;;  %v9490_v43 = vmul.f32 1.442695, %v9397_v39 }
 0x86b   : > { %v9247_v42 = vpop.xlane.xlu1 %9246  ;;  %17944 = vpow2.f32 %v9474_v37 }
 0x86c   : > { %v9486_v7 = vmul.f32 1.442695, %v9395_v20  ;;  %v9391_v32 = vsub.f32 %v26831_v41, %v9247_v42 }
 0x86d   : > { %v9238_v56 = vpop.xlane.xlu0 %9237 }
 0x86e   : > { %v17939_v48 = vpop.eup %17938  ;;  %17946 = vpow2.f32 %v9486_v7  ;;  %v9388_v12 = vsub.f32 %v26832_v35, %v9238_v56  ;;  %v9478_v11 = vmul.f32 1.442695, %v9391_v32 }
 0x86f   : > { %v9271_v15 = vpop.xlane.xlu1 %9270  ;;  %v24014_v31 = vmul.f32 %v17939_v48, %v23784_v3  ;;  %17948 = vpow2.f32 %v9490_v43 }
 0x870   : > { %v17941_v51 = vpop.eup %17940  ;;  %v9472_v63 = vmul.f32 1.442695, %v9388_v12  ;;  %v9399_v5 = vsub.f32 %v26834_v28, %v9271_v15 }
 0x871   : > { %v9262_v27 = vpop.xlane.xlu0 %9261  ;;  %v9689_v20 = vsel %vm9175_vm1, %v24014_v31, 0.0  ;;  %v24020_v41 = vmul.f32 %v17941_v51, %v23809_v4 }
 0x872   : > { %17950 = vpow2.f32 %v9472_v63  ;;  %v9396_v35 = vsub.f32 %v26835_v46, %v9262_v27  ;;  %9690 = vadd.xlane.f32.xlu1 %v9689_v20  ;;  %v9494_v28 = vmul.f32 1.442695, %v9399_v5 }
 0x873   : > { %v9277_v42 = vpop.xlane.xlu1 %9276  ;;  %v9686_v7 = vsel %vm9175_vm1, %v24020_v41, 0.0  ;;  %17952 = vpow2.f32 %v9478_v11 }
 0x874   : > { %v17943_v43 = vpop.eup %17942  ;;  %v9488_v19 = vmul.f32 1.442695, %v9396_v35  ;;  %9687 = vadd.xlane.f32.xlu0 %v9686_v7  ;;  %v9401_v24 = vsub.f32 %v26836_v47, %v9277_v42 }
 0x875   : > { %v9244_v38 = vpop.xlane.xlu0 %9243  ;;  %v24027_v39 = vmul.f32 %v17943_v43, %v23809_v4  ;;  %v17945_v46 = vpop.eup %17944 }
 0x876   : > { %17954 = vpow2.f32 %v9488_v19  ;;  %v9390_v37 = vsub.f32 %v26837_v45, %v9244_v38  ;;  %v9498_v15 = vmul.f32 1.442695, %v9401_v24  ;;  %v24040_v20 = vmul.f32 %v17945_v46, %v23824_v22 }
 0x877   : > { %v9301_v32 = vpop.xlane.xlu1 %9300  ;;  %v9710_v56 = vsel %vm9175_vm1, %v24027_v39, 0.0  ;;  %17956 = vpow2.f32 %v9494_v28 }
 0x878   : > { %v17947_v48 = vpop.eup %17946  ;;  %v9476_v12 = vmul.f32 1.442695, %v9390_v37  ;;  %9711 = vadd.xlane.f32.xlu0 %v9710_v56  ;;  %v9409_v51 = vsub.f32 %v26838_v26, %v9301_v32  ;;  %v9695_v38 = vsel %vm9175_vm1, %v24040_v20, 0.0 }
 0x879   : > { %v9268_v47 = vpop.xlane.xlu0 %9267  ;;  %v24034_v63 = vmul.f32 %v17947_v48, %v23784_v3  ;;  %v17949_v11 = vpop.eup %17948 }
 0x87a   : > { %17958 = vpow2.f32 %v9476_v12  ;;  %v9398_v45 = vsub.f32 %v26839_v61, %v9268_v47  ;;  %v9514_v26 = vmul.f32 1.442695, %v9409_v51  ;;  %v24052_v46 = vmul.f32 %v17949_v11, %v23824_v22 }
 0x87b   : > { %v9283_v5 = vpop.xlane.xlu1 %9282  ;;  %v9713_v27 = vsel %vm9175_vm1, %v24034_v63, 0.0  ;;  %17960 = vpow2.f32 %v9498_v15 }
 0x87c   : > { %v17951_v35 = vpop.eup %17950  ;;  %v9492_v42 = vmul.f32 1.442695, %v9398_v45  ;;  %9714 = vadd.xlane.f32.xlu1 %v9713_v27  ;;  %v9403_v7 = vsub.f32 %v26841_v50, %v9283_v5  ;;  %v9719_v11 = vsel %vm9175_vm1, %v24052_v46, 0.0 }
 0x87d   : > { %v9274_v43 = vpop.xlane.xlu0 %9273  ;;  %v24044_v19 = vmul.f32 %v17951_v35, %v23870_v60  ;;  %v17953_v28 = vpop.eup %17952 }
 0x87e   : > { %17962 = vpow2.f32 %v9492_v42  ;;  %v9400_v61 = vsub.f32 %v26842_v17, %v9274_v43  ;;  %v9502_v56 = vmul.f32 1.442695, %v9403_v7  ;;  %v24064_v5 = vmul.f32 %v17953_v28, %v23922_v2 }
 0x87f   : > { %v9307_v24 = vpop.xlane.xlu1 %9306  ;;  %v9692_v37 = vsel %vm9175_vm1, %v24044_v19, 0.0  ;;  %17964 = vpow2.f32 %v9514_v26 }
 0x880   : > { %v17955_v32 = vpop.eup %17954  ;;  %v9496_v50 = vmul.f32 1.442695, %v9400_v61  ;;  %9696 = vadd.xlane.f32.xlu1 %v9695_v38  ;;  %9693 = vadd.xlane.f32.xlu0 %v9692_v37  ;;  %v9411_v48 = vsub.f32 %v26844_v59, %v9307_v24  ;;  %v9701_v28 = vsel %vm9175_vm1, %v24064_v5, 0.0 }
 0x881   : > { %v9298_v17 = vpop.xlane.xlu0 %9297  ;;  %v24056_v12 = vmul.f32 %v17955_v32, %v23870_v60  ;;  %v17957_v51 = vpop.eup %17956 }
 0x882   : > { %17966 = vpow2.f32 %v9496_v50  ;;  %v9408_v15 = vsub.f32 %v26845_v53, %v9298_v17  ;;  %v9518_v35 = vmul.f32 1.442695, %v9411_v48  ;;  %v24076_v38 = vmul.f32 %v17957_v51, %v23922_v2 }
 0x883   : > { %v9289_v47 = vpop.xlane.xlu1 %9288  ;;  %v9716_v45 = vsel %vm9175_vm1, %v24056_v12, 0.0  ;;  %17968 = vpow2.f32 %v9502_v56 }
 0x884   : > { %v17959_v27 = vpop.eup %17958  ;;  %v9512_v59 = vmul.f32 1.442695, %v9408_v15  ;;  %9720 = vadd.xlane.f32.xlu1 %v9719_v11  ;;  %9717 = vadd.xlane.f32.xlu0 %v9716_v45  ;;  %v9405_v42 = vsub.f32 %v26846_v25, %v9289_v47  ;;  %v9725_v51 = vsel %vm9175_vm1, %v24076_v38, 0.0 }
 0x885   : > { %v9280_v53 = vpop.xlane.xlu0 %9279  ;;  %v24068_v26 = vmul.f32 %v17959_v27, %v23955_v44  ;;  %v17961_v43 = vpop.eup %17960 }
 0x886   : > { %17970 = vpow2.f32 %v9512_v59  ;;  %v9402_v7 = vsub.f32 %v26848_v34, %v9280_v53  ;;  %v9506_v32 = vmul.f32 1.442695, %v9405_v42  ;;  %v24088_v11 = vmul.f32 %v17961_v43, %v23747_v10  ;;  %v26919_v42 = vld [vmem:[#allocation211_spill] sm:$0xff] }
 0x887   : > { %v9313_v61 = vpop.xlane.xlu1 %9312  ;;  %v9698_v24 = vsel %vm9175_vm1, %v24068_v26, 0.0  ;;  %17972 = vpow2.f32 %v9518_v35 }
 0x888   : > { %v17963_v37 = vpop.eup %17962  ;;  %v9500_v25 = vmul.f32 1.442695, %v9402_v7  ;;  %9702 = vadd.xlane.f32.xlu1 %v9701_v28  ;;  %9699 = vadd.xlane.f32.xlu0 %v9698_v24  ;;  %v9413_v50 = vsub.f32 %v26849_v52, %v9313_v61  ;;  %v9731_v43 = vsel %vm9175_vm1, %v24088_v11, 0.0 }
 0x889   : > { %v9304_v34 = vpop.xlane.xlu0 %9303  ;;  %v24080_v56 = vmul.f32 %v17963_v37, %v23955_v44  ;;  %v17965_v17 = vpop.eup %17964 }
 0x88a   : > { %17974 = vpow2.f32 %v9500_v25  ;;  %v9410_v48 = vsub.f32 %v26851_v8, %v9304_v34  ;;  %v9522_v27 = vmul.f32 1.442695, %v9413_v50  ;;  %v24100_v24 = vmul.f32 %v17965_v17, %v23747_v10 }
 0x88b   : > { %v9295_v15 = vpop.xlane.xlu1 %9294  ;;  %v9722_v47 = vsel %vm9175_vm1, %v24080_v56, 0.0  ;;  %17976 = vpow2.f32 %v9506_v32  ;;  %v26920_v32 = vld [vmem:[#allocation112_spill] sm:$0xff] }
 0x88c   : > { %v17967_v45 = vpop.eup %17966  ;;  %v9516_v52 = vmul.f32 1.442695, %v9410_v48  ;;  %9726 = vadd.xlane.f32.xlu1 %v9725_v51  ;;  %9723 = vadd.xlane.f32.xlu0 %v9722_v47  ;;  %v9407_v59 = vsub.f32 %v26853_v33, %v9295_v15  ;;  %v26921_v15 = vld [vmem:[#allocation118_spill] sm:$0xff]  ;;  %v9755_v17 = vsel %vm9175_vm1, %v24100_v24, 0.0 }
 0x88d   : > { %v9286_v8 = vpop.xlane.xlu0 %9285  ;;  %v24092_v35 = vmul.f32 %v17967_v45, %v23769_v30  ;;  %v17969_v7 = vpop.eup %17968 }
 0x88e   : > { %17978 = vpow2.f32 %v9516_v52  ;;  %v9404_v53 = vsub.f32 %v26919_v42, %v9286_v8  ;;  %v9510_v25 = vmul.f32 1.442695, %v9407_v59 }
 0x88f   : > { %v9319_v61 = vpop.xlane.xlu1 %9318  ;;  %v9728_v28 = vsel %vm9175_vm1, %v24092_v35, 0.0  ;;  %17980 = vpow2.f32 %v9522_v27  ;;  %v24112_v27 = vmul.f32 %v17969_v7, %v23784_v3 }
 0x890   : > { %v17971_v37 = vpop.eup %17970  ;;  %v9504_v33 = vmul.f32 1.442695, %v9404_v53  ;;  %9732 = vadd.xlane.f32.xlu1 %v9731_v43  ;;  %9729 = vadd.xlane.f32.xlu0 %v9728_v28  ;;  %v9415_v50 = vsub.f32 %v26920_v32, %v9319_v61  ;;  %v26923_v43 = vld [vmem:[#allocation209_spill] sm:$0xff] }
 0x891   : > { %v9310_v34 = vpop.xlane.xlu0 %9309  ;;  %v24104_v48 = vmul.f32 %v17971_v37, %v23769_v30  ;;  %v17973_v47 = vpop.eup %17972  ;;  %v9737_v32 = vsel %vm9175_vm1, %v24112_v27, 0.0 }
 0x892   : > { %17982 = vpow2.f32 %v9504_v33  ;;  %v9412_v51 = vsub.f32 %v26921_v15, %v9310_v34  ;;  %v9526_v42 = vmul.f32 1.442695, %v9415_v50  ;;  %v24123_v34 = vmul.f32 %v17973_v47, %v23784_v3 }
 0x893   : > { %v9637_v45 = vpop.xlane.xlu1 %9636  ;;  %v9752_v52 = vsel %vm9175_vm1, %v24104_v48, 0.0  ;;  %17984 = vpow2.f32 %v9510_v25 }
 0x894   : > { %v17975_v59 = vpop.eup %17974  ;;  %v9520_v8 = vmul.f32 1.442695, %v9412_v51  ;;  %9756 = vadd.xlane.f32.xlu1 %v9755_v17  ;;  %9753 = vadd.xlane.f32.xlu0 %v9752_v52  ;;  %26924 = vst [vmem:[#allocation156_spill] sm:$0xff] %v24123_v34  ;;  %v26926_v17 = vld [vmem:[#allocation121_spill] sm:$0xff] }
 0x895   : > { %v9292_v53 = vpop.xlane.xlu0 %9291  ;;  %v24115_v61 = vmul.f32 %v17975_v59, %v23809_v4  ;;  %v17977_v37 = vpop.eup %17976 }
 0x896   : > { %17986 = vpow2.f32 %v9520_v8  ;;  %v9406_v28 = vsub.f32 %v26923_v43, %v9292_v53  ;;  %v9761_v53 = vsel %vm9175_vm1, %v24123_v34, 0.0  ;;  %v24134_v43 = vmul.f32 %v17977_v37, %v23824_v22  ;;  %v26940_v34 = vld [vmem:[#allocation125_spill] sm:$0xff] }
 0x897   : > { %26922 = vst [vmem:[#allocation151_spill] sm:$0xff] %v24115_v61  ;;  %v9661_v33 = vpop.xlane.xlu1 %9660  ;;  %v9734_v7 = vsel %vm9175_vm1, %v24115_v61, 0.0  ;;  %17988 = vpow2.f32 %v9526_v42 }
 0x898   : > { %v17979_v25 = vpop.eup %17978  ;;  %v9508_v50 = vmul.f32 1.442695, %v9406_v28  ;;  %9738 = vadd.xlane.f32.xlu1 %v9737_v32  ;;  %9735 = vadd.xlane.f32.xlu0 %v9734_v7  ;;  %26927 = vst [vmem:[#allocation152_spill] sm:$0xff] %v24134_v43  ;;  %v26928_v32 = vld [vmem:[#allocation101_spill] sm:$0xff]  ;;  %v9743_v37 = vsel %vm9175_vm1, %v24134_v43, 0.0 }
 0x899   : > { %v9316_v15 = vpop.xlane.xlu0 %9315  ;;  %v24126_v51 = vmul.f32 %v17979_v25, %v23809_v4  ;;  %v17981_v59 = vpop.eup %17980 }
 0x89a   : > { %17990 = vpow2.f32 %v9508_v50  ;;  %v9414_v52 = vsub.f32 %v26926_v17, %v9316_v15 }
 0x89b   : > { %26925 = vst [vmem:[#allocation154_spill] sm:$0xff] %v24126_v51  ;;  %v9325_v8 = vpop.xlane.xlu1 %9324  ;;  %v9758_v47 = vsel %vm9175_vm1, %v24126_v51, 0.0  ;;  %17992 = vrcp.f32 %v9637_v45 }
 0x89c   : > { %v17983_v28 = vpop.eup %17982  ;;  %v9524_v42 = vmul.f32 1.442695, %v9414_v52  ;;  %v9417_v4 = vsub.f32 %v26928_v32, %v9325_v8  ;;  %9762 = vadd.xlane.f32.xlu1 %v9761_v53  ;;  %9759 = vadd.xlane.f32.xlu0 %v9758_v47  ;;  %17994 = vrcp.f32 %v9661_v33  ;;  %v24145_v52 = vmul.f32 %v17981_v59, %v23824_v22  ;;  %v26931_v33 = vld [vmem:[#allocation116_spill] sm:$0xff] }
 0x89d   : > { %v9634_v7 = vpop.xlane.xlu0 %9633  ;;  %v24138_v25 = vmul.f32 %v17983_v28, %v23870_v60  ;;  %v17985_v15 = vpop.eup %17984 }
 0x89e   : > { %17996 = vpow2.f32 %v9524_v42  ;;  %v9530_v50 = vmul.f32 1.442695, %v9417_v4  ;;  %26930 = vst [vmem:[#allocation134_spill] sm:$0xff] %v24145_v52  ;;  %v24156_v59 = vmul.f32 %v17985_v15, %v23922_v2 }
 0x89f   : > { %26929 = vst [vmem:[#allocation51_spill] sm:$0xff] %v24138_v25  ;;  %17998 = vrcp.f32 %v9634_v7  ;;  %v9349_v17 = vpop.xlane.xlu1 %9348  ;;  %v9740_v45 = vsel %vm9175_vm1, %v24138_v25, 0.0  ;;  %v9767_v7 = vsel %vm9175_vm1, %v24145_v52, 0.0 }
 0x8a0   : > { %v17987_v8 = vpop.eup %17986  ;;  %18000 = vpow2.f32 %v9530_v50  ;;  %v9425_v53 = vsub.f32 %v26931_v33, %v9349_v17  ;;  %9744 = vadd.xlane.f32.xlu1 %v9743_v37  ;;  %9741 = vadd.xlane.f32.xlu0 %v9740_v45  ;;  %26933 = vst [vmem:[#allocation122_spill] sm:$0xff] %v24156_v59  ;;  %v9749_v52 = vsel %vm9175_vm1, %v24156_v59, 0.0  ;;  %v26939_v59 = vld [vmem:[#allocation46_spill] sm:$0xff] }
 0x8a1   : > { %v9658_v47 = vpop.xlane.xlu0 %9657  ;;  %v24149_v28 = vmul.f32 %v17987_v8, %v23870_v60  ;;  %v17989_v32 = vpop.eup %17988  ;;  %v26935_v8 = vld [vmem:[#allocation96_spill] sm:$0xff] }
 0x8a2   : > { %v9546_v42 = vmul.f32 1.442695, %v9425_v53  ;;  %18002 = vrcp.f32 %v9658_v47 }
 0x8a3   : > { %26932 = vst [vmem:[#allocation115_spill] sm:$0xff] %v24149_v28  ;;  %v9643_v4 = vpop.xlane.xlu1 %9642  ;;  %v9764_v22 = vsel %vm9175_vm1, %v24149_v28, 0.0  ;;  %v24167_v28 = vmul.f32 %v17989_v32, %v23922_v2 }
 0x8a4   : > { %v17991_v50 = vpop.eup %17990  ;;  %18004 = vpow2.f32 %v9546_v42  ;;  %9768 = vadd.xlane.f32.xlu1 %v9767_v7  ;;  %9765 = vadd.xlane.f32.xlu0 %v9764_v22 }
 0x8a5   : > { %v9322_v17 = vpop.xlane.xlu0 %9321  ;;  %v24159_v37 = vmul.f32 %v17991_v50, %v23955_v44  ;;  %v17993_v45 = vpop.eup %17992  ;;  %26936 = vst [vmem:[#allocation44_spill] sm:$0xff] %v24167_v28  ;;  %v9773_v32 = vsel %vm9175_vm1, %v24167_v28, 0.0 }
 0x8a6   : > { %v9416_v33 = vsub.f32 %v26935_v8, %v9322_v17  ;;  %v17995_v53 = vpop.eup %17994  ;;  %v26938_v8 = vld [vmem:[#allocation110_spill] sm:$0xff] }
 0x8a7   : > { %26934 = vst [vmem:[#allocation117_spill] sm:$0xff] %v24159_v37  ;;  %v9667_v47 = vpop.xlane.xlu1 %9666  ;;  %v9746_v15 = vsel %vm9175_vm1, %v24159_v37, 0.0  ;;  %v9889_v37 = vmul.f32 %v17993_v45, %v26940_v34  ;;  %v26941_v45 = vld [vmem:[#allocation133_spill] sm:$0xff] }
 0x8a8   : > { %v17997_v42 = vpop.eup %17996  ;;  %v9528_v7 = vmul.f32 1.442695, %v9416_v33  ;;  %9750 = vadd.xlane.f32.xlu1 %v9749_v52  ;;  %9747 = vadd.xlane.f32.xlu0 %v9746_v15 }
 0x8a9   : > { %v17999_v22 = vpop.eup %17998  ;;  %v9346_v50 = vpop.xlane.xlu0 %9345  ;;  %v24170_v25 = vmul.f32 %v17997_v42, %v23955_v44 }
 0x8aa   : > { %v18001_v17 = vpop.eup %18000  ;;  %18006 = vpow2.f32 %v9528_v7  ;;  %v9424_v43 = vsub.f32 %v26938_v8, %v9346_v50  ;;  %v9888_v51 = vmul.f32 %v17999_v22, %v26939_v59  ;;  %v26942_v50 = vld [vmem:[#allocation136_spill] sm:$0xff] }
 0x8ab   : > { %26937 = vst [vmem:[#allocation119_spill] sm:$0xff] %v24170_v25  ;;  %v9331_v61 = vpop.xlane.xlu1 %9330  ;;  %v9770_v52 = vsel %vm9175_vm1, %v24170_v25, 0.0  ;;  %v24180_v33 = vmul.f32 %v18001_v17, %v23747_v10  ;;  %18008 = vrcp.f32 %v9643_v4  ;;  %v9897_v8 = vmul.f32 %v17995_v53, %v26942_v50 }
 0x8ac   : > { %v18003_v15 = vpop.eup %18002  ;;  %v9544_v42 = vmul.f32 1.442695, %v9424_v43  ;;  %v9419_v7 = vsub.f32 %v26878_v6, %v9331_v61  ;;  %9774 = vadd.xlane.f32.xlu1 %v9773_v32  ;;  %9771 = vadd.xlane.f32.xlu0 %v9770_v52  ;;  %v9952_v59 = vpack.c.bf16 %v9889_v37, %v9888_v51  ;;  %18010 = vrcp.f32 %v9667_v47  ;;  %v26943_v43 = vld [vmem:[#allocation120_spill] sm:$0xff] }
 0x8ad   : > { %v9640_v34 = vpop.xlane.xlu0 %9639  ;;  %v9896_v22 = vmul.f32 %v18003_v15, %v26941_v45  ;;  %v9779_v6 = vsel %vm9175_vm1, %v24180_v33, 0.0 }
 0x8ae   : > { %v18005_v28 = vpop.eup %18004  ;;  %18012 = vpow2.f32 %v9544_v42  ;;  %v9534_v25 = vmul.f32 1.442695, %v9419_v7  ;;  %v12772_v17 = vsel %vm9175_vm1, %v9952_v59, 0 }
 0x8af   : > { %18014 = vrcp.f32 %v9640_v34  ;;  %17402 = vmatpush3.bf16.xpose.msra.mxu0 %v12772_v17  ;;  %v9355_v4 = vpop.xlane.xlu1 %9354  ;;  %v9956_v61 = vpack.c.bf16 %v9897_v8, %v9896_v22  ;;  %v24189_v51 = vmul.f32 %v18005_v28, %v23747_v10 }
 0x8b0   : > { %18016 = vpow2.f32 %v9534_v25  ;;  %v9427_v37 = vsub.f32 %v26943_v43, %v9355_v4  ;;  %9780 = vadd.xlane.f32.xlu1 %v9779_v6  ;;  %17403 = vmatprep.subr.bf16.mxu0 %v26918_v21  ;;  %v26944_v43 = vld [vmem:[#allocation141_spill] sm:$0xff] }
 0x8b1   : > { %v9664_v53 = vpop.xlane.xlu0 %9663  ;;  %v12828_v47 = vsel %vm9175_vm1, %v9956_v61, 0  ;;  %v9803_v15 = vsel %vm9175_vm1, %v24189_v51, 0.0 }
 0x8b2   : > { %v9550_v32 = vmul.f32 1.442695, %v9427_v37  ;;  %18018 = vrcp.f32 %v9664_v53  ;;  %17414 = vmatpush3.bf16.xpose.msra.mxu1 %v12828_v47 }
 0x8b3   : > { %v9649_v52 = vpop.xlane.xlu1 %9648  ;;  %17415 = vmatprep.subr.bf16.mxu1 %v26918_v21 }
 0x8b4   : > { %v18007_v10 = vpop.eup %18006  ;;  %18020 = vpow2.f32 %v9550_v32  ;;  %9804 = vadd.xlane.f32.xlu1 %v9803_v15 }
 0x8b5   : > { %v9328_v25 = vpop.xlane.xlu0 %9327  ;;  %v24198_v28 = vmul.f32 %v18007_v10, %v23769_v30  ;;  %v18009_v42 = vpop.eup %18008 }
 0x8b6   : > { %v9418_v7 = vsub.f32 %v26886_v40, %v9328_v25  ;;  %v18011_v59 = vpop.eup %18010  ;;  %v26945_v40 = vld [vmem:[#allocation129_spill] sm:$0xff] }
 0x8b7   : > { %v9673_v34 = vpop.xlane.xlu1 %9672  ;;  %v9776_v45 = vsel %vm9175_vm1, %v24198_v28, 0.0  ;;  %v9891_v53 = vmul.f32 %v18009_v42, %v26945_v40 }
 0x8b8   : > { %v18013_v22 = vpop.eup %18012  ;;  %v9532_v50 = vmul.f32 1.442695, %v9418_v7  ;;  %9777 = vadd.xlane.f32.xlu0 %v9776_v45 }
 0x8b9   : > { %v18015_v8 = vpop.eup %18014  ;;  %v9352_v17 = vpop.xlane.xlu0 %9351  ;;  %v24204_v4 = vmul.f32 %v18013_v22, %v23769_v30  ;;  %v26946_v22 = vld [vmem:[#allocation230_spill] sm:$0xff] }
 0x8ba   : > { %v18017_v6 = vpop.eup %18016  ;;  %18022 = vpow2.f32 %v9532_v50  ;;  %v9426_v61 = vsub.f32 %v26893_v54, %v9352_v17  ;;  %v9890_v37 = vmul.f32 %v18015_v8, %v26944_v43  ;;  %v9899_v50 = vmul.f32 %v18011_v59, %v26946_v22  ;;  %v18170_v17 = vld [vmem:[#allocation5 + $0x18] sm:$0xff] }
 0x8bb   : > { %v9337_v47 = vpop.xlane.xlu1 %9336  ;;  %v9800_v32 = vsel %vm9175_vm1, %v24204_v4, 0.0  ;;  %v24212_v15 = vmul.f32 %v18017_v6, %v23784_v3  ;;  %18024 = vrcp.f32 %v9649_v52 }
 0x8bc   : > { %v18019_v10 = vpop.eup %18018  ;;  %v9548_v25 = vmul.f32 1.442695, %v9426_v61  ;;  %v9421_v30 = vsub.f32 %v26898_v14, %v9337_v47  ;;  %9801 = vadd.xlane.f32.xlu0 %v9800_v32  ;;  %v9953_v7 = vpack.c.bf16 %v9891_v53, %v9890_v37  ;;  %18026 = vrcp.f32 %v9673_v34  ;;  %v18171_v32 = vld [vmem:[#allocation5 + $0x10] sm:$0xff] }
 0x8bd   : > { %v9646_v54 = vpop.xlane.xlu0 %9645  ;;  %v9785_v45 = vsel %vm9175_vm1, %v24212_v15, 0.0  ;;  %v9898_v42 = vmul.f32 %v18019_v10, %v23831_v55 }
 0x8be   : > { %v18021_v8 = vpop.eup %18020  ;;  %18028 = vpow2.f32 %v9548_v25  ;;  %v9538_v3 = vmul.f32 1.442695, %v9421_v30  ;;  %9786 = vadd.xlane.f32.xlu1 %v9785_v45  ;;  %v12775_v52 = vsel %vm9175_vm1, %v9953_v7, 0 }
 0x8bf   : > { %18030 = vrcp.f32 %v9646_v54  ;;  %17404 = vmatpush3.bf16.xpose.msra.mxu0 %v12775_v52  ;;  %v9361_v14 = vpop.xlane.xlu1 %9360  ;;  %v24220_v6 = vmul.f32 %v18170_v17, %v18021_v8  ;;  %v9957_v34 = vpack.c.bf16 %v9899_v50, %v9898_v42 }
 0x8c0   : > { %18032 = vpow2.f32 %v9538_v3  ;;  %v9429_v61 = vsub.f32 %v26903_v57, %v9361_v14  ;;  %17405 = vmatprep.subr.bf16.mxu0 %v26918_v21 }
 0x8c1   : > { %v9670_v55 = vpop.xlane.xlu0 %9669  ;;  %v9809_v59 = vsel %vm9175_vm1, %v24220_v6, 0.0  ;;  %v12831_v43 = vsel %vm9175_vm1, %v9957_v34, 0 }
 0x8c2   : > { %v9554_v37 = vmul.f32 1.442695, %v9429_v61  ;;  %18034 = vrcp.f32 %v9670_v55  ;;  %9810 = vadd.xlane.f32.xlu1 %v9809_v59  ;;  %17416 = vmatpush3.bf16.xpose.msra.mxu1 %v12831_v43  ;;  %v18172_v61 = vld [vmem:[#allocation5 + $0x28] sm:$0xff] }
 0x8c3   : > { %v9655_v40 = vpop.xlane.xlu1 %9654  ;;  %17417 = vmatprep.subr.bf16.mxu1 %v26918_v21 }
 0x8c4   : > { %v18023_v53 = vpop.eup %18022  ;;  %18036 = vpow2.f32 %v9554_v37 }
 0x8c5   : > { %v9334_v47 = vpop.xlane.xlu0 %9333  ;;  %v24228_v57 = vmul.f32 %v18171_v32, %v18023_v53  ;;  %v18025_v10 = vpop.eup %18024 }
 0x8c6   : > { %v9420_v25 = vsub.f32 %v26906_v13, %v9334_v47  ;;  %v18027_v30 = vpop.eup %18026  ;;  %v9893_v13 = vmul.f32 %v18025_v10, %v23839_v49 }
 0x8c7   : > { %v9679_v7 = vpop.xlane.xlu1 %9678  ;;  %v9782_v54 = vsel %vm9175_vm1, %v24228_v57, 0.0  ;;  %v9901_v47 = vmul.f32 %v18027_v30, %v23849_v29 }
 0x8c8   : > { %v18029_v45 = vpop.eup %18028  ;;  %v9536_v42 = vmul.f32 1.442695, %v9420_v25  ;;  %9783 = vadd.xlane.f32.xlu0 %v9782_v54 }
 0x8c9   : > { %v18031_v22 = vpop.eup %18030  ;;  %v9358_v50 = vpop.xlane.xlu0 %9357  ;;  %v24233_v8 = vmul.f32 %v18171_v32, %v18029_v45 }
 0x8ca   : > { %v18033_v3 = vpop.eup %18032  ;;  %18038 = vpow2.f32 %v9536_v42  ;;  %v9428_v52 = vsub.f32 %v26908_v23, %v9358_v50  ;;  %v9892_v14 = vmul.f32 %v18031_v22, %v23896_v0 }
 0x8cb   : > { %v9343_v17 = vpop.xlane.xlu1 %9342  ;;  %v9806_v34 = vsel %vm9175_vm1, %v24233_v8, 0.0  ;;  %v24240_v55 = vmul.f32 %v18172_v61, %v18033_v3  ;;  %18040 = vrcp.f32 %v9655_v40 }
 0x8cc   : > { %v18035_v59 = vpop.eup %18034  ;;  %v9552_v43 = vmul.f32 1.442695, %v9428_v52  ;;  %v9423_v37 = vsub.f32 %v26909_v18, %v9343_v17  ;;  %9807 = vadd.xlane.f32.xlu0 %v9806_v34  ;;  %v9954_v53 = vpack.c.bf16 %v9893_v13, %v9892_v14  ;;  %18042 = vrcp.f32 %v9679_v7 }
 0x8cd   : > { %v9652_v23 = vpop.xlane.xlu0 %9651  ;;  %v9791_v0 = vsel %vm9175_vm1, %v24240_v55, 0.0  ;;  %v9900_v49 = vmul.f32 %v18035_v59, %v23927_v36 }
 0x8ce   : > { %v18037_v32 = vpop.eup %18036  ;;  %18044 = vpow2.f32 %v9552_v43  ;;  %v9542_v10 = vmul.f32 1.442695, %v9423_v37  ;;  %9792 = vadd.xlane.f32.xlu1 %v9791_v0  ;;  %v12778_v40 = vsel %vm9175_vm1, %v9954_v53, 0  ;;  %v18173_v43 = vld [vmem:[#allocation5 + $0x20] sm:$0xff] }
 0x8cf   : > { %18046 = vrcp.f32 %v9652_v23  ;;  %17406 = vmatpush3.bf16.xpose.msra.mxu0 %v12778_v40  ;;  %v9367_v18 = vpop.xlane.xlu1 %9366  ;;  %v24248_v25 = vmul.f32 %v18172_v61, %v18037_v32  ;;  %v9958_v7 = vpack.c.bf16 %v9901_v47, %v9900_v49 }
 0x8d0   : > { %18048 = vpow2.f32 %v9542_v10  ;;  %v9431_v54 = vsub.f32 %v26911_v62, %v9367_v18  ;;  %17407 = vmatprep.subr.bf16.mxu0 %v26918_v21 }
 0x8d1   : > { %v9676_v36 = vpop.xlane.xlu0 %9675  ;;  %v9815_v29 = vsel %vm9175_vm1, %v24248_v25, 0.0  ;;  %v12834_v30 = vsel %vm9175_vm1, %v9958_v7, 0  ;;  %v26947_v7 = vld [vmem:[#allocation148_spill] sm:$0xff] }
 0x8d2   : > { %v9558_v45 = vmul.f32 1.442695, %v9431_v54  ;;  %18050 = vrcp.f32 %v9676_v36  ;;  %9816 = vadd.xlane.f32.xlu1 %v9815_v29  ;;  %17418 = vmatpush3.bf16.xpose.msra.mxu1 %v12834_v30  ;;  %v26948_v54 = vld [vmem:[#allocation146_spill] sm:$0xff]  ;;  %v26949_v30 = vld [vmem:[#allocation140_spill] sm:$0xff] }
 0x8d3   : > { %17419 = vmatprep.subr.bf16.mxu1 %v26918_v21  ;;  %v9685_v14 = vpop.xlane.xlu1 %9684 }
 0x8d4   : > { %v18039_v42 = vpop.eup %18038  ;;  %18052 = vpow2.f32 %v9558_v45  ;;  %v26950_v45 = vld [vmem:[#allocation138_spill] sm:$0xff] }
 0x8d5   : > { %v9340_v22 = vpop.xlane.xlu0 %9339  ;;  %v24257_v50 = vmul.f32 %v18039_v42, %v23870_v60  ;;  %v18041_v62 = vpop.eup %18040  ;;  %v12672_v42 = vcombine.low %v26950_v45, %v26949_v30  ;;  %v26956_v30 = vld [vmem:[#allocation157_spill] sm:$0xff] }
 0x8d6   : > { %v9422_v3 = vsub.f32 %v26914_v9, %v9340_v22  ;;  %v18043_v52 = vpop.eup %18042  ;;  %v9895_v9 = vmul.f32 %v18041_v62, %v23940_v16 }
 0x8d7   : > { %v9788_v13 = vsel %vm9175_vm1, %v24257_v50, 0.0  ;;  %v9709_v40 = vpop.xlane.xlu1 %9708  ;;  %v9903_v16 = vmul.f32 %v18043_v52, %v26948_v54 }
 0x8d8   : > { %v18045_v17 = vpop.eup %18044  ;;  %v9540_v34 = vmul.f32 1.442695, %v9422_v3  ;;  %9789 = vadd.xlane.f32.xlu0 %v9788_v13  ;;  %v26951_v3 = vld [vmem:[#allocation139_spill] sm:$0xff] }
 0x8d9   : > { %v18047_v61 = vpop.eup %18046  ;;  %v9364_v59 = vpop.xlane.xlu0 %9363  ;;  %v24262_v37 = vmul.f32 %v18173_v43, %v18045_v17 }
 0x8da   : > { %v18049_v53 = vpop.eup %18048  ;;  %18054 = vpow2.f32 %v9540_v34  ;;  %v9430_v60 = vsub.f32 %v26915_v1, %v9364_v59  ;;  %v9894_v23 = vmul.f32 %v18047_v61, %v23964_v58  ;;  %v12747_v61 = vshrl.u32 %v12672_v42, 16 }
 0x8db   : > { %v9812_v0 = vsel %vm9175_vm1, %v24262_v37, 0.0  ;;  %v24270_v49 = vmul.f32 %v18049_v53, %v23922_v2  ;;  %18056 = vrcp.f32 %v9685_v14  ;;  %v26952_v14 = vld [vmem:[#allocation137_spill] sm:$0xff] }
 0x8dc   : > { %v18051_v47 = vpop.eup %18050  ;;  %v9556_v32 = vmul.f32 1.442695, %v9430_v60  ;;  %9813 = vadd.xlane.f32.xlu0 %v9812_v0  ;;  %v9955_v10 = vpack.c.bf16 %v9895_v9, %v9894_v23  ;;  %v12740_v52 = vcombine.low %v26952_v14, %v26951_v3 }
 0x8dd   : > { %v9682_v18 = vpop.xlane.xlu0 %9681  ;;  %v9797_v1 = vsel %vm9175_vm1, %v24270_v49, 0.0  ;;  %v9902_v58 = vmul.f32 %v18051_v47, %v26947_v7 }
 0x8de   : > { %v18053_v36 = vpop.eup %18052  ;;  %18058 = vpow2.f32 %v9556_v32  ;;  %9798 = vadd.xlane.f32.xlu1 %v9797_v1  ;;  %v12781_v29 = vsel %vm9175_vm1, %v9955_v10, 0  ;;  %v12746_v59 = vpack.i.b16 %v12740_v52, %v12672_v42  ;;  %v12748_v43 = vshrl.u32 %v12740_v52, 16  ;;  %v26954_v1 = vld [vmem:[#allocation144_spill] sm:$0xff] }
 0x8df   : > { %18060 = vrcp.f32 %v9682_v18  ;;  %17408 = vmatpush3.bf16.xpose.msra.mxu0 %v12781_v29  ;;  %v24280_v22 = vmul.f32 %v18053_v36, %v23922_v2  ;;  %v9959_v62 = vpack.c.bf16 %v9903_v16, %v9902_v58  ;;  %v26955_v36 = vld [vmem:[#allocation153_spill] sm:$0xff] }
 0x8e0   : > { %18062 = vrcp.f32 %v9709_v40  ;;  %17425 = vmatprep.subr.bf16.mxu0 %v26918_v21  ;;  %v12749_v23 = vpack.i.b16 %v12748_v43, %v12747_v61  ;;  %v26953_v40 = vld [vmem:[#allocation155_spill] sm:$0xff] }
 0x8e1   : > { %v9706_v13 = vpop.xlane.xlu0 %9705  ;;  %v9821_v17 = vsel %vm9175_vm1, %v24280_v22, 0.0  ;;  %v12837_v34 = vsel %vm9175_vm1, %v9959_v62, 0 }
 0x8e2   : > { %18064 = vrcp.f32 %v9706_v13  ;;  %9822 = vadd.xlane.f32.xlu1 %v9821_v17  ;;  %17420 = vmatpush3.bf16.xpose.msra.mxu1 %v12837_v34 }
 0x8e3   : > { %17437 = vmatprep.subr.bf16.mxu1 %v26918_v21 }
 0x8e4   : > { %v18055_v2 = vpop.eup %18054 }
 0x8e5   : > { %v24290_v53 = vmul.f32 %v18055_v2, %v23955_v44  ;;  %v18057_v60 = vpop.eup %18056 }
 0x8e6   : > { %17410 = vmatmul.mubr.msk.bf16.vlgmr.msra.gmra.mrb[32].mxu0 %vm9175_vm1, %v12746_v59  ;;  %v9905_v7 = vmul.f32 %v18057_v60, %v26954_v1 }
 0x8e7   : > { %v9794_v9 = vsel %vm9175_vm1, %v24290_v53, 0.0  ;;  %17433 = vmatprep.mubr.msk.bf16.mxu0 %vm18446_vm2, %v26918_v21 }
 0x8e8   : > { %v18059_v0 = vpop.eup %18058  ;;  %9795 = vadd.xlane.f32.xlu0 %v9794_v9 }
 0x8e9   : > { %v18061_v47 = vpop.eup %18060  ;;  %17422 = vmatmul.mubr.msk.bf16.vlgmr.msra.gmra.mrb[64].mxu1 %vm9175_vm1, %v12749_v23  ;;  %v24299_v32 = vmul.f32 %v18059_v0, %v23955_v44 }
 0x8ea   : > { %v18063_v10 = vpop.eup %18062  ;;  %v9904_v18 = vmul.f32 %v18061_v47, %v26953_v40  ;;  %17445 = vmatprep.mubr.msk.bf16.mxu1 %vm18446_vm2, %v26918_v21 }
 0x8eb   : > { %v9818_v58 = vsel %vm9175_vm1, %v24299_v32, 0.0  ;;  %v9913_v45 = vmul.f32 %v18063_v10, %v26956_v30 }
 0x8ec   : > { %v18065_v54 = vpop.eup %18064  ;;  %9819 = vadd.xlane.f32.xlu0 %v9818_v58  ;;  %v9960_v16 = vpack.c.bf16 %v9905_v7, %v9904_v18 }
 0x8ed   : > { %v9912_v29 = vmul.f32 %v18065_v54, %v26955_v36 }
 0x8ee   : > { %v12884_v44 = vsel %vm9175_vm1, %v9960_v16, 0 }
 0x8ef   : > { %17426 = vmatpush3.bf16.xpose.msra.mxu0 %v12884_v44  ;;  %v9964_v42 = vpack.c.bf16 %v9913_v45, %v9912_v29 }
 0x8f0   : > { %17427 = vmatprep.subr.bf16.mxu0 %v26918_v21 }
 0x8f1   : > { %v12940_v62 = vsel %vm9175_vm1, %v9964_v42, 0 }
 0x8f2   : > { %17438 = vmatpush3.bf16.xpose.msra.mxu1 %v12940_v62 }
 0x8f3   : > { %17439 = vmatprep.subr.bf16.mxu1 %v26918_v21 }
 0x8ff   : > { %v9691_v3 = vpop.xlane.xlu1 %9690 }
 0x900   : > { %18066 = vrcp.f32 %v9691_v3 }
 0x901   : > { %v9688_v14 = vpop.xlane.xlu0 %9687 }
 0x902   : > { %18068 = vrcp.f32 %v9688_v14 }
 0x905   : > { %v9712_v52 = vpop.xlane.xlu0 %9711 }
 0x906   : > { %18070 = vrcp.f32 %v9712_v52 }
 0x909   : > { %v9715_v13 = vpop.xlane.xlu1 %9714 }
 0x90a   : > { %v18067_v17 = vpop.eup %18066  ;;  %18072 = vrcp.f32 %v9715_v13 }
 0x90b   : > { %v9907_v43 = vmul.f32 %v18067_v17, %v24014_v31 }
 0x90c   : > { %v18069_v34 = vpop.eup %18068 }
 0x90d   : > { %v9697_v61 = vpop.xlane.xlu1 %9696  ;;  %v9694_v2 = vpop.xlane.xlu0 %9693  ;;  %v9906_v59 = vmul.f32 %v18069_v34, %v24020_v41 }
 0x90e   : > { %18074 = vrcp.f32 %v9697_v61 }
 0x90f   : > { %18076 = vrcp.f32 %v9694_v2  ;;  %v9961_v60 = vpack.c.bf16 %v9907_v43, %v9906_v59 }
 0x910   : > { %v18071_v47 = vpop.eup %18070 }
 0x911   : > { %v9721_v23 = vpop.xlane.xlu1 %9720  ;;  %v9718_v9 = vpop.xlane.xlu0 %9717  ;;  %v12887_v0 = vsel %vm9175_vm1, %v9961_v60, 0  ;;  %v9914_v41 = vmul.f32 %v18071_v47, %v24027_v39 }
 0x912   : > { %18078 = vrcp.f32 %v9721_v23  ;;  %17428 = vmatpush3.bf16.xpose.msra.mxu0 %v12887_v0 }
 0x913   : > { %18080 = vrcp.f32 %v9718_v9  ;;  %17429 = vmatprep.subr.bf16.mxu0 %v26918_v21 }
 0x914   : > { %v18073_v10 = vpop.eup %18072 }
 0x915   : > { %v9703_v40 = vpop.xlane.xlu1 %9702  ;;  %v9700_v18 = vpop.xlane.xlu0 %9699  ;;  %v9915_v31 = vmul.f32 %v18073_v10, %v24034_v63 }
 0x916   : > { %18082 = vrcp.f32 %v9703_v40 }
 0x917   : > { %18084 = vrcp.f32 %v9700_v18  ;;  %v9965_v1 = vpack.c.bf16 %v9915_v31, %v9914_v41 }
 0x918   : > { %v18075_v7 = vpop.eup %18074 }
 0x919   : > { %v18077_v58 = vpop.eup %18076  ;;  %v9727_v54 = vpop.xlane.xlu1 %9726  ;;  %v12943_v36 = vsel %vm9175_vm1, %v9965_v1, 0  ;;  %v9909_v29 = vmul.f32 %v18075_v7, %v24040_v20 }
 0x91a   : > { %v9724_v16 = vpop.xlane.xlu0 %9723  ;;  %18086 = vrcp.f32 %v9727_v54  ;;  %17440 = vmatpush3.bf16.xpose.msra.mxu1 %v12943_v36  ;;  %v9908_v30 = vmul.f32 %v18077_v58, %v24044_v19  ;;  %v26958_v36 = vld [vmem:[#allocation48_spill] sm:$0xff] }
 0x91b   : > { %18088 = vrcp.f32 %v9724_v16  ;;  %17441 = vmatprep.subr.bf16.mxu1 %v26918_v21  ;;  %v26957_v16 = vld [vmem:[#allocation49_spill] sm:$0xff] }
 0x91c   : > { %v18079_v39 = vpop.eup %18078  ;;  %v9962_v63 = vpack.c.bf16 %v9909_v29, %v9908_v30 }
 0x91d   : > { %v18081_v45 = vpop.eup %18080  ;;  %v9733_v44 = vpop.xlane.xlu1 %9732  ;;  %v9917_v62 = vmul.f32 %v18079_v39, %v24052_v46 }
 0x91e   : > { %v9730_v42 = vpop.xlane.xlu0 %9729  ;;  %18090 = vrcp.f32 %v9733_v44  ;;  %v12890_v3 = vsel %vm9175_vm1, %v9962_v63, 0  ;;  %v9916_v14 = vmul.f32 %v18081_v45, %v24056_v12 }
 0x91f   : > { %18092 = vrcp.f32 %v9730_v42  ;;  %17430 = vmatpush3.bf16.xpose.msra.mxu0 %v12890_v3  ;;  %v26960_v42 = vld [vmem:[#allocation147_spill] sm:$0xff] }
 0x920   : > { %v18083_v20 = vpop.eup %18082  ;;  %v9966_v52 = vpack.c.bf16 %v9917_v62, %v9916_v14  ;;  %17431 = vmatprep.subr.bf16.mxu0 %v26918_v21  ;;  %v26961_v62 = vld [vmem:[#allocation151_spill] sm:$0xff] }
 0x921   : > { %v18085_v19 = vpop.eup %18084  ;;  %v9757_v13 = vpop.xlane.xlu1 %9756  ;;  %v9911_v34 = vmul.f32 %v18083_v20, %v24064_v5 }
 0x922   : > { %v9754_v17 = vpop.xlane.xlu0 %9753  ;;  %18094 = vrcp.f32 %v9757_v13  ;;  %v12946_v61 = vsel %vm9175_vm1, %v9966_v52, 0  ;;  %v9910_v46 = vmul.f32 %v18085_v19, %v24068_v26  ;;  %v26962_v13 = vld [vmem:[#allocation156_spill] sm:$0xff] }
 0x923   : > { %18096 = vrcp.f32 %v9754_v17  ;;  %17442 = vmatpush3.bf16.xpose.msra.mxu1 %v12946_v61  ;;  %v26963_v61 = vld [vmem:[#allocation154_spill] sm:$0xff] }
 0x924   : > { %v18087_v2 = vpop.eup %18086  ;;  %v9963_v12 = vpack.c.bf16 %v9911_v34, %v9910_v46  ;;  %17443 = vmatprep.subr.bf16.mxu1 %v26918_v21 }
 0x925   : > { %v18089_v59 = vpop.eup %18088  ;;  %v9739_v43 = vpop.xlane.xlu1 %9738  ;;  %v9919_v23 = vmul.f32 %v18087_v2, %v24076_v38 }
 0x926   : > { %v9736_v60 = vpop.xlane.xlu0 %9735  ;;  %18098 = vrcp.f32 %v9739_v43  ;;  %v12893_v9 = vsel %vm9175_vm1, %v9963_v12, 0  ;;  %v9918_v5 = vmul.f32 %v18089_v59, %v24080_v56 }
 0x927   : > { %18100 = vrcp.f32 %v9736_v60  ;;  %17432 = vmatpush3.bf16.xpose.msra.mxu0 %v12893_v9 }
 0x928   : > { %v18091_v0 = vpop.eup %18090  ;;  %v9967_v26 = vpack.c.bf16 %v9919_v23, %v9918_v5  ;;  %17449 = vmatprep.subr.bf16.mxu0 %v26918_v21  ;;  %v26964_v23 = vld [vmem:[#allocation152_spill] sm:$0xff] }
 0x929   : > { %v18093_v47 = vpop.eup %18092  ;;  %v9763_v10 = vpop.xlane.xlu1 %9762  ;;  %v9921_v18 = vmul.f32 %v18091_v0, %v24088_v11  ;;  %v26959_v11 = vpack.i.b16 %v26957_v16, %v26958_v36  ;;  %v26965_v0 = vld [vmem:[#allocation51_spill] sm:$0xff]  ;;  %v26968_v16 = vld [vmem:[#allocation122_spill] sm:$0xff] }
 0x92a   : > { %v9760_v40 = vpop.xlane.xlu0 %9759  ;;  %18102 = vrcp.f32 %v9763_v10  ;;  %v12949_v41 = vsel %vm9175_vm1, %v9967_v26, 0  ;;  %v9920_v38 = vmul.f32 %v18093_v47, %v24092_v35 }
 0x92b   : > { %18104 = vrcp.f32 %v9760_v40  ;;  %17444 = vmatpush3.bf16.xpose.msra.mxu1 %v12949_v41 }
 0x92c   : > { %v18095_v31 = vpop.eup %18094  ;;  %v9968_v56 = vpack.c.bf16 %v9921_v18, %v9920_v38  ;;  %17461 = vmatprep.subr.bf16.mxu1 %v26918_v21  ;;  %v26966_v18 = vld [vmem:[#allocation134_spill] sm:$0xff] }
 0x92d   : > { %v18097_v1 = vpop.eup %18096  ;;  %v9745_v7 = vpop.xlane.xlu1 %9744  ;;  %v9929_v54 = vmul.f32 %v18095_v31, %v24100_v24  ;;  %v26967_v31 = vld [vmem:[#allocation115_spill] sm:$0xff] }
 0x92e   : > { %v9742_v58 = vpop.xlane.xlu0 %9741  ;;  %18106 = vrcp.f32 %v9745_v7  ;;  %17434 = vmatmul.mubr.msk.bf16.vlgmr.msra.gmra.mrb[36].mxu0 %vm9175_vm1, %v26959_v11  ;;  %v12996_v29 = vsel %vm9175_vm1, %v9968_v56, 0  ;;  %v9928_v35 = vmul.f32 %v18097_v1, %v24104_v48 }
 0x92f   : > { %18108 = vrcp.f32 %v9742_v58  ;;  %17450 = vmatpush3.bf16.xpose.msra.mxu0 %v12996_v29  ;;  %17457 = vmatprep.mubr.msk.bf16.mxu0 %vm18446_vm2, %v26918_v21  ;;  %v26969_v29 = vld [vmem:[#allocation117_spill] sm:$0xff] }
 0x930   : > { %v18099_v30 = vpop.eup %18098  ;;  %v9972_v39 = vpack.c.bf16 %v9929_v54, %v9928_v35  ;;  %17451 = vmatprep.subr.bf16.mxu0 %v26918_v21 }
 0x931   : > { %v18101_v24 = vpop.eup %18100  ;;  %v9769_v63 = vpop.xlane.xlu1 %9768  ;;  %v9923_v44 = vmul.f32 %v18099_v30, %v24112_v27 }
 0x932   : > { %v9766_v45 = vpop.xlane.xlu0 %9765  ;;  %18110 = vrcp.f32 %v9769_v63  ;;  %17446 = vmatmul.mubr.msk.bf16.vlgmr.msra.gmra.mrb[68].mxu1 %vm9175_vm1, %v26960_v42  ;;  %v13052_v48 = vsel %vm9175_vm1, %v9972_v39, 0  ;;  %v9922_v3 = vmul.f32 %v18101_v24, %v26961_v62  ;;  %v26971_v62 = vld [vmem:[#allocation119_spill] sm:$0xff] }
 0x933   : > { %18112 = vrcp.f32 %v9766_v45  ;;  %17462 = vmatpush3.bf16.xpose.msra.mxu1 %v13052_v48  ;;  %17469 = vmatprep.mubr.msk.bf16.mxu1 %vm18446_vm2, %v26918_v21 }
 0x934   : > { %v18103_v14 = vpop.eup %18102  ;;  %v9969_v20 = vpack.c.bf16 %v9923_v44, %v9922_v3  ;;  %17463 = vmatprep.subr.bf16.mxu1 %v26918_v21  ;;  %v26970_v44 = vld [vmem:[#allocation44_spill] sm:$0xff] }
 0x935   : > { %v18105_v52 = vpop.eup %18104  ;;  %v9751_v19 = vpop.xlane.xlu1 %9750  ;;  %v9931_v17 = vmul.f32 %v18103_v14, %v26962_v13  ;;  %v26973_v13 = vld [vmem:[#allocation149_spill] sm:$0xff] }
 0x936   : > { %v9748_v27 = vpop.xlane.xlu0 %9747  ;;  %18114 = vrcp.f32 %v9751_v19  ;;  %v12999_v34 = vsel %vm9175_vm1, %v9969_v20, 0  ;;  %v9930_v46 = vmul.f32 %v18105_v52, %v26963_v61 }
 0x937   : > { %18116 = vrcp.f32 %v9748_v27  ;;  %17452 = vmatpush3.bf16.xpose.msra.mxu0 %v12999_v34  ;;  %v26972_v27 = vld [vmem:[#allocation231_spill] sm:$0xff] }
 0x938   : > { %v18107_v2 = vpop.eup %18106  ;;  %v9973_v12 = vpack.c.bf16 %v9931_v17, %v9930_v46  ;;  %17453 = vmatprep.subr.bf16.mxu0 %v26918_v21  ;;  %v26974_v17 = vpack.i.b16 %v26972_v27, %v26973_v13 }
 0x939   : > { %v18109_v59 = vpop.eup %18108  ;;  %v9775_v43 = vpop.xlane.xlu1 %9774  ;;  %v9925_v9 = vmul.f32 %v18107_v2, %v26964_v23 }
 0x93a   : > { %v9772_v60 = vpop.xlane.xlu0 %9771  ;;  %18118 = vrcp.f32 %v9775_v43  ;;  %v13055_v5 = vsel %vm9175_vm1, %v9973_v12, 0  ;;  %v9924_v26 = vmul.f32 %v18109_v59, %v26965_v0  ;;  %v26975_v59 = vld [vmem:[#allocation143_spill] sm:$0xff] }
 0x93b   : > { %18120 = vrcp.f32 %v9772_v60  ;;  %17464 = vmatpush3.bf16.xpose.msra.mxu1 %v13055_v5 }
 0x93c   : > { %v18111_v47 = vpop.eup %18110  ;;  %v9970_v10 = vpack.c.bf16 %v9925_v9, %v9924_v26  ;;  %17465 = vmatprep.subr.bf16.mxu1 %v26918_v21 }
 0x93d   : > { %v18113_v40 = vpop.eup %18112  ;;  %v9933_v41 = vmul.f32 %v18111_v47, %v26966_v18  ;;  %v9781_v1 = vpop.xlane.xlu1 %9780 }
 0x93e   : > { %v13002_v38 = vsel %vm9175_vm1, %v9970_v10, 0  ;;  %v9932_v56 = vmul.f32 %v18113_v40, %v26967_v31  ;;  %18122 = vrcp.f32 %v9781_v1 }
 0x93f   : > { %17454 = vmatpush3.bf16.xpose.msra.mxu0 %v13002_v38 }
 0x940   : > { %v18115_v7 = vpop.eup %18114  ;;  %v9974_v58 = vpack.c.bf16 %v9933_v41, %v9932_v56  ;;  %17455 = vmatprep.subr.bf16.mxu0 %v26918_v21 }
 0x941   : > { %v18117_v54 = vpop.eup %18116  ;;  %v9927_v36 = vmul.f32 %v18115_v7, %v26968_v16  ;;  %v9805_v63 = vpop.xlane.xlu1 %9804 }
 0x942   : > { %v13058_v11 = vsel %vm9175_vm1, %v9974_v58, 0  ;;  %v9926_v35 = vmul.f32 %v18117_v54, %v26969_v29 }
 0x943   : > { %17466 = vmatpush3.bf16.xpose.msra.mxu1 %v13058_v11 }
 0x944   : > { %v18119_v30 = vpop.eup %18118  ;;  %v9971_v39 = vpack.c.bf16 %v9927_v36, %v9926_v35  ;;  %17467 = vmatprep.subr.bf16.mxu1 %v26918_v21 }
 0x945   : > { %v18121_v24 = vpop.eup %18120  ;;  %v9778_v45 = vpop.xlane.xlu0 %9777  ;;  %v9935_v42 = vmul.f32 %v18119_v30, %v26970_v44 }
 0x946   : > { %18124 = vrcp.f32 %v9778_v45  ;;  %v13005_v48 = vsel %vm9175_vm1, %v9971_v39, 0  ;;  %v9934_v3 = vmul.f32 %v18121_v24, %v26971_v62 }
 0x947   : > { %17456 = vmatpush3.bf16.xpose.msra.mxu0 %v13005_v48  ;;  %18126 = vrcp.f32 %v9805_v63 }
 0x948   : > { %v9975_v14 = vpack.c.bf16 %v9935_v42, %v9934_v3  ;;  %17473 = vmatprep.subr.bf16.mxu0 %v26918_v21  ;;  %v18123_v19 = vpop.eup %18122 }
 0x949   : > { %v9802_v20 = vpop.xlane.xlu0 %9801  ;;  %v9937_v2 = vmul.f32 %v18123_v19, %v24180_v33 }
 0x94a   : > { %18128 = vrcp.f32 %v9802_v20  ;;  %v13061_v52 = vsel %vm9175_vm1, %v9975_v14, 0 }
 0x94b   : > { %17468 = vmatpush3.bf16.xpose.msra.mxu1 %v13061_v52  ;;  %v9787_v34 = vpop.xlane.xlu1 %9786 }
 0x94c   : > { %17485 = vmatprep.subr.bf16.mxu1 %v26918_v21  ;;  %18130 = vrcp.f32 %v9787_v34 }
 0x94e   : > { %17458 = vmatmul.mubr.msk.bf16.vlgmr.msra.gmra.mrb[40].mxu0 %vm9175_vm1, %v26974_v17 }
 0x94f   : > { %17481 = vmatprep.mubr.msk.bf16.mxu0 %vm18446_vm2, %v26918_v21  ;;  %v9811_v23 = vpop.xlane.xlu1 %9810 }
 0x950   : > { %v18125_v61 = vpop.eup %18124 }
 0x951   : > { %v9936_v46 = vmul.f32 %v18125_v61, %v24198_v28  ;;  %v18127_v12 = vpop.eup %18126  ;;  %v26977_v61 = vld [vmem:[#allocation145_spill] sm:$0xff] }
 0x952   : > { %17470 = vmatmul.mubr.msk.bf16.vlgmr.msra.gmra.mrb[72].mxu1 %vm9175_vm1, %v26975_v59  ;;  %v9945_v28 = vmul.f32 %v18127_v12, %v24189_v51 }
 0x953   : > { %v9976_v43 = vpack.c.bf16 %v9937_v2, %v9936_v46  ;;  %17493 = vmatprep.mubr.msk.bf16.mxu1 %vm18446_vm2, %v26918_v21 }
 0x954   : > { %v18129_v60 = vpop.eup %18128 }
 0x955   : > { %v9784_v9 = vpop.xlane.xlu0 %9783  ;;  %v13108_v5 = vsel %vm9175_vm1, %v9976_v43, 0  ;;  %v9944_v0 = vmul.f32 %v18129_v60, %v24204_v4 }
 0x956   : > { %18132 = vrcp.f32 %v9784_v9  ;;  %17474 = vmatpush3.bf16.xpose.msra.mxu0 %v13108_v5  ;;  %v18131_v10 = vpop.eup %18130 }
 0x957   : > { %v9980_v33 = vpack.c.bf16 %v9945_v28, %v9944_v0  ;;  %17475 = vmatprep.subr.bf16.mxu0 %v26918_v21  ;;  %18134 = vrcp.f32 %v9811_v23  ;;  %v9939_v51 = vmul.f32 %v18131_v10, %v24212_v15 }
 0x959   : > { %v9808_v26 = vpop.xlane.xlu0 %9807  ;;  %v13164_v47 = vsel %vm9175_vm1, %v9980_v33, 0 }
 0x95a   : > { %18136 = vrcp.f32 %v9808_v26  ;;  %17486 = vmatpush3.bf16.xpose.msra.mxu1 %v13164_v47 }
 0x95b   : > { %17487 = vmatprep.subr.bf16.mxu1 %v26918_v21  ;;  %v9793_v40 = vpop.xlane.xlu1 %9792 }
 0x95c   : > { %18138 = vrcp.f32 %v9793_v40 }
 0x95f   : > { %v9817_v56 = vpop.xlane.xlu1 %9816 }
 0x960   : > { %v18133_v18 = vpop.eup %18132 }
 0x961   : > { %v9938_v4 = vmul.f32 %v18133_v18, %v24228_v57  ;;  %v18135_v41 = vpop.eup %18134 }
 0x962   : > { %v9947_v54 = vmul.f32 %v18135_v41, %v24220_v6 }
 0x963   : > { %v9977_v38 = vpack.c.bf16 %v9939_v51, %v9938_v4 }
 0x964   : > { %v18137_v31 = vpop.eup %18136 }
 0x965   : > { %v9790_v1 = vpop.xlane.xlu0 %9789  ;;  %v13111_v7 = vsel %vm9175_vm1, %v9977_v38, 0  ;;  %v9946_v58 = vmul.f32 %v18137_v31, %v24233_v8 }
 0x966   : > { %18140 = vrcp.f32 %v9790_v1  ;;  %17476 = vmatpush3.bf16.xpose.msra.mxu0 %v13111_v7  ;;  %v18139_v36 = vpop.eup %18138 }
 0x967   : > { %v9981_v16 = vpack.c.bf16 %v9947_v54, %v9946_v58  ;;  %17477 = vmatprep.subr.bf16.mxu0 %v26918_v21  ;;  %18142 = vrcp.f32 %v9817_v56  ;;  %v9941_v6 = vmul.f32 %v18139_v36, %v24240_v55 }
 0x969   : > { %v9814_v57 = vpop.xlane.xlu0 %9813  ;;  %v13167_v15 = vsel %vm9175_vm1, %v9981_v16, 0 }
 0x96a   : > { %18144 = vrcp.f32 %v9814_v57  ;;  %17488 = vmatpush3.bf16.xpose.msra.mxu1 %v13167_v15 }
 0x96b   : > { %17489 = vmatprep.subr.bf16.mxu1 %v26918_v21  ;;  %v9799_v11 = vpop.xlane.xlu1 %9798 }
 0x96c   : > { %18146 = vrcp.f32 %v9799_v11 }
 0x96f   : > { %v9823_v24 = vpop.xlane.xlu1 %9822 }
 0x970   : > { %v18141_v29 = vpop.eup %18140 }
 0x971   : > { %v9940_v8 = vmul.f32 %v18141_v29, %v24257_v50  ;;  %v18143_v35 = vpop.eup %18142 }
 0x972   : > { %v9949_v42 = vmul.f32 %v18143_v35, %v24248_v25 }
 0x973   : > { %v9978_v30 = vpack.c.bf16 %v9941_v6, %v9940_v8 }
 0x974   : > { %v18145_v39 = vpop.eup %18144 }
 0x975   : > { %v9796_v63 = vpop.xlane.xlu0 %9795  ;;  %v13114_v45 = vsel %vm9175_vm1, %v9978_v30, 0  ;;  %v9948_v44 = vmul.f32 %v18145_v39, %v24262_v37 }
 0x976   : > { %18148 = vrcp.f32 %v9796_v63  ;;  %17478 = vmatpush3.bf16.xpose.msra.mxu0 %v13114_v45  ;;  %v18147_v62 = vpop.eup %18146 }
 0x977   : > { %v9982_v48 = vpack.c.bf16 %v9949_v42, %v9948_v44  ;;  %17479 = vmatprep.subr.bf16.mxu0 %v26918_v21  ;;  %18150 = vrcp.f32 %v9823_v24  ;;  %v9943_v37 = vmul.f32 %v18147_v62, %v24270_v49  ;;  %v26979_v49 = vld [vmem:[#allocation150_spill] sm:$0xff] }
 0x979   : > { %v9820_v50 = vpop.xlane.xlu0 %9819  ;;  %v13170_v55 = vsel %vm9175_vm1, %v9982_v48, 0 }
 0x97a   : > { %18152 = vrcp.f32 %v9820_v50  ;;  %17490 = vmatpush3.bf16.xpose.msra.mxu1 %v13170_v55 }
 0x97b   : > { %17491 = vmatprep.subr.bf16.mxu1 %v26918_v21  ;;  %v26976_v21 = vld [vmem:[#allocation142_spill] sm:$0xff] }
 0x97c   : > { %v26978_v46 = vpack.i.b16 %v26976_v21, %v26977_v61 }
 0x980   : > { %v18149_v3 = vpop.eup %18148 }
 0x981   : > { %v9942_v14 = vmul.f32 %v18149_v3, %v24290_v53  ;;  %v18151_v25 = vpop.eup %18150 }
 0x982   : > { %v9951_v13 = vmul.f32 %v18151_v25, %v24280_v22  ;;  %v26980_v25 = vld [vmem:[#allocation56_spill] sm:$0xff] }
 0x983   : > { %v9979_v20 = vpack.c.bf16 %v9943_v37, %v9942_v14 }
 0x984   : > { %v18153_v52 = vpop.eup %18152 }
 0x985   : > { %v13117_v19 = vsel %vm9175_vm1, %v9979_v20, 0  ;;  %v9950_v27 = vmul.f32 %v18153_v52, %v24299_v32 }
 0x986   : > { %17480 = vmatpush3.bf16.xpose.msra.mxu0 %v13117_v19 }
 0x987   : > { %v9983_v17 = vpack.c.bf16 %v9951_v13, %v9950_v27 }
 0x989   : > { %v13173_v34 = vsel %vm9175_vm1, %v9983_v17, 0 }
 0x98a   : > { %17492 = vmatpush3.bf16.xpose.msra.mxu1 %v13173_v34 }
 0x98d   : > { %17482 = vmatmul.mubr.msk.bf16.vlgmr.msra.gmra.mrb[44].mxu0 %vm9175_vm1, %v26978_v46 }
 0x991   : > { %17494 = vmatmul.mubr.msk.bf16.vlgmr.msra.gmra.mrb[76].mxu1 %vm9175_vm1, %v26979_v49 }
 0x9b9   : > { %v12817_v53 = vpop.f32.mrb[32].mxu0 }
 0x9ba   : > { %v17411_v2 = vpop.f32.mrb[33].mxu0  ;;  %13216 = vxpose.xlu0.b32.start [1/2] (short) (narrow) %v12817_v53, 64 }
 0x9bb   : > { %v12820_v12 = vpop.f32.mrb[34].mxu0 }
 0x9bc   : > { %v17412_v32 = vpop.f32.mrb[35].mxu0  ;;  %v12873_v59 = vpop.f32.mrb[64].mxu1 }
 0x9bd   : > { %13248 = vxpose.xlu1.b32.start [1/2] (short) (narrow) %v12873_v59, 64  ;;  %v17423_v22 = vpop.f32.mrb[65].mxu1 }
 0x9be   : > { %13217 = vxpose.xlu0.b32.end [2/2] (short) (narrow) %v12820_v12, 64  ;;  %v12876_v43 = vpop.f32.mrb[66].mxu1 }
 0x9bf   : > { %v17424_v60 = vpop.f32.mrb[67].mxu1 }
 0x9c1   : > { %13249 = vxpose.xlu1.b32.end [2/2] (short) (narrow) %v12876_v43, 64 }
 0xa01   : > { %v12929_v23 = vpop.f32.mrb[36].mxu0 }
 0xa02   : > { %13280 = vxpose.xlu0.b32.start [1/2] (short) (narrow) %v12929_v23, 64  ;;  %v17435_v9 = vpop.f32.mrb[37].mxu0 }
 0xa03   : > { %v12932_v5 = vpop.f32.mrb[38].mxu0 }
 0xa04   : > { %v17436_v0 = vpop.f32.mrb[39].mxu0 }
 0xa05   : > { %v12985_v28 = vpop.f32.mrb[68].mxu1 }
 0xa06   : > { %13281 = vxpose.xlu0.b32.end [2/2] (short) (narrow) %v12932_v5, 64  ;;  %13312 = vxpose.xlu1.b32.start [1/2] (short) (narrow) %v12985_v28, 64  ;;  %v17447_v33 = vpop.f32.mrb[69].mxu1  ;;  %v26981_v5 = vld [vmem:[#allocation57_spill] sm:$0xff] }
 0xa07   : > { %v12988_v26 = vpop.f32.mrb[70].mxu1 }
 0xa08   : > { %v17448_v47 = vpop.f32.mrb[71].mxu1 }
 0xa0a   : > { %13313 = vxpose.xlu1.b32.end [2/2] (short) (narrow) %v12988_v26, 64 }
 0xa21   : > { %v13041_v10 = vpop.f32.mrb[40].mxu0 }
 0xa22   : > { %13344 = vxpose.xlu0.b32.start [1/2] (short) (narrow) %v13041_v10, 64  ;;  %v17459_v40 = vpop.f32.mrb[41].mxu0 }
 0xa23   : > { %v13044_v18 = vpop.f32.mrb[42].mxu0 }
 0xa24   : > { %v17460_v4 = vpop.f32.mrb[43].mxu0 }
 0xa25   : > { %v13097_v51 = vpop.f32.mrb[72].mxu1 }
 0xa26   : > { %13345 = vxpose.xlu0.b32.end [2/2] (short) (narrow) %v13044_v18, 64  ;;  %13376 = vxpose.xlu1.b32.start [1/2] (short) (narrow) %v13097_v51, 64  ;;  %v17471_v41 = vpop.f32.mrb[73].mxu1 }
 0xa27   : > { %v13100_v38 = vpop.f32.mrb[74].mxu1 }
 0xa28   : > { %v17472_v31 = vpop.f32.mrb[75].mxu1 }
 0xa2a   : > { %13377 = vxpose.xlu1.b32.end [2/2] (short) (narrow) %v13100_v38, 64 }
 0xa3a   : > { %v13232_v56 = vpop.trf.xlu0 }
 0xa3d   : > { %v13264_v1 = vpop.trf.xlu1 }
 0xa3e   : > { %v13233_v7 = vpop.trf.xlu0 }
 0xa41   : > { %v13265_v58 = vpop.trf.xlu1 }
 0xa42   : > { %v13234_v54 = vpop.trf.xlu0 }
 0xa45   : > { %v24425_v36 = vpop.trf.xlu1 }
 0xa46   : > { %v24427_v8 = vpop.trf.xlu0 }
 0xa49   : > { %v24429_v39 = vpop.trf.xlu1 }
 0xa4a   : > { %v24431_v24 = vpop.trf.xlu0 }
 0xa4d   : > { %v24433_v63 = vpop.trf.xlu1 }
 0xa4e   : > { %v24435_v45 = vpop.trf.xlu0 }
 0xa51   : > { %v24437_v44 = vpop.trf.xlu1 }
 0xa52   : > { %v24439_v42 = vpop.trf.xlu0 }
 0xa55   : > { %v24441_v48 = vpop.trf.xlu1 }
 0xa56   : > { %v24443_v50 = vpop.trf.xlu0 }
 0xa59   : > { %v24445_v55 = vpop.trf.xlu1 }
 0xa60   : > { %v13153_v16 = vpop.f32.mrb[44].mxu0 }
 0xa61   : > { %13408 = vxpose.xlu0.b32.start [1/2] (short) (narrow) %v13153_v16, 64  ;;  %v17483_v57 = vpop.f32.mrb[45].mxu0 }
 0xa62   : > { %v13156_v15 = vpop.f32.mrb[46].mxu0 }
 0xa63   : > { %v17484_v11 = vpop.f32.mrb[47].mxu0 }
 0xa64   : > { %v13209_v29 = vpop.f32.mrb[76].mxu1 }
 0xa65   : > { %13409 = vxpose.xlu0.b32.end [2/2] (short) (narrow) %v13156_v15, 64  ;;  %13440 = vxpose.xlu1.b32.start [1/2] (short) (narrow) %v13209_v29, 64  ;;  %v17495_v6 = vpop.f32.mrb[77].mxu1 }
 0xa66   : > { %v13212_v35 = vpop.f32.mrb[78].mxu1 }
 0xa67   : > { %v17496_v30 = vpop.f32.mrb[79].mxu1 }
 0xa69   : > { %13441 = vxpose.xlu1.b32.end [2/2] (short) (narrow) %v13212_v35, 64 }
 0xa82   : > { %v13296_v62 = vpop.trf.xlu0 }
 0xa83   : > { %v13472_v3 = vcombine.low %v13232_v56, %v13296_v62  ;;  %v13473_v14 = vcombine.high %v13232_v56, %v13296_v62 }
 0xa85   : > { %v13480_v20 = vrot.slane %v13472_v3, %v26980_v25  ;;  %v13487_v52 = vrot.slane %v13473_v14, %v26980_v25 }
 0xa86   : > { %v13328_v37 = vpop.trf.xlu1  ;;  %v13297_v19 = vpop.trf.xlu0 }
 0xa87   : > { %v13488_v27 = vcombine.low %v13264_v1, %v13328_v37  ;;  %v13489_v13 = vcombine.high %v13264_v1, %v13328_v37  ;;  %v13608_v17 = vcombine.low %v13233_v7, %v13297_v19  ;;  %v13609_v34 = vcombine.high %v13233_v7, %v13297_v19 }
 0xa89   : > { %v13496_v21 = vrot.slane %v13488_v27, %v26980_v25  ;;  %v13503_v61 = vrot.slane %v13489_v13, %v26980_v25  ;;  %v13616_v49 = vrot.slane %v13608_v17, %v26980_v25  ;;  %v13623_v53 = vrot.slane %v13609_v34, %v26980_v25 }
 0xa8a   : > { %v13329_v46 = vpop.trf.xlu1  ;;  %v13298_v2 = vpop.trf.xlu0 }
 0xa8b   : > { %v13536_v12 = vcombine.low %v13480_v20, %v13496_v21  ;;  %v13537_v32 = vcombine.high %v13480_v20, %v13496_v21  ;;  %v13552_v59 = vcombine.low %v13487_v52, %v13503_v61  ;;  %v13553_v22 = vcombine.high %v13487_v52, %v13503_v61 }
 0xa8c   : > { %v13624_v43 = vcombine.low %v13265_v58, %v13329_v46  ;;  %v13625_v60 = vcombine.high %v13265_v58, %v13329_v46  ;;  %v13744_v23 = vcombine.low %v13234_v54, %v13298_v2  ;;  %v13745_v9 = vcombine.high %v13234_v54, %v13298_v2 }
 0xa8d   : > { %v13544_v0 = vrot.slane %v13536_v12, %v26981_v5  ;;  %v13551_v28 = vrot.slane %v13537_v32, %v26981_v5  ;;  %v13560_v33 = vrot.slane %v13552_v59, %v26981_v5  ;;  %v13567_v26 = vrot.slane %v13553_v22, %v26981_v5 }
 0xa8e   : > { %v13632_v47 = vrot.slane %v13624_v43, %v26980_v25  ;;  %v13639_v10 = vrot.slane %v13625_v60, %v26980_v25  ;;  %v13330_v40 = vpop.trf.xlu1  ;;  %v13752_v18 = vrot.slane %v13744_v23, %v26980_v25  ;;  %v13759_v4 = vrot.slane %v13745_v9, %v26980_v25  ;;  %v13299_v61 = vpop.trf.xlu0 }
 0xa8f   : > { %v17025_v51 = vcombine.low %v13544_v0, %v13551_v28  ;;  %v17027_v41 = vcombine.high %v13544_v0, %v13551_v28  ;;  %v17029_v38 = vcombine.low %v13560_v33, %v13567_v26  ;;  %v17031_v31 = vcombine.high %v13560_v33, %v13567_v26 }
 0xa90   : > { %v13672_v56 = vcombine.low %v13616_v49, %v13632_v47  ;;  %v13673_v1 = vcombine.high %v13616_v49, %v13632_v47  ;;  %v13688_v7 = vcombine.low %v13623_v53, %v13639_v10  ;;  %v13689_v58 = vcombine.high %v13623_v53, %v13639_v10 }
 0xa91   : > { %v24462_v54 = vrot.slane %v17025_v51, %v26980_v25  ;;  %v24465_v16 = vrot.slane %v17027_v41, %v26980_v25  ;;  %v24468_v57 = vrot.slane %v17029_v38, %v26980_v25  ;;  %v24471_v15 = vrot.slane %v17031_v31, %v26980_v25 }
 0xa92   : > { %v13680_v11 = vrot.slane %v13672_v56, %v26981_v5  ;;  %v13687_v29 = vrot.slane %v13673_v1, %v26981_v5  ;;  %v13696_v6 = vrot.slane %v13688_v7, %v26981_v5  ;;  %v13703_v35 = vrot.slane %v13689_v58, %v26981_v5  ;;  %v13331_v30 = vpop.trf.xlu1  ;;  %v13300_v51 = vpop.trf.xlu0 }
 0xa93   : > { %v13760_v62 = vcombine.low %v24425_v36, %v13330_v40  ;;  %v13761_v3 = vcombine.high %v24425_v36, %v13330_v40  ;;  %v13896_v14 = vcombine.low %v24429_v39, %v13331_v30  ;;  %v13897_v37 = vcombine.high %v24429_v39, %v13331_v30 }
 0xa94   : > { %v17033_v20 = vcombine.low %v13680_v11, %v13687_v29  ;;  %v17035_v52 = vcombine.high %v13680_v11, %v13687_v29  ;;  %v17037_v19 = vcombine.low %v13696_v6, %v13703_v35  ;;  %v17039_v27 = vcombine.high %v13696_v6, %v13703_v35 }
 0xa95   : > { %v13768_v13 = vrot.slane %v13760_v62, %v26980_v25  ;;  %v13775_v17 = vrot.slane %v13761_v3, %v26980_v25  ;;  %v13904_v34 = vrot.slane %v13896_v14, %v26980_v25  ;;  %v13911_v21 = vrot.slane %v13897_v37, %v26980_v25 }
 0xa96   : > { %v24486_v46 = vrot.slane %v17033_v20, %v26980_v25  ;;  %v24489_v36 = vrot.slane %v17035_v52, %v26980_v25  ;;  %v24492_v39 = vrot.slane %v17037_v19, %v26980_v25  ;;  %v24495_v49 = vrot.slane %v17039_v27, %v26980_v25  ;;  %v13332_v53 = vpop.trf.xlu1 }
 0xa97   : > { %v13808_v2 = vcombine.low %v13752_v18, %v13768_v13  ;;  %v13809_v12 = vcombine.high %v13752_v18, %v13768_v13  ;;  %v13824_v32 = vcombine.low %v13759_v4, %v13775_v17  ;;  %v13825_v59 = vcombine.high %v13759_v4, %v13775_v17 }
 0xa98   : > { %v13880_v22 = vcombine.low %v24427_v8, %v13299_v61  ;;  %v13881_v43 = vcombine.high %v24427_v8, %v13299_v61  ;;  %v14032_v60 = vcombine.low %v24433_v63, %v13332_v53  ;;  %v14033_v23 = vcombine.high %v24433_v63, %v13332_v53  ;;  %v13301_v53 = vpop.trf.xlu0 }
 0xa99   : > { %v13816_v9 = vrot.slane %v13808_v2, %v26981_v5  ;;  %v13823_v0 = vrot.slane %v13809_v12, %v26981_v5  ;;  %v13832_v28 = vrot.slane %v13824_v32, %v26981_v5  ;;  %v13839_v33 = vrot.slane %v13825_v59, %v26981_v5 }
 0xa9a   : > { %v13888_v26 = vrot.slane %v13880_v22, %v26980_v25  ;;  %v13895_v47 = vrot.slane %v13881_v43, %v26980_v25  ;;  %v14040_v10 = vrot.slane %v14032_v60, %v26980_v25  ;;  %v14047_v8 = vrot.slane %v14033_v23, %v26980_v25  ;;  %v13333_v41 = vpop.trf.xlu1 }
 0xa9b   : > { %v17041_v40 = vcombine.low %v13816_v9, %v13823_v0  ;;  %v17043_v18 = vcombine.high %v13816_v9, %v13823_v0  ;;  %v17045_v4 = vcombine.low %v13832_v28, %v13839_v33  ;;  %v17047_v63 = vcombine.high %v13832_v28, %v13839_v33 }
 0xa9c   : > { %v13944_v38 = vcombine.low %v13888_v26, %v13904_v34  ;;  %v13945_v31 = vcombine.high %v13888_v26, %v13904_v34  ;;  %v13960_v56 = vcombine.low %v13895_v47, %v13911_v21  ;;  %v13961_v1 = vcombine.high %v13895_v47, %v13911_v21 }
 0xa9d   : > { %v24510_v7 = vrot.slane %v17041_v40, %v26980_v25  ;;  %v24513_v58 = vrot.slane %v17043_v18, %v26980_v25  ;;  %v24516_v11 = vrot.slane %v17045_v4, %v26980_v25  ;;  %v24519_v29 = vrot.slane %v17047_v63, %v26980_v25 }
 0xa9e   : > { %v13952_v6 = vrot.slane %v13944_v38, %v26981_v5  ;;  %v13959_v35 = vrot.slane %v13945_v31, %v26981_v5  ;;  %v13968_v30 = vrot.slane %v13960_v56, %v26981_v5  ;;  %v13975_v62 = vrot.slane %v13961_v1, %v26981_v5  ;;  %v13334_v2 = vpop.trf.xlu1 }
 0xa9f   : > { %v14016_v3 = vcombine.low %v24431_v24, %v13300_v51  ;;  %v14017_v14 = vcombine.high %v24431_v24, %v13300_v51  ;;  %v14168_v37 = vcombine.low %v24437_v44, %v13333_v41  ;;  %v14169_v20 = vcombine.high %v24437_v44, %v13333_v41  ;;  %v13302_v41 = vpop.trf.xlu0 }
 0xaa0   : > { %v17049_v52 = vcombine.low %v13952_v6, %v13959_v35  ;;  %v17051_v19 = vcombine.high %v13952_v6, %v13959_v35  ;;  %v17053_v27 = vcombine.low %v13968_v30, %v13975_v62  ;;  %v17055_v13 = vcombine.high %v13968_v30, %v13975_v62 }
 0xaa1   : > { %v14024_v17 = vrot.slane %v14016_v3, %v26980_v25  ;;  %v14031_v34 = vrot.slane %v14017_v14, %v26980_v25  ;;  %v14176_v21 = vrot.slane %v14168_v37, %v26980_v25  ;;  %v14183_v61 = vrot.slane %v14169_v20, %v26980_v25 }
 0xaa2   : > { %v24534_v24 = vrot.slane %v17049_v52, %v26980_v25  ;;  %v24537_v12 = vrot.slane %v17051_v19, %v26980_v25  ;;  %v24540_v44 = vrot.slane %v17053_v27, %v26980_v25  ;;  %v24543_v32 = vrot.slane %v17055_v13, %v26980_v25 }
 0xaa3   : > { %v14080_v59 = vcombine.low %v14024_v17, %v14040_v10  ;;  %v14081_v22 = vcombine.high %v14024_v17, %v14040_v10  ;;  %v14096_v43 = vcombine.low %v14031_v34, %v14047_v8  ;;  %v14097_v60 = vcombine.high %v14031_v34, %v14047_v8 }
 0xaa4   : > { %v14152_v23 = vcombine.low %v24435_v45, %v13301_v53  ;;  %v14153_v9 = vcombine.high %v24435_v45, %v13301_v53  ;;  %v14304_v0 = vcombine.low %v24441_v48, %v13334_v2  ;;  %v14305_v28 = vcombine.high %v24441_v48, %v13334_v2 }
 0xaa5   : > { %v14088_v33 = vrot.slane %v14080_v59, %v26981_v5  ;;  %v14095_v26 = vrot.slane %v14081_v22, %v26981_v5  ;;  %v14104_v47 = vrot.slane %v14096_v43, %v26981_v5  ;;  %v14111_v40 = vrot.slane %v14097_v60, %v26981_v5  ;;  %v13335_v43 = vpop.trf.xlu1 }
 0xaa6   : > { %v14160_v10 = vrot.slane %v14152_v23, %v26980_v25  ;;  %v14167_v8 = vrot.slane %v14153_v9, %v26980_v25  ;;  %v14312_v18 = vrot.slane %v14304_v0, %v26980_v25  ;;  %v14319_v45 = vrot.slane %v14305_v28, %v26980_v25 }
 0xaa7   : > { %v17057_v4 = vcombine.low %v14088_v33, %v14095_v26  ;;  %v17059_v63 = vcombine.high %v14088_v33, %v14095_v26  ;;  %v17061_v51 = vcombine.low %v14104_v47, %v14111_v40  ;;  %v17063_v48 = vcombine.high %v14104_v47, %v14111_v40 }
 0xaa8   : > { %v14216_v38 = vcombine.low %v14160_v10, %v14176_v21  ;;  %v14217_v31 = vcombine.high %v14160_v10, %v14176_v21  ;;  %v14232_v56 = vcombine.low %v14167_v8, %v14183_v61  ;;  %v14233_v1 = vcombine.high %v14167_v8, %v14183_v61 }
 0xaa9   : > { %v24558_v6 = vrot.slane %v17057_v4, %v26980_v25  ;;  %v24561_v35 = vrot.slane %v17059_v63, %v26980_v25  ;;  %v24564_v30 = vrot.slane %v17061_v51, %v26980_v25  ;;  %v24567_v62 = vrot.slane %v17063_v48, %v26980_v25 }
 0xaaa   : > { %v14224_v3 = vrot.slane %v14216_v38, %v26981_v5  ;;  %v14231_v14 = vrot.slane %v14217_v31, %v26981_v5  ;;  %v14240_v37 = vrot.slane %v14232_v56, %v26981_v5  ;;  %v14247_v20 = vrot.slane %v14233_v1, %v26981_v5 }
 0xaab   : > { %v14288_v52 = vcombine.low %v24439_v42, %v13302_v41  ;;  %v14289_v19 = vcombine.high %v24439_v42, %v13302_v41  ;;  %v14625_v27 = vcombine.high %v24462_v54, %v24465_v16  ;;  %v14657_v13 = vcombine.high %v24468_v57, %v24471_v15  ;;  %v13303_v42 = vpop.trf.xlu0 }
 0xaac   : > { %v17065_v17 = vcombine.low %v14224_v3, %v14231_v14  ;;  %v17067_v34 = vcombine.high %v14224_v3, %v14231_v14  ;;  %v17069_v21 = vcombine.low %v14240_v37, %v14247_v20  ;;  %v17071_v61 = vcombine.high %v14240_v37, %v14247_v20 }
 0xaad   : > { %v14296_v53 = vrot.slane %v14288_v52, %v26980_v25  ;;  %v14303_v2 = vrot.slane %v14289_v19, %v26980_v25  ;;  %v14639_v59 = vrot.slane %v14625_v27, %v26981_v5  ;;  %v14671_v22 = vrot.slane %v14657_v13, %v26981_v5 }
 0xaae   : > { %v24584_v60 = vrot.slane %v17065_v17, %v26980_v25  ;;  %v24587_v23 = vrot.slane %v17067_v34, %v26980_v25  ;;  %v24590_v9 = vrot.slane %v17069_v21, %v26980_v25  ;;  %v24593_v0 = vrot.slane %v17071_v61, %v26980_v25  ;;  %v24625_v21 = vpop.trf.xlu1 }
 0xaaf   : > { %v14352_v28 = vcombine.low %v14296_v53, %v14312_v18  ;;  %v14353_v33 = vcombine.high %v14296_v53, %v14312_v18  ;;  %v14368_v26 = vcombine.low %v14303_v2, %v14319_v45  ;;  %v14369_v47 = vcombine.high %v14303_v2, %v14319_v45  ;;  %v24604_v18 = vpop.trf.xlu0 }
 0xab0   : > { %v14690_v40 = vcombine.low %v14639_v59, %v14671_v22  ;;  %v14761_v10 = vcombine.high %v24486_v46, %v24489_v36  ;;  %v14793_v8 = vcombine.high %v24492_v39, %v24495_v49  ;;  %v14440_v4 = vcombine.low %v24445_v55, %v13335_v43 }
 0xab1   : > { %v14360_v63 = vrot.slane %v14352_v28, %v26981_v5  ;;  %v14367_v51 = vrot.slane %v14353_v33, %v26981_v5  ;;  %v14376_v48 = vrot.slane %v14368_v26, %v26981_v5  ;;  %v14383_v41 = vrot.slane %v14369_v47, %v26981_v5 }
 0xab2   : > { %v14775_v45 = vrot.slane %v14761_v10, %v26981_v5  ;;  %v14807_v38 = vrot.slane %v14793_v8, %v26981_v5  ;;  %v14441_v31 = vcombine.high %v24445_v55, %v13335_v43  ;;  %v14448_v56 = vrot.slane %v14440_v4, %v26980_v25 }
 0xab3   : > { %v17073_v1 = vcombine.low %v14360_v63, %v14367_v51  ;;  %v17075_v3 = vcombine.high %v14360_v63, %v14367_v51  ;;  %v17077_v14 = vcombine.low %v14376_v48, %v14383_v41  ;;  %v17079_v37 = vcombine.high %v14376_v48, %v14383_v41  ;;  %v24635_v26 = vpop.trf.xlu0  ;;  %v24659_v41 = vpop.trf.xlu1 }
 0xab4   : > { %v14826_v20 = vcombine.low %v14775_v45, %v14807_v38  ;;  %v14455_v52 = vrot.slane %v14441_v31, %v26980_v25  ;;  %v14424_v19 = vcombine.low %v24443_v50, %v13303_v42  ;;  %v14425_v27 = vcombine.high %v24443_v50, %v13303_v42 }
 0xab5   : > { %v24614_v13 = vrot.slane %v17073_v1, %v26980_v25  ;;  %v24617_v17 = vrot.slane %v17075_v3, %v26980_v25  ;;  %v24620_v55 = vrot.slane %v17077_v14, %v26980_v25  ;;  %v24623_v34 = vrot.slane %v17079_v37, %v26980_v25 }
 0xab6   : > { %v17619_v61 = vpack.i.bf16 %v14826_v20, %v14690_v40  ;;  %v14432_v53 = vrot.slane %v14424_v19, %v26980_v25  ;;  %v14439_v2 = vrot.slane %v14425_v27, %v26980_v25  ;;  %v14691_v50 = vcombine.high %v14639_v59, %v14671_v22 }
 0xab7   : > { %v14827_v43 = vcombine.high %v14775_v45, %v14807_v38  ;;  %v14624_v42 = vcombine.low %v24462_v54, %v24465_v16  ;;  %v14656_v28 = vcombine.low %v24468_v57, %v24471_v15  ;;  %v14760_v33 = vcombine.low %v24486_v46, %v24489_v36  ;;  %v24673_v14 = vpop.trf.xlu0 }
 0xab8   : > { %17620 = vrot.lane.b32.xlu1 %v17619_v61, %s18441_s29  ;;  %v14488_v47 = vcombine.low %v14432_v53, %v14448_v56  ;;  %v14489_v40 = vcombine.high %v14432_v53, %v14448_v56  ;;  %v14504_v10 = vcombine.low %v14439_v2, %v14455_v52  ;;  %v14505_v8 = vcombine.high %v14439_v2, %v14455_v52 }
 0xab9   : > { %v17624_v4 = vpack.i.bf16 %v14827_v43, %v14691_v50  ;;  %v24639_v59 = vrot.slane %v14624_v42, %v26981_v5  ;;  %v24642_v54 = vrot.slane %v14656_v28, %v26981_v5  ;;  %v24645_v16 = vrot.slane %v14760_v33, %v26981_v5 }
 0xaba   : > { %v14496_v57 = vrot.slane %v14488_v47, %v26981_v5  ;;  %v14503_v15 = vrot.slane %v14489_v40, %v26981_v5  ;;  %v14512_v46 = vrot.slane %v14504_v10, %v26981_v5  ;;  %v14519_v36 = vrot.slane %v14505_v8, %v26981_v5 }
 0xabb   : > { %v14689_v22 = vcombine.high %v24639_v59, %v24642_v54  ;;  %v14792_v63 = vcombine.low %v24492_v39, %v24495_v49  ;;  %v14896_v51 = vcombine.low %v24510_v7, %v24513_v58  ;;  %v14928_v48 = vcombine.low %v24516_v11, %v24519_v29 }
 0xabc   : > { %v17081_v45 = vcombine.low %v14496_v57, %v14503_v15  ;;  %v17083_v38 = vcombine.high %v14496_v57, %v14503_v15  ;;  %v17085_v31 = vcombine.low %v14512_v46, %v14519_v36  ;;  %v17087_v56 = vcombine.high %v14512_v46, %v14519_v36  ;;  %17625 = vrot.lane.b32.xlu1 %v17624_v4, %s18440_s26  ;;  %v24728_v4 = vpop.trf.xlu0 }
 0xabd   : > { %v24663_v1 = vrot.slane %v14792_v63, %v26981_v5  ;;  %v24666_v3 = vrot.slane %v14896_v51, %v26981_v5  ;;  %v24669_v39 = vrot.slane %v14928_v48, %v26981_v5  ;;  %v15032_v49 = vcombine.low %v24534_v24, %v24537_v12 }
 0xabe   : > { %v24676_v37 = vrot.slane %v17081_v45, %v26980_v25  ;;  %v24679_v20 = vrot.slane %v17083_v38, %v26980_v25  ;;  %v24682_v52 = vrot.slane %v17085_v31, %v26980_v25  ;;  %v24685_v19 = vrot.slane %v17087_v56, %v26980_v25 }
 0xabf   : > { %v14825_v27 = vcombine.high %v24645_v16, %v24663_v1  ;;  %v14961_v61 = vcombine.high %v24666_v3, %v24669_v39  ;;  %v24692_v53 = vrot.slane %v15032_v49, %v26981_v5  ;;  %v15064_v2 = vcombine.low %v24540_v44, %v24543_v32 }
 0xac0   : > { %v14897_v50 = vcombine.high %v24510_v7, %v24513_v58  ;;  %v14929_v43 = vcombine.high %v24516_v11, %v24519_v29  ;;  %v15033_v42 = vcombine.high %v24534_v24, %v24537_v12  ;;  %v15065_v28 = vcombine.high %v24540_v44, %v24543_v32  ;;  %v24711_v7 = vpop.trf.xlu1 }
 0xac1   : > { %v17614_v33 = vpack.i.bf16 %v14825_v27, %v14689_v22  ;;  %v24705_v47 = vrot.slane %v15064_v2, %v26981_v5  ;;  %v15168_v40 = vcombine.low %v24558_v6, %v24561_v35  ;;  %v15200_v10 = vcombine.low %v24564_v30, %v24567_v62 }
 0xac2   : > { %v14911_v58 = vrot.slane %v14897_v50, %v26981_v5  ;;  %v14943_v11 = vrot.slane %v14929_v43, %v26981_v5  ;;  %v15047_v29 = vrot.slane %v15033_v42, %v26981_v5  ;;  %v15079_v24 = vrot.slane %v15065_v28, %v26981_v5  ;;  %v24767_v43 = vpop.trf.xlu0 }
 0xac3   : > { %17615 = vrot.lane.b32.xlu0 %v17614_v33, %s18442_s30  ;;  %v15097_v12 = vcombine.high %v24692_v53, %v24705_v47  ;;  %v24721_v44 = vrot.slane %v15168_v40, %v26981_v5  ;;  %v24724_v32 = vrot.slane %v15200_v10, %v26981_v5  ;;  %v15304_v8 = vcombine.low %v24584_v60, %v24587_v23  ;;  %v17818_v10 = vld [vmem:[#allocation8] ss:$8 sps:$4 sm:$0xff]  }
 0xac4   : > { %v14962_v57 = vcombine.low %v14911_v58, %v14943_v11  ;;  %v15098_v15 = vcombine.low %v15047_v29, %v15079_v24  ;;  %v14963_v46 = vcombine.high %v14911_v58, %v14943_v11  ;;  %v15099_v36 = vcombine.high %v15047_v29, %v15079_v24  ;;  %v24751_v50 = vpop.trf.xlu1  ;;  %v17820_v58 = vld [vmem:[#allocation8 + $0x4] ss:$8 sps:$4 sm:$0xff]  }
 0xac5   : > { %v17629_v22 = vpack.i.bf16 %v15097_v12, %v14961_v61  ;;  %v15233_v63 = vcombine.high %v24721_v44, %v24724_v32  ;;  %v24733_v51 = vrot.slane %v15304_v8, %v26981_v5  ;;  %v15336_v48 = vcombine.low %v24590_v9, %v24593_v0  ;;  %v17823_v8 = vld [vmem:[#allocation8 + $0x14] ss:$8 sps:$4 sm:$0xff]   ;;  %16045 = vmatprep.subr.bf16.mxu0 %v17820_v58 }
 0xac6   : > { %v17634_v45 = vpack.i.bf16 %v15098_v15, %v14962_v57  ;;  %v17639_v38 = vpack.i.bf16 %v15099_v36, %v14963_v46  ;;  %v15169_v31 = vcombine.high %v24558_v6, %v24561_v35  ;;  %v15201_v56 = vcombine.high %v24564_v30, %v24567_v62  ;;  %16046 = vmatpush1.bf16.msra.mxu0 %v17818_v10 }
 0xac7   : > { %17630 = vrot.lane.b32.xlu1 %v17629_v22, %s18442_s30  ;;  %v24743_v49 = vrot.slane %v15336_v48, %v26981_v5  ;;  %v15305_v27 = vcombine.high %v24584_v60, %v24587_v23  ;;  %v15337_v61 = vcombine.high %v24590_v9, %v24593_v0  ;;  %v15440_v2 = vcombine.low %v24614_v13, %v24617_v17 }
 0xac8   : > { %17635 = vrot.lane.b32.xlu0 %v17634_v45, %s18441_s29  ;;  %v15183_v6 = vrot.slane %v15169_v31, %v26981_v5  ;;  %v15215_v35 = vrot.slane %v15201_v56, %v26981_v5  ;;  %v15472_v30 = vcombine.low %v24620_v55, %v24623_v34  ;;  %v15576_v62 = vcombine.low %v24676_v37, %v24679_v20  ;;  %v17826_v56 = vld [vmem:[#allocation8 + $0x24] ss:$8 sps:$4 sm:$0xff]  }
 0xac9   : > { %v15369_v60 = vcombine.high %v24733_v51, %v24743_v49  ;;  %v15319_v23 = vrot.slane %v15305_v27, %v26981_v5  ;;  %v15351_v9 = vrot.slane %v15337_v61, %v26981_v5  ;;  %v24765_v0 = vrot.slane %v15440_v2, %v26981_v5  ;;  %16047 = vmatprep.subr.bf16.mxu0 %v17823_v8  ;;  %v17832_v8 = vld [vmem:[#allocation8 + $0x44] ss:$8 sps:$4 sm:$0xff]  }
 0xaca   : > { %v15234_v42 = vcombine.low %v15183_v6, %v15215_v35  ;;  %v15235_v28 = vcombine.high %v15183_v6, %v15215_v35  ;;  %v24770_v33 = vrot.slane %v15472_v30, %v26981_v5  ;;  %v24773_v40 = vrot.slane %v15576_v62, %v26981_v5 }
 0xacb   : > { %26982 = vst [vmem:[#allocation113_spill] sm:$0xff] %v24765_v0  ;;  %17640 = vrot.lane.b32.xlu1 %v17639_v38, %s18440_s26  ;;  %v17644_v11 = vpack.i.bf16 %v15369_v60, %v15233_v63  ;;  %v15370_v29 = vcombine.low %v15319_v23, %v15351_v9  ;;  %v15371_v24 = vcombine.high %v15319_v23, %v15351_v9  ;;  %v24792_v38 = vpop.trf.xlu1 }
 0xacc   : > { %26983 = vst [vmem:[#allocation52_spill] sm:$0xff] %v24770_v33  ;;  %26984 = vst [vmem:[#allocation160_spill] sm:$0xff] %v24773_v40  ;;  %v15608_v12 = vcombine.low %v24682_v52, %v24685_v19  ;;  %v15505_v57 = vcombine.high %v24765_v0, %v24770_v33  ;;  %v15441_v15 = vcombine.high %v24614_v13, %v24617_v17 }
 0xacd   : > { %v15473_v46 = vcombine.high %v24620_v55, %v24623_v34  ;;  %v15577_v36 = vcombine.high %v24676_v37, %v24679_v20  ;;  %17645 = vrot.lane.b32.xlu0 %v17644_v11, %s18442_s30  ;;  %v17649_v22 = vpack.i.bf16 %v15370_v29, %v15234_v42  ;;  %v17654_v63 = vpack.i.bf16 %v15371_v24, %v15235_v28  ;;  %v17821_v37 = vld [vmem:[#allocation8 + $0x10] ss:$8 sps:$4 sm:$0xff]   ;;  %v17824_v28 = vld [vmem:[#allocation8 + $0x20] ss:$8 sps:$4 sm:$0xff]   ;;  %v17829_v29 = vld [vmem:[#allocation8 + $0x34] ss:$8 sps:$4 sm:$0xff]  }
 0xace   : > { %v24788_v48 = vrot.slane %v15608_v12, %v26981_v5  ;;  %v15609_v45 = vcombine.high %v24682_v52, %v24685_v19  ;;  %v15455_v13 = vrot.slane %v15441_v15, %v26981_v5  ;;  %v24803_v19 = vpop.trf.xlu0  ;;  %16048 = vmatpush1.bf16.msra.mxu0 %v17821_v37  ;;  %v17827_v12 = vld [vmem:[#allocation8 + $0x30] ss:$8 sps:$4 sm:$0xff]   ;;  %v17830_v15 = vld [vmem:[#allocation8 + $0x40] ss:$8 sps:$4 sm:$0xff]  }
 0xacf   : > { %v15487_v17 = vrot.slane %v15473_v46, %v26981_v5  ;;  %v15591_v55 = vrot.slane %v15577_v36, %v26981_v5  ;;  %17650 = vrot.lane.b32.xlu1 %v17649_v22, %s18441_s29  ;;  %v24821_v58 = vpop.trf.xlu1  ;;  %16049 = vmatprep.subr.bf16.mxu0 %v17826_v56  ;;  %v17835_v36 = vld [vmem:[#allocation8 + $0x54] ss:$8 sps:$4 sm:$0xff]   ;;  %v17833_v22 = vld [vmem:[#allocation8 + $0x50] ss:$8 sps:$4 sm:$0xff]  }
 0xad0   : > { %26985 = vst [vmem:[#allocation47_spill] sm:$0xff] %v24788_v48  ;;  %v15641_v20 = vcombine.high %v24773_v40, %v24788_v48  ;;  %v15623_v52 = vrot.slane %v15609_v45, %v26981_v5 }
 0xad1   : > { %v15507_v27 = vcombine.high %v15455_v13, %v15487_v17  ;;  %17655 = vrot.lane.b32.xlu0 %v17654_v63, %s18440_s26  ;;  %v15506_v35 = vcombine.low %v15455_v13, %v15487_v17 }
 0xad2   : > { %v17659_v6 = vpack.i.bf16 %v15641_v20, %v15505_v57  ;;  %v15642_v30 = vcombine.low %v15591_v55, %v15623_v52  ;;  %v15643_v62 = vcombine.high %v15591_v55, %v15623_v52  ;;  %v24826_v24 = vpop.trf.xlu0  ;;  %16050 = vmatpush1.bf16.msra.mxu0 %v17824_v28 }
 0xad3   : > { %16051 = vmatprep.subr.bf16.mxu0 %v17829_v29  ;;  %v24828_v57 = vpop.trf.xlu1 }
 0xad4   : > { %17660 = vrot.lane.b32.xlu1 %v17659_v6, %s18442_s30  ;;  %v17664_v10 = vpack.i.bf16 %v15642_v30, %v15506_v35  ;;  %v24823_v11 = vpack.i.bf16 %v15643_v62, %v15507_v27  ;;  %s27020_s30 = sld [smem:[#allocation241_spill]] }
 0xad6   : > { %17665 = vrot.lane.b32.xlu0 %v17664_v10, %s18441_s29  ;;  %16052 = vmatpush1.bf16.msra.mxu0 %v17827_v12  ;;  %v24830_v46 = vpop.trf.xlu0 }
 0xad7   : > { %16053 = vmatprep.subr.bf16.mxu0 %v17832_v8  ;;  %v24832_v63 = vpop.trf.xlu1 }
 0xada   : > { %16054 = vmatpush1.bf16.msra.mxu0 %v17830_v15 }
 0xadb   : > { %16055 = vmatprep.subr.bf16.mxu0 %v17835_v36 }
 0xade   : > { %16056 = vmatpush1.bf16.msra.mxu0 %v17833_v22 }
 0xae1   : > { %v13424_v45 = vpop.trf.xlu0 }
 0xae2   : > { %v13504_v13 = vcombine.low %v24604_v18, %v13424_v45  ;;  %v13505_v17 = vcombine.high %v24604_v18, %v13424_v45 }
 0xae4   : > { %v13512_v6 = vrot.slane %v13504_v13, %v26980_v25  ;;  %v13519_v35 = vrot.slane %v13505_v17, %v26980_v25 }
 0xae5   : > { %v13456_v55 = vpop.trf.xlu1  ;;  %v13425_v37 = vpop.trf.xlu0 }
 0xae6   : > { %v13520_v20 = vcombine.low %v24625_v21, %v13456_v55  ;;  %v13521_v52 = vcombine.high %v24625_v21, %v13456_v55  ;;  %v13640_v56 = vcombine.low %v24635_v26, %v13425_v37  ;;  %v13641_v27 = vcombine.high %v24635_v26, %v13425_v37 }
 0xae8   : > { %v13528_v30 = vrot.slane %v13520_v20, %v26980_v25  ;;  %v13535_v62 = vrot.slane %v13521_v52, %v26980_v25  ;;  %v13648_v18 = vrot.slane %v13640_v56, %v26980_v25  ;;  %v13655_v28 = vrot.slane %v13641_v27, %v26980_v25 }
 0xae9   : > { %v13457_v10 = vpop.trf.xlu1  ;;  %v13426_v29 = vpop.trf.xlu0 }
 0xaea   : > { %v13568_v12 = vcombine.low %v13512_v6, %v13528_v30  ;;  %v13569_v21 = vcombine.high %v13512_v6, %v13528_v30  ;;  %v13584_v8 = vcombine.low %v13519_v35, %v13535_v62  ;;  %v13585_v15 = vcombine.high %v13519_v35, %v13535_v62 }
 0xaeb   : > { %v13656_v26 = vcombine.low %v24659_v41, %v13457_v10  ;;  %v13657_v36 = vcombine.high %v24659_v41, %v13457_v10  ;;  %v13776_v22 = vcombine.low %v24673_v14, %v13426_v29  ;;  %v13777_v45 = vcombine.high %v24673_v14, %v13426_v29 }
 0xaec   : > { %v13576_v13 = vrot.slane %v13568_v12, %v26981_v5  ;;  %v13583_v17 = vrot.slane %v13569_v21, %v26981_v5  ;;  %v13592_v55 = vrot.slane %v13584_v8, %v26981_v5  ;;  %v13599_v37 = vrot.slane %v13585_v15, %v26981_v5 }
 0xaed   : > { %v13664_v20 = vrot.slane %v13656_v26, %v26980_v25  ;;  %v13671_v52 = vrot.slane %v13657_v36, %v26980_v25  ;;  %v13784_v56 = vrot.slane %v13776_v22, %v26980_v25  ;;  %v13791_v41 = vrot.slane %v13777_v45, %v26980_v25  ;;  %v13458_v30 = vpop.trf.xlu1  ;;  %v13427_v62 = vpop.trf.xlu0 }
 0xaee   : > { %v17026_v27 = vcombine.low %v13576_v13, %v13583_v17  ;;  %v17028_v6 = vcombine.high %v13576_v13, %v13583_v17  ;;  %v17030_v35 = vcombine.low %v13592_v55, %v13599_v37  ;;  %v17032_v14 = vcombine.high %v13592_v55, %v13599_v37 }
 0xaef   : > { %v13704_v10 = vcombine.low %v13648_v18, %v13664_v20  ;;  %v13705_v29 = vcombine.high %v13648_v18, %v13664_v20  ;;  %v13720_v12 = vcombine.low %v13655_v28, %v13671_v52  ;;  %v13721_v21 = vcombine.high %v13655_v28, %v13671_v52 }
 0xaf0   : > { %v24859_v8 = vrot.slane %v17026_v27, %v26980_v25  ;;  %v24862_v15 = vrot.slane %v17028_v6, %v26980_v25  ;;  %v24865_v26 = vrot.slane %v17030_v35, %v26980_v25  ;;  %v24868_v36 = vrot.slane %v17032_v14, %v26980_v25 }
 0xaf1   : > { %v13712_v22 = vrot.slane %v13704_v10, %v26981_v5  ;;  %v13719_v45 = vrot.slane %v13705_v29, %v26981_v5  ;;  %v13728_v18 = vrot.slane %v13720_v12, %v26981_v5  ;;  %v13735_v28 = vrot.slane %v13721_v21, %v26981_v5  ;;  %v13459_v12 = vpop.trf.xlu1  ;;  %v13428_v21 = vpop.trf.xlu0 }
 0xaf2   : > { %v13792_v13 = vcombine.low %v24711_v7, %v13458_v30  ;;  %v13793_v17 = vcombine.high %v24711_v7, %v13458_v30  ;;  %v13912_v55 = vcombine.low %v24728_v4, %v13427_v62  ;;  %v13913_v37 = vcombine.high %v24728_v4, %v13427_v62 }
 0xaf3   : > { %v17034_v20 = vcombine.low %v13712_v22, %v13719_v45  ;;  %v17036_v52 = vcombine.high %v13712_v22, %v13719_v45  ;;  %v17038_v27 = vcombine.low %v13728_v18, %v13735_v28  ;;  %v17040_v6 = vcombine.high %v13728_v18, %v13735_v28 }
 0xaf4   : > { %v13800_v35 = vrot.slane %v13792_v13, %v26980_v25  ;;  %v13807_v14 = vrot.slane %v13793_v17, %v26980_v25  ;;  %v13920_v10 = vrot.slane %v13912_v55, %v26980_v25  ;;  %v13927_v29 = vrot.slane %v13913_v37, %v26980_v25 }
 0xaf5   : > { %v24883_v7 = vrot.slane %v17034_v20, %v26980_v25  ;;  %v24886_v30 = vrot.slane %v17036_v52, %v26980_v25  ;;  %v24889_v4 = vrot.slane %v17038_v27, %v26980_v25  ;;  %v24892_v62 = vrot.slane %v17040_v6, %v26980_v25 }
 0xaf6   : > { %v13840_v22 = vcombine.low %v13784_v56, %v13800_v35  ;;  %v13841_v45 = vcombine.high %v13784_v56, %v13800_v35  ;;  %v13856_v18 = vcombine.low %v13791_v41, %v13807_v14  ;;  %v13857_v28 = vcombine.high %v13791_v41, %v13807_v14 }
 0xaf7   : > { %v13928_v13 = vcombine.low %v24751_v50, %v13459_v12  ;;  %v13929_v17 = vcombine.high %v24751_v50, %v13459_v12  ;;  %v14048_v55 = vcombine.low %v24767_v43, %v13428_v21  ;;  %v14049_v37 = vcombine.high %v24767_v43, %v13428_v21  ;;  %v13460_v21 = vpop.trf.xlu1 }
 0xaf8   : > { %v13848_v20 = vrot.slane %v13840_v22, %v26981_v5  ;;  %v13855_v52 = vrot.slane %v13841_v45, %v26981_v5  ;;  %v13864_v27 = vrot.slane %v13856_v18, %v26981_v5  ;;  %v13871_v6 = vrot.slane %v13857_v28, %v26981_v5  ;;  %v13429_v22 = vpop.trf.xlu0 }
 0xaf9   : > { %v13936_v56 = vrot.slane %v13928_v13, %v26980_v25  ;;  %v13943_v41 = vrot.slane %v13929_v17, %v26980_v25  ;;  %v14056_v35 = vrot.slane %v14048_v55, %v26980_v25  ;;  %v14063_v50 = vrot.slane %v14049_v37, %v26980_v25 }
 0xafa   : > { %v17042_v14 = vcombine.low %v13848_v20, %v13855_v52  ;;  %v17044_v12 = vcombine.high %v13848_v20, %v13855_v52  ;;  %v17046_v9 = vcombine.low %v13864_v27, %v13871_v6  ;;  %v17048_v43 = vcombine.high %v13864_v27, %v13871_v6 }
 0xafb   : > { %v13976_v42 = vcombine.low %v13920_v10, %v13936_v56  ;;  %v13977_v45 = vcombine.high %v13920_v10, %v13936_v56  ;;  %v13992_v60 = vcombine.low %v13927_v29, %v13943_v41  ;;  %v13993_v18 = vcombine.high %v13927_v29, %v13943_v41 }
 0xafc   : > { %v24907_v28 = vrot.slane %v17042_v14, %v26980_v25  ;;  %v24910_v13 = vrot.slane %v17044_v12, %v26980_v25  ;;  %v24913_v17 = vrot.slane %v17046_v9, %v26980_v25  ;;  %v24916_v55 = vrot.slane %v17048_v43, %v26980_v25  ;;  %v13430_v23 = vpop.trf.xlu0 }
 0xafd   : > { %v13984_v37 = vrot.slane %v13976_v42, %v26981_v5  ;;  %v13991_v20 = vrot.slane %v13977_v45, %v26981_v5  ;;  %v14000_v10 = vrot.slane %v13992_v60, %v26981_v5  ;;  %v14007_v29 = vrot.slane %v13993_v18, %v26981_v5  ;;  %v13461_v18 = vpop.trf.xlu1 }
 0xafe   : > { %v14064_v52 = vcombine.low %v24792_v38, %v13460_v21  ;;  %v14065_v27 = vcombine.high %v24792_v38, %v13460_v21  ;;  %v14184_v6 = vcombine.low %v24803_v19, %v13429_v22  ;;  %v14185_v9 = vcombine.high %v24803_v19, %v13429_v22 }
 0xaff   : > { %v17050_v56 = vcombine.low %v13984_v37, %v13991_v20  ;;  %v17052_v41 = vcombine.high %v13984_v37, %v13991_v20  ;;  %v17054_v14 = vcombine.low %v14000_v10, %v14007_v29  ;;  %v17056_v12 = vcombine.high %v14000_v10, %v14007_v29 }
 0xb00   : > { %v14072_v42 = vrot.slane %v14064_v52, %v26980_v25  ;;  %v14079_v43 = vrot.slane %v14065_v27, %v26980_v25  ;;  %v14192_v60 = vrot.slane %v14184_v6, %v26980_v25  ;;  %v14199_v45 = vrot.slane %v14185_v9, %v26980_v25 }
 0xb01   : > { %v24931_v38 = vrot.slane %v17050_v56, %v26980_v25  ;;  %v24934_v21 = vrot.slane %v17052_v41, %v26980_v25  ;;  %v24937_v19 = vrot.slane %v17054_v14, %v26980_v25  ;;  %v24940_v22 = vrot.slane %v17056_v12, %v26980_v25  ;;  %v13462_v34 = vpop.trf.xlu1 }
 0xb02   : > { %v14112_v37 = vcombine.low %v14056_v35, %v14072_v42  ;;  %v14113_v20 = vcombine.high %v14056_v35, %v14072_v42  ;;  %v14128_v10 = vcombine.low %v14063_v50, %v14079_v43  ;;  %v14129_v29 = vcombine.high %v14063_v50, %v14079_v43 }
 0xb03   : > { %v14200_v52 = vcombine.low %v24821_v58, %v13461_v18  ;;  %v14201_v27 = vcombine.high %v24821_v58, %v13461_v18  ;;  %v14320_v6 = vcombine.low %v24826_v24, %v13430_v23  ;;  %v14321_v9 = vcombine.high %v24826_v24, %v13430_v23 }
 0xb04   : > { %v14120_v56 = vrot.slane %v14112_v37, %v26981_v5  ;;  %v14127_v41 = vrot.slane %v14113_v20, %v26981_v5  ;;  %v14136_v14 = vrot.slane %v14128_v10, %v26981_v5  ;;  %v14143_v12 = vrot.slane %v14129_v29, %v26981_v5 }
 0xb05   : > { %v14208_v35 = vrot.slane %v14200_v52, %v26980_v25  ;;  %v14215_v50 = vrot.slane %v14201_v27, %v26980_v25  ;;  %v14328_v42 = vrot.slane %v14320_v6, %v26980_v25  ;;  %v14335_v58 = vrot.slane %v14321_v9, %v26980_v25 }
 0xb06   : > { %v17058_v43 = vcombine.low %v14120_v56, %v14127_v41  ;;  %v17060_v18 = vcombine.high %v14120_v56, %v14127_v41  ;;  %v17062_v2 = vcombine.low %v14136_v14, %v14143_v12  ;;  %v17064_v23 = vcombine.high %v14136_v14, %v14143_v12 }
 0xb07   : > { %v14248_v24 = vcombine.low %v14192_v60, %v14208_v35  ;;  %v14249_v37 = vcombine.high %v14192_v60, %v14208_v35  ;;  %v14264_v61 = vcombine.low %v14199_v45, %v14215_v50  ;;  %v14265_v20 = vcombine.high %v14199_v45, %v14215_v50 }
 0xb08   : > { %v24955_v10 = vrot.slane %v17058_v43, %v26980_v25  ;;  %v24958_v29 = vrot.slane %v17060_v18, %v26980_v25  ;;  %v24961_v52 = vrot.slane %v17062_v2, %v26980_v25  ;;  %v24964_v27 = vrot.slane %v17064_v23, %v26980_v25 }
 0xb09   : > { %v14256_v6 = vrot.slane %v14248_v24, %v26981_v5  ;;  %v14263_v9 = vrot.slane %v14249_v37, %v26981_v5  ;;  %v14272_v60 = vrot.slane %v14264_v61, %v26981_v5  ;;  %v14279_v45 = vrot.slane %v14265_v20, %v26981_v5 }
 0xb0a   : > { %v14336_v56 = vcombine.low %v24828_v57, %v13462_v34  ;;  %v14337_v41 = vcombine.high %v24828_v57, %v13462_v34  ;;  %v14640_v14 = vcombine.low %v24859_v8, %v24862_v15  ;;  %v14672_v2 = vcombine.low %v24865_v26, %v24868_v36 }
 0xb0b   : > { %v17066_v12 = vcombine.low %v14256_v6, %v14263_v9  ;;  %v17068_v35 = vcombine.high %v14256_v6, %v14263_v9  ;;  %v17070_v50 = vcombine.low %v14272_v60, %v14279_v45  ;;  %v17072_v43 = vcombine.high %v14272_v60, %v14279_v45  ;;  %v17836_v6 = vld [vmem:[#allocation8 + $0x60] ss:$8 sps:$4 sm:$0xff]   ;;  %v17838_v9 = vld [vmem:[#allocation8 + $0x64] ss:$8 sps:$4 sm:$0xff]  }
 0xb0c   : > { %v14344_v18 = vrot.slane %v14336_v56, %v26980_v25  ;;  %v14351_v61 = vrot.slane %v14337_v41, %v26980_v25  ;;  %v14648_v23 = vrot.slane %v14640_v14, %v26981_v5  ;;  %v14680_v24 = vrot.slane %v14672_v2, %v26981_v5  ;;  %v13431_v14 = vpop.trf.xlu0  ;;  %16057 = vmatprep.subr.bf16.mxu0 %v17838_v9 }
 0xb0d   : > { %v24981_v34 = vrot.slane %v17066_v12, %v26980_v25  ;;  %v24984_v57 = vrot.slane %v17068_v35, %v26980_v25  ;;  %v24987_v37 = vrot.slane %v17070_v50, %v26980_v25  ;;  %v24990_v20 = vrot.slane %v17072_v43, %v26980_v25  ;;  %16058 = vmatpush1.bf16.msra.mxu0 %v17836_v6 }
 0xb0e   : > { %v14384_v60 = vcombine.low %v14328_v42, %v14344_v18  ;;  %v14385_v45 = vcombine.high %v14328_v42, %v14344_v18  ;;  %v14400_v56 = vcombine.low %v14335_v58, %v14351_v61  ;;  %v14401_v41 = vcombine.high %v14335_v58, %v14351_v61 }
 0xb0f   : > { %v14693_v2 = vcombine.high %v14648_v23, %v14680_v24  ;;  %v14776_v12 = vcombine.low %v24883_v7, %v24886_v30  ;;  %v14808_v35 = vcombine.low %v24889_v4, %v24892_v62  ;;  %v14692_v31 = vcombine.low %v14648_v23, %v14680_v24 }
 0xb10   : > { %v14392_v50 = vrot.slane %v14384_v60, %v26981_v5  ;;  %v14399_v43 = vrot.slane %v14385_v45, %v26981_v5  ;;  %v14408_v33 = vrot.slane %v14400_v56, %v26981_v5  ;;  %v14415_v42 = vrot.slane %v14401_v41, %v26981_v5  ;;  %v13463_v60 = vpop.trf.xlu1 }
 0xb11   : > { %v14784_v58 = vrot.slane %v14776_v12, %v26981_v5  ;;  %v14816_v18 = vrot.slane %v14808_v35, %v26981_v5  ;;  %v14456_v61 = vcombine.low %v24830_v46, %v13431_v14  ;;  %v14457_v0 = vcombine.high %v24830_v46, %v13431_v14 }
 0xb12   : > { %v17074_v48 = vcombine.low %v14392_v50, %v14399_v43  ;;  %v17076_v23 = vcombine.high %v14392_v50, %v14399_v43  ;;  %v17078_v24 = vcombine.low %v14408_v33, %v14415_v42  ;;  %v17080_v9 = vcombine.high %v14408_v33, %v14415_v42  ;;  %v17839_v42 = vld [vmem:[#allocation8 + $0x70] ss:$8 sps:$4 sm:$0xff]  }
 0xb13   : > { %v14829_v40 = vcombine.high %v14784_v58, %v14816_v18  ;;  %v14828_v45 = vcombine.low %v14784_v58, %v14816_v18  ;;  %v14464_v56 = vrot.slane %v14456_v61, %v26980_v25  ;;  %v14471_v41 = vrot.slane %v14457_v0, %v26980_v25  ;;  %v17841_v0 = vld [vmem:[#allocation8 + $0x74] ss:$8 sps:$4 sm:$0xff]  }
 0xb14   : > { %v25007_v6 = vrot.slane %v17074_v48, %v26980_v25  ;;  %v25010_v12 = vrot.slane %v17076_v23, %v26980_v25  ;;  %v25013_v35 = vrot.slane %v17078_v24, %v26980_v25  ;;  %v25016_v46 = vrot.slane %v17080_v9, %v26980_v25  ;;  %16059 = vmatprep.subr.bf16.mxu0 %v17841_v0 }
 0xb15   : > { %v17674_v33 = vpack.i.bf16 %v14829_v40, %v14693_v2  ;;  %v17669_v14 = vpack.i.bf16 %v14828_v45, %v14692_v31  ;;  %v14472_v50 = vcombine.low %v24832_v63, %v13463_v60  ;;  %v14473_v43 = vcombine.high %v24832_v63, %v13463_v60  ;;  %16060 = vmatpush1.bf16.msra.mxu0 %v17839_v42 }
 0xb16   : > { %v14641_v48 = vcombine.high %v24859_v8, %v24862_v15  ;;  %v14673_v58 = vcombine.high %v24865_v26, %v24868_v36  ;;  %v14777_v18 = vcombine.high %v24883_v7, %v24886_v30  ;;  %v14809_v61 = vcombine.high %v24889_v4, %v24892_v62 }
 0xb17   : > { %17675 = vrot.lane.b32.xlu0 %v17674_v33, %s18438_s13  ;;  %17670 = vrot.lane.b32.xlu1 %v17669_v14, %s18439_s25  ;;  %v14480_v40 = vrot.slane %v14472_v50, %v26980_v25  ;;  %v14487_v31 = vrot.slane %v14473_v43, %v26980_v25  ;;  %v14912_v63 = vcombine.low %v24907_v28, %v24910_v13 }
 0xb18   : > { %v14655_v8 = vrot.slane %v14641_v48, %v26981_v5  ;;  %v14687_v15 = vrot.slane %v14673_v58, %v26981_v5  ;;  %v14791_v26 = vrot.slane %v14777_v18, %v26981_v5  ;;  %v14823_v36 = vrot.slane %v14809_v61, %v26981_v5 }
 0xb19   : > { %v14520_v7 = vcombine.low %v14464_v56, %v14480_v40  ;;  %v14521_v30 = vcombine.high %v14464_v56, %v14480_v40  ;;  %v14536_v4 = vcombine.low %v14471_v41, %v14487_v31  ;;  %v14537_v62 = vcombine.high %v14471_v41, %v14487_v31 }
 0xb1a   : > { %v14695_v2 = vcombine.high %v14655_v8, %v14687_v15  ;;  %v14831_v23 = vcombine.high %v14791_v26, %v14823_v36  ;;  %v14694_v24 = vcombine.low %v14655_v8, %v14687_v15  ;;  %v14830_v9 = vcombine.low %v14791_v26, %v14823_v36 }
 0xb1b   : > { %v14528_v60 = vrot.slane %v14520_v7, %v26981_v5  ;;  %v14535_v45 = vrot.slane %v14521_v30, %v26981_v5  ;;  %v14544_v33 = vrot.slane %v14536_v4, %v26981_v5  ;;  %v14551_v14 = vrot.slane %v14537_v62, %v26981_v5 }
 0xb1c   : > { %v17684_v50 = vpack.i.bf16 %v14831_v23, %v14695_v2  ;;  %v17679_v43 = vpack.i.bf16 %v14830_v9, %v14694_v24  ;;  %v14920_v0 = vrot.slane %v14912_v63, %v26981_v5  ;;  %v14944_v56 = vcombine.low %v24913_v17, %v24916_v55 }
 0xb1d   : > { %v17082_v41 = vcombine.low %v14528_v60, %v14535_v45  ;;  %v17084_v42 = vcombine.high %v14528_v60, %v14535_v45  ;;  %v17086_v48 = vcombine.low %v14544_v33, %v14551_v14  ;;  %v17088_v58 = vcombine.high %v14544_v33, %v14551_v14 }
 0xb1e   : > { %17685 = vrot.lane.b32.xlu0 %v17684_v50, %s18437_s12  ;;  %17680 = vrot.lane.b32.xlu1 %v17679_v43, %s18436_s21  ;;  %v14952_v18 = vrot.slane %v14944_v56, %v26981_v5  ;;  %v15048_v61 = vcombine.low %v24931_v38, %v24934_v21  ;;  %v15080_v40 = vcombine.low %v24937_v19, %v24940_v22 }
 0xb1f   : > { %v25053_v31 = vrot.slane %v17082_v41, %v26980_v25  ;;  %v25056_v63 = vrot.slane %v17084_v42, %v26980_v25  ;;  %v25059_v8 = vrot.slane %v17086_v48, %v26980_v25  ;;  %v25062_v15 = vrot.slane %v17088_v58, %v26980_v25 }
 0xb20   : > { %v14965_v26 = vcombine.high %v14920_v0, %v14952_v18  ;;  %v15056_v36 = vrot.slane %v15048_v61, %v26981_v5  ;;  %v15088_v7 = vrot.slane %v15080_v40, %v26981_v5  ;;  %v14964_v30 = vcombine.low %v14920_v0, %v14952_v18 }
 0xb21   : > { %v14913_v4 = vcombine.high %v24907_v28, %v24910_v13  ;;  %v14945_v62 = vcombine.high %v24913_v17, %v24916_v55  ;;  %v15049_v2 = vcombine.high %v24931_v38, %v24934_v21  ;;  %v15081_v23 = vcombine.high %v24937_v19, %v24940_v22 }
 0xb22   : > { %v15101_v25 = vcombine.high %v15056_v36, %v15088_v7  ;;  %v15100_v24 = vcombine.low %v15056_v36, %v15088_v7  ;;  %v15184_v9 = vcombine.low %v24955_v10, %v24958_v29  ;;  %v15216_v60 = vcombine.low %v24961_v52, %v24964_v27 }
 0xb23   : > { %v14927_v45 = vrot.slane %v14913_v4, %v26981_v5  ;;  %v14959_v28 = vrot.slane %v14945_v62, %v26981_v5  ;;  %v15063_v13 = vrot.slane %v15049_v2, %v26981_v5  ;;  %v15095_v17 = vrot.slane %v15081_v23, %v26981_v5 }
 0xb24   : > { %v17694_v55 = vpack.i.bf16 %v15101_v25, %v14965_v26  ;;  %v17689_v38 = vpack.i.bf16 %v15100_v24, %v14964_v30  ;;  %v15192_v21 = vrot.slane %v15184_v9, %v26981_v5  ;;  %v15224_v19 = vrot.slane %v15216_v60, %v26981_v5 }
 0xb25   : > { %v14967_v22 = vcombine.high %v14927_v45, %v14959_v28  ;;  %v15103_v33 = vcombine.high %v15063_v13, %v15095_v17  ;;  %v14966_v14 = vcombine.low %v14927_v45, %v14959_v28  ;;  %v15102_v50 = vcombine.low %v15063_v13, %v15095_v17 }
 0xb26   : > { %17695 = vrot.lane.b32.xlu1 %v17694_v55, %s18438_s13  ;;  %17690 = vrot.lane.b32.xlu0 %v17689_v38, %s18439_s25  ;;  %v15237_v43 = vcombine.high %v15192_v21, %v15224_v19  ;;  %v15320_v0 = vcombine.low %v24981_v34, %v24984_v57  ;;  %v15352_v56 = vcombine.low %v24987_v37, %v24990_v20  ;;  %v18447_v4 = vmov 0  }
 0xb27   : > { %v17704_v41 = vpack.i.bf16 %v15103_v33, %v14967_v22  ;;  %v17699_v42 = vpack.i.bf16 %v15102_v50, %v14966_v14  ;;  %v15236_v48 = vcombine.low %v15192_v21, %v15224_v19  ;;  %v15185_v58 = vcombine.high %v24955_v10, %v24958_v29  ;;  %16077 = vmatprep.mubr.bf16.mxu0 %v18447_v4 }
 0xb28   : > { %v15328_v18 = vrot.slane %v15320_v0, %v26981_v5  ;;  %v15360_v61 = vrot.slane %v15352_v56, %v26981_v5  ;;  %v15217_v40 = vcombine.high %v24961_v52, %v24964_v27  ;;  %v15321_v26 = vcombine.high %v24981_v34, %v24984_v57 }
 0xb29   : > { %v15199_v36 = vrot.slane %v15185_v58, %v26981_v5  ;;  %v15353_v7 = vcombine.high %v24987_v37, %v24990_v20  ;;  %v15456_v30 = vcombine.low %v25007_v6, %v25010_v12  ;;  %v15488_v10 = vcombine.low %v25013_v35, %v25016_v46 }
 0xb2a   : > { %17705 = vrot.lane.b32.xlu1 %v17704_v41, %s18437_s12  ;;  %17700 = vrot.lane.b32.xlu0 %v17699_v42, %s18436_s21  ;;  %v15373_v29 = vcombine.high %v15328_v18, %v15360_v61  ;;  %v15372_v52 = vcombine.low %v15328_v18, %v15360_v61  ;;  %v15231_v27 = vrot.slane %v15217_v40, %v26981_v5 }
 0xb2b   : > { %v15335_v34 = vrot.slane %v15321_v26, %v26981_v5  ;;  %v15367_v57 = vrot.slane %v15353_v7, %v26981_v5  ;;  %v15464_v24 = vrot.slane %v15456_v30, %v26981_v5  ;;  %v15496_v9 = vrot.slane %v15488_v10, %v26981_v5 }
 0xb2c   : > { %v17714_v37 = vpack.i.bf16 %v15373_v29, %v15237_v43  ;;  %v17709_v20 = vpack.i.bf16 %v15372_v52, %v15236_v48  ;;  %v15239_v62 = vcombine.high %v15199_v36, %v15231_v27  ;;  %v15238_v2 = vcombine.low %v15199_v36, %v15231_v27 }
 0xb2d   : > { %v15375_v23 = vcombine.high %v15335_v34, %v15367_v57  ;;  %v15374_v25 = vcombine.low %v15335_v34, %v15367_v57  ;;  %v15592_v60 = vcombine.low %v25053_v31, %v25056_v63  ;;  %v15624_v45 = vcombine.low %v25059_v8, %v25062_v15 }
 0xb2e   : > { %17715 = vrot.lane.b32.xlu0 %v17714_v37, %s18438_s13  ;;  %17710 = vrot.lane.b32.xlu1 %v17709_v20, %s18439_s25  ;;  %v15457_v28 = vcombine.high %v25007_v6, %v25010_v12  ;;  %v15489_v21 = vcombine.high %v25013_v35, %v25016_v46  ;;  %v15593_v19 = vcombine.high %v25053_v31, %v25056_v63 }
 0xb2f   : > { %v17729_v13 = vpack.i.bf16 %v15375_v23, %v15239_v62  ;;  %v17719_v17 = vpack.i.bf16 %v15374_v25, %v15238_v2  ;;  %v15600_v55 = vrot.slane %v15592_v60, %v26981_v5  ;;  %v15632_v38 = vrot.slane %v15624_v45, %v26981_v5 }
 0xb30   : > { %v15625_v22 = vcombine.high %v25059_v8, %v25062_v15  ;;  %v15508_v6 = vcombine.low %v15464_v24, %v15496_v9  ;;  %v15471_v33 = vrot.slane %v15457_v28, %v26981_v5  ;;  %v15503_v14 = vrot.slane %v15489_v21, %v26981_v5 }
 0xb31   : > { %v15644_v12 = vcombine.low %v15600_v55, %v15632_v38  ;;  %v15607_v50 = vrot.slane %v15593_v19, %v26981_v5  ;;  %v15645_v43 = vcombine.high %v15600_v55, %v15632_v38  ;;  %v15509_v63 = vcombine.high %v15464_v24, %v15496_v9 }
 0xb32   : > { %17730 = vrot.lane.b32.xlu0 %v17729_v13, %s18437_s12  ;;  %17720 = vrot.lane.b32.xlu1 %v17719_v17, %s18436_s21  ;;  %v15639_v35 = vrot.slane %v15625_v22, %v26981_v5  ;;  %v15510_v8 = vcombine.low %v15471_v33, %v15503_v14  ;;  %v15511_v41 = vcombine.high %v15471_v33, %v15503_v14  ;;  %v17621_v5 = vpop.permute.xlu1 %17620 }
 0xb33   : > { %v17734_v46 = vpack.i.bf16 %v15644_v12, %v15508_v6  ;;  %v17739_v15 = vpack.i.bf16 %v15645_v43, %v15509_v63  ;;  %v26986_v52 = vcombine.low %v24645_v16, %v24663_v1  ;;  %v26987_v34 = vcombine.low %v24639_v59, %v24642_v54 }
 0xb34   : > { %v15646_v31 = vcombine.low %v15607_v50, %v15639_v35  ;;  %v15647_v56 = vcombine.high %v15607_v50, %v15639_v35  ;;  %v17623_v37 = vunpack.i.h.bf16 %v17621_v5  ;;  %v17622_v20 = vunpack.i.l.bf16 %v17621_v5 }
 0xb35   : > { %v17616_v48 = vpop.permute.xlu0 %17615 }
 0xb36   : > { %17725 = vrot.lane.b32.xlu1 %v24823_v11, %s18440_s26  ;;  %17735 = vrot.lane.b32.xlu0 %v17734_v46, %s18439_s25  ;;  %v17744_v0 = vpack.i.bf16 %v15646_v31, %v15510_v8  ;;  %v17749_v42 = vpack.i.bf16 %v15647_v56, %v15511_v41  ;;  %v17626_v58 = vpop.permute.xlu1 %17625  ;;  %v17618_v7 = vunpack.i.h.bf16 %v17616_v48  ;;  %v17617_v30 = vunpack.i.l.bf16 %v17616_v48 }
 0xb37   : > { %v17628_v60 = vunpack.i.h.bf16 %v17626_v58  ;;  %v17627_v16 = vunpack.i.l.bf16 %v17626_v58  ;;  %v26989_v56 = vcombine.low %v24692_v53, %v24705_v47 }
 0xb38   : > { %v15873_v27 = vsel %vm8558_vm0, %v26986_v52, %v17618_v7  ;;  %v15872_v57 = vsel %vm8558_vm0, %v26987_v34, %v17617_v30 }
 0xb39   : > { %v15882_v23 = vsel %vm15880_vm3, %v15873_v27, %v17623_v37  ;;  %v15881_v25 = vsel %vm15880_vm3, %v15872_v57, %v17622_v20  ;;  %v26990_v27 = vcombine.low %v24733_v51, %v24743_v49 }
 0xb3a   : > { %17740 = vrot.lane.b32.xlu1 %v17739_v15, %s18438_s13  ;;  %17745 = vrot.lane.b32.xlu0 %v17744_v0, %s18436_s21  ;;  %v17636_v18 = vpop.permute.xlu0 %17635  ;;  %v17631_v11 = vpop.permute.xlu1 %17630  ;;  %v15890_v1 = vsel %vm15889_vm4, %v15881_v25, %v17627_v16  ;;  %v15891_v45 = vsel %vm15889_vm4, %v15882_v23, %v17628_v60  ;;  %v26988_v15 = vcombine.low %v24666_v3, %v24669_v39  ;;  %s25447_s13 = scalar_lea.vmem [#allocation13], %s16898_s14  ;;  %s17160_s14 = sshll.u32 %s18532_s23, 10 }
 0xb3b   : > { %v17633_v6 = vunpack.i.h.bf16 %v17631_v11  ;;  %v17632_v12 = vunpack.i.l.bf16 %v17631_v11  ;;  %v17638_v50 = vunpack.i.h.bf16 %v17636_v18  ;;  %v17637_v35 = vunpack.i.l.bf16 %v17636_v18  ;;  %s16765_s25 = sshll.u32 %s25447_s13, 4  ;;  %s25472_s10 = scalar_lea.hbm %s27020_s30, %s17160_s14  ;;  %s25474_s25 = int_to_ptr.vmem [resolvable:$true] %s16765_s25 }
 0xb3c   : > { %s16752_s23 = scalar_lea.sflag [#allocation4], %s18754_s3  ;;  %s18344_s27 = scalar_lea.vmem %s25474_s25, 1024 }
 0xb3d   : > { %v15874_v0 = vsel %vm8558_vm0, %v26988_v15, %v17632_v12  ;;  %v15875_v41 = vsel %vm8558_vm0, %v26989_v56, %v17633_v6  ;;  %v26993_v56 = vld [vmem:[#allocation47_spill] sm:$0xff]  ;;  %p18345_p7 = scmp.ne.s32.totalorder %s25474_s25, %s18344_s27  ;;  %p18351_p13 = scmp.lt.s32.totalorder %s25474_s25, %s18349_s24 }
 0xb3e   : > { %17750 = vrot.lane.b32.xlu1 %v17749_v42, %s18437_s12  ;;  %v25143_v40 = vpop.permute.xlu1 %17640  ;;  %v15884_v48 = vsel %vm15880_vm3, %v15875_v41, %v17638_v50  ;;  %v15883_v58 = vsel %vm15880_vm3, %v15874_v0, %v17637_v35  ;;  %v26992_v0 = vld [vmem:[#allocation160_spill] sm:$0xff]  ;;  %s27019_s12 = sld [smem:[#allocation240_spill]] }
 0xb3f   : > { %v25141_v61 = vpop.permute.xlu0 %17645  ;;  %v17643_v42 = vunpack.i.h.bf16 %v25143_v40  ;;  %v17642_v5 = vunpack.i.l.bf16 %v25143_v40  ;;  %v26994_v41 = vcombine.low %v26992_v0, %v26993_v56  ;;  %v27003_v0 = vld [vmem:[#allocation24_spill] sm:$0xff]  ;;  %p18346_p12 = pnand %p18345_p7, %p27021_p4 }
 0xb40   : > { %v17648_v18 = vunpack.i.h.bf16 %v25141_v61  ;;  %v17647_v11 = vunpack.i.l.bf16 %v25141_v61  ;;  %v26991_v61 = vcombine.low %v24721_v44, %v24724_v32 }
 0xb41   : > { %v15892_v7 = vsel %vm15889_vm4, %v15883_v58, %v17642_v5  ;;  %v15893_v30 = vsel %vm15889_vm4, %v15884_v48, %v17643_v42  ;;  %v26995_v58 = vld [vmem:[#allocation113_spill] sm:$0xff]  ;;  %p18347_p1 = pneg %p18346_p12 }
 0xb42   : > { %v25147_v36 = vpop.permute.xlu1 %17650  ;;  %v15877_v34 = vsel %vm8558_vm0, %v26990_v27, %v17648_v18  ;;  %v15876_v57 = vsel %vm8558_vm0, %v26991_v61, %v17647_v11  ;;  %v26996_v18 = vld [vmem:[#allocation52_spill] sm:$0xff] }
 0xb43   : > { %v25145_v26 = vpop.permute.xlu0 %17655  ;;  %v26997_v11 = vcombine.low %v26995_v58, %v26996_v18 }
 0xb44   : > { %v17658_v23 = vunpack.i.h.bf16 %v25145_v26  ;;  %v17657_v25 = vunpack.i.l.bf16 %v25145_v26 }
 0xb46   : > { %v25149_v10 = vpop.permute.xlu1 %17660 }
 0xb48   : > { %v25151_v29 = vpop.permute.xlu0 %17665 }
 0xb49   : > { %v17668_v35 = vunpack.i.h.bf16 %v25151_v29  ;;  %v17667_v42 = vunpack.i.l.bf16 %v25151_v29 }
 0xb89   : > { %v17671_v62 = vpop.permute.xlu1 %17670  ;;  %v17676_v2 = vpop.permute.xlu0 %17675 }
 0xb8a   : > { %v17673_v24 = vunpack.i.h.bf16 %v17671_v62  ;;  %v17672_v9 = vunpack.i.l.bf16 %v17671_v62  ;;  %v17678_v59 = vunpack.i.h.bf16 %v17676_v2  ;;  %v17677_v54 = vunpack.i.l.bf16 %v17676_v2 }
 0xb8b   : > { %v17653_v62 = vunpack.i.h.bf16 %v25147_v36  ;;  %v17652_v2 = vunpack.i.l.bf16 %v25147_v36 }
 0xb8c   : > { %v15898_v28 = vsel %vm9175_vm1, %v15890_v1, %v17672_v9  ;;  %v15899_v13 = vsel %vm9175_vm1, %v15891_v45, %v17673_v24 }
 0xb8d   : > { %v15907_v33 = vsel %vm15906_vm5, %v15898_v28, %v17677_v54  ;;  %v15908_v14 = vsel %vm15906_vm5, %v15899_v13, %v17678_v59  ;;  %v15885_v36 = vsel %vm15880_vm3, %v15876_v57, %v17652_v2  ;;  %v15886_v59 = vsel %vm15880_vm3, %v15877_v34, %v17653_v62 }
 0xb90   : > { %v17681_v17 = vpop.permute.xlu1 %17680  ;;  %v17686_v55 = vpop.permute.xlu0 %17685 }
 0xb91   : > { %v17683_v38 = vunpack.i.h.bf16 %v17681_v17  ;;  %v17682_v21 = vunpack.i.l.bf16 %v17681_v17  ;;  %v17688_v19 = vunpack.i.h.bf16 %v17686_v55  ;;  %v17687_v22 = vunpack.i.l.bf16 %v17686_v55 }
 0xb92   : > { %v15894_v17 = vsel %vm15889_vm4, %v15885_v36, %v17657_v25  ;;  %v15895_v55 = vsel %vm15889_vm4, %v15886_v59, %v17658_v23 }
 0xb93   : > { %v15916_v46 = vsel %vm15915_vm6, %v15907_v33, %v17682_v21  ;;  %v15917_v43 = vsel %vm15915_vm6, %v15908_v14, %v17683_v38  ;;  %v17662_v33 = vunpack.i.l.bf16 %v25149_v10 }
 0xb94   : > { %v15925_v31 = vsel %vm15924_vm7, %v15916_v46, %v17687_v22  ;;  %v15926_v63 = vsel %vm15924_vm7, %v15917_v43, %v17688_v19  ;;  %v17663_v19 = vunpack.i.h.bf16 %v25149_v10 }
 0xb95   : > { %v15933_v8 = vpack.c.bf16 %v15926_v63, %v15925_v31 }
 0xb96   : > { %v15879_v10 = vsel %vm8558_vm0, %v26994_v41, %v17663_v19 }
 0xb97   : > { %16078 = vmatmul.mubr.bf16.vlgmr.msra.gmra.mrb[48].mxu0 %v15933_v8  ;;  %v15888_v29 = vsel %vm15880_vm3, %v15879_v10, %v17668_v35 }
 0xb98   : > { %v17696_v3 = vpop.permute.xlu1 %17695  ;;  %v17691_v39 = vpop.permute.xlu0 %17690  ;;  %16087 = vmatprep.mubr.bf16.mxu0 %v18447_v4 }
 0xb99   : > { %v17693_v53 = vunpack.i.h.bf16 %v17691_v39  ;;  %v17692_v47 = vunpack.i.l.bf16 %v17691_v39  ;;  %v17698_v40 = vunpack.i.h.bf16 %v17696_v3  ;;  %v17697_v52 = vunpack.i.l.bf16 %v17696_v3 }
 0xb9a   : > { %v15878_v3 = vsel %vm8558_vm0, %v26997_v11, %v17662_v33  ;;  %v27004_v11 = vld [vmem:[#allocation21_spill] sm:$0xff] }
 0xb9b   : > { %v15900_v37 = vsel %vm9175_vm1, %v15892_v7, %v17692_v47  ;;  %v15901_v20 = vsel %vm9175_vm1, %v15893_v30, %v17693_v53  ;;  %v15887_v34 = vsel %vm15880_vm3, %v15878_v3, %v17667_v42 }
 0xb9c   : > { %v17706_v51 = vpop.permute.xlu1 %17705  ;;  %v17701_v49 = vpop.permute.xlu0 %17700  ;;  %v15909_v32 = vsel %vm15906_vm5, %v15900_v37, %v17697_v52  ;;  %v15910_v16 = vsel %vm15906_vm5, %v15901_v20, %v17698_v40 }
 0xb9d   : > { %v17708_v24 = vunpack.i.h.bf16 %v17706_v51  ;;  %v17707_v9 = vunpack.i.l.bf16 %v17706_v51  ;;  %v17703_v60 = vunpack.i.h.bf16 %v17701_v49  ;;  %v17702_v44 = vunpack.i.l.bf16 %v17701_v49 }
 0xb9f   : > { %v15918_v1 = vsel %vm15915_vm6, %v15909_v32, %v17702_v44  ;;  %v15919_v45 = vsel %vm15915_vm6, %v15910_v16, %v17703_v60 }
 0xba0   : > { %v17711_v54 = vpop.permute.xlu1 %17710  ;;  %v17716_v26 = vpop.permute.xlu0 %17715  ;;  %v15927_v28 = vsel %vm15924_vm7, %v15918_v1, %v17707_v9  ;;  %v15928_v13 = vsel %vm15924_vm7, %v15919_v45, %v17708_v24 }
 0xba1   : > { %v17713_v38 = vunpack.i.h.bf16 %v17711_v54  ;;  %v17712_v21 = vunpack.i.l.bf16 %v17711_v54  ;;  %v17718_v22 = vunpack.i.h.bf16 %v17716_v26  ;;  %v17717_v6 = vunpack.i.l.bf16 %v17716_v26 }
 0xba2   : > { %v15934_v12 = vpack.c.bf16 %v15928_v13, %v15927_v28  ;;  %v15953_v13 = vld [vmem:[%s25526_s6] sm:$0x3] }
 0xba3   : > { %v15902_v14 = vsel %vm9175_vm1, %v15894_v17, %v17712_v21  ;;  %v15903_v50 = vsel %vm9175_vm1, %v15895_v55, %v17713_v38  ;;  %v26998_v17 = vld [vmem:[#allocation35_spill] sm:$0xff]  ;;  %v26999_v38 = vld [vmem:[#allocation36_spill] sm:$0xff] }
 0xba4   : > { %16088 = vmatmul.mubr.bf16.gmra.mrb[52].mxu0 %v15934_v12  ;;  %v17721_v46 = vpop.permute.xlu1 %17720  ;;  %v17731_v43 = vpop.permute.xlu0 %17730  ;;  %v15911_v5 = vsel %vm15906_vm5, %v15902_v14, %v17717_v6  ;;  %v15912_v48 = vsel %vm15906_vm5, %v15903_v50, %v17718_v22  ;;  %v15958_v55 = vrot.slane %v15953_v13, %v26998_v17  ;;  %v15962_v21 = vrot.slane %v15953_v13, %v26999_v38  ;;  %v27000_v14 = vld [vmem:[#allocation19_spill] sm:$0xff] }
 0xba5   : > { %v17723_v31 = vunpack.i.h.bf16 %v17721_v46  ;;  %v17722_v63 = vunpack.i.l.bf16 %v17721_v46  ;;  %v17733_v8 = vunpack.i.h.bf16 %v17731_v43  ;;  %v17732_v15 = vunpack.i.l.bf16 %v17731_v43  ;;  %16097 = vmatprep.mubr.bf16.mxu0 %v18447_v4  ;;  %v27001_v43 = vld [vmem:[#allocation20_spill] sm:$0xff] }
 0xba7   : > { %v15920_v39 = vsel %vm15915_vm6, %v15911_v5, %v17722_v63  ;;  %v15921_v53 = vsel %vm15915_vm6, %v15912_v48, %v17723_v31 }
 0xba8   : > { %v17726_v47 = vpop.permute.xlu1 %17725  ;;  %v17736_v7 = vpop.permute.xlu0 %17735  ;;  %v15929_v30 = vsel %vm15924_vm7, %v15920_v39, %v17732_v15  ;;  %v15930_v40 = vsel %vm15924_vm7, %v15921_v53, %v17733_v8  ;;  %v27002_v8 = vld [vmem:[#allocation23_spill] sm:$0xff] }
 0xba9   : > { %v17728_v52 = vunpack.i.h.bf16 %v17726_v47  ;;  %v17727_v27 = vunpack.i.l.bf16 %v17726_v47  ;;  %v17738_v61 = vunpack.i.h.bf16 %v17736_v7  ;;  %v17737_v57 = vunpack.i.l.bf16 %v17736_v7  ;;  %v27005_v47 = vld [vmem:[#allocation22_spill] sm:$0xff] }
 0xbaa   : > { %v15935_v37 = vpack.c.bf16 %v15930_v40, %v15929_v30  ;;  %v27006_v40 = vld [vmem:[#allocation25_spill] sm:$0xff] }
 0xbab   : > { %v15896_v20 = vsel %vm15889_vm4, %v15887_v34, %v17727_v27  ;;  %v15897_v62 = vsel %vm15889_vm4, %v15888_v29, %v17728_v52  ;;  %v27007_v52 = vld [vmem:[#allocation26_spill] sm:$0xff] }
 0xbac   : > { %16098 = vmatmul.mubr.bf16.gmra.mrb[56].mxu0 %v15935_v37  ;;  %v17741_v2 = vpop.permute.xlu1 %17740  ;;  %v17746_v23 = vpop.permute.xlu0 %17745  ;;  %v15904_v49 = vsel %vm9175_vm1, %v15896_v20, %v17737_v57  ;;  %v15905_v24 = vsel %vm9175_vm1, %v15897_v62, %v17738_v61 }
 0xbad   : > { %v17743_v25 = vunpack.i.h.bf16 %v17741_v2  ;;  %v17742_v51 = vunpack.i.l.bf16 %v17741_v2  ;;  %16107 = vmatprep.mubr.bf16.mxu0 %v18447_v4  ;;  %v17748_v9 = vunpack.i.h.bf16 %v17746_v23  ;;  %v17747_v60 = vunpack.i.l.bf16 %v17746_v23  ;;  %v27008_v23 = vld [vmem:[#allocation27_spill] sm:$0xff] }
 0xbaf   : > { %v15913_v44 = vsel %vm15906_vm5, %v15904_v49, %v17742_v51  ;;  %v15914_v32 = vsel %vm15906_vm5, %v15905_v24, %v17743_v25  ;;  %v27009_v24 = vld [vmem:[#allocation28_spill] sm:$0xff] }
 0xbb0   : > { %v17751_v16 = vpop.permute.xlu1 %17750  ;;  %v15922_v36 = vsel %vm15915_vm6, %v15913_v44, %v17747_v60  ;;  %v15923_v59 = vsel %vm15915_vm6, %v15914_v32, %v17748_v9  ;;  %v27010_v44 = vld [vmem:[#allocation29_spill] sm:$0xff] }
 0xbb1   : > { %v17753_v1 = vunpack.i.h.bf16 %v17751_v16  ;;  %v17752_v45 = vunpack.i.l.bf16 %v17751_v16  ;;  %v27011_v16 = vld [vmem:[#allocation30_spill] sm:$0xff] }
 0xbb3   : > { %v15931_v54 = vsel %vm15924_vm7, %v15922_v36, %v17752_v45  ;;  %v15932_v26 = vsel %vm15924_vm7, %v15923_v59, %v17753_v1 }
 0xbb4   : > { %v15936_v28 = vpack.c.bf16 %v15932_v26, %v15931_v54 }
 0xbb6   : > { %16108 = vmatmul.mubr.bf16.gmra.mrb[60].mxu0 %v15936_v28 }
 0xbb7   : > { %16638 = vmatprep.mubr.bf16.mxu0 %v18447_v4 }
 0xc6a   : > { %v16079_v19 = vpop.f32.mrb[48].mxu0 }
 0xc6b   : > { %v16080_v22 = vadd.f32 %v16079_v19, %v15958_v55  ;;  %v16081_v6 = vpop.f32.mrb[49].mxu0  ;;  %v27012_v19 = vld [vmem:[#allocation31_spill] sm:$0xff] }
 0xc6c   : > { %v16082_v12 = vadd.f32 %v16081_v6, %v15962_v21  ;;  %v16083_v33 = vpop.f32.mrb[50].mxu0 }
 0xc6d   : > { %v25255_v50 = vadd.f32 %v16080_v22, %v27000_v14  ;;  %v16084_v35 = vadd.f32 %v16083_v33, %v15958_v55  ;;  %v16085_v46 = vpop.f32.mrb[51].mxu0  ;;  %v27013_v33 = vld [vmem:[#allocation32_spill] sm:$0xff] }
 0xc6e   : > { %v25258_v31 = vadd.f32 %v16082_v12, %v27001_v43  ;;  %v16086_v63 = vadd.f32 %v16085_v46, %v15962_v21  ;;  %v27014_v46 = vld [vmem:[#allocation33_spill] sm:$0xff] }
 0xc6f   : > { %v25261_v15 = vadd.f32 %v16084_v35, %v27002_v8 }
 0xc70   : > { %v25264_v56 = vadd.f32 %v16086_v63, %v27003_v0  ;;  %v16134_v41 = vadd.f32 %v25258_v31, %v25255_v50  ;;  %v27015_v63 = vld [vmem:[#allocation34_spill] sm:$0xff] }
 0xc72   : > { %16135 = vadd.xlane.f32.xlu0 %v16134_v41  ;;  %v16137_v10 = vadd.f32 %v25264_v56, %v25261_v15 }
 0xc74   : > { %16138 = vadd.xlane.f32.xlu1 %v16137_v10  ;;  %v17843_v10 = vld [vmem:[#allocation10] sm:$0xff]  }
 0xc77   : > { %v16089_v42 = vpop.f32.mrb[52].mxu0 }
 0xc78   : > { %v16090_v5 = vadd.f32 %v16089_v42, %v15958_v55  ;;  %v16091_v48 = vpop.f32.mrb[53].mxu0  ;;  %v17844_v42 = vld [vmem:[#allocation10 + $0x48] sm:$0xff]  }
 0xc79   : > { %v16092_v58 = vadd.f32 %v16091_v48, %v15962_v21  ;;  %v16093_v18 = vpop.f32.mrb[54].mxu0  ;;  %v17847_v48 = vld [vmem:[#allocation10 + $0x10] sm:$0xff]  }
 0xc7a   : > { %v25271_v3 = vadd.f32 %v16090_v5, %v27004_v11  ;;  %v16094_v39 = vadd.f32 %v16093_v18, %v15958_v55  ;;  %v16095_v53 = vpop.f32.mrb[55].mxu0  ;;  %v17846_v5 = vld [vmem:[#allocation10 + $0x50] sm:$0xff]  }
 0xc7b   : > { %v25274_v7 = vadd.f32 %v16092_v58, %v27005_v47  ;;  %v16096_v30 = vadd.f32 %v16095_v53, %v15962_v21 }
 0xc7c   : > { %v25277_v29 = vadd.f32 %v16094_v39, %v27006_v40 }
 0xc7d   : > { %v25280_v27 = vadd.f32 %v16096_v30, %v27007_v52  ;;  %v16140_v34 = vadd.f32 %v25274_v7, %v25271_v3  ;;  %v27016_v30 = vld [vmem:[#allocation37_spill] sm:$0xff]  ;;  %v27017_v52 = vld [vmem:[#allocation38_spill] sm:$0xff] }
 0xc7f   : > { %v16099_v61 = vpop.f32.mrb[56].mxu0  ;;  %16141 = vadd.xlane.f32.xlu0 %v16140_v34  ;;  %v16143_v2 = vadd.f32 %v25280_v27, %v25277_v29 }
 0xc80   : > { %v16100_v57 = vadd.f32 %v16099_v61, %v15958_v55  ;;  %v16101_v37 = vpop.f32.mrb[57].mxu0 }
 0xc81   : > { %v16102_v20 = vadd.f32 %v16101_v37, %v15962_v21  ;;  %v16103_v62 = vpop.f32.mrb[58].mxu0 }
 0xc82   : > { %v25287_v25 = vadd.f32 %v16100_v57, %v27008_v23  ;;  %v16104_v51 = vadd.f32 %v16103_v62, %v15958_v55  ;;  %v16105_v49 = vpop.f32.mrb[59].mxu0 }
 0xc83   : > { %v25290_v9 = vadd.f32 %v16102_v20, %v27009_v24  ;;  %v16106_v60 = vadd.f32 %v16105_v49, %v15962_v21  ;;  %16144 = vadd.xlane.f32.xlu0 %v16143_v2 }
 0xc84   : > { %v25293_v32 = vadd.f32 %v16104_v51, %v27010_v44 }
 0xc85   : > { %v25296_v1 = vadd.f32 %v16106_v60, %v27011_v16  ;;  %v16146_v45 = vadd.f32 %v25290_v9, %v25287_v25 }
 0xc87   : > { %16147 = vadd.xlane.f32.xlu0 %v16146_v45  ;;  %v16149_v36 = vadd.f32 %v25296_v1, %v25293_v32 }
 0xc89   : > { %16150 = vadd.xlane.f32.xlu1 %v16149_v36  ;;  %v16109_v59 = vpop.f32.mrb[60].mxu0 }
 0xc8a   : > { %v16110_v54 = vadd.f32 %v16109_v59, %v15958_v55  ;;  %v16111_v26 = vpop.f32.mrb[61].mxu0 }
 0xc8b   : > { %v16112_v28 = vadd.f32 %v16111_v26, %v15962_v21  ;;  %v16113_v13 = vpop.f32.mrb[62].mxu0 }
 0xc8c   : > { %v25303_v22 = vadd.f32 %v16110_v54, %v27012_v19  ;;  %v16114_v6 = vadd.f32 %v16113_v13, %v15958_v55  ;;  %v16115_v12 = vpop.f32.mrb[63].mxu0  ;;  %v17842_v55 = vld [vmem:[#allocation10 + $0x40] sm:$0xff]  }
 0xc8d   : > { %v25306_v14 = vadd.f32 %v16112_v28, %v27013_v33  ;;  %v16116_v35 = vadd.f32 %v16115_v12, %v15962_v21  ;;  %17281 = vmatprep.subr.bf16.mxu1 %v17842_v55  ;;  %v17845_v21 = vld [vmem:[#allocation10 + $0x8] sm:$0xff]  }
 0xc8e   : > { %v25309_v43 = vadd.f32 %v16114_v6, %v27014_v46  ;;  %17282 = vmatpush3.bf16.msra.mxu1 %v17843_v10 }
 0xc8f   : > { %v25312_v8 = vadd.f32 %v16116_v35, %v27015_v63  ;;  %v16152_v0 = vadd.f32 %v25306_v14, %v25303_v22  ;;  %17283 = vmatprep.subr.bf16.mxu1 %v17844_v42 }
 0xc91   : > { %16153 = vadd.xlane.f32.xlu0 %v16152_v0  ;;  %v16155_v41 = vadd.f32 %v25312_v8, %v25309_v43 }
 0xc92   : > { %17284 = vmatpush3.bf16.msra.mxu1 %v17845_v21 }
 0xc93   : > { %16156 = vadd.xlane.f32.xlu1 %v16155_v41  ;;  %17285 = vmatprep.subr.bf16.mxu1 %v17846_v5 }
 0xc96   : > { %17286 = vmatpush3.bf16.msra.mxu1 %v17847_v48 }
 0xcff   : > { %v16136_v58 = vpop.xlane.xlu0 %16135 }
 0xd00   : > { %v16158_v18 = vmul.f32 0.0069444445, %v16136_v58 }
 0xd01   : > { %v16139_v11 = vpop.xlane.xlu1 %16138 }
 0xd02   : > { %v16166_v39 = vsub.f32 %v25255_v50, %v16158_v18  ;;  %v16167_v53 = vsub.f32 %v25258_v31, %v16158_v18  ;;  %v16159_v47 = vmul.f32 0.0069444445, %v16139_v11 }
 0xd04   : > { %v25321_v40 = vmul.f32 %v16166_v39, %v27016_v30  ;;  %v25324_v34 = vmul.f32 %v16167_v53, %v27017_v52  ;;  %v16168_v61 = vsub.f32 %v25261_v15, %v16159_v47  ;;  %v16169_v57 = vsub.f32 %v25264_v56, %v16159_v47 }
 0xd06   : > { %v25329_v37 = vmul.f32 %v16168_v61, %v27016_v30  ;;  %v25332_v20 = vmul.f32 %v16169_v57, %v27017_v52  ;;  %v16198_v62 = vmul.f32 %v25321_v40, %v25321_v40  ;;  %v16199_v2 = vmul.f32 %v25324_v34, %v25324_v34 }
 0xd08   : > { %v16214_v23 = vadd.f32 %v16199_v2, %v16198_v62  ;;  %v16200_v51 = vmul.f32 %v25329_v37, %v25329_v37  ;;  %v16201_v49 = vmul.f32 %v25332_v20, %v25332_v20 }
 0xd0a   : > { %16215 = vadd.xlane.f32.xlu0 %v16214_v23  ;;  %v16217_v24 = vadd.f32 %v16201_v49, %v16200_v51  ;;  %v17848_v51 = vld [vmem:[#allocation10 + $0x58] sm:$0xff]  }
 0xd0b   : > { %v17849_v49 = vld [vmem:[#allocation10 + $0x18] sm:$0xff]   ;;  %17287 = vmatprep.subr.bf16.mxu1 %v17848_v51  ;;  %v17864_v51 = vld [vmem:[#allocation11 + $0x20] ss:$8 sps:$4 sm:$0xff]  }
 0xd0c   : > { %v16142_v60 = vpop.xlane.xlu0 %16141  ;;  %16218 = vadd.xlane.f32.xlu1 %v16217_v24  ;;  %v17850_v24 = vld [vmem:[#allocation10 + $0x60] sm:$0xff]   ;;  %17288 = vmatpush3.bf16.msra.mxu1 %v17849_v49  ;;  %v17869_v49 = vld [vmem:[#allocation11 + $0x34] ss:$8 sps:$4 sm:$0xff]  }
 0xd0d   : > { %v16160_v44 = vmul.f32 0.0069444445, %v16142_v60  ;;  %17289 = vmatprep.subr.bf16.mxu1 %v17850_v24  ;;  %v17867_v24 = vld [vmem:[#allocation11 + $0x30] ss:$8 sps:$4 sm:$0xff]  }
 0xd0f   : > { %v16170_v16 = vsub.f32 %v25271_v3, %v16160_v44  ;;  %v16171_v45 = vsub.f32 %v25274_v7, %v16160_v44 }
 0xd10   : > { %v16145_v36 = vpop.xlane.xlu0 %16144 }
 0xd11   : > { %v25345_v59 = vmul.f32 %v16170_v16, %v27016_v30  ;;  %v25348_v54 = vmul.f32 %v16171_v45, %v27017_v52  ;;  %v16161_v26 = vmul.f32 0.0069444445, %v16145_v36 }
 0xd13   : > { %v16172_v28 = vsub.f32 %v25277_v29, %v16161_v26  ;;  %v16173_v13 = vsub.f32 %v25280_v27, %v16161_v26  ;;  %v16202_v19 = vmul.f32 %v25345_v59, %v25345_v59  ;;  %v16203_v6 = vmul.f32 %v25348_v54, %v25348_v54 }
 0xd14   : > { %v16148_v12 = vpop.xlane.xlu0 %16147 }
 0xd15   : > { %v25357_v33 = vmul.f32 %v16172_v28, %v27016_v30  ;;  %v25360_v35 = vmul.f32 %v16173_v13, %v27017_v52  ;;  %v16162_v46 = vmul.f32 0.0069444445, %v16148_v12  ;;  %v16220_v63 = vadd.f32 %v16203_v6, %v16202_v19  ;;  %v17851_v28 = vld [vmem:[#allocation10 + $0x20] sm:$0xff]  }
 0xd16   : > { %v16151_v0 = vpop.xlane.xlu1 %16150  ;;  %17290 = vmatpush3.bf16.msra.mxu1 %v17851_v28 }
 0xd17   : > { %v16174_v41 = vsub.f32 %v25287_v25, %v16162_v46  ;;  %v16175_v55 = vsub.f32 %v25290_v9, %v16162_v46  ;;  %v16163_v10 = vmul.f32 0.0069444445, %v16151_v0  ;;  %16221 = vadd.xlane.f32.xlu0 %v16220_v63  ;;  %v16204_v42 = vmul.f32 %v25357_v33, %v25357_v33 }
 0xd18   : > { %v16205_v21 = vmul.f32 %v25360_v35, %v25360_v35 }
 0xd19   : > { %v25369_v5 = vmul.f32 %v16174_v41, %v27016_v30  ;;  %v25372_v48 = vmul.f32 %v16175_v55, %v27017_v52  ;;  %v16176_v58 = vsub.f32 %v25293_v32, %v16163_v10  ;;  %v16177_v18 = vsub.f32 %v25296_v1, %v16163_v10 }
 0xd1a   : > { %v16223_v11 = vadd.f32 %v16205_v21, %v16204_v42  ;;  %v17852_v21 = vld [vmem:[#allocation10 + $0x68] sm:$0xff]  }
 0xd1b   : > { %v25377_v39 = vmul.f32 %v16176_v58, %v27016_v30  ;;  %v25380_v53 = vmul.f32 %v16177_v18, %v27017_v52  ;;  %v16206_v47 = vmul.f32 %v25369_v5, %v25369_v5  ;;  %v16207_v61 = vmul.f32 %v25372_v48, %v25372_v48  ;;  %v17853_v58 = vld [vmem:[#allocation10 + $0x28] sm:$0xff]   ;;  %17291 = vmatprep.subr.bf16.mxu1 %v17852_v21  ;;  %v17855_v18 = vld [vmem:[#allocation10 + $0x30] sm:$0xff]  }
 0xd1c   : > { %16224 = vadd.xlane.f32.xlu1 %v16223_v11  ;;  %17292 = vmatpush3.bf16.msra.mxu1 %v17853_v58  ;;  %v17856_v11 = vld [vmem:[#allocation10 + $0x78] sm:$0xff]  }
 0xd1d   : > { %v16226_v57 = vadd.f32 %v16207_v61, %v16206_v47  ;;  %v16208_v62 = vmul.f32 %v25377_v39, %v25377_v39  ;;  %v16209_v2 = vmul.f32 %v25380_v53, %v25380_v53  ;;  %v17857_v47 = vld [vmem:[#allocation10 + $0x38] sm:$0xff]   ;;  %v17858_v61 = vld [vmem:[#allocation11] ss:$8 sps:$4 sm:$0xff]  }
 0xd1e   : > { %v16154_v23 = vpop.xlane.xlu0 %16153 }
 0xd1f   : > { %16227 = vadd.xlane.f32.xlu0 %v16226_v57  ;;  %v16164_v60 = vmul.f32 0.0069444445, %v16154_v23  ;;  %v16229_v44 = vadd.f32 %v16209_v2, %v16208_v62  ;;  %v17860_v57 = vld [vmem:[#allocation11 + $0x4] ss:$8 sps:$4 sm:$0xff]   ;;  %v17863_v62 = vld [vmem:[#allocation11 + $0x14] ss:$8 sps:$4 sm:$0xff]  }
 0xd20   : > { %v16157_v16 = vpop.xlane.xlu1 %16156  ;;  %16606 = vmatprep.subr.bf16.mxu0 %v17860_v57  ;;  %v17861_v2 = vld [vmem:[#allocation11 + $0x10] ss:$8 sps:$4 sm:$0xff]   ;;  %v17866_v23 = vld [vmem:[#allocation11 + $0x24] ss:$8 sps:$4 sm:$0xff]  }
 0xd21   : > { %v16178_v45 = vsub.f32 %v25303_v22, %v16164_v60  ;;  %v16179_v36 = vsub.f32 %v25306_v14, %v16164_v60  ;;  %v16165_v26 = vmul.f32 0.0069444445, %v16157_v16  ;;  %16230 = vadd.xlane.f32.xlu1 %v16229_v44  ;;  %16607 = vmatpush1.bf16.msra.mxu0 %v17858_v61  ;;  %v17872_v60 = vld [vmem:[#allocation11 + $0x44] ss:$8 sps:$4 sm:$0xff]   ;;  %v17870_v44 = vld [vmem:[#allocation11 + $0x40] ss:$8 sps:$4 sm:$0xff]  }
 0xd22   : > { %16608 = vmatprep.subr.bf16.mxu0 %v17863_v62 }
 0xd23   : > { %v25393_v13 = vmul.f32 %v16178_v45, %v27016_v30  ;;  %v25396_v19 = vmul.f32 %v16179_v36, %v27017_v52  ;;  %v16180_v6 = vsub.f32 %v25309_v43, %v16165_v26  ;;  %v16181_v12 = vsub.f32 %v25312_v8, %v16165_v26 }
 0xd25   : > { %v25401_v46 = vmul.f32 %v16180_v6, %v27016_v30  ;;  %v25404_v63 = vmul.f32 %v16181_v12, %v27017_v52  ;;  %v16210_v0 = vmul.f32 %v25393_v13, %v25393_v13  ;;  %v16211_v41 = vmul.f32 %v25396_v19, %v25396_v19  ;;  %v17854_v52 = vld [vmem:[#allocation10 + $0x70] sm:$0xff]   ;;  %16609 = vmatpush1.bf16.msra.mxu0 %v17861_v2 }
 0xd26   : > { %17293 = vmatprep.subr.bf16.mxu1 %v17854_v52  ;;  %16610 = vmatprep.subr.bf16.mxu0 %v17866_v23 }
 0xd27   : > { %v16232_v55 = vadd.f32 %v16211_v41, %v16210_v0  ;;  %v16212_v10 = vmul.f32 %v25401_v46, %v25401_v46  ;;  %v16213_v42 = vmul.f32 %v25404_v63, %v25404_v63  ;;  %17294 = vmatpush3.bf16.msra.mxu1 %v17855_v18 }
 0xd28   : > { %17295 = vmatprep.subr.bf16.mxu1 %v17856_v11 }
 0xd29   : > { %16233 = vadd.xlane.f32.xlu0 %v16232_v55  ;;  %v16235_v30 = vadd.f32 %v16213_v42, %v16212_v10  ;;  %16611 = vmatpush1.bf16.msra.mxu0 %v17864_v51 }
 0xd2a   : > { %16612 = vmatprep.subr.bf16.mxu0 %v17869_v49 }
 0xd2b   : > { %16236 = vadd.xlane.f32.xlu1 %v16235_v30  ;;  %17296 = vmatpush3.bf16.msra.mxu1 %v17857_v47 }
 0xd2d   : > { %16613 = vmatpush1.bf16.msra.mxu0 %v17867_v24 }
 0xd2e   : > { %16614 = vmatprep.subr.bf16.mxu0 %v17872_v60 }
 0xd31   : > { %16615 = vmatpush1.bf16.msra.mxu0 %v17870_v44 }
 0xd97   : > { %v16216_v16 = vpop.xlane.xlu0 %16215 }
 0xd98   : > { %v16238_v45 = vmul.f32 0.0069444445, %v16216_v16 }
 0xd99   : > { %v16219_v36 = vpop.xlane.xlu1 %16218 }
 0xd9a   : > { %v16246_v26 = vadd.f32 1e-05, %v16238_v45  ;;  %v16239_v28 = vmul.f32 0.0069444445, %v16219_v36 }
 0xd9c   : > { %18154 = vrsqrt.f32 %v16246_v26  ;;  %v16247_v6 = vadd.f32 1e-05, %v16239_v28 }
 0xd9e   : > { %18156 = vrsqrt.f32 %v16247_v6 }
 0xda4   : > { %v16222_v12 = vpop.xlane.xlu0 %16221 }
 0xda5   : > { %v16240_v0 = vmul.f32 0.0069444445, %v16222_v12 }
 0xda6   : > { %v18155_v41 = vpop.eup %18154 }
 0xda7   : > { %v16248_v55 = vadd.f32 1e-05, %v16240_v0  ;;  %v16263_v30 = vmul.f32 %v18155_v41, %v25324_v34  ;;  %v16262_v58 = vmul.f32 %v18155_v41, %v25321_v40 }
 0xda8   : > { %v18157_v10 = vpop.eup %18156 }
 0xda9   : > { %v16225_v42 = vpop.xlane.xlu1 %16224  ;;  %v16265_v21 = vmul.f32 %v18157_v10, %v25332_v20  ;;  %v16264_v52 = vmul.f32 %v18157_v10, %v25329_v37  ;;  %18158 = vrsqrt.f32 %v16248_v55 }
 0xdaa   : > { %v16241_v18 = vmul.f32 0.0069444445, %v16225_v42 }
 0xdab   : > { %v16279_v11 = vpack.c.bf16 %v16265_v21, %v16263_v30  ;;  %v16278_v47 = vpack.c.bf16 %v16264_v52, %v16262_v58 }
 0xdac   : > { %v16249_v61 = vadd.f32 1e-05, %v16241_v18  ;;  %v16228_v57 = vpop.xlane.xlu0 %16227 }
 0xdad   : > { %v16242_v62 = vmul.f32 0.0069444445, %v16228_v57  ;;  %16453 = vmatprep.mubr.bf16.mxu1 %v16279_v11  ;;  %v17875_v11 = vld [vmem:[#allocation11 + $0x54] ss:$8 sps:$4 sm:$0xff]  }
 0xdae   : > { %18160 = vrsqrt.f32 %v16249_v61  ;;  %v16231_v2 = vpop.xlane.xlu1 %16230  ;;  %16454 = vmatmul.mubr.bf16.vlgmr.msra.gmra.mrb[80].mxu1 %v16278_v47  ;;  %16616 = vmatprep.subr.bf16.mxu0 %v17875_v11  ;;  %v17878_v47 = vld [vmem:[#allocation11 + $0x64] ss:$8 sps:$4 sm:$0xff]   ;;  %v17881_v61 = vld [vmem:[#allocation11 + $0x74] ss:$8 sps:$4 sm:$0xff]  }
 0xdaf   : > { %v16250_v23 = vadd.f32 1e-05, %v16242_v62  ;;  %v16243_v51 = vmul.f32 0.0069444445, %v16231_v2 }
 0xdb1   : > { %18162 = vrsqrt.f32 %v16250_v23  ;;  %v16251_v34 = vadd.f32 1e-05, %v16243_v51 }
 0xdb3   : > { %18164 = vrsqrt.f32 %v16251_v34  ;;  %v18159_v20 = vpop.eup %18158 }
 0xdb4   : > { %v16267_v60 = vmul.f32 %v18159_v20, %v25348_v54  ;;  %v16266_v44 = vmul.f32 %v18159_v20, %v25345_v59 }
 0xdb6   : > { %v16234_v40 = vpop.xlane.xlu0 %16233 }
 0xdb7   : > { %v16244_v49 = vmul.f32 0.0069444445, %v16234_v40 }
 0xdb8   : > { %v18161_v37 = vpop.eup %18160  ;;  %v16237_v24 = vpop.xlane.xlu1 %16236 }
 0xdb9   : > { %v16252_v16 = vadd.f32 1e-05, %v16244_v49  ;;  %v16245_v45 = vmul.f32 0.0069444445, %v16237_v24  ;;  %v16269_v36 = vmul.f32 %v18161_v37, %v25360_v35  ;;  %v16268_v26 = vmul.f32 %v18161_v37, %v25357_v33 }
 0xdbb   : > { %v18163_v28 = vpop.eup %18162  ;;  %18166 = vrsqrt.f32 %v16252_v16  ;;  %v16253_v6 = vadd.f32 1e-05, %v16245_v45  ;;  %v16281_v12 = vpack.c.bf16 %v16269_v36, %v16267_v60  ;;  %v16280_v0 = vpack.c.bf16 %v16268_v26, %v16266_v44 }
 0xdbc   : > { %v16271_v55 = vmul.f32 %v18163_v28, %v25372_v48  ;;  %v16270_v35 = vmul.f32 %v18163_v28, %v25369_v5  ;;  %v17876_v5 = vld [vmem:[#allocation11 + $0x60] ss:$8 sps:$4 sm:$0xff]  }
 0xdbd   : > { %v18165_v41 = vpop.eup %18164  ;;  %18168 = vrsqrt.f32 %v16253_v6  ;;  %16461 = vmatprep.mubr.bf16.mxu1 %v16281_v12 }
 0xdbe   : > { %16462 = vmatmul.mubr.bf16.gmra.mrb[84].mxu1 %v16280_v0  ;;  %v16273_v54 = vmul.f32 %v18165_v41, %v25380_v53  ;;  %v16272_v10 = vmul.f32 %v18165_v41, %v25377_v39  ;;  %v17873_v39 = vld [vmem:[#allocation11 + $0x50] ss:$8 sps:$4 sm:$0xff]  }
 0xdbf   : > { %16617 = vmatpush1.bf16.msra.mxu0 %v17873_v39 }
 0xdc0   : > { %v16283_v59 = vpack.c.bf16 %v16273_v54, %v16271_v55  ;;  %v16282_v33 = vpack.c.bf16 %v16272_v10, %v16270_v35  ;;  %16618 = vmatprep.subr.bf16.mxu0 %v17878_v47 }
 0xdc2   : > { %16469 = vmatprep.mubr.bf16.mxu1 %v16283_v59 }
 0xdc3   : > { %16619 = vmatpush1.bf16.msra.mxu0 %v17876_v5 }
 0xdc4   : > { %16620 = vmatprep.subr.bf16.mxu0 %v17881_v61 }
 0xdc5   : > { %v18167_v42 = vpop.eup %18166 }
 0xdc6   : > { %16470 = vmatmul.mubr.bf16.gmra.mrb[88].mxu1 %v16282_v33  ;;  %v16275_v21 = vmul.f32 %v18167_v42, %v25396_v19  ;;  %v16274_v52 = vmul.f32 %v18167_v42, %v25393_v13  ;;  %v17879_v19 = vld [vmem:[#allocation11 + $0x70] ss:$8 sps:$4 sm:$0xff]   ;;  %v17105_v13 = vld [vmem:[%s27018_s22] ss:$0 sm:$0xff]  ;;  %s18350_s22 = scalar_lea.vmem %s18349_s24, 2048 }
 0xdc7   : > { %v18169_v30 = vpop.eup %18168  ;;  %16621 = vmatpush1.bf16.msra.mxu0 %v17879_v19  ;;  %p18352_p0 = scmp.lt.s32.totalorder %s18350_s22, %s18344_s27 }
 0xdc8   : > { %v16277_v58 = vmul.f32 %v18169_v30, %v25404_v63  ;;  %v16276_v48 = vmul.f32 %v18169_v30, %v25401_v46 }
 0xdc9   : > { %p18353_p2 = por %p18352_p0, %p18351_p13 }
 0xdca   : > { %v16285_v18 = vpack.c.bf16 %v16277_v58, %v16275_v21  ;;  %v16284_v53 = vpack.c.bf16 %v16276_v48, %v16274_v52 }
 0xdcb   : > { %p18354_p8 = pnand %p18353_p2, %p18347_p1 }
 0xdcc   : > { %16477 = vmatprep.mubr.bf16.mxu1 %v16285_v18 }
 0xdce   : > { %16478 = vmatmul.mubr.bf16.gmra.mrb[92].mxu1 %v16284_v53 }
 0xe81   : > { %v17297_v63 = vpop.f32.mrb[80].mxu1 }
 0xe82   : > { %v17298_v46 = vpop.f32.mrb[81].mxu1 }
 0xe83   : > { %v17299_v57 = vadd.f32 %v17298_v46, %v17297_v63  ;;  %v17300_v62 = vpop.f32.mrb[82].mxu1  ;;  %v16514_v63 = vld [vmem:[%s27019_s12] sm:$0x3] }
 0xe84   : > { %v17301_v2 = vpop.f32.mrb[83].mxu1  ;;  %v16519_v46 = vrot.slane %v16514_v63, %v26998_v17 }
 0xe85   : > { %v16456_v23 = vadd.f32 %v17299_v57, %v17105_v13  ;;  %v17302_v51 = vadd.f32 %v17301_v2, %v17300_v62  ;;  %v16523_v57 = vrot.slane %v16514_v63, %v26999_v38 }
 0xe87   : > { %v16459_v34 = vadd.f32 %v17302_v51, %v17105_v13  ;;  %v16486_v20 = vmax.f32 %v16456_v23, 0.0 }
 0xe89   : > { %v16487_v40 = vmax.f32 %v16459_v34, 0.0 }
 0xe8b   : > { %v16494_v49 = vpack.c.bf16 %v16487_v40, %v16486_v20 }
 0xe8d   : > { %16639 = vmatmul.mubr.bf16.vlgmr.msra.gmra.mrb[64].mxu0 %v16494_v49 }
 0xe8e   : > { %16648 = vmatprep.mubr.bf16.mxu0 %v18447_v4 }
 0xe91   : > { %v17303_v37 = vpop.f32.mrb[84].mxu1 }
 0xe92   : > { %v17304_v24 = vpop.f32.mrb[85].mxu1 }
 0xe93   : > { %v17305_v60 = vadd.f32 %v17304_v24, %v17303_v37  ;;  %v17306_v44 = vpop.f32.mrb[86].mxu1 }
 0xe94   : > { %v17307_v16 = vpop.f32.mrb[87].mxu1 }
 0xe95   : > { %v16464_v45 = vadd.f32 %v17305_v60, %v17105_v13  ;;  %v17308_v36 = vadd.f32 %v17307_v16, %v17306_v44 }
 0xe97   : > { %v16467_v26 = vadd.f32 %v17308_v36, %v17105_v13  ;;  %v16488_v28 = vmax.f32 %v16464_v45, 0.0 }
 0xe99   : > { %v16489_v6 = vmax.f32 %v16467_v26, 0.0  ;;  %v17309_v12 = vpop.f32.mrb[88].mxu1 }
 0xe9a   : > { %v17310_v0 = vpop.f32.mrb[89].mxu1 }
 0xe9b   : > { %v17311_v41 = vadd.f32 %v17310_v0, %v17309_v12  ;;  %v17312_v55 = vpop.f32.mrb[90].mxu1  ;;  %v16495_v54 = vpack.c.bf16 %v16489_v6, %v16488_v28 }
 0xe9c   : > { %v17313_v59 = vpop.f32.mrb[91].mxu1 }
 0xe9d   : > { %v16472_v10 = vadd.f32 %v17311_v41, %v17105_v13  ;;  %v17314_v35 = vadd.f32 %v17313_v59, %v17312_v55  ;;  %16649 = vmatmul.mubr.bf16.gmra.mrb[68].mxu0 %v16495_v54 }
 0xe9e   : > { %16658 = vmatprep.mubr.bf16.mxu0 %v18447_v4 }
 0xe9f   : > { %v16475_v33 = vadd.f32 %v17314_v35, %v17105_v13  ;;  %v16490_v42 = vmax.f32 %v16472_v10, 0.0 }
 0xea1   : > { %v16491_v30 = vmax.f32 %v16475_v33, 0.0  ;;  %v17315_v21 = vpop.f32.mrb[92].mxu1 }
 0xea2   : > { %v17316_v58 = vpop.f32.mrb[93].mxu1 }
 0xea3   : > { %v17317_v52 = vadd.f32 %v17316_v58, %v17315_v21  ;;  %v17318_v48 = vpop.f32.mrb[94].mxu1  ;;  %v16496_v18 = vpack.c.bf16 %v16491_v30, %v16490_v42 }
 0xea4   : > { %v17319_v53 = vpop.f32.mrb[95].mxu1 }
 0xea5   : > { %v16480_v39 = vadd.f32 %v17317_v52, %v17105_v13  ;;  %v17320_v11 = vadd.f32 %v17319_v53, %v17318_v48  ;;  %16659 = vmatmul.mubr.bf16.gmra.mrb[72].mxu0 %v16496_v18 }
 0xea6   : > { %16668 = vmatprep.mubr.bf16.mxu0 %v18447_v4 }
 0xea7   : > { %v16483_v5 = vadd.f32 %v17320_v11, %v17105_v13  ;;  %v16492_v47 = vmax.f32 %v16480_v39, 0.0 }
 0xea9   : > { %v16493_v61 = vmax.f32 %v16483_v5, 0.0 }
 0xeab   : > { %v16497_v19 = vpack.c.bf16 %v16493_v61, %v16492_v47 }
 0xead   : > { %16669 = vmatmul.mubr.bf16.gmra.mrb[76].mxu0 %v16497_v19 }
 0xf60   : > { %v16640_v62 = vpop.f32.mrb[64].mxu0 }
 0xf61   : > { %v16641_v2 = vadd.f32 %v16640_v62, %v16519_v46  ;;  %v16642_v23 = vpop.f32.mrb[65].mxu0 }
 0xf62   : > { %v16643_v51 = vadd.f32 %v16642_v23, %v16523_v57  ;;  %v16644_v34 = vpop.f32.mrb[66].mxu0 }
 0xf63   : > { %v16679_v4 = vadd.f32 %v16641_v2, %v25255_v50  ;;  %v16645_v13 = vadd.f32 %v16644_v34, %v16519_v46  ;;  %v16646_v20 = vpop.f32.mrb[67].mxu0 }
 0xf64   : > { %v16680_v40 = vadd.f32 %v16643_v51, %v25258_v31  ;;  %v16647_v49 = vadd.f32 %v16646_v20, %v16523_v57 }
 0xf65   : > { %v16681_v37 = vadd.f32 %v16645_v13, %v25261_v15 }
 0xf66   : > { %v17152_v24 = vpack.c.bf16 %v16680_v40, %v16679_v4  ;;  %v16682_v60 = vadd.f32 %v16647_v49, %v25264_v56 }
 0xf68   : > { %16743 = vst [vmem:[%s25447_s13] sm:$0xff] %v17152_v24  ;;  %v17153_v17 = vpack.c.bf16 %v16682_v60, %v16681_v37 }
 0xf6a   : > { %16744 = vst [vmem:[%s25447_s13 + $0x8] sm:$0xff] %v17153_v17 }
 0xf70   : > { %v16650_v38 = vpop.f32.mrb[68].mxu0 }
 0xf71   : > { %v16651_v50 = vadd.f32 %v16650_v38, %v16519_v46  ;;  %v16652_v44 = vpop.f32.mrb[69].mxu0 }
 0xf72   : > { %v16653_v31 = vadd.f32 %v16652_v44, %v16523_v57  ;;  %v16654_v16 = vpop.f32.mrb[70].mxu0 }
 0xf73   : > { %v16683_v15 = vadd.f32 %v16651_v50, %v25271_v3  ;;  %v16655_v45 = vadd.f32 %v16654_v16, %v16519_v46  ;;  %v16656_v36 = vpop.f32.mrb[71].mxu0 }
 0xf74   : > { %v16684_v56 = vadd.f32 %v16653_v31, %v25274_v7  ;;  %v16657_v26 = vadd.f32 %v16656_v36, %v16523_v57 }
 0xf75   : > { %v16685_v28 = vadd.f32 %v16655_v45, %v25277_v29 }
 0xf76   : > { %v17154_v6 = vpack.c.bf16 %v16684_v56, %v16683_v15  ;;  %v16686_v12 = vadd.f32 %v16657_v26, %v25280_v27 }
 0xf78   : > { %16745 = vst [vmem:[%s25447_s13 + $0x10] sm:$0xff] %v17154_v6  ;;  %v17155_v0 = vpack.c.bf16 %v16686_v12, %v16685_v28  ;;  %v16660_v41 = vpop.f32.mrb[72].mxu0 }
 0xf79   : > { %v16661_v55 = vadd.f32 %v16660_v41, %v16519_v46  ;;  %v16662_v54 = vpop.f32.mrb[73].mxu0 }
 0xf7a   : > { %16746 = vst [vmem:[%s25447_s13 + $0x18] sm:$0xff] %v17155_v0  ;;  %v16663_v59 = vadd.f32 %v16662_v54, %v16523_v57  ;;  %v16664_v3 = vpop.f32.mrb[74].mxu0 }
 0xf7b   : > { %v16687_v10 = vadd.f32 %v16661_v55, %v25287_v25  ;;  %v16665_v35 = vadd.f32 %v16664_v3, %v16519_v46  ;;  %v16666_v7 = vpop.f32.mrb[75].mxu0 }
 0xf7c   : > { %v16688_v33 = vadd.f32 %v16663_v59, %v25290_v9  ;;  %v16667_v29 = vadd.f32 %v16666_v7, %v16523_v57 }
 0xf7d   : > { %v16689_v42 = vadd.f32 %v16665_v35, %v25293_v32 }
 0xf7e   : > { %v17156_v27 = vpack.c.bf16 %v16688_v33, %v16687_v10  ;;  %v16690_v30 = vadd.f32 %v16667_v29, %v25296_v1 }
 0xf80   : > { %16747 = vst [vmem:[%s25447_s13 + $0x20] sm:$0xff] %v17156_v27  ;;  %v17157_v21 = vpack.c.bf16 %v16690_v30, %v16689_v42  ;;  %v16670_v58 = vpop.f32.mrb[76].mxu0 }
 0xf81   : > { %v16671_v52 = vadd.f32 %v16670_v58, %v16519_v46  ;;  %v16672_v48 = vpop.f32.mrb[77].mxu0 }
 0xf82   : > { %16748 = vst [vmem:[%s25447_s13 + $0x28] sm:$0xff] %v17157_v21  ;;  %v16673_v25 = vadd.f32 %v16672_v48, %v16523_v57  ;;  %v16674_v18 = vpop.f32.mrb[78].mxu0 }
 0xf83   : > { %v16691_v9 = vadd.f32 %v16671_v52, %v25303_v22  ;;  %v16675_v53 = vadd.f32 %v16674_v18, %v16519_v46  ;;  %v16676_v32 = vpop.f32.mrb[79].mxu0 }
 0xf84   : > { %v16692_v39 = vadd.f32 %v16673_v25, %v25306_v14  ;;  %v16677_v11 = vadd.f32 %v16676_v32, %v16523_v57 }
 0xf85   : > { %v16693_v1 = vadd.f32 %v16675_v53, %v25309_v43 }
 0xf86   : > { %v17158_v5 = vpack.c.bf16 %v16692_v39, %v16691_v9  ;;  %v16694_v47 = vadd.f32 %v16677_v11, %v25312_v8 }
 0xf88   : > { %16749 = vst [vmem:[%s25447_s13 + $0x30] sm:$0xff] %v17158_v5  ;;  %v17159_v22 = vpack.c.bf16 %v16694_v47, %v16693_v1 }
 0xf8a   : > { %16750 = vst [vmem:[%s25447_s13 + $0x38] sm:$0xff] %v17159_v22 }
 0xf8b   : > { %18357 = shalt.err (!%p18354_p8)
}
 0xf8c   : > { %s18358_s8 = scalar_lea.hbm %s25472_s10, 1024  ;;  %s18362_s13 = scalar_lea.hbm %s27020_s30, 2048 }
 0xf8d   : > { %p18359_p6 = scmp.ne.s32.totalorder %s25472_s10, %s18358_s8  ;;  %p18363_p3 = scmp.lt.u32.totalorder %s25472_s10, %s27020_s30 }
 0xf8e   : > { %p18364_p5 = scmp.lt.u32.totalorder %s18362_s13, %s18358_s8  ;;  %p18366_p7 = scmp.lt.u32.totalorder %s18358_s8, %s25472_s10 }
 0xf8f   : > { %p18360_p10 = pnand %p18359_p6, %p27021_p4 }
 0xf90   : > { %p18365_p9 = por %p18364_p5, %p18363_p3 }
 0xf91   : > { %p18361_p11 = pneg %p18360_p10 }
 0xf92   : > { %p18367_p12 = por %p18366_p7, %p18365_p9 }
 0xf94   : > { %p18368_p1 = pnand %p18367_p12, %p18361_p11 }
 0xf96   : > { %18371 = shalt.err (!%p18368_p1)
}
 0xf97   : > { %s18449_s29 = smov 128   ;;  %s18450_s27 = smov 8  }
 0xf98   : > { %17519 = dma.vmem_to_hbm [thread:$0]  (%p27021_p4), %s25474_s25, 1024, %s25472_s10, %s16752_s23, %s18449_s29, %s18449_s29, %s18450_s27  }
 0xf99 PF: > { %s16780_s2 = sand.u32 1, %s18410_s17   ;;  %p27022_p13 = scmp.ne.s32.totalorder %s26021_s28, 0 }
 0xf9a   : > { %p27023_p0 = scmp.ge.s32.totalorder %s18422_s20, 2  ;;  %s16781_s24 = scalar_lea.sflag [#allocation4], %s16780_s2 }
 0xf9c   : > { %p17542_p2 = pnand %p27023_p0, %p27022_p13 }
 0xf9e   : > { %18405 = dma.done.wait (!%p17542_p2), %s16781_s24, 1024  }
 0xf9f   : > { %18407 = vsyncadd (!%p17542_p2), %s16781_s24, 4294966272  ;;  %p27_p8 = scmp.ge.s32.totalorder %s18678_s16, 4   ;;  %s27024_s17 = smov %s18414_s18 }
 0xfa0   : > { %s27025_s18 = smov %s18418_s19  ;;  %s27026_s19 = smov %s18690_s15 }
 0xfa1   : > { %s27027_s20 = smov %s18678_s16  ;;  %29 = sbr.rel (!%p27_p8) target bundleno = 14 (0xe), region = 129 }
 0xfa8   :  { %16786 = vsyncpa [#allocation3], 1 }
 0xfa9   :  { %16788 = vsyncpa [#allocation3 + $0x1], 1 }
 0xfaa   :  { %16789 = vsyncpa [#allocation6], 1 }
 0xfab   :  { %16790 = vsyncpa [#allocation9], 1 }
 0xfac   :  { %16791 = vsyncpa [#allocation12], 1 }
 0xfad   :  { %16792 = vsyncpa [#allocation4], 1 }
 0xfae   :  { %16794 = vsyncpa [#allocation4 + $0x1], 1 }

</bundles_post_ra>
